<compile_context>
chip_gen: v7x
topology: tpu7x:2x2x1
jax: 0.10.0
libtpu: 0.0.40
codegen_flags: <defaults>
</compile_context>

<pallas_src>
import jax
import jax.numpy as jnp
from jax.experimental import pallas as pl
from jax.experimental.pallas import tpu as pltpu

LANE = 128  # padded channel / class width -> unmasked 128-lane stores
VMEM_LIMIT = 32 * 1024 * 1024


def _round_up(x, m):
    return (x + m - 1) // m * m


def _pow2_tile(n, cap, floor=1):
    """Largest power-of-two tile in [floor, cap] that divides n."""
    t = floor
    while t * 2 <= cap and n % (t * 2) == 0:
        t *= 2
    return t


# ---------------------------------------------------------------------------
# Wrapper-side patch construction (XLA glue; spatial extents 28/14/10/5 are not
# (8,128)-aligned so in-kernel window gathering would force sublane relayouts).
# ---------------------------------------------------------------------------
def _pool_grouped_patches(x, k):
    """im2col for a valid kxk conv, rows pre-grouped by 2x2-pool quadrant.

    x: (N, H, W, C) NHWC.  Returns (patches, n_pool, gs) where
      patches: (N, 4*gs, Kpad) bf16,
      row q*gs + (i*PW + j) holds the patch of conv output position
      (oh=2i+dh, ow=2j+dw), q = 2*dh + dw; feature order = (kh*k + kw)*C + ci.
    gs = PH*PW rounded up to a multiple of 16 (bf16 sublane-pair aligned).
    """
    N, H, W, C = x.shape
    OH, OW = H - k + 1, W - k + 1
    PH, PW = OH // 2, OW // 2
    n_pool = PH * PW
    gs = _round_up(n_pool, 16)
    k0 = k * k * C
    kp = _round_up(k0, 8)

    cols = [x[:, kh:kh + OH, kw:kw + OW, :] for kh in range(k) for kw in range(k)]
    pat = jnp.stack(cols, axis=3).reshape(N, OH, OW, k0)

    groups = []
    for dh in (0, 1):
        for dw in (0, 1):
            g = pat[:, dh::2, dw::2, :].reshape(N, n_pool, k0)
            if gs != n_pool:
                g = jnp.pad(g, ((0, 0), (0, gs - n_pool), (0, 0)))
            groups.append(g)
    out = jnp.concatenate(groups, axis=1)                  # (N, 4*gs, k0)
    if kp != k0:
        out = jnp.pad(out, ((0, 0), (0, 0), (0, kp - k0)))
    return out.astype(jnp.bfloat16), n_pool, gs


# ---------------------------------------------------------------------------
# Kernel 1/2: batched fused conv (patch matmul) + bias + ReLU + 2x2 maxpool
# ---------------------------------------------------------------------------
def _conv_relu_pool_kernel(p_ref, w_ref, b_ref, o_ref):
    # p_ref: (bt, 4*gs, K) bf16   w_ref: (K, 128) bf16   b_ref: (1, 128) f32
    # o_ref: (bt, gs, 128) bf16
    bt, gs, _ = o_ref.shape
    r = 4 * gs
    k = p_ref.shape[-1]
    pat = p_ref[...].reshape(bt * r, k)                    # leading-dim merge (layout no-op)
    acc = jnp.dot(pat, w_ref[...], preferred_element_type=jnp.float32)
    acc = jnp.maximum(acc + b_ref[...], 0.0)               # bias + ReLU (f32, VPU)
    acc = acc.reshape(bt, 4, gs, LANE)                     # (image, quadrant, pos, ch)
    pooled = jnp.maximum(jnp.maximum(acc[:, 0], acc[:, 1]),
                         jnp.maximum(acc[:, 2], acc[:, 3]))
    o_ref[...] = pooled.astype(o_ref.dtype)                # bf16, gs-aligned full-width store


def conv_relu_pool(patches, w, b, gs, bt):
    N, R, K = patches.shape
    assert N % bt == 0 and R == 4 * gs
    return pl.pallas_call(
        _conv_relu_pool_kernel,
        out_shape=jax.ShapeDtypeStruct((N, gs, LANE), jnp.bfloat16),
        grid=(N // bt,),
        in_specs=[
            pl.BlockSpec((bt, R, K), lambda n: (n, 0, 0)),
            pl.BlockSpec((K, LANE), lambda n: (0, 0)),
            pl.BlockSpec((1, LANE), lambda n: (0, 0)),
        ],
        out_specs=pl.BlockSpec((bt, gs, LANE), lambda n: (n, 0, 0)),
        compiler_params=pltpu.CompilerParams(
            dimension_semantics=("parallel",),
            vmem_limit_bytes=VMEM_LIMIT),
        cost_estimate=pl.CostEstimate(
            flops=int(2 * N * R * K * LANE),
            transcendentals=0,
            bytes_accessed=int(patches.size * 2 + w.size * 2 + b.size * 4
                               + N * gs * LANE * 2),
        ),
    )(patches, w, b)


# ---------------------------------------------------------------------------
# Kernel 3: fused conv3 (dense on 400) + ReLU + fc1 + ReLU + dropout(id) + RBF
# ---------------------------------------------------------------------------
def _head_kernel(x_ref, w3_ref, b3_ref, wfc_ref, bfc_ref, ct2_ref, csq_ref, o_ref):
    h = jnp.dot(x_ref[...], w3_ref[...], preferred_element_type=jnp.float32)
    h = jnp.maximum(h + b3_ref[...], 0.0)                  # conv3 + ReLU (cols :120 real)
    h = jnp.dot(h.astype(jnp.bfloat16), wfc_ref[...], preferred_element_type=jnp.float32)
    h = jnp.maximum(h + bfc_ref[...], 0.0)                 # fc1 + ReLU (cols :84 real)
    # dropout(p=0.5): inference-mode identity.
    # TODO(synk): training-mode dropout (random mask + 1/(1-p) scale) not implemented.
    hb = h.astype(jnp.bfloat16)
    xx = jnp.sum(h * h, axis=-1, keepdims=True)            # ||x||^2 (f32 lane reduce)
    d = jnp.dot(hb, ct2_ref[...], preferred_element_type=jnp.float32)   # -2 x @ c^T (bf16 MXU)
    # NOTE: lanes 10..127 carry ||x||^2 + padding garbage; only [:, :10] is meaningful.
    o_ref[...] = d + csq_ref[...] + xx


def head(x3, params, mt):
    M, K = x3.shape
    assert M % mt == 0
    full = lambda i: (0, 0)
    flops = int(2 * M * (K * LANE + LANE * LANE + LANE * LANE))
    bytes_acc = int(x3.size * 2 + params["w3"].size * 2 + params["wfc"].size * 2
                    + params["ct2"].size * 2 + 3 * LANE * 4 + M * LANE * 4)
    return pl.pallas_call(
        _head_kernel,
        out_shape=jax.ShapeDtypeStruct((M, LANE), jnp.float32),
        grid=(M // mt,),
        in_specs=[
            pl.BlockSpec((mt, K), lambda i: (i, 0)),
            pl.BlockSpec((K, LANE), full),
            pl.BlockSpec((1, LANE), full),
            pl.BlockSpec((LANE, LANE), full),
            pl.BlockSpec((1, LANE), full),
            pl.BlockSpec((LANE, LANE), full),
            pl.BlockSpec((1, LANE), full),
        ],
        out_specs=pl.BlockSpec((mt, LANE), lambda i: (i, 0)),
        compiler_params=pltpu.CompilerParams(
            dimension_semantics=("parallel",),
            vmem_limit_bytes=VMEM_LIMIT),
        cost_estimate=pl.CostEstimate(flops=flops, transcendentals=0,
                                      bytes_accessed=bytes_acc),
    )(x3, params["w3"], params["b3"], params["wfc"], params["bfc"],
      params["ct2"], params["csq"])


# ---------------------------------------------------------------------------
# Parameters (synthetic, deterministic), stored padded & pre-transformed
# ---------------------------------------------------------------------------
def _uinit(key, shape, fan_in):
    bound = 1.0 / jnp.sqrt(jnp.float32(fan_in))
    return jax.random.uniform(key, shape, jnp.float32, -bound, bound)


def init_params(key):
    ks = jax.random.split(key, 9)
    # conv1: 1->6, k=5.  Feature order kh*5+kw (Cin=1); K 25->32, Cout 6->128.
    w1r = _uinit(ks[0], (25, 6), 25)
    w1 = jnp.zeros((32, LANE), jnp.float32).at[:25, :6].set(w1r).astype(jnp.bfloat16)
    b1 = jnp.zeros((1, LANE), jnp.float32).at[0, :6].set(_uinit(ks[1], (6,), 25))
    # conv2: 6->16, k=5.  Input channels stored padded to 8 -> K = 25*8 = 200.
    w2r = _uinit(ks[2], (25, 6, 16), 150)
    w2 = (jnp.zeros((25, 8, LANE), jnp.float32).at[:, :6, :16].set(w2r)
          .reshape(200, LANE).astype(jnp.bfloat16))
    b2 = jnp.zeros((1, LANE), jnp.float32).at[0, :16].set(_uinit(ks[3], (16,), 150))
    # conv3 == dense on the flattened (5*5*16 = 400) pool2 output -> 120.
    w3r = _uinit(ks[4], (25, 16, 120), 400)
    w3 = (jnp.zeros((25, 16, LANE), jnp.float32).at[:, :, :120].set(w3r)
          .reshape(400, LANE).astype(jnp.bfloat16))
    b3 = jnp.zeros((1, LANE), jnp.float32).at[0, :120].set(_uinit(ks[5], (120,), 400))
    # fc1: 120 -> 84.
    wfr = _uinit(ks[6], (120, 84), 120)
    wfc = jnp.zeros((LANE, LANE), jnp.float32).at[:120, :84].set(wfr).astype(jnp.bfloat16)
    bfc = jnp.zeros((1, LANE), jnp.float32).at[0, :84].set(_uinit(ks[7], (84,), 120))
    # RBF head: 10 centers in 84-d, pre-folded: d = ||x||^2 + (x @ (-2 C^T)) + ||c||^2.
    c = _uinit(ks[8], (10, 84), 84)
    ct2 = (jnp.zeros((LANE, LANE), jnp.float32).at[:84, :10].set(-2.0 * c.T)
           .astype(jnp.bfloat16))
    csq = jnp.zeros((1, LANE), jnp.float32).at[0, :10].set(jnp.sum(c * c, axis=1))
    return dict(w1=w1, b1=b1, w2=w2, b2=b2, w3=w3, b3=b3,
                wfc=wfc, bfc=bfc, ct2=ct2, csq=csq)


# ---------------------------------------------------------------------------
# Forward pass (3 fused, batch-tiled pallas_calls)
# ---------------------------------------------------------------------------
@jax.jit
def lenet5_forward(params, x_nchw):
    x = jnp.transpose(x_nchw, (0, 2, 3, 1)).astype(jnp.float32)     # NCHW -> NHWC (N,32,32,1)
    N = x.shape[0]
    npad = _round_up(max(N, 16), 16)          # >=16 so the head's bf16 block is tile-aligned
    if npad != N:
        x = jnp.pad(x, ((0, npad - N), (0, 0), (0, 0), (0, 0)))

    # Batch tiles: powers of two dividing npad; caps keep >=2 grid steps (v7x megacore)
    # and bound per-step VMEM (stage1 ~0.6 MiB/img, stage2 ~0.13 MiB/img incl. acc).
    bt1 = _pow2_tile(npad, cap=min(8, npad // 2))
    bt2 = _pow2_tile(npad, cap=min(32, npad // 2))
    mt = _pow2_tile(npad, cap=min(512, max(16, npad // 2)), floor=16)

    # stage 1: conv1(5x5, 1->6) + ReLU + 2x2 maxpool (fused).
    p1, np1, gs1 = _pool_grouped_patches(x, 5)                      # (npad, 4*gs1, 32) bf16
    a1 = conv_relu_pool(p1, params["w1"], params["b1"], gs1, bt1)   # (npad, gs1, 128) bf16

    # stage 2: conv2(5x5, 6->16) + ReLU + 2x2 maxpool (fused).
    pool1 = a1[:, :np1, :8].reshape(npad, 14, 14, 8)                # 6 real + 2 zero channels
    p2, np2, gs2 = _pool_grouped_patches(pool1, 5)                  # (npad, 4*gs2, 200) bf16
    a2 = conv_relu_pool(p2, params["w2"], params["b2"], gs2, bt2)   # (npad, gs2, 128) bf16

    # stage 3: conv3 + ReLU + fc1 + ReLU + dropout(id) + RBF (fused).
    # conv3 "im2col" is just a flatten (5x5 input with a 5x5 kernel -> 1x1 output).
    x3 = a2[:, :np2, :16].reshape(npad, 400)                        # bf16, feature = p*16+c
    out = head(x3, params, mt)                                      # (npad, 128) f32
    return out[:N, :10]                                             # real logits


# ---------------------------------------------------------------------------
# Pure-JAX reference replicating the kernel path's bf16 quantization points
# (so the self-check tolerance can be tight).
# ---------------------------------------------------------------------------
def _reference_forward(params, x_nchw):
    f32 = jnp.float32
    x = jnp.transpose(x_nchw, (0, 2, 3, 1)).astype(f32)
    N = x.shape[0]

    def conv_relu(xin, w, b, k, kdim):
        n, hh, ww, c = xin.shape
        oh, ow = hh - k + 1, ww - k + 1
        cols = [xin[:, i:i + oh, j:j + ow, :] for i in range(k) for j in range(k)]
        pat = jnp.stack(cols, axis=3).reshape(n, oh, ow, k * k * c)
        if k * k * c < kdim:
            pat = jnp.pad(pat, ((0, 0), (0, 0), (0, 0), (0, kdim - k * k * c)))
        pat = pat.astype(jnp.bfloat16)
        y = jnp.einsum("nhwk,kc->nhwc", pat, w, preferred_element_type=f32) + b[0]
        return jnp.maximum(y, 0.0)

    def pool2x2(xin):
        return jnp.max(jnp.stack([xin[:, dh::2, dw::2, :]
                                  for dh in (0, 1) for dw in (0, 1)]), axis=0)

    y = pool2x2(conv_relu(x, params["w1"], params["b1"], 5, 32)).astype(jnp.bfloat16)
    y = pool2x2(conv_relu(y[..., :8].astype(f32), params["w2"], params["b2"], 5, 200))
    y = y.astype(jnp.bfloat16)
    x3 = y[..., :16].reshape(N, 400)
    h = jnp.maximum(jnp.dot(x3, params["w3"], preferred_element_type=f32)
                    + params["b3"][0], 0.0)
    h = jnp.maximum(jnp.dot(h.astype(jnp.bfloat16), params["wfc"],
                            preferred_element_type=f32) + params["bfc"][0], 0.0)
    d = jnp.dot(h.astype(jnp.bfloat16), params["ct2"], preferred_element_type=f32)
    d = d + params["csq"][0] + jnp.sum(h * h, axis=-1, keepdims=True)
    return d[:, :10]


if __name__ == "__main__":
    key = jax.random.PRNGKey(0)
    pkey, xkey = jax.random.split(key)
    params = init_params(pkey)
    # Classic LeNet-5 input: 1 channel, 32x32 (required so conv3 -> 1x1). Batch 8.
    x = jax.random.normal(xkey, (8, 1, 32, 32), dtype=jnp.float32)

    out = jax.block_until_ready(lenet5_forward(params, x))
    assert out.shape == (8, 10)

    ref = jax.block_until_ready(_reference_forward(params, x))
    err = float(jnp.max(jnp.abs(out - ref)))
    scale = float(jnp.maximum(jnp.max(jnp.abs(ref)), 1.0))
    assert err / scale < 1e-3, f"mismatch vs reference: abs={err} rel={err / scale}"

    print("KERNEL_OK")
</pallas_src>

<mosaic_0001>
module attributes {stable_mosaic.version = 11 : i64} {
  func.func @_conv_relu_pool_kernel(%arg0: i32, %arg1: memref<8x832x32xbf16, #tpu.memory_space<vmem>>, %arg2: memref<32x128xbf16, #tpu.memory_space<vmem>>, %arg3: memref<1x128xf32, #tpu.memory_space<vmem>>, %arg4: memref<8x208x128xbf16, #tpu.memory_space<vmem>>) attributes {dimension_semantics = [#tpu.dimension_semantics<parallel>], iteration_bounds = array<i64: 2>, scalar_prefetch = 0 : i64, scratch_operands = 0 : i64, tpu.core_type = #tpu.core_type<tc>, window_params = [{transform_indices = @transform_0, window_bounds = array<i64: 8, 832, 32>}, {pipeline_mode = #tpu.pipeline_mode<synchronous>, transform_indices = @transform_1, window_bounds = array<i64: 32, 128>}, {pipeline_mode = #tpu.pipeline_mode<synchronous>, transform_indices = @transform_2, window_bounds = array<i64: 1, 128>}, {transform_indices = @transform_3, window_bounds = array<i64: 8, 208, 128>}]} {
    %c0 = arith.constant 0 : index
    %c0_0 = arith.constant 0 : index
    %c0_1 = arith.constant 0 : index
    %0 = vector.load %arg1[%c0, %c0_0, %c0_1] : memref<8x832x32xbf16, #tpu.memory_space<vmem>>, vector<8x832x32xbf16>
    %1 = vector.shape_cast %0 : vector<8x832x32xbf16> to vector<6656x32xbf16>
    %c0_2 = arith.constant 0 : index
    %c0_3 = arith.constant 0 : index
    %2 = vector.load %arg2[%c0_2, %c0_3] : memref<32x128xbf16, #tpu.memory_space<vmem>>, vector<32x128xbf16>
    %cst = arith.constant dense<0.000000e+00> : vector<6656x128xf32>
    %3 = tpu.matmul %1, %2, %cst {dimension_numbers = #tpu.dot_dimension_numbers<[1], [0], [0], [1], [0, 0, 1, 1], [], []>} : vector<6656x32xbf16>, vector<32x128xbf16>, vector<6656x128xf32> -> vector<6656x128xf32>
    %c0_4 = arith.constant 0 : index
    %c0_5 = arith.constant 0 : index
    %4 = vector.load %arg3[%c0_4, %c0_5] : memref<1x128xf32, #tpu.memory_space<vmem>>, vector<1x128xf32>
    %5 = vector.broadcast %4 : vector<1x128xf32> to vector<6656x128xf32>
    %6 = arith.addf %3, %5 : vector<6656x128xf32>
    %cst_6 = arith.constant 0.000000e+00 : f32
    %7 = vector.broadcast %cst_6 : f32 to vector<6656x128xf32>
    %8 = arith.maximumf %6, %7 : vector<6656x128xf32>
    %9 = vector.shape_cast %8 : vector<6656x128xf32> to vector<8x4x208x128xf32>
    %10 = vector.extract_strided_slice %9 {offsets = [0, 0, 0, 0], sizes = [8, 1, 208, 128], strides = [1, 1, 1, 1]} : vector<8x4x208x128xf32> to vector<8x1x208x128xf32>
    %11 = vector.shape_cast %10 : vector<8x1x208x128xf32> to vector<8x208x128xf32>
    %12 = vector.extract_strided_slice %9 {offsets = [0, 1, 0, 0], sizes = [8, 1, 208, 128], strides = [1, 1, 1, 1]} : vector<8x4x208x128xf32> to vector<8x1x208x128xf32>
    %13 = vector.shape_cast %12 : vector<8x1x208x128xf32> to vector<8x208x128xf32>
    %14 = arith.maximumf %11, %13 : vector<8x208x128xf32>
    %15 = vector.extract_strided_slice %9 {offsets = [0, 2, 0, 0], sizes = [8, 1, 208, 128], strides = [1, 1, 1, 1]} : vector<8x4x208x128xf32> to vector<8x1x208x128xf32>
    %16 = vector.shape_cast %15 : vector<8x1x208x128xf32> to vector<8x208x128xf32>
    %17 = vector.extract_strided_slice %9 {offsets = [0, 3, 0, 0], sizes = [8, 1, 208, 128], strides = [1, 1, 1, 1]} : vector<8x4x208x128xf32> to vector<8x1x208x128xf32>
    %18 = vector.shape_cast %17 : vector<8x1x208x128xf32> to vector<8x208x128xf32>
    %19 = arith.maximumf %16, %18 : vector<8x208x128xf32>
    %20 = arith.maximumf %14, %19 : vector<8x208x128xf32>
    %21 = arith.truncf %20 : vector<8x208x128xf32> to vector<8x208x128xbf16>
    %c0_7 = arith.constant 0 : index
    %c0_8 = arith.constant 0 : index
    %c0_9 = arith.constant 0 : index
    %22 = vector.load %arg4[%c0_7, %c0_8, %c0_9] : memref<8x208x128xbf16, #tpu.memory_space<vmem>>, vector<8x208x128xbf16>
    tpu.vector_store %arg4[%c0_7, %c0_8, %c0_9], %21 {strides = array<i32>} : memref<8x208x128xbf16, #tpu.memory_space<vmem>>, vector<8x208x128xbf16>,
    return
  }
  func.func @transform_0(%arg0: i32) -> (i32, i32, i32) {
    %c0_i32 = arith.constant 0 : i32
    %c0_i32_0 = arith.constant 0 : i32
    %c0_i32_1 = arith.constant 0 : i32
    return %arg0, %c0_i32, %c0_i32_0 : i32, i32, i32
  }
  func.func @transform_1(%arg0: i32) -> (i32, i32) {
    %c0_i32 = arith.constant 0 : i32
    %c0_i32_0 = arith.constant 0 : i32
    %c0_i32_1 = arith.constant 0 : i32
    return %c0_i32, %c0_i32_0 : i32, i32
  }
  func.func @transform_2(%arg0: i32) -> (i32, i32) {
    %c0_i32 = arith.constant 0 : i32
    %c0_i32_0 = arith.constant 0 : i32
    %c0_i32_1 = arith.constant 0 : i32
    return %c0_i32, %c0_i32_0 : i32, i32
  }
  func.func @transform_3(%arg0: i32) -> (i32, i32, i32) {
    %c0_i32 = arith.constant 0 : i32
    %c0_i32_0 = arith.constant 0 : i32
    %c0_i32_1 = arith.constant 0 : i32
    return %arg0, %c0_i32, %c0_i32_0 : i32, i32, i32
  }
}

module attributes {stable_mosaic.version = 11 : i64} {
  func.func @_conv_relu_pool_kernel(%arg0: i32, %arg1: memref<8x128x200xbf16, #tpu.memory_space<vmem>>, %arg2: memref<200x128xbf16, #tpu.memory_space<vmem>>, %arg3: memref<1x128xf32, #tpu.memory_space<vmem>>, %arg4: memref<8x32x128xbf16, #tpu.memory_space<vmem>>) attributes {dimension_semantics = [#tpu.dimension_semantics<parallel>], iteration_bounds = array<i64: 2>, scalar_prefetch = 0 : i64, scratch_operands = 0 : i64, tpu.core_type = #tpu.core_type<tc>, window_params = [{transform_indices = @transform_0, window_bounds = array<i64: 8, 128, 200>}, {pipeline_mode = #tpu.pipeline_mode<synchronous>, transform_indices = @transform_1, window_bounds = array<i64: 200, 128>}, {pipeline_mode = #tpu.pipeline_mode<synchronous>, transform_indices = @transform_2, window_bounds = array<i64: 1, 128>}, {transform_indices = @transform_3, window_bounds = array<i64: 8, 32, 128>}]} {
    %c0 = arith.constant 0 : index
    %c0_0 = arith.constant 0 : index
    %c0_1 = arith.constant 0 : index
    %0 = vector.load %arg1[%c0, %c0_0, %c0_1] : memref<8x128x200xbf16, #tpu.memory_space<vmem>>, vector<8x128x200xbf16>
    %1 = vector.shape_cast %0 : vector<8x128x200xbf16> to vector<1024x200xbf16>
    %c0_2 = arith.constant 0 : index
    %c0_3 = arith.constant 0 : index
    %2 = vector.load %arg2[%c0_2, %c0_3] : memref<200x128xbf16, #tpu.memory_space<vmem>>, vector<200x128xbf16>
    %cst = arith.constant dense<0.000000e+00> : vector<1024x128xf32>
    %3 = tpu.matmul %1, %2, %cst {dimension_numbers = #tpu.dot_dimension_numbers<[1], [0], [0], [1], [0, 0, 1, 1], [], []>} : vector<1024x200xbf16>, vector<200x128xbf16>, vector<1024x128xf32> -> vector<1024x128xf32>
    %c0_4 = arith.constant 0 : index
    %c0_5 = arith.constant 0 : index
    %4 = vector.load %arg3[%c0_4, %c0_5] : memref<1x128xf32, #tpu.memory_space<vmem>>, vector<1x128xf32>
    %5 = vector.broadcast %4 : vector<1x128xf32> to vector<1024x128xf32>
    %6 = arith.addf %3, %5 : vector<1024x128xf32>
    %cst_6 = arith.constant 0.000000e+00 : f32
    %7 = vector.broadcast %cst_6 : f32 to vector<1024x128xf32>
    %8 = arith.maximumf %6, %7 : vector<1024x128xf32>
    %9 = vector.shape_cast %8 : vector<1024x128xf32> to vector<8x4x32x128xf32>
    %10 = vector.extract_strided_slice %9 {offsets = [0, 0, 0, 0], sizes = [8, 1, 32, 128], strides = [1, 1, 1, 1]} : vector<8x4x32x128xf32> to vector<8x1x32x128xf32>
    %11 = vector.shape_cast %10 : vector<8x1x32x128xf32> to vector<8x32x128xf32>
    %12 = vector.extract_strided_slice %9 {offsets = [0, 1, 0, 0], sizes = [8, 1, 32, 128], strides = [1, 1, 1, 1]} : vector<8x4x32x128xf32> to vector<8x1x32x128xf32>
    %13 = vector.shape_cast %12 : vector<8x1x32x128xf32> to vector<8x32x128xf32>
    %14 = arith.maximumf %11, %13 : vector<8x32x128xf32>
    %15 = vector.extract_strided_slice %9 {offsets = [0, 2, 0, 0], sizes = [8, 1, 32, 128], strides = [1, 1, 1, 1]} : vector<8x4x32x128xf32> to vector<8x1x32x128xf32>
    %16 = vector.shape_cast %15 : vector<8x1x32x128xf32> to vector<8x32x128xf32>
    %17 = vector.extract_strided_slice %9 {offsets = [0, 3, 0, 0], sizes = [8, 1, 32, 128], strides = [1, 1, 1, 1]} : vector<8x4x32x128xf32> to vector<8x1x32x128xf32>
    %18 = vector.shape_cast %17 : vector<8x1x32x128xf32> to vector<8x32x128xf32>
    %19 = arith.maximumf %16, %18 : vector<8x32x128xf32>
    %20 = arith.maximumf %14, %19 : vector<8x32x128xf32>
    %21 = arith.truncf %20 : vector<8x32x128xf32> to vector<8x32x128xbf16>
    %c0_7 = arith.constant 0 : index
    %c0_8 = arith.constant 0 : index
    %c0_9 = arith.constant 0 : index
    %22 = vector.load %arg4[%c0_7, %c0_8, %c0_9] : memref<8x32x128xbf16, #tpu.memory_space<vmem>>, vector<8x32x128xbf16>
    tpu.vector_store %arg4[%c0_7, %c0_8, %c0_9], %21 {strides = array<i32>} : memref<8x32x128xbf16, #tpu.memory_space<vmem>>, vector<8x32x128xbf16>,
    return
  }
  func.func @transform_0(%arg0: i32) -> (i32, i32, i32) {
    %c0_i32 = arith.constant 0 : i32
    %c0_i32_0 = arith.constant 0 : i32
    %c0_i32_1 = arith.constant 0 : i32
    return %arg0, %c0_i32, %c0_i32_0 : i32, i32, i32
  }
  func.func @transform_1(%arg0: i32) -> (i32, i32) {
    %c0_i32 = arith.constant 0 : i32
    %c0_i32_0 = arith.constant 0 : i32
    %c0_i32_1 = arith.constant 0 : i32
    return %c0_i32, %c0_i32_0 : i32, i32
  }
  func.func @transform_2(%arg0: i32) -> (i32, i32) {
    %c0_i32 = arith.constant 0 : i32
    %c0_i32_0 = arith.constant 0 : i32
    %c0_i32_1 = arith.constant 0 : i32
    return %c0_i32, %c0_i32_0 : i32, i32
  }
  func.func @transform_3(%arg0: i32) -> (i32, i32, i32) {
    %c0_i32 = arith.constant 0 : i32
    %c0_i32_0 = arith.constant 0 : i32
    %c0_i32_1 = arith.constant 0 : i32
    return %arg0, %c0_i32, %c0_i32_0 : i32, i32, i32
  }
}

module attributes {stable_mosaic.version = 11 : i64} {
  func.func @_head_kernel(%arg0: i32, %arg1: memref<16x400xbf16, #tpu.memory_space<vmem>>, %arg2: memref<400x128xbf16, #tpu.memory_space<vmem>>, %arg3: memref<1x128xf32, #tpu.memory_space<vmem>>, %arg4: memref<128x128xbf16, #tpu.memory_space<vmem>>, %arg5: memref<1x128xf32, #tpu.memory_space<vmem>>, %arg6: memref<128x128xbf16, #tpu.memory_space<vmem>>, %arg7: memref<1x128xf32, #tpu.memory_space<vmem>>, %arg8: memref<16x128xf32, #tpu.memory_space<vmem>>) attributes {dimension_semantics = [#tpu.dimension_semantics<parallel>], iteration_bounds = array<i64: 1>, scalar_prefetch = 0 : i64, scratch_operands = 0 : i64, tpu.core_type = #tpu.core_type<tc>, window_params = [{transform_indices = @transform_0, window_bounds = array<i64: 16, 400>}, {pipeline_mode = #tpu.pipeline_mode<synchronous>, transform_indices = @transform_1, window_bounds = array<i64: 400, 128>}, {pipeline_mode = #tpu.pipeline_mode<synchronous>, transform_indices = @transform_2, window_bounds = array<i64: 1, 128>}, {pipeline_mode = #tpu.pipeline_mode<synchronous>, transform_indices = @transform_3, window_bounds = array<i64: 128, 128>}, {pipeline_mode = #tpu.pipeline_mode<synchronous>, transform_indices = @transform_4, window_bounds = array<i64: 1, 128>}, {pipeline_mode = #tpu.pipeline_mode<synchronous>, transform_indices = @transform_5, window_bounds = array<i64: 128, 128>}, {pipeline_mode = #tpu.pipeline_mode<synchronous>, transform_indices = @transform_6, window_bounds = array<i64: 1, 128>}, {transform_indices = @transform_7, window_bounds = array<i64: 16, 128>}]} {
    %c0 = arith.constant 0 : index
    %c0_0 = arith.constant 0 : index
    %0 = vector.load %arg1[%c0, %c0_0] : memref<16x400xbf16, #tpu.memory_space<vmem>>, vector<16x400xbf16>
    %c0_1 = arith.constant 0 : index
    %c0_2 = arith.constant 0 : index
    %1 = vector.load %arg2[%c0_1, %c0_2] : memref<400x128xbf16, #tpu.memory_space<vmem>>, vector<400x128xbf16>
    %cst = arith.constant dense<0.000000e+00> : vector<16x128xf32>
    %2 = tpu.matmul %0, %1, %cst {dimension_numbers = #tpu.dot_dimension_numbers<[1], [0], [0], [1], [0, 0, 1, 1], [], []>} : vector<16x400xbf16>, vector<400x128xbf16>, vector<16x128xf32> -> vector<16x128xf32>
    %c0_3 = arith.constant 0 : index
    %c0_4 = arith.constant 0 : index
    %3 = vector.load %arg3[%c0_3, %c0_4] : memref<1x128xf32, #tpu.memory_space<vmem>>, vector<1x128xf32>
    %4 = vector.broadcast %3 : vector<1x128xf32> to vector<16x128xf32>
    %5 = arith.addf %2, %4 : vector<16x128xf32>
    %cst_5 = arith.constant 0.000000e+00 : f32
    %6 = vector.broadcast %cst_5 : f32 to vector<16x128xf32>
    %7 = arith.maximumf %5, %6 : vector<16x128xf32>
    %8 = arith.truncf %7 : vector<16x128xf32> to vector<16x128xbf16>
    %c0_6 = arith.constant 0 : index
    %c0_7 = arith.constant 0 : index
    %9 = vector.load %arg4[%c0_6, %c0_7] : memref<128x128xbf16, #tpu.memory_space<vmem>>, vector<128x128xbf16>
    %cst_8 = arith.constant dense<0.000000e+00> : vector<16x128xf32>
    %10 = tpu.matmul %8, %9, %cst_8 {dimension_numbers = #tpu.dot_dimension_numbers<[1], [0], [0], [1], [0, 0, 1, 1], [], []>} : vector<16x128xbf16>, vector<128x128xbf16>, vector<16x128xf32> -> vector<16x128xf32>
    %c0_9 = arith.constant 0 : index
    %c0_10 = arith.constant 0 : index
    %11 = vector.load %arg5[%c0_9, %c0_10] : memref<1x128xf32, #tpu.memory_space<vmem>>, vector<1x128xf32>
    %12 = vector.broadcast %11 : vector<1x128xf32> to vector<16x128xf32>
    %13 = arith.addf %10, %12 : vector<16x128xf32>
    %cst_11 = arith.constant 0.000000e+00 : f32
    %14 = vector.broadcast %cst_11 : f32 to vector<16x128xf32>
    %15 = arith.maximumf %13, %14 : vector<16x128xf32>
    %16 = arith.truncf %15 : vector<16x128xf32> to vector<16x128xbf16>
    %17 = arith.mulf %15, %15 : vector<16x128xf32>
    %cst_12 = arith.constant dense<0.000000e+00> : vector<16xf32>
    %18 = vector.multi_reduction <add>, %17, %cst_12 [1] : vector<16x128xf32> to vector<16xf32>
    %19 = vector.shape_cast %18 : vector<16xf32> to vector<16x1xf32>
    %c0_13 = arith.constant 0 : index
    %c0_14 = arith.constant 0 : index
    %20 = vector.load %arg6[%c0_13, %c0_14] : memref<128x128xbf16, #tpu.memory_space<vmem>>, vector<128x128xbf16>
    %cst_15 = arith.constant dense<0.000000e+00> : vector<16x128xf32>
    %21 = tpu.matmul %16, %20, %cst_15 {dimension_numbers = #tpu.dot_dimension_numbers<[1], [0], [0], [1], [0, 0, 1, 1], [], []>} : vector<16x128xbf16>, vector<128x128xbf16>, vector<16x128xf32> -> vector<16x128xf32>
    %c0_16 = arith.constant 0 : index
    %c0_17 = arith.constant 0 : index
    %22 = vector.load %arg7[%c0_16, %c0_17] : memref<1x128xf32, #tpu.memory_space<vmem>>, vector<1x128xf32>
    %23 = vector.broadcast %22 : vector<1x128xf32> to vector<16x128xf32>
    %24 = arith.addf %21, %23 : vector<16x128xf32>
    %25 = vector.broadcast %19 : vector<16x1xf32> to vector<16x128xf32>
    %26 = arith.addf %24, %25 : vector<16x128xf32>
    %c0_18 = arith.constant 0 : index
    %c0_19 = arith.constant 0 : index
    %27 = vector.load %arg8[%c0_18, %c0_19] : memref<16x128xf32, #tpu.memory_space<vmem>>, vector<16x128xf32>
    tpu.vector_store %arg8[%c0_18, %c0_19], %26 {strides = array<i32>} : memref<16x128xf32, #tpu.memory_space<vmem>>, vector<16x128xf32>,
    return
  }
  func.func @transform_0(%arg0: i32) -> (i32, i32) {
    %c0_i32 = arith.constant 0 : i32
    %c0_i32_0 = arith.constant 0 : i32
    return %arg0, %c0_i32 : i32, i32
  }
  func.func @transform_1(%arg0: i32) -> (i32, i32) {
    %c0_i32 = arith.constant 0 : i32
    %c0_i32_0 = arith.constant 0 : i32
    %c0_i32_1 = arith.constant 0 : i32
    return %c0_i32, %c0_i32_0 : i32, i32
  }
  func.func @transform_2(%arg0: i32) -> (i32, i32) {
    %c0_i32 = arith.constant 0 : i32
    %c0_i32_0 = arith.constant 0 : i32
    %c0_i32_1 = arith.constant 0 : i32
    return %c0_i32, %c0_i32_0 : i32, i32
  }
  func.func @transform_3(%arg0: i32) -> (i32, i32) {
    %c0_i32 = arith.constant 0 : i32
    %c0_i32_0 = arith.constant 0 : i32
    %c0_i32_1 = arith.constant 0 : i32
    return %c0_i32, %c0_i32_0 : i32, i32
  }
  func.func @transform_4(%arg0: i32) -> (i32, i32) {
    %c0_i32 = arith.constant 0 : i32
    %c0_i32_0 = arith.constant 0 : i32
    %c0_i32_1 = arith.constant 0 : i32
    return %c0_i32, %c0_i32_0 : i32, i32
  }
  func.func @transform_5(%arg0: i32) -> (i32, i32) {
    %c0_i32 = arith.constant 0 : i32
    %c0_i32_0 = arith.constant 0 : i32
    %c0_i32_1 = arith.constant 0 : i32
    return %c0_i32, %c0_i32_0 : i32, i32
  }
  func.func @transform_6(%arg0: i32) -> (i32, i32) {
    %c0_i32 = arith.constant 0 : i32
    %c0_i32_0 = arith.constant 0 : i32
    %c0_i32_1 = arith.constant 0 : i32
    return %c0_i32, %c0_i32_0 : i32, i32
  }
  func.func @transform_7(%arg0: i32) -> (i32, i32) {
    %c0_i32 = arith.constant 0 : i32
    %c0_i32_0 = arith.constant 0 : i32
    return %arg0, %c0_i32 : i32, i32
  }
}

</mosaic_0001>

<bundles_post_ra>
// kernel: lenet5_forward.3
= control target key start
LH: loop header
LB: loop body
LE: loop exit
PB: predicated region body
PF: predicated region fallthrough
CT: control target
= control target key end

     0   :  { %s13885_s12 = smov 0   ;;  %s19203_s0 = inlined_call_operand.vmem [shape: bf16[16,832,32], index: 0, kind: input, shape index: {}]   ;;  %s19204_s1 = inlined_call_operand.vmem [shape: bf16[32,128], index: 1, kind: input, shape index: {}]   ;;  %s19205_s2 = inlined_call_operand.vmem [shape: f32[1,128], index: 2, kind: input, shape index: {}]   ;;  %s19206_s3 = inlined_call_operand.vmem [shape: bf16[16,208,128], index: 3, kind: output, shape index: {}]  }
   0x1 LB: > { %s10279_s13 = sadd.s32 4294967295, %s13863_s12   ;;  %p10283_p0 = scmp.ge.s32.totalorder %s13863_s12, 1  ;;  %s13863_s12 = sphi %s13885_s12, %s13_s12  }
   0x2   : > { %p139_p1 = scmp.lt.s32.totalorder %s13863_s12, 3 }
   0x4   : > { %p140_p2 = pnand %p10283_p0, %p139_p1 }
   0x6   : > { %143 = sbr.rel (%p140_p2) target bundleno = 1099 (0x44b), region = 32 }
   0xd   : > { %v13432_v0 = vld [vmem:[%s19204_s1] sm:$0xff]   ;;  %s10284_s16 = sshll.u32 %s10279_s13, 3  ;;  %v13433_v1 = vld [vmem:[%s19204_s1 + $0x8] sm:$0xff]   ;;  %vm3115_vm0 = vcmask 261120  }
   0xe   : > { %p166_p3 = scmp.lt.s32.totalorder %s10284_s16, 15  ;;  %12582 = vmatprep.subr.bf16.mxu0 %v13432_v0  ;;  %13418 = vmatprep.subr.bf16.mxu1 %v13432_v0 }
   0xf   : > { %12583 = vmatpush3.bf16.msra.mxu0 %v13432_v0  ;;  %13420 = vmatpush3.bf16.msra.mxu1 %v13432_v0 }
  0x10   : > { %s20201_s16 = smov (!%p166_p3, %s10284_s16), 15  ;;  %12584 = vmatprep.subr.bf16.mxu0 %v13433_v1  ;;  %13419 = vmatprep.subr.bf16.mxu1 %v13433_v1 }
  0x11   : > { %s13422_s19 = smul.u32 416, %s20201_s16 }
  0x12   : > { %s13423_s27 = smul.u32 104, %s20201_s16 }
  0x13   : > { %12585 = vmatpush3.bf16.msra.mxu0 %v13433_v1  ;;  %13421 = vmatpush3.bf16.msra.mxu1 %v13433_v1  ;;  %s13905_s22 = scalar_lea.vmem %s19203_s0, %s13422_s19 }
  0x14   : > { %v13434_v2 = vld [vmem:[%s13905_s22] sm:$0xff]   ;;  %v13436_v4 = vld [vmem:[%s13905_s22 + $0x8] sm:$0xff]   ;;  %v13438_v6 = vld [vmem:[%s13905_s22 + $0x10] sm:$0xff]   ;;  %s15166_s30 = scalar_lea.vmem %s19206_s3, %s13423_s27 }
  0x15   : > { %v13435_v3 = vld [vmem:[%s13905_s22 + $0x680] sm:$0xff]   ;;  %12586 = vmatprep.mubr.msk.bf16.mxu0 %vm3115_vm0, %v13434_v2  ;;  %v13437_v5 = vld [vmem:[%s13905_s22 + $0x688] sm:$0xff]   ;;  %v13439_v7 = vld [vmem:[%s13905_s22 + $0x690] sm:$0xff]  }
  0x16   : > { %13002 = vmatprep.mubr.msk.bf16.mxu1 %vm3115_vm0, %v13435_v3  ;;  %12587 = vmatmul.mubr.msk.bf16.vlgmr.msra.gmra.mrb[0].mxu0 %vm3115_vm0, %v13436_v4  ;;  %v13440_v8 = vld [vmem:[%s13905_s22 + $0x18] sm:$0xff]   ;;  %v13442_v10 = vld [vmem:[%s13905_s22 + $0x20] sm:$0xff]   ;;  %v13444_v12 = vld [vmem:[%s13905_s22 + $0x28] sm:$0xff]  }
  0x17   : > { %13003 = vmatmul.mubr.msk.bf16.vlgmr.msra.gmra.mrb[0].mxu1 %vm3115_vm0, %v13437_v5  ;;  %12590 = vmatprep.mubr.msk.bf16.mxu0 %vm3115_vm0, %v13438_v6  ;;  %v13441_v9 = vld [vmem:[%s13905_s22 + $0x698] sm:$0xff]   ;;  %v13443_v11 = vld [vmem:[%s13905_s22 + $0x6a0] sm:$0xff]   ;;  %v13445_v13 = vld [vmem:[%s13905_s22 + $0x6a8] sm:$0xff]  }
  0x18   : > { %13006 = vmatprep.mubr.msk.bf16.mxu1 %vm3115_vm0, %v13439_v7  ;;  %v13446_v14 = vld [vmem:[%s13905_s22 + $0x30] sm:$0xff]   ;;  %v13448_v16 = vld [vmem:[%s13905_s22 + $0x38] sm:$0xff]   ;;  %v13450_v18 = vld [vmem:[%s13905_s22 + $0x40] sm:$0xff]  }
  0x19   : > { %v13447_v15 = vld [vmem:[%s13905_s22 + $0x6b0] sm:$0xff]   ;;  %v13449_v17 = vld [vmem:[%s13905_s22 + $0x6b8] sm:$0xff]   ;;  %v13451_v19 = vld [vmem:[%s13905_s22 + $0x6c0] sm:$0xff]  }
  0x1a   : > { %v13452_v20 = vld [vmem:[%s13905_s22 + $0x48] sm:$0xff]   ;;  %v13454_v22 = vld [vmem:[%s13905_s22 + $0x50] sm:$0xff]   ;;  %v13456_v24 = vld [vmem:[%s13905_s22 + $0x58] sm:$0xff]  }
  0x1b   : > { %v13453_v21 = vld [vmem:[%s13905_s22 + $0x6c8] sm:$0xff]   ;;  %v13455_v23 = vld [vmem:[%s13905_s22 + $0x6d0] sm:$0xff]   ;;  %v13457_v25 = vld [vmem:[%s13905_s22 + $0x6d8] sm:$0xff]  }
  0x1c   : > { %v13458_v26 = vld [vmem:[%s13905_s22 + $0x60] sm:$0xff]   ;;  %v13460_v28 = vld [vmem:[%s13905_s22 + $0x68] sm:$0xff]   ;;  %v13462_v30 = vld [vmem:[%s13905_s22 + $0x70] sm:$0xff]  }
  0x1d   : > { %v13459_v27 = vld [vmem:[%s13905_s22 + $0x6e0] sm:$0xff]   ;;  %v13461_v29 = vld [vmem:[%s13905_s22 + $0x6e8] sm:$0xff]   ;;  %v13463_v31 = vld [vmem:[%s13905_s22 + $0x6f0] sm:$0xff]  }
  0x1e   : > { %12591 = vmatmul.mubr.msk.bf16.gmra.mrb[4].mxu0 %vm3115_vm0, %v13440_v8  ;;  %v13464_v32 = vld [vmem:[%s13905_s22 + $0x78] sm:$0xff]   ;;  %v13466_v34 = vld [vmem:[%s13905_s22 + $0x80] sm:$0xff]   ;;  %v13468_v36 = vld [vmem:[%s13905_s22 + $0x88] sm:$0xff]  }
  0x1f   : > { %13007 = vmatmul.mubr.msk.bf16.gmra.mrb[4].mxu1 %vm3115_vm0, %v13441_v9  ;;  %12594 = vmatprep.mubr.msk.bf16.mxu0 %vm3115_vm0, %v13442_v10  ;;  %v13465_v33 = vld [vmem:[%s13905_s22 + $0x6f8] sm:$0xff]   ;;  %v13467_v35 = vld [vmem:[%s13905_s22 + $0x700] sm:$0xff]   ;;  %v13469_v37 = vld [vmem:[%s13905_s22 + $0x708] sm:$0xff]  }
  0x20   : > { %13010 = vmatprep.mubr.msk.bf16.mxu1 %vm3115_vm0, %v13443_v11  ;;  %v13470_v38 = vld [vmem:[%s13905_s22 + $0x90] sm:$0xff]   ;;  %v13472_v40 = vld [vmem:[%s13905_s22 + $0x98] sm:$0xff]   ;;  %v13474_v42 = vld [vmem:[%s13905_s22 + $0xa0] sm:$0xff]  }
  0x21   : > { %v13471_v39 = vld [vmem:[%s13905_s22 + $0x710] sm:$0xff]   ;;  %v13473_v41 = vld [vmem:[%s13905_s22 + $0x718] sm:$0xff]   ;;  %v13475_v43 = vld [vmem:[%s13905_s22 + $0x720] sm:$0xff]  }
  0x22   : > { %v13476_v44 = vld [vmem:[%s13905_s22 + $0xa8] sm:$0xff]   ;;  %v13478_v46 = vld [vmem:[%s13905_s22 + $0xb0] sm:$0xff]   ;;  %v13480_v48 = vld [vmem:[%s13905_s22 + $0xb8] sm:$0xff]  }
  0x23   : > { %v13477_v45 = vld [vmem:[%s13905_s22 + $0x728] sm:$0xff]   ;;  %v13479_v47 = vld [vmem:[%s13905_s22 + $0x730] sm:$0xff]   ;;  %v13481_v49 = vld [vmem:[%s13905_s22 + $0x738] sm:$0xff]  }
  0x24   : > { %v13482_v50 = vld [vmem:[%s13905_s22 + $0xc0] sm:$0xff]   ;;  %v13484_v52 = vld [vmem:[%s13905_s22 + $0xc8] sm:$0xff]   ;;  %v13486_v54 = vld [vmem:[%s13905_s22 + $0xd0] sm:$0xff]  }
  0x25   : > { %v13483_v51 = vld [vmem:[%s13905_s22 + $0x740] sm:$0xff]   ;;  %v13485_v53 = vld [vmem:[%s13905_s22 + $0x748] sm:$0xff]   ;;  %v13487_v55 = vld [vmem:[%s13905_s22 + $0x750] sm:$0xff]  }
  0x26   : > { %12595 = vmatmul.mubr.msk.bf16.gmra.mrb[8].mxu0 %vm3115_vm0, %v13444_v12  ;;  %v13488_v56 = vld [vmem:[%s13905_s22 + $0xd8] sm:$0xff]   ;;  %v13490_v58 = vld [vmem:[%s13905_s22 + $0xe0] sm:$0xff]   ;;  %v13492_v60 = vld [vmem:[%s13905_s22 + $0xe8] sm:$0xff]  }
  0x27   : > { %13011 = vmatmul.mubr.msk.bf16.gmra.mrb[8].mxu1 %vm3115_vm0, %v13445_v13  ;;  %12598 = vmatprep.mubr.msk.bf16.mxu0 %vm3115_vm0, %v13446_v14  ;;  %v13489_v57 = vld [vmem:[%s13905_s22 + $0x758] sm:$0xff]   ;;  %v13491_v59 = vld [vmem:[%s13905_s22 + $0x760] sm:$0xff]   ;;  %v13493_v61 = vld [vmem:[%s13905_s22 + $0x768] sm:$0xff]  }
  0x28   : > { %13014 = vmatprep.mubr.msk.bf16.mxu1 %vm3115_vm0, %v13447_v15  ;;  %v13494_v62 = vld [vmem:[%s13905_s22 + $0xf0] sm:$0xff]   ;;  %v13496_v0 = vld [vmem:[%s13905_s22 + $0xf8] sm:$0xff]   ;;  %v13498_v2 = vld [vmem:[%s13905_s22 + $0x100] sm:$0xff]  }
  0x29   : > { %v13495_v63 = vld [vmem:[%s13905_s22 + $0x770] sm:$0xff]   ;;  %v13497_v1 = vld [vmem:[%s13905_s22 + $0x778] sm:$0xff]   ;;  %v13499_v3 = vld [vmem:[%s13905_s22 + $0x780] sm:$0xff]  }
  0x2a   : > { %v13500_v4 = vld [vmem:[%s13905_s22 + $0x108] sm:$0xff]   ;;  %v13502_v6 = vld [vmem:[%s13905_s22 + $0x110] sm:$0xff]   ;;  %v13504_v8 = vld [vmem:[%s13905_s22 + $0x118] sm:$0xff]  }
  0x2b   : > { %v13501_v5 = vld [vmem:[%s13905_s22 + $0x788] sm:$0xff]   ;;  %v13503_v7 = vld [vmem:[%s13905_s22 + $0x790] sm:$0xff]   ;;  %v13505_v9 = vld [vmem:[%s13905_s22 + $0x798] sm:$0xff]  }
  0x2c   : > { %v13506_v10 = vld [vmem:[%s13905_s22 + $0x120] sm:$0xff]   ;;  %v13508_v12 = vld [vmem:[%s13905_s22 + $0x128] sm:$0xff]   ;;  %v13510_v14 = vld [vmem:[%s13905_s22 + $0x130] sm:$0xff]  }
  0x2d   : > { %v13507_v11 = vld [vmem:[%s13905_s22 + $0x7a0] sm:$0xff]   ;;  %v13509_v13 = vld [vmem:[%s13905_s22 + $0x7a8] sm:$0xff]   ;;  %v13511_v15 = vld [vmem:[%s13905_s22 + $0x7b0] sm:$0xff]  }
  0x2e   : > { %12599 = vmatmul.mubr.msk.bf16.gmra.mrb[12].mxu0 %vm3115_vm0, %v13448_v16  ;;  %v13512_v16 = vld [vmem:[%s13905_s22 + $0x138] sm:$0xff]  }
  0x2f   : > { %13015 = vmatmul.mubr.msk.bf16.gmra.mrb[12].mxu1 %vm3115_vm0, %v13449_v17  ;;  %12602 = vmatprep.mubr.msk.bf16.mxu0 %vm3115_vm0, %v13450_v18  ;;  %v13513_v17 = vld [vmem:[%s13905_s22 + $0x7b8] sm:$0xff]   ;;  %v13514_v18 = vld [vmem:[%s13905_s22 + $0x140] sm:$0xff]  }
  0x30   : > { %13018 = vmatprep.mubr.msk.bf16.mxu1 %vm3115_vm0, %v13451_v19  ;;  %v13515_v19 = vld [vmem:[%s13905_s22 + $0x7c0] sm:$0xff]  }
  0x36   : > { %12603 = vmatmul.mubr.msk.bf16.gmra.mrb[16].mxu0 %vm3115_vm0, %v13452_v20  ;;  %v13516_v20 = vld [vmem:[%s13905_s22 + $0x148] sm:$0xff]  }
  0x37   : > { %13019 = vmatmul.mubr.msk.bf16.gmra.mrb[16].mxu1 %vm3115_vm0, %v13453_v21  ;;  %12606 = vmatprep.mubr.msk.bf16.mxu0 %vm3115_vm0, %v13454_v22  ;;  %v13517_v21 = vld [vmem:[%s13905_s22 + $0x7c8] sm:$0xff]   ;;  %v13518_v22 = vld [vmem:[%s13905_s22 + $0x150] sm:$0xff]  }
  0x38   : > { %13022 = vmatprep.mubr.msk.bf16.mxu1 %vm3115_vm0, %v13455_v23  ;;  %v13519_v23 = vld [vmem:[%s13905_s22 + $0x7d0] sm:$0xff]  }
  0x3e   : > { %12607 = vmatmul.mubr.msk.bf16.gmra.mrb[20].mxu0 %vm3115_vm0, %v13456_v24  ;;  %v13520_v24 = vld [vmem:[%s13905_s22 + $0x158] sm:$0xff]  }
  0x3f   : > { %13023 = vmatmul.mubr.msk.bf16.gmra.mrb[20].mxu1 %vm3115_vm0, %v13457_v25  ;;  %12610 = vmatprep.mubr.msk.bf16.mxu0 %vm3115_vm0, %v13458_v26  ;;  %v13521_v25 = vld [vmem:[%s13905_s22 + $0x7d8] sm:$0xff]   ;;  %v13522_v26 = vld [vmem:[%s13905_s22 + $0x160] sm:$0xff]  }
  0x40   : > { %13026 = vmatprep.mubr.msk.bf16.mxu1 %vm3115_vm0, %v13459_v27  ;;  %v13523_v27 = vld [vmem:[%s13905_s22 + $0x7e0] sm:$0xff]  }
  0x46   : > { %12611 = vmatmul.mubr.msk.bf16.gmra.mrb[24].mxu0 %vm3115_vm0, %v13460_v28  ;;  %v13524_v28 = vld [vmem:[%s13905_s22 + $0x168] sm:$0xff]  }
  0x47   : > { %13027 = vmatmul.mubr.msk.bf16.gmra.mrb[24].mxu1 %vm3115_vm0, %v13461_v29  ;;  %12614 = vmatprep.mubr.msk.bf16.mxu0 %vm3115_vm0, %v13462_v30  ;;  %v13525_v29 = vld [vmem:[%s13905_s22 + $0x7e8] sm:$0xff]   ;;  %v13526_v30 = vld [vmem:[%s13905_s22 + $0x170] sm:$0xff]  }
  0x48   : > { %13030 = vmatprep.mubr.msk.bf16.mxu1 %vm3115_vm0, %v13463_v31  ;;  %v13527_v31 = vld [vmem:[%s13905_s22 + $0x7f0] sm:$0xff]  }
  0x4e   : > { %12615 = vmatmul.mubr.msk.bf16.gmra.mrb[28].mxu0 %vm3115_vm0, %v13464_v32  ;;  %v13528_v32 = vld [vmem:[%s13905_s22 + $0x178] sm:$0xff]  }
  0x4f   : > { %13031 = vmatmul.mubr.msk.bf16.gmra.mrb[28].mxu1 %vm3115_vm0, %v13465_v33  ;;  %12618 = vmatprep.mubr.msk.bf16.mxu0 %vm3115_vm0, %v13466_v34  ;;  %v13529_v33 = vld [vmem:[%s13905_s22 + $0x7f8] sm:$0xff]   ;;  %v13530_v34 = vld [vmem:[%s13905_s22 + $0x180] sm:$0xff]  }
  0x50   : > { %13034 = vmatprep.mubr.msk.bf16.mxu1 %vm3115_vm0, %v13467_v35  ;;  %v13531_v35 = vld [vmem:[%s13905_s22 + $0x800] sm:$0xff]  }
  0x56   : > { %12619 = vmatmul.mubr.msk.bf16.gmra.mrb[32].mxu0 %vm3115_vm0, %v13468_v36  ;;  %v13532_v36 = vld [vmem:[%s13905_s22 + $0x188] sm:$0xff]  }
  0x57   : > { %13035 = vmatmul.mubr.msk.bf16.gmra.mrb[32].mxu1 %vm3115_vm0, %v13469_v37  ;;  %12622 = vmatprep.mubr.msk.bf16.mxu0 %vm3115_vm0, %v13470_v38  ;;  %v13533_v37 = vld [vmem:[%s13905_s22 + $0x808] sm:$0xff]   ;;  %v13534_v38 = vld [vmem:[%s13905_s22 + $0x190] sm:$0xff]  }
  0x58   : > { %13038 = vmatprep.mubr.msk.bf16.mxu1 %vm3115_vm0, %v13471_v39  ;;  %v13535_v39 = vld [vmem:[%s13905_s22 + $0x810] sm:$0xff]  }
  0x5e   : > { %12623 = vmatmul.mubr.msk.bf16.gmra.mrb[36].mxu0 %vm3115_vm0, %v13472_v40  ;;  %v13536_v40 = vld [vmem:[%s13905_s22 + $0x198] sm:$0xff]  }
  0x5f   : > { %13039 = vmatmul.mubr.msk.bf16.gmra.mrb[36].mxu1 %vm3115_vm0, %v13473_v41  ;;  %12626 = vmatprep.mubr.msk.bf16.mxu0 %vm3115_vm0, %v13474_v42  ;;  %v13537_v41 = vld [vmem:[%s13905_s22 + $0x818] sm:$0xff]   ;;  %v13538_v42 = vld [vmem:[%s13905_s22 + $0x1a0] sm:$0xff]  }
  0x60   : > { %13042 = vmatprep.mubr.msk.bf16.mxu1 %vm3115_vm0, %v13475_v43  ;;  %v13539_v43 = vld [vmem:[%s13905_s22 + $0x820] sm:$0xff]  }
  0x66   : > { %12627 = vmatmul.mubr.msk.bf16.gmra.mrb[40].mxu0 %vm3115_vm0, %v13476_v44  ;;  %v13540_v44 = vld [vmem:[%s13905_s22 + $0x1a8] sm:$0xff]  }
  0x67   : > { %13043 = vmatmul.mubr.msk.bf16.gmra.mrb[40].mxu1 %vm3115_vm0, %v13477_v45  ;;  %12630 = vmatprep.mubr.msk.bf16.mxu0 %vm3115_vm0, %v13478_v46  ;;  %v13541_v45 = vld [vmem:[%s13905_s22 + $0x828] sm:$0xff]   ;;  %v13542_v46 = vld [vmem:[%s13905_s22 + $0x1b0] sm:$0xff]  }
  0x68   : > { %13046 = vmatprep.mubr.msk.bf16.mxu1 %vm3115_vm0, %v13479_v47  ;;  %v13543_v47 = vld [vmem:[%s13905_s22 + $0x830] sm:$0xff]  }
  0x6e   : > { %12631 = vmatmul.mubr.msk.bf16.gmra.mrb[44].mxu0 %vm3115_vm0, %v13480_v48  ;;  %v13544_v48 = vld [vmem:[%s13905_s22 + $0x1b8] sm:$0xff]  }
  0x6f   : > { %13047 = vmatmul.mubr.msk.bf16.gmra.mrb[44].mxu1 %vm3115_vm0, %v13481_v49  ;;  %12634 = vmatprep.mubr.msk.bf16.mxu0 %vm3115_vm0, %v13482_v50  ;;  %v13545_v50 = vld [vmem:[%s13905_s22 + $0x838] sm:$0xff]  }
  0x70   : > { %13050 = vmatprep.mubr.msk.bf16.mxu1 %vm3115_vm0, %v13483_v51  ;;  %v13546_v51 = vld [vmem:[%s13905_s22 + $0x1c0] sm:$0xff]  }
  0x76   : > { %12635 = vmatmul.mubr.msk.bf16.gmra.mrb[48].mxu0 %vm3115_vm0, %v13484_v52 }
  0x77   : > { %13051 = vmatmul.mubr.msk.bf16.gmra.mrb[48].mxu1 %vm3115_vm0, %v13485_v53  ;;  %12638 = vmatprep.mubr.msk.bf16.mxu0 %vm3115_vm0, %v13486_v54 }
  0x78   : > { %13054 = vmatprep.mubr.msk.bf16.mxu1 %vm3115_vm0, %v13487_v55 }
  0x7e   : > { %12639 = vmatmul.mubr.msk.bf16.gmra.mrb[52].mxu0 %vm3115_vm0, %v13488_v56 }
  0x7f   : > { %13055 = vmatmul.mubr.msk.bf16.gmra.mrb[52].mxu1 %vm3115_vm0, %v13489_v57  ;;  %12642 = vmatprep.mubr.msk.bf16.mxu0 %vm3115_vm0, %v13490_v58  ;;  %v13547_v58 = vld [vmem:[%s13905_s22 + $0x840] sm:$0xff]  }
  0x80   : > { %13058 = vmatprep.mubr.msk.bf16.mxu1 %vm3115_vm0, %v13491_v59 }
  0x86   : > { %12643 = vmatmul.mubr.msk.bf16.gmra.mrb[56].mxu0 %vm3115_vm0, %v13492_v60  ;;  %v13548_v60 = vld [vmem:[%s13905_s22 + $0x1c8] sm:$0xff]  }
  0x87   : > { %13059 = vmatmul.mubr.msk.bf16.gmra.mrb[56].mxu1 %vm3115_vm0, %v13493_v61  ;;  %12646 = vmatprep.mubr.msk.bf16.mxu0 %vm3115_vm0, %v13494_v62  ;;  %v13549_v62 = vld [vmem:[%s13905_s22 + $0x848] sm:$0xff]  }
  0x88   : > { %13062 = vmatprep.mubr.msk.bf16.mxu1 %vm3115_vm0, %v13495_v63  ;;  %v13550_v63 = vld [vmem:[%s13905_s22 + $0x1d0] sm:$0xff]  }
  0x8e   : > { %12647 = vmatmul.mubr.msk.bf16.gmra.mrb[60].mxu0 %vm3115_vm0, %v13496_v0 }
  0x8f   : > { %13063 = vmatmul.mubr.msk.bf16.gmra.mrb[60].mxu1 %vm3115_vm0, %v13497_v1  ;;  %12650 = vmatprep.mubr.msk.bf16.mxu0 %vm3115_vm0, %v13498_v2 }
  0x90   : > { %13066 = vmatprep.mubr.msk.bf16.mxu1 %vm3115_vm0, %v13499_v3 }
  0x96   : > { %12651 = vmatmul.mubr.msk.bf16.gmra.mrb[64].mxu0 %vm3115_vm0, %v13500_v4 }
  0x97   : > { %13067 = vmatmul.mubr.msk.bf16.gmra.mrb[64].mxu1 %vm3115_vm0, %v13501_v5  ;;  %12654 = vmatprep.mubr.msk.bf16.mxu0 %vm3115_vm0, %v13502_v6  ;;  %v13551_v6 = vld [vmem:[%s13905_s22 + $0x850] sm:$0xff]  }
  0x98   : > { %13070 = vmatprep.mubr.msk.bf16.mxu1 %vm3115_vm0, %v13503_v7 }
  0x9e   : > { %12655 = vmatmul.mubr.msk.bf16.gmra.mrb[68].mxu0 %vm3115_vm0, %v13504_v8  ;;  %v13552_v8 = vld [vmem:[%s13905_s22 + $0x1d8] sm:$0xff]  }
  0x9f   : > { %13071 = vmatmul.mubr.msk.bf16.gmra.mrb[68].mxu1 %vm3115_vm0, %v13505_v9  ;;  %12658 = vmatprep.mubr.msk.bf16.mxu0 %vm3115_vm0, %v13506_v10  ;;  %v13553_v10 = vld [vmem:[%s13905_s22 + $0x858] sm:$0xff]  }
  0xa0   : > { %13074 = vmatprep.mubr.msk.bf16.mxu1 %vm3115_vm0, %v13507_v11  ;;  %v13554_v11 = vld [vmem:[%s13905_s22 + $0x1e0] sm:$0xff]  }
  0xa6   : > { %12659 = vmatmul.mubr.msk.bf16.gmra.mrb[72].mxu0 %vm3115_vm0, %v13508_v12 }
  0xa7   : > { %13075 = vmatmul.mubr.msk.bf16.gmra.mrb[72].mxu1 %vm3115_vm0, %v13509_v13  ;;  %12662 = vmatprep.mubr.msk.bf16.mxu0 %vm3115_vm0, %v13510_v14 }
  0xa8   : > { %13078 = vmatprep.mubr.msk.bf16.mxu1 %vm3115_vm0, %v13511_v15 }
  0xae   : > { %12663 = vmatmul.mubr.msk.bf16.gmra.mrb[76].mxu0 %vm3115_vm0, %v13512_v16 }
  0xaf   : > { %13079 = vmatmul.mubr.msk.bf16.gmra.mrb[76].mxu1 %vm3115_vm0, %v13513_v17  ;;  %12666 = vmatprep.mubr.msk.bf16.mxu0 %vm3115_vm0, %v13514_v18  ;;  %v13555_v18 = vld [vmem:[%s13905_s22 + $0x860] sm:$0xff]  }
  0xb0   : > { %13082 = vmatprep.mubr.msk.bf16.mxu1 %vm3115_vm0, %v13515_v19 }
  0xb6   : > { %12667 = vmatmul.mubr.msk.bf16.gmra.mrb[80].mxu0 %vm3115_vm0, %v13516_v20  ;;  %v13556_v20 = vld [vmem:[%s13905_s22 + $0x1e8] sm:$0xff]  }
  0xb7   : > { %13083 = vmatmul.mubr.msk.bf16.gmra.mrb[80].mxu1 %vm3115_vm0, %v13517_v21  ;;  %12670 = vmatprep.mubr.msk.bf16.mxu0 %vm3115_vm0, %v13518_v22  ;;  %v13557_v22 = vld [vmem:[%s13905_s22 + $0x868] sm:$0xff]  }
  0xb8   : > { %13086 = vmatprep.mubr.msk.bf16.mxu1 %vm3115_vm0, %v13519_v23  ;;  %v13558_v23 = vld [vmem:[%s13905_s22 + $0x1f0] sm:$0xff]  }
  0xbe   : > { %12671 = vmatmul.mubr.msk.bf16.gmra.mrb[84].mxu0 %vm3115_vm0, %v13520_v24 }
  0xbf   : > { %13087 = vmatmul.mubr.msk.bf16.gmra.mrb[84].mxu1 %vm3115_vm0, %v13521_v25  ;;  %12674 = vmatprep.mubr.msk.bf16.mxu0 %vm3115_vm0, %v13522_v26 }
  0xc0   : > { %13090 = vmatprep.mubr.msk.bf16.mxu1 %vm3115_vm0, %v13523_v27 }
  0xc6   : > { %12675 = vmatmul.mubr.msk.bf16.gmra.mrb[88].mxu0 %vm3115_vm0, %v13524_v28 }
  0xc7   : > { %13091 = vmatmul.mubr.msk.bf16.gmra.mrb[88].mxu1 %vm3115_vm0, %v13525_v29  ;;  %12678 = vmatprep.mubr.msk.bf16.mxu0 %vm3115_vm0, %v13526_v30  ;;  %v13559_v30 = vld [vmem:[%s13905_s22 + $0x870] sm:$0xff]  }
  0xc8   : > { %13094 = vmatprep.mubr.msk.bf16.mxu1 %vm3115_vm0, %v13527_v31 }
  0xce   : > { %12679 = vmatmul.mubr.msk.bf16.gmra.mrb[92].mxu0 %vm3115_vm0, %v13528_v32  ;;  %v14216_v32 = vld [vmem:[%s19205_s2] ss:$0 sm:$0xff] }
  0xcf   : > { %13095 = vmatmul.mubr.msk.bf16.gmra.mrb[92].mxu1 %vm3115_vm0, %v13529_v33  ;;  %12682 = vmatprep.mubr.msk.bf16.mxu0 %vm3115_vm0, %v13530_v34  ;;  %v13560_v33 = vld [vmem:[%s13905_s22 + $0x1f8] sm:$0xff]  }
  0xd0   : > { %13098 = vmatprep.mubr.msk.bf16.mxu1 %vm3115_vm0, %v13531_v35 }
  0xd6   : > { %12683 = vmatmul.mubr.msk.bf16.gmra.mrb[96].mxu0 %vm3115_vm0, %v13532_v36 }
  0xd7   : > { %13099 = vmatmul.mubr.msk.bf16.gmra.mrb[96].mxu1 %vm3115_vm0, %v13533_v37  ;;  %12686 = vmatprep.mubr.msk.bf16.mxu0 %vm3115_vm0, %v13534_v38  ;;  %v13561_v38 = vld [vmem:[%s13905_s22 + $0x878] sm:$0xff]  }
  0xd8   : > { %13102 = vmatprep.mubr.msk.bf16.mxu1 %vm3115_vm0, %v13535_v39  ;;  %v13562_v39 = vld [vmem:[%s13905_s22 + $0x200] sm:$0xff]  }
  0xde   : > { %12687 = vmatmul.mubr.msk.bf16.gmra.mrb[100].mxu0 %vm3115_vm0, %v13536_v40 }
  0xdf   : > { %13103 = vmatmul.mubr.msk.bf16.gmra.mrb[100].mxu1 %vm3115_vm0, %v13537_v41  ;;  %12690 = vmatprep.mubr.msk.bf16.mxu0 %vm3115_vm0, %v13538_v42 }
  0xe0   : > { %13106 = vmatprep.mubr.msk.bf16.mxu1 %vm3115_vm0, %v13539_v43 }
  0xe6   : > { %12691 = vmatmul.mubr.msk.bf16.gmra.mrb[104].mxu0 %vm3115_vm0, %v13540_v44 }
  0xe7   : > { %13107 = vmatmul.mubr.msk.bf16.gmra.mrb[104].mxu1 %vm3115_vm0, %v13541_v45  ;;  %12694 = vmatprep.mubr.msk.bf16.mxu0 %vm3115_vm0, %v13542_v46 }
  0xe8   : > { %13110 = vmatprep.mubr.msk.bf16.mxu1 %vm3115_vm0, %v13543_v47 }
  0xe9   : > { %v14128_v49 = vpop.f32.mrb[0].mxu0 }
  0xea   : > { %v14132_v52 = vpop.f32.mrb[0].mxu1  ;;  %v14134_v53 = vpop.f32.mrb[1].mxu0  ;;  %v14225_v34 = vadd.f32 %v14128_v49, %v14216_v32 }
  0xeb   : > { %v14136_v54 = vpop.f32.mrb[1].mxu1  ;;  %v14138_v55 = vpop.f32.mrb[2].mxu0  ;;  %v14229_v35 = vadd.f32 %v14132_v52, %v14216_v32  ;;  %v14233_v36 = vadd.f32 %v14216_v32, %v14134_v53 }
  0xec   : > { %v14140_v56 = vpop.f32.mrb[2].mxu1  ;;  %v14142_v57 = vpop.f32.mrb[3].mxu0  ;;  %v14241_v40 = vadd.f32 %v14216_v32, %v14136_v54  ;;  %v14245_v41 = vadd.f32 %v14138_v55, %v14216_v32  ;;  %v13563_v54 = vld [vmem:[%s13905_s22 + $0x880] sm:$0xff]  }
  0xed   : > { %v14145_v59 = vpop.f32.mrb[3].mxu1  ;;  %v14249_v42 = vadd.f32 %v14140_v56, %v14216_v32  ;;  %v14253_v43 = vadd.f32 %v14216_v32, %v14142_v57 }
  0xee   : > { %12695 = vmatmul.mubr.msk.bf16.gmra.mrb[108].mxu0 %vm3115_vm0, %v13544_v48  ;;  %v14261_v46 = vadd.f32 %v14216_v32, %v14145_v59 }
  0xef   : > { %13111 = vmatmul.mubr.msk.bf16.gmra.mrb[108].mxu1 %vm3115_vm0, %v13545_v50  ;;  %12698 = vmatprep.mubr.msk.bf16.mxu0 %vm3115_vm0, %v13546_v51 }
  0xf0   : > { %13114 = vmatprep.mubr.msk.bf16.mxu1 %vm3115_vm0, %v13547_v58 }
  0xf1   : > { %v12592_v61 = vpop.f32.mrb[4].mxu0 }
  0xf2   : > { %v13008_v0 = vpop.f32.mrb[4].mxu1  ;;  %v4414_v1 = vpop.f32.mrb[5].mxu0  ;;  %v14264_v47 = vadd.f32 %v12592_v61, %v14216_v32  ;;  %v13567_v61 = vld [vmem:[%s13905_s22 + $0x890] sm:$0xff]  }
  0xf3   : > { %v14154_v2 = vpop.f32.mrb[5].mxu1  ;;  %v14156_v3 = vpop.f32.mrb[6].mxu0  ;;  %v14271_v50 = vadd.f32 %v13008_v0, %v14216_v32  ;;  %v14274_v51 = vadd.f32 %v14216_v32, %v4414_v1  ;;  %v13569_v0 = vld [vmem:[%s13905_s22 + $0x898] sm:$0xff]  }
  0xf4   : > { %v14158_v4 = vpop.f32.mrb[6].mxu1  ;;  %v14160_v5 = vpop.f32.mrb[7].mxu0  ;;  %v14286_v58 = vadd.f32 %v14216_v32, %v14154_v2 }
  0xf5   : > { %v14163_v7 = vpop.f32.mrb[7].mxu1 }
  0xf6   : > { %12699 = vmatmul.mubr.msk.bf16.gmra.mrb[112].mxu0 %vm3115_vm0, %v13548_v60 }
  0xf7   : > { %13115 = vmatmul.mubr.msk.bf16.gmra.mrb[112].mxu1 %vm3115_vm0, %v13549_v62  ;;  %12702 = vmatprep.mubr.msk.bf16.mxu0 %vm3115_vm0, %v13550_v63 }
  0xf8   : > { %13118 = vmatprep.mubr.msk.bf16.mxu1 %vm3115_vm0, %v13551_v6 }
  0xf9   : > { %v14170_v9 = vpop.f32.mrb[8].mxu0 }
  0xfa   : > { %v14174_v12 = vpop.f32.mrb[8].mxu1  ;;  %v14176_v13 = vpop.f32.mrb[9].mxu0 }
  0xfb   : > { %v14178_v14 = vpop.f32.mrb[9].mxu1  ;;  %v14180_v15 = vpop.f32.mrb[10].mxu0 }
  0xfc   : > { %v14182_v16 = vpop.f32.mrb[10].mxu1  ;;  %v14184_v17 = vpop.f32.mrb[11].mxu0 }
  0xfd   : > { %v14187_v19 = vpop.f32.mrb[11].mxu1 }
  0xfe   : > { %12703 = vmatmul.mubr.msk.bf16.gmra.mrb[116].mxu0 %vm3115_vm0, %v13552_v8  ;;  %v13564_v8 = vld [vmem:[%s13905_s22 + $0x208] sm:$0xff]  }
  0xff   : > { %13119 = vmatmul.mubr.msk.bf16.gmra.mrb[116].mxu1 %vm3115_vm0, %v13553_v10  ;;  %12706 = vmatprep.mubr.msk.bf16.mxu0 %vm3115_vm0, %v13554_v11  ;;  %v14306_v11 = vadd.f32 %v14156_v3, %v14216_v32  ;;  %v14326_v3 = vadd.f32 %v14170_v9, %v14216_v32  ;;  %v14346_v9 = vadd.f32 %v14180_v15, %v14216_v32 }
 0x100   : > { %13122 = vmatprep.mubr.msk.bf16.mxu1 %vm3115_vm0, %v13555_v18  ;;  %v14310_v18 = vadd.f32 %v14158_v4, %v14216_v32 }
 0x101   : > { %v14194_v21 = vpop.f32.mrb[12].mxu0 }
 0x102   : > { %v14198_v24 = vpop.f32.mrb[12].mxu1  ;;  %v14200_v25 = vpop.f32.mrb[13].mxu0  ;;  %v14366_v15 = vadd.f32 %v14194_v21, %v14216_v32 }
 0x103   : > { %v14202_v26 = vpop.f32.mrb[13].mxu1  ;;  %v14204_v27 = vpop.f32.mrb[14].mxu0  ;;  %v14378_v55 = vadd.f32 %v14198_v24, %v14216_v32  ;;  %v13570_v24 = vld [vmem:[%s13905_s22 + $0x220] sm:$0xff]  }
 0x104   : > { %v14206_v28 = vpop.f32.mrb[14].mxu1  ;;  %v14208_v29 = vpop.f32.mrb[15].mxu0 }
 0x105   : > { %v14211_v31 = vpop.f32.mrb[15].mxu1  ;;  %v14417_v56 = vadd.f32 %v14206_v28, %v14216_v32  ;;  %v14424_v63 = vadd.f32 %v14216_v32, %v14208_v29  ;;  %v13571_v28 = vld [vmem:[%s13905_s22 + $0x8a0] sm:$0xff]  }
 0x106   : > { %12707 = vmatmul.mubr.msk.bf16.gmra.mrb[120].mxu0 %vm3115_vm0, %v13556_v20  ;;  %v14314_v20 = vadd.f32 %v14216_v32, %v14160_v5  ;;  %v14334_v5 = vadd.f32 %v14174_v12, %v14216_v32  ;;  %v14354_v12 = vadd.f32 %v14182_v16, %v14216_v32  ;;  %v13568_v16 = vld [vmem:[%s13905_s22 + $0x218] sm:$0xff]  }
 0x107   : > { %13123 = vmatmul.mubr.msk.bf16.gmra.mrb[120].mxu1 %vm3115_vm0, %v13557_v22  ;;  %12710 = vmatprep.mubr.msk.bf16.mxu0 %vm3115_vm0, %v13558_v23  ;;  %v13565_v23 = vld [vmem:[%s13905_s22 + $0x888] sm:$0xff]  }
 0x108   : > { %13126 = vmatprep.mubr.msk.bf16.mxu1 %vm3115_vm0, %v13559_v30  ;;  %v13566_v30 = vld [vmem:[%s13905_s22 + $0x210] sm:$0xff]  }
 0x109   : > { %v14235_v37 = vpop.f32.mrb[16].mxu0 }
 0x10a   : > { %v14255_v44 = vpop.f32.mrb[16].mxu1  ;;  %v14257_v45 = vpop.f32.mrb[17].mxu0 }
 0x10b   : > { %v14266_v48 = vpop.f32.mrb[17].mxu1  ;;  %v14268_v49 = vpop.f32.mrb[18].mxu0 }
 0x10c   : > { %v14276_v52 = vpop.f32.mrb[18].mxu1  ;;  %v14278_v53 = vpop.f32.mrb[19].mxu0 }
 0x10d   : > { %v14288_v59 = vpop.f32.mrb[19].mxu1 }
 0x10e   : > { %12711 = vmatmul.mubr.msk.bf16.gmra.mrb[124].mxu0 %vm3115_vm0, %v13560_v33  ;;  %v14322_v33 = vadd.f32 %v14216_v32, %v14163_v7  ;;  %v14342_v7 = vadd.f32 %v14216_v32, %v14178_v14  ;;  %v14362_v14 = vadd.f32 %v14216_v32, %v14187_v19 }
 0x10f   : > { %13127 = vmatmul.mubr.msk.bf16.gmra.mrb[124].mxu1 %vm3115_vm0, %v13561_v38  ;;  %12714 = vmatprep.mubr.msk.bf16.mxu0 %vm3115_vm0, %v13562_v39  ;;  %v14338_v39 = vadd.f32 %v14216_v32, %v14176_v13  ;;  %v14358_v13 = vadd.f32 %v14216_v32, %v14184_v17 }
 0x110   : > { %13130 = vmatprep.mubr.msk.bf16.mxu1 %vm3115_vm0, %v13563_v54 }
 0x111   : > { %v14316_v22 = vpop.f32.mrb[20].mxu0 }
 0x112   : > { %v14328_v38 = vpop.f32.mrb[20].mxu1  ;;  %v14330_v4 = vpop.f32.mrb[21].mxu0 }
 0x113   : > { %v14348_v54 = vpop.f32.mrb[21].mxu1  ;;  %v14350_v2 = vpop.f32.mrb[22].mxu0 }
 0x114   : > { %19298 = vst [vmem:[#allocation2_spill] sm:$0xff] %v14350_v2  ;;  %v14368_v1 = vpop.f32.mrb[22].mxu1  ;;  %v14370_v62 = vpop.f32.mrb[23].mxu0 }
 0x115   : > { %19299 = vst [vmem:[#allocation3_spill] sm:$0xff] %v14368_v1  ;;  %v14380_v19 = vpop.f32.mrb[23].mxu1 }
 0x116   : > { %12715 = vmatmul.mubr.msk.bf16.gmra.mrb[128].mxu0 %vm3115_vm0, %v13564_v8  ;;  %v14409_v8 = vadd.f32 %v14216_v32, %v14202_v26  ;;  %v14428_v26 = vadd.f32 %v14216_v32, %v14211_v31 }
 0x117   : > { %13131 = vmatmul.mubr.msk.bf16.gmra.mrb[128].mxu1 %vm3115_vm0, %v13565_v23  ;;  %12718 = vmatprep.mubr.msk.bf16.mxu0 %vm3115_vm0, %v13566_v30  ;;  %v14402_v23 = vadd.f32 %v14216_v32, %v14200_v25 }
 0x118   : > { %13134 = vmatprep.mubr.msk.bf16.mxu1 %vm3115_vm0, %v13567_v61  ;;  %v14413_v61 = vadd.f32 %v14204_v27, %v14216_v32 }
 0x119   : > { %v12612_v17 = vpop.f32.mrb[24].mxu0 }
 0x11a   : > { %v4503_v30 = vadd.f32 %v12612_v17, %v14216_v32  ;;  %v13028_v21 = vpop.f32.mrb[24].mxu1  ;;  %v14405_v10 = vpop.f32.mrb[25].mxu0 }
 0x11b   : > { %19300 = vst [vmem:[#allocation4_spill] sm:$0xff] %v14405_v10  ;;  %v6167_v25 = vadd.f32 %v13028_v21, %v14216_v32  ;;  %v14420_v6 = vpop.f32.mrb[25].mxu1  ;;  %v12613_v17 = vpop.f32.mrb[26].mxu0  ;;  %v14436_v21 = vadd.f32 %v14235_v37, %v14216_v32 }
 0x11c   : > { %19301 = vst [vmem:[#allocation5_spill] sm:$0xff] %v14420_v6  ;;  %v7751_v60 = vmax.f32 %v4503_v30, 0.0  ;;  %v4506_v27 = vadd.f32 %v12613_v17, %v14216_v32  ;;  %v13029_v57 = vpop.f32.mrb[26].mxu1  ;;  %v14431_v1 = vpop.f32.mrb[27].mxu0  ;;  %v14440_v6 = vadd.f32 %v14255_v44, %v14216_v32  ;;  %v19305_v17 = vmax.f32 %v14233_v36, 0.0  ;;  %v13573_v36 = vld [vmem:[%s13905_s22 + $0x8a8] sm:$0xff]  }
 0x11d   : > { %19302 = vst [vmem:[#allocation6_spill] sm:$0xff] %v14431_v1  ;;  %v8167_v29 = vmax.f32 %v6167_v25, 0.0  ;;  %v6170_v10 = vadd.f32 %v13029_v57, %v14216_v32  ;;  %v14443_v31 = vpop.f32.mrb[27].mxu1  ;;  %v19307_v44 = vmax.f32 %v14241_v40, 0.0  ;;  %v13572_v40 = vld [vmem:[%s13905_s22 + $0x228] sm:$0xff]  }
 0x11e   : > { %19303 = vst [vmem:[#allocation7_spill] sm:$0xff] %v14440_v6  ;;  %19304 = vst [vmem:[#allocation8_spill] sm:$0xff] %v14443_v31  ;;  %v14448_v1 = vmax.f32 %v19305_v17, %v7751_v60  ;;  %v7752_v2 = vmax.f32 %v4506_v27, 0.0  ;;  %12719 = vmatmul.mubr.msk.bf16.gmra.mrb[132].mxu0 %vm3115_vm0, %v13568_v16  ;;  %v19309_v16 = vmax.f32 %v14253_v43, 0.0  ;;  %v13574_v27 = vld [vmem:[%s13905_s22 + $0x230] sm:$0xff]   ;;  %v14478_v43 = vadd.f32 %v14216_v32, %v14257_v45 }
 0x11f   : > { %v14454_v25 = vmax.f32 %v19307_v44, %v8167_v29  ;;  %v8168_v57 = vmax.f32 %v6170_v10, 0.0  ;;  %13135 = vmatmul.mubr.msk.bf16.gmra.mrb[132].mxu1 %vm3115_vm0, %v13569_v0  ;;  %12722 = vmatprep.mubr.msk.bf16.mxu0 %vm3115_vm0, %v13570_v24  ;;  %v19311_v24 = vmax.f32 %v14261_v46, 0.0  ;;  %v14487_v46 = vadd.f32 %v14268_v49, %v14216_v32 }
 0x120   : > { %19306 = vst [vmem:[#allocation9_spill] sm:$0xff] %v14448_v1  ;;  %v14463_v17 = vmax.f32 %v19309_v16, %v7752_v2  ;;  %13138 = vmatprep.mubr.msk.bf16.mxu1 %vm3115_vm0, %v13571_v28  ;;  %v14482_v2 = vadd.f32 %v14216_v32, %v14266_v48  ;;  %v14497_v29 = vadd.f32 %v14216_v32, %v14278_v53  ;;  %v19313_v6 = vmax.f32 %v14274_v51, 0.0 }
 0x121   : > { %19308 = vst [vmem:[#allocation10_spill] sm:$0xff] %v14454_v25  ;;  %v14472_v44 = vmax.f32 %v19311_v24, %v8168_v57  ;;  %v12616_v60 = vpop.f32.mrb[28].mxu0  ;;  %v14491_v57 = vadd.f32 %v14276_v52, %v14216_v32 }
 0x122   : > { %19310 = vst [vmem:[#allocation11_spill] sm:$0xff] %v14463_v17  ;;  %v4519_v28 = vadd.f32 %v12616_v60, %v14216_v32  ;;  %v13032_v16 = vpop.f32.mrb[28].mxu1  ;;  %v4510_v0 = vpop.f32.mrb[29].mxu0  ;;  %v13575_v17 = vld [vmem:[%s13905_s22 + $0x8b0] sm:$0xff]  }
 0x123   : > { %19312 = vst [vmem:[#allocation12_spill] sm:$0xff] %v14472_v44  ;;  %v6183_v45 = vadd.f32 %v13032_v16, %v14216_v32  ;;  %v4511_v24 = vadd.f32 %v14216_v32, %v4510_v0  ;;  %v6174_v10 = vpop.f32.mrb[29].mxu1  ;;  %v12617_v48 = vpop.f32.mrb[30].mxu0 }
 0x124   : > { %v7755_v60 = vmax.f32 %v4519_v28, 0.0  ;;  %v6175_v37 = vadd.f32 %v14216_v32, %v6174_v10  ;;  %v4522_v49 = vadd.f32 %v12617_v48, %v14216_v32  ;;  %v13033_v30 = vpop.f32.mrb[30].mxu1  ;;  %v4513_v44 = vpop.f32.mrb[31].mxu0  ;;  %v19314_v48 = vmax.f32 %v14286_v58, 0.0 }
 0x125   : > { %v8171_v52 = vmax.f32 %v6183_v45, 0.0  ;;  %v7753_v25 = vmax.f32 %v4511_v24, 0.0  ;;  %v6186_v16 = vadd.f32 %v13033_v30, %v14216_v32  ;;  %v4514_v0 = vadd.f32 %v14216_v32, %v4513_v44  ;;  %v6177_v1 = vpop.f32.mrb[31].mxu1 }
 0x126   : > { %v14506_v31 = vmax.f32 %v19313_v6, %v7755_v60  ;;  %v8169_v53 = vmax.f32 %v6175_v37, 0.0  ;;  %v7756_v28 = vmax.f32 %v4522_v49, 0.0  ;;  %v6178_v10 = vadd.f32 %v14216_v32, %v6177_v1  ;;  %12723 = vmatmul.mubr.msk.bf16.gmra.mrb[136].mxu0 %vm3115_vm0, %v13572_v40 }
 0x127   : > { %v14512_v45 = vmax.f32 %v19314_v48, %v8171_v52  ;;  %v19315_v30 = vmax.f32 %v14225_v34, 0.0  ;;  %v8172_v24 = vmax.f32 %v6186_v16, 0.0  ;;  %v7754_v51 = vmax.f32 %v4514_v0, 0.0  ;;  %13139 = vmatmul.mubr.msk.bf16.gmra.mrb[136].mxu1 %vm3115_vm0, %v13573_v36  ;;  %12726 = vmatprep.mubr.msk.bf16.mxu0 %vm3115_vm0, %v13574_v27  ;;  %v13577_v16 = vld [vmem:[%s13905_s22 + $0x8b8] sm:$0xff]  }
 0x128   : > { %v19316_v1 = vmax.f32 %v14229_v35, 0.0  ;;  %v19317_v58 = vmax.f32 %v14314_v20, 0.0  ;;  %v8170_v34 = vmax.f32 %v6178_v10, 0.0  ;;  %13142 = vmatprep.mubr.msk.bf16.mxu1 %vm3115_vm0, %v13575_v17  ;;  %v19318_v36 = vmax.f32 %v14322_v33, 0.0 }
 0x129   : > { %v14516_v44 = vmax.f32 %v19315_v30, %v7753_v25  ;;  %v13576_v25 = vld [vmem:[%s13905_s22 + $0x238] sm:$0xff]   ;;  %v19319_v49 = vmax.f32 %v14245_v41, 0.0  ;;  %v12620_v52 = vpop.f32.mrb[32].mxu0  ;;  %v14544_v0 = vadd.f32 %v14216_v32, %v14288_v59  ;;  %v19320_v17 = vmax.f32 %v14249_v42, 0.0  ;;  %v13578_v41 = vld [vmem:[%s13905_s22 + $0x240] sm:$0xff]  }
 0x12a   : > { %v14523_v37 = vmax.f32 %v19316_v1, %v8169_v53  ;;  %v14527_v40 = vmax.f32 %v19317_v58, %v7756_v28  ;;  %v14534_v27 = vmax.f32 %v19318_v36, %v8172_v24  ;;  %v4535_v33 = vadd.f32 %v12620_v52, %v14216_v32  ;;  %v13036_v28 = vpop.f32.mrb[32].mxu1  ;;  %v4526_v10 = vpop.f32.mrb[33].mxu0 }
 0x12b   : > { %v14538_v35 = vmax.f32 %v19319_v49, %v7754_v51  ;;  %v14548_v53 = vmax.f32 %v19320_v17, %v8170_v34  ;;  %v6199_v24 = vadd.f32 %v13036_v28, %v14216_v32  ;;  %v4527_v51 = vadd.f32 %v14216_v32, %v4526_v10  ;;  %v6190_v59 = vpop.f32.mrb[33].mxu1  ;;  %v12621_v1 = vpop.f32.mrb[34].mxu0  ;;  %v13579_v17 = vld [vmem:[%s13905_s22 + $0x8c0] sm:$0xff]  }
 0x12c   : > { %v14558_v42 = vadd.f32 %v14316_v22, %v14216_v32  ;;  %v7759_v58 = vmax.f32 %v4535_v33, 0.0  ;;  %v6191_v34 = vadd.f32 %v14216_v32, %v6190_v59  ;;  %v4538_v36 = vadd.f32 %v12621_v1, %v14216_v32  ;;  %v13037_v49 = vpop.f32.mrb[34].mxu1  ;;  %v4529_v52 = vpop.f32.mrb[35].mxu0 }
 0x12d   : > { %v8175_v48 = vmax.f32 %v6199_v24, 0.0  ;;  %v7757_v20 = vmax.f32 %v4527_v51, 0.0  ;;  %v6202_v28 = vadd.f32 %v13037_v49, %v14216_v32  ;;  %v4530_v10 = vadd.f32 %v14216_v32, %v4529_v52  ;;  %v6193_v30 = vpop.f32.mrb[35].mxu1 }
 0x12e   : > { %v19321_v60 = vmax.f32 %v14338_v39, 0.0  ;;  %v8173_v22 = vmax.f32 %v6191_v34, 0.0  ;;  %v7760_v33 = vmax.f32 %v4538_v36, 0.0  ;;  %v6194_v59 = vadd.f32 %v14216_v32, %v6193_v30  ;;  %12727 = vmatmul.mubr.msk.bf16.gmra.mrb[140].mxu0 %vm3115_vm0, %v13576_v25  ;;  %v13580_v30 = vld [vmem:[%s13905_s22 + $0x248] sm:$0xff]  }
 0x12f   : > { %v19322_v1 = vmax.f32 %v14342_v7, 0.0  ;;  %v19323_v51 = vmax.f32 %v14264_v47, 0.0  ;;  %v8176_v52 = vmax.f32 %v6202_v28, 0.0  ;;  %v7758_v39 = vmax.f32 %v4530_v10, 0.0  ;;  %13143 = vmatmul.mubr.msk.bf16.gmra.mrb[140].mxu1 %vm3115_vm0, %v13577_v16  ;;  %12730 = vmatprep.mubr.msk.bf16.mxu0 %vm3115_vm0, %v13578_v41  ;;  %v13581_v36 = vld [vmem:[%s13905_s22 + $0x8c8] sm:$0xff]  }
 0x130   : > { %v14567_v6 = vmax.f32 %v19321_v60, %v7759_v58  ;;  %v14583_v60 = vadd.f32 %v14328_v38, %v14216_v32  ;;  %v19324_v25 = vmax.f32 %v14271_v50, 0.0  ;;  %13146 = vmatprep.mubr.msk.bf16.mxu1 %vm3115_vm0, %v13579_v17  ;;  %v19327_v41 = vmax.f32 %v14362_v14, 0.0 }
 0x131   : > { %v14573_v24 = vmax.f32 %v19322_v1, %v8175_v48  ;;  %v14577_v49 = vmax.f32 %v19323_v51, %v7757_v20  ;;  %v19325_v48 = vmax.f32 %v14358_v13, 0.0  ;;  %v8174_v20 = vmax.f32 %v6194_v59, 0.0  ;;  %v12624_v34 = vpop.f32.mrb[36].mxu0 }
 0x132   : > { %v14587_v7 = vmax.f32 %v19324_v25, %v8173_v22  ;;  %v14598_v58 = vmax.f32 %v19327_v41, %v8176_v52  ;;  %v19329_v38 = vmax.f32 %v14306_v11, 0.0  ;;  %v14607_v13 = vadd.f32 %v14216_v32, %v14330_v4  ;;  %v13040_v14 = vpop.f32.mrb[36].mxu1  ;;  %v4542_v22 = vpop.f32.mrb[37].mxu0 }
 0x133   : > { %v14591_v47 = vmax.f32 %v19325_v48, %v7760_v33  ;;  %v19331_v17 = vmax.f32 %v14310_v18, 0.0  ;;  %v4551_v10 = vadd.f32 %v12624_v34, %v14216_v32  ;;  %v14617_v11 = vadd.f32 %v14216_v32, %v14348_v54  ;;  %v6206_v1 = vpop.f32.mrb[37].mxu1  ;;  %v12625_v51 = vpop.f32.mrb[38].mxu0  ;;  %v13582_v18 = vld [vmem:[%s13905_s22 + $0x250] sm:$0xff]  }
 0x134   : > { %19328 = vst [vmem:[#allocation14_spill] sm:$0xff] %v14598_v58  ;;  %v14602_v50 = vmax.f32 %v19329_v38, %v7758_v39  ;;  %v6215_v59 = vadd.f32 %v13040_v14, %v14216_v32  ;;  %v4543_v4 = vadd.f32 %v14216_v32, %v4542_v22  ;;  %v6207_v25 = vadd.f32 %v14216_v32, %v6206_v1  ;;  %v4545_v41 = vpop.f32.mrb[39].mxu0  ;;  %v13583_v38 = vld [vmem:[%s13905_s22 + $0x8d0] sm:$0xff]   ;;  %v13618_v58 = vld [vmem:[%s13905_s22 + $0x2e0] sm:$0xff]  }
 0x135   : > { %19326 = vst [vmem:[#allocation13_spill] sm:$0xff] %v14591_v47  ;;  %v14611_v28 = vmax.f32 %v19331_v17, %v8174_v20  ;;  %v7763_v39 = vmax.f32 %v4551_v10, 0.0  ;;  %v4554_v48 = vadd.f32 %v12625_v51, %v14216_v32  ;;  %v13041_v20 = vpop.f32.mrb[38].mxu1  ;;  %v4546_v14 = vadd.f32 %v14216_v32, %v4545_v41  ;;  %v13584_v41 = vld [vmem:[%s13905_s22 + $0x258] sm:$0xff]  }
 0x136   : > { %19330 = vst [vmem:[#allocation15_spill] sm:$0xff] %v14602_v50  ;;  %v8179_v34 = vmax.f32 %v6215_v59, 0.0  ;;  %v7761_v54 = vmax.f32 %v4543_v4, 0.0  ;;  %v6218_v17 = vadd.f32 %v13041_v20, %v14216_v32  ;;  %v6209_v22 = vpop.f32.mrb[39].mxu1  ;;  %v19333_v33 = vmax.f32 %v14402_v23, 0.0  ;;  %12731 = vmatmul.mubr.msk.bf16.gmra.mrb[144].mxu0 %vm3115_vm0, %v13580_v30 }
 0x137   : > { %19332 = vst [vmem:[#allocation16_spill] sm:$0xff] %v14611_v28  ;;  %v8177_v10 = vmax.f32 %v6207_v25, 0.0  ;;  %v7764_v52 = vmax.f32 %v4554_v48, 0.0  ;;  %v6210_v1 = vadd.f32 %v14216_v32, %v6209_v22  ;;  %v19335_v51 = vmax.f32 %v14409_v8, 0.0  ;;  %13147 = vmatmul.mubr.msk.bf16.gmra.mrb[144].mxu1 %vm3115_vm0, %v13581_v36  ;;  %12734 = vmatprep.mubr.msk.bf16.mxu0 %vm3115_vm0, %v13582_v18  ;;  %v13586_v22 = vld [vmem:[%s13905_s22 + $0x260] sm:$0xff]  }
 0x138   : > { %v14630_v16 = vmax.f32 %v19333_v33, %v7763_v39  ;;  %v19337_v4 = vmax.f32 %v14326_v3, 0.0  ;;  %v8180_v23 = vmax.f32 %v6218_v17, 0.0  ;;  %v7762_v33 = vmax.f32 %v4546_v14, 0.0  ;;  %13150 = vmatprep.mubr.msk.bf16.mxu1 %vm3115_vm0, %v13583_v38  ;;  %v13585_v14 = vld [vmem:[%s13905_s22 + $0x8d8] sm:$0xff]  }
 0x139   : > { %v14636_v59 = vmax.f32 %v19335_v51, %v8179_v34  ;;  %v19339_v30 = vmax.f32 %v14334_v5, 0.0  ;;  %v19341_v8 = vmax.f32 %v14424_v63, 0.0  ;;  %v8178_v3 = vmax.f32 %v6210_v1, 0.0  ;;  %v12628_v5 = vpop.f32.mrb[40].mxu0 }
 0x13a   : > { %19334 = vst [vmem:[#allocation17_spill] sm:$0xff] %v14630_v16  ;;  %v14640_v20 = vmax.f32 %v19337_v4, %v7761_v54  ;;  %v19343_v36 = vmax.f32 %v14428_v26, 0.0  ;;  %v19345_v18 = vmax.f32 %v14346_v9, 0.0  ;;  %v19347_v63 = vmax.f32 %v14354_v12, 0.0  ;;  %v4558_v1 = vpop.f32.mrb[41].mxu0 }
 0x13b   : > { %19336 = vst [vmem:[#allocation18_spill] sm:$0xff] %v14636_v59  ;;  %v14647_v25 = vmax.f32 %v19339_v30, %v8177_v10  ;;  %v14651_v48 = vmax.f32 %v19341_v8, %v7764_v52  ;;  %v4567_v38 = vadd.f32 %v12628_v5, %v14216_v32  ;;  %v13044_v10 = vpop.f32.mrb[40].mxu1  ;;  %v14673_v26 = vadd.f32 %v14216_v32, %v14370_v62 }
 0x13c   : > { %19338 = vst [vmem:[#allocation19_spill] sm:$0xff] %v14640_v20  ;;  %v14658_v54 = vmax.f32 %v19343_v36, %v8180_v23  ;;  %v14662_v17 = vmax.f32 %v19345_v18, %v7762_v33  ;;  %v14668_v52 = vmax.f32 %v19347_v63, %v8178_v3  ;;  %v6231_v9 = vadd.f32 %v13044_v10, %v14216_v32  ;;  %v6222_v4 = vpop.f32.mrb[41].mxu1  ;;  %v12629_v23 = vpop.f32.mrb[42].mxu0  ;;  %v13587_v18 = vld [vmem:[%s13905_s22 + $0x8e0] sm:$0xff]  }
 0x13d   : > { %19340 = vst [vmem:[#allocation20_spill] sm:$0xff] %v14647_v25  ;;  %19342 = vst [vmem:[#allocation21_spill] sm:$0xff] %v14651_v48  ;;  %v4559_v51 = vadd.f32 %v14216_v32, %v4558_v1  ;;  %v14679_v12 = vadd.f32 %v14216_v32, %v14380_v19  ;;  %v7767_v33 = vmax.f32 %v4567_v38, 0.0  ;;  %v6223_v30 = vadd.f32 %v14216_v32, %v6222_v4  ;;  %v13045_v3 = vpop.f32.mrb[42].mxu1  ;;  %v4561_v36 = vpop.f32.mrb[43].mxu0  ;;  %v13615_v25 = vld [vmem:[%s13905_s22 + $0x950] sm:$0xff]  }
 0x13e   : > { %19344 = vst [vmem:[#allocation22_spill] sm:$0xff] %v14658_v54  ;;  %19346 = vst [vmem:[#allocation23_spill] sm:$0xff] %v14662_v17  ;;  %v4570_v8 = vadd.f32 %v12629_v23, %v14216_v32  ;;  %v8183_v62 = vmax.f32 %v6231_v9, 0.0  ;;  %v6234_v63 = vadd.f32 %v13045_v3, %v14216_v32  ;;  %v4562_v10 = vadd.f32 %v14216_v32, %v4561_v36  ;;  %v6225_v1 = vpop.f32.mrb[43].mxu1  ;;  %v13588_v36 = vld [vmem:[%s13905_s22 + $0x268] sm:$0xff]  }
 0x13f   : > { %19348 = vst [vmem:[#allocation24_spill] sm:$0xff] %v14668_v52  ;;  %v7765_v5 = vmax.f32 %v4559_v51, 0.0  ;;  %v19349_v34 = vmax.f32 %v14478_v43, 0.0  ;;  %v8181_v19 = vmax.f32 %v6223_v30, 0.0  ;;  %v6226_v4 = vadd.f32 %v14216_v32, %v6225_v1  ;;  %12735 = vmatmul.mubr.msk.bf16.gmra.mrb[148].mxu0 %vm3115_vm0, %v13584_v41  ;;  %13151 = vmatmul.mubr.msk.bf16.gmra.mrb[148].mxu1 %vm3115_vm0, %v13585_v14 }
 0x140   : > { %v7768_v38 = vmax.f32 %v4570_v8, 0.0  ;;  %v19351_v23 = vmax.f32 %v14482_v2, 0.0  ;;  %v19353_v51 = vmax.f32 %v14366_v15, 0.0  ;;  %v8184_v43 = vmax.f32 %v6234_v63, 0.0  ;;  %12738 = vmatprep.mubr.msk.bf16.mxu0 %vm3115_vm0, %v13586_v22  ;;  %13154 = vmatprep.mubr.msk.bf16.mxu1 %vm3115_vm0, %v13587_v18  ;;  %v13589_v63 = vld [vmem:[%s13905_s22 + $0x8e8] sm:$0xff]  }
 0x141   : > { %v14688_v39 = vmax.f32 %v19349_v34, %v7767_v33  ;;  %v7766_v34 = vmax.f32 %v4562_v10, 0.0  ;;  %v7746_v33 = vmax.f32 %v14673_v26, 0.0  ;;  %v19355_v41 = vmax.f32 %v14378_v55, 0.0  ;;  %v12632_v55 = vpop.f32.mrb[44].mxu0  ;;  %v13590_v10 = vld [vmem:[%s13905_s22 + $0x270] sm:$0xff]  }
 0x142   : > { %v14694_v9 = vmax.f32 %v19351_v23, %v8183_v62  ;;  %v14698_v3 = vmax.f32 %v19353_v51, %v7765_v5  ;;  %v19357_v2 = vmax.f32 %v14497_v29, 0.0  ;;  %v8182_v15 = vmax.f32 %v6226_v4, 0.0  ;;  %v19363_v29 = vld [vmem:[#allocation2_spill] sm:$0xff]  ;;  %v19366_v4 = vld [vmem:[#allocation4_spill] sm:$0xff]  ;;  %v19367_v23 = vld [vmem:[#allocation5_spill] sm:$0xff] }
 0x143   : > { %19350 = vst [vmem:[#allocation25_spill] sm:$0xff] %v14688_v39  ;;  %v14705_v30 = vmax.f32 %v19355_v41, %v8181_v19  ;;  %v8162_v62 = vmax.f32 %v14679_v12, 0.0  ;;  %v19359_v14 = vmax.f32 %v14544_v0, 0.0  ;;  %v19361_v22 = vmax.f32 %v14413_v61, 0.0  ;;  %v13048_v12 = vpop.f32.mrb[44].mxu1  ;;  %v13611_v39 = vld [vmem:[%s13905_s22 + $0x940] sm:$0xff]  }
 0x144   : > { %19352 = vst [vmem:[#allocation26_spill] sm:$0xff] %v14694_v9  ;;  %19354 = vst [vmem:[#allocation27_spill] sm:$0xff] %v14698_v3  ;;  %v14709_v8 = vmax.f32 %v19357_v2, %v7768_v38  ;;  %v14726_v1 = vadd.f32 %v19363_v29, %v14216_v32  ;;  %v19364_v18 = vmax.f32 %v14417_v56, 0.0  ;;  %v4583_v0 = vadd.f32 %v12632_v55, %v14216_v32  ;;  %v4574_v38 = vpop.f32.mrb[45].mxu0  ;;  %v6238_v56 = vpop.f32.mrb[45].mxu1  ;;  %v19368_v2 = vld [vmem:[#allocation6_spill] sm:$0xff] }
 0x145   : > { %19356 = vst [vmem:[#allocation28_spill] sm:$0xff] %v14705_v30  ;;  %v14716_v5 = vmax.f32 %v19359_v14, %v8184_v43  ;;  %v14720_v26 = vmax.f32 %v19361_v22, %v7766_v34  ;;  %v14735_v61 = vadd.f32 %v14216_v32, %v19366_v4  ;;  %v14739_v51 = vadd.f32 %v14216_v32, %v19367_v23  ;;  %v12633_v41 = vpop.f32.mrb[46].mxu0  ;;  %v13049_v29 = vpop.f32.mrb[46].mxu1  ;;  %v13591_v4 = vld [vmem:[%s13905_s22 + $0x8f0] sm:$0xff]  }
 0x146   : > { %19358 = vst [vmem:[#allocation29_spill] sm:$0xff] %v14709_v8  ;;  %v14730_v19 = vmax.f32 %v19364_v18, %v8182_v15  ;;  %v6247_v43 = vadd.f32 %v13048_v12, %v14216_v32  ;;  %v4575_v34 = vadd.f32 %v14216_v32, %v4574_v38  ;;  %v14745_v15 = vadd.f32 %v14216_v32, %v19368_v2  ;;  %v4577_v18 = vpop.f32.mrb[47].mxu0 }
 0x147   : > { %19360 = vst [vmem:[#allocation30_spill] sm:$0xff] %v14716_v5  ;;  %19362 = vst [vmem:[#allocation31_spill] sm:$0xff] %v14720_v26  ;;  %v7771_v14 = vmax.f32 %v4583_v0, 0.0  ;;  %v6239_v22 = vadd.f32 %v14216_v32, %v6238_v56  ;;  %v4586_v55 = vadd.f32 %v12633_v41, %v14216_v32  ;;  %v6250_v12 = vadd.f32 %v13049_v29, %v14216_v32  ;;  %v6241_v26 = vpop.f32.mrb[47].mxu1 }
 0x148   : > { %19365 = vst [vmem:[#allocation2_spill] sm:$0xff] %v14730_v19  ;;  %v8187_v23 = vmax.f32 %v6247_v43, 0.0  ;;  %v7769_v19 = vmax.f32 %v4575_v34, 0.0  ;;  %v4578_v38 = vadd.f32 %v14216_v32, %v4577_v18  ;;  %v19369_v5 = vmax.f32 %v14607_v13, 0.0  ;;  %12739 = vmatmul.mubr.msk.bf16.gmra.mrb[152].mxu0 %vm3115_vm0, %v13588_v36  ;;  %13155 = vmatmul.mubr.msk.bf16.gmra.mrb[152].mxu1 %vm3115_vm0, %v13589_v63 }
 0x149   : > { %v8185_v2 = vmax.f32 %v6239_v22, 0.0  ;;  %v7772_v0 = vmax.f32 %v4586_v55, 0.0  ;;  %v6242_v56 = vadd.f32 %v14216_v32, %v6241_v26  ;;  %v19371_v41 = vmax.f32 %v14617_v11, 0.0  ;;  %12742 = vmatprep.mubr.msk.bf16.mxu0 %vm3115_vm0, %v13590_v10  ;;  %v19376_v26 = vld [vmem:[#allocation7_spill] sm:$0xff]  ;;  %13158 = vmatprep.mubr.msk.bf16.mxu1 %vm3115_vm0, %v13591_v4 }
 0x14a   : > { %v14754_v8 = vmax.f32 %v19369_v5, %v7771_v14  ;;  %v19373_v43 = vmax.f32 %v14436_v21, 0.0  ;;  %v8188_v29 = vmax.f32 %v6250_v12, 0.0  ;;  %v7770_v13 = vmax.f32 %v4578_v38, 0.0  ;;  %v19375_v5 = vld [vmem:[#allocation8_spill] sm:$0xff]  ;;  %v13592_v12 = vld [vmem:[%s13905_s22 + $0x278] sm:$0xff]  }
 0x14b   : > { %v14760_v30 = vmax.f32 %v19371_v41, %v8187_v23  ;;  %v6162_v36 = vadd.f32 %v14216_v32, %v19375_v5  ;;  %v19377_v11 = vmax.f32 %v19376_v26, 0.0  ;;  %v14774_v22 = vmax.f32 %v7746_v33, %v7772_v0  ;;  %v12636_v23 = vpop.f32.mrb[48].mxu0  ;;  %v13593_v38 = vld [vmem:[%s13905_s22 + $0x8f8] sm:$0xff]   ;;  %v13595_v41 = vld [vmem:[%s13905_s22 + $0x900] sm:$0xff]  }
 0x14c   : > { %19370 = vst [vmem:[#allocation4_spill] sm:$0xff] %v14754_v8  ;;  %v14764_v34 = vmax.f32 %v19373_v43, %v7769_v19  ;;  %v8186_v21 = vmax.f32 %v6242_v56, 0.0  ;;  %v7748_v19 = vmax.f32 %v14726_v1, 0.0  ;;  %v7749_v55 = vmax.f32 %v14735_v61, 0.0  ;;  %v4590_v61 = vpop.f32.mrb[49].mxu0 }
 0x14d   : > { %19372 = vst [vmem:[#allocation5_spill] sm:$0xff] %v14760_v30  ;;  %v14772_v14 = vmax.f32 %v19377_v11, %v8185_v2  ;;  %19379 = vst [vmem:[#allocation7_spill] sm:$0xff] %v14774_v22  ;;  %v14779_v63 = vmax.f32 %v8162_v62, %v8188_v29  ;;  %v19381_v10 = vmax.f32 %v14487_v46, 0.0  ;;  %v13594_v2 = vld [vmem:[%s13905_s22 + $0x280] sm:$0xff]   ;;  %v8165_v33 = vmax.f32 %v14739_v51, 0.0  ;;  %v13052_v62 = vpop.f32.mrb[48].mxu1 }
 0x14e   : > { %19374 = vst [vmem:[#allocation6_spill] sm:$0xff] %v14764_v34  ;;  %v7750_v0 = vmax.f32 %v14745_v15, 0.0  ;;  %v19383_v4 = vmax.f32 %v14491_v57, 0.0  ;;  %v4599_v1 = vadd.f32 %v12636_v23, %v14216_v32  ;;  %v19385_v46 = vld [vmem:[#allocation3_spill] sm:$0xff]  ;;  %v6263_v29 = vadd.f32 %v13052_v62, %v14216_v32  ;;  %v6254_v5 = vpop.f32.mrb[49].mxu1  ;;  %v12637_v51 = vpop.f32.mrb[50].mxu0 }
 0x14f   : > { %19378 = vst [vmem:[#allocation8_spill] sm:$0xff] %v14772_v14  ;;  %19380 = vst [vmem:[#allocation32_spill] sm:$0xff] %v14779_v63  ;;  %v14783_v18 = vmax.f32 %v19381_v10, %v7770_v13  ;;  %v6154_v43 = vadd.f32 %v19385_v46, %v14216_v32  ;;  %v4591_v13 = vadd.f32 %v14216_v32, %v4590_v61  ;;  %v8166_v26 = vmax.f32 %v6162_v36, 0.0  ;;  %v4593_v10 = vpop.f32.mrb[51].mxu0  ;;  %v13609_v22 = vld [vmem:[%s13905_s22 + $0x938] sm:$0xff]  }
 0x150   : > { %v14792_v56 = vmax.f32 %v19383_v4, %v8186_v21  ;;  %v7775_v15 = vmax.f32 %v4599_v1, 0.0  ;;  %v6255_v57 = vadd.f32 %v14216_v32, %v6254_v5  ;;  %v4602_v11 = vadd.f32 %v12637_v51, %v14216_v32  ;;  %v13053_v21 = vpop.f32.mrb[50].mxu1  ;;  %12743 = vmatmul.mubr.msk.bf16.gmra.mrb[156].mxu0 %vm3115_vm0, %v13592_v12  ;;  %13159 = vmatmul.mubr.msk.bf16.gmra.mrb[156].mxu1 %vm3115_vm0, %v13593_v38  ;;  %v13597_v38 = vld [vmem:[%s13905_s22 + $0x908] sm:$0xff]  }
 0x151   : > { %19382 = vst [vmem:[#allocation33_spill] sm:$0xff] %v14783_v18  ;;  %v8191_v23 = vmax.f32 %v6263_v29, 0.0  ;;  %v7773_v4 = vmax.f32 %v4591_v13, 0.0  ;;  %v4594_v46 = vadd.f32 %v14216_v32, %v4593_v10  ;;  %v6257_v18 = vpop.f32.mrb[51].mxu1  ;;  %v19388_v29 = vmax.f32 %v14558_v42, 0.0  ;;  %12746 = vmatprep.mubr.msk.bf16.mxu0 %vm3115_vm0, %v13594_v2  ;;  %13162 = vmatprep.mubr.msk.bf16.mxu1 %vm3115_vm0, %v13595_v41  ;;  %v13596_v42 = vld [vmem:[%s13905_s22 + $0x288] sm:$0xff]  }
 0x152   : > { %19384 = vst [vmem:[#allocation34_spill] sm:$0xff] %v14792_v56  ;;  %v6266_v56 = vadd.f32 %v13053_v21, %v14216_v32  ;;  %v14804_v62 = vmax.f32 %v7749_v55, %v7775_v15  ;;  %v8189_v61 = vmax.f32 %v6255_v57, 0.0  ;;  %v7776_v63 = vmax.f32 %v4602_v11, 0.0  ;;  %v12640_v57 = vpop.f32.mrb[52].mxu0  ;;  %v13598_v2 = vld [vmem:[%s13905_s22 + $0x290] sm:$0xff]  }
 0x153   : > { %v6258_v36 = vadd.f32 %v14216_v32, %v6257_v18  ;;  %v14808_v1 = vmax.f32 %v8165_v33, %v8191_v23  ;;  %v14812_v13 = vmax.f32 %v19388_v29, %v7773_v4  ;;  %v7774_v51 = vmax.f32 %v4594_v46, 0.0  ;;  %v13599_v41 = vld [vmem:[%s13905_s22 + $0x910] sm:$0xff]   ;;  %v13601_v4 = vld [vmem:[%s13905_s22 + $0x918] sm:$0xff]   ;;  %v13602_v46 = vld [vmem:[%s13905_s22 + $0x2a0] sm:$0xff]  }
 0x154   : > { %19386 = vst [vmem:[#allocation3_spill] sm:$0xff] %v14804_v62  ;;  %v8192_v5 = vmax.f32 %v6266_v56, 0.0  ;;  %v8164_v55 = vmax.f32 %v6154_v43, 0.0  ;;  %v19390_v15 = vmax.f32 %v14583_v60, 0.0  ;;  %v14820_v18 = vmax.f32 %v7750_v0, %v7776_v63  ;;  %v13056_v60 = vpop.f32.mrb[52].mxu1  ;;  %v4606_v63 = vpop.f32.mrb[53].mxu0 }
 0x155   : > { %19387 = vst [vmem:[#allocation35_spill] sm:$0xff] %v14808_v1  ;;  %19389 = vst [vmem:[#allocation36_spill] sm:$0xff] %v14812_v13  ;;  %v8190_v12 = vmax.f32 %v6258_v36, 0.0  ;;  %v14826_v56 = vmax.f32 %v7748_v19, %v7774_v51  ;;  %v6270_v0 = vpop.f32.mrb[53].mxu1  ;;  %v12641_v11 = vpop.f32.mrb[54].mxu0  ;;  %v13600_v19 = vld [vmem:[%s13905_s22 + $0x298] sm:$0xff]  }
 0x156   : > { %v14818_v32 = vmax.f32 %v19390_v15, %v8189_v61  ;;  %19392 = vst [vmem:[#allocation38_spill] sm:$0xff] %v14820_v18  ;;  %v14824_v33 = vmax.f32 %v8166_v26, %v8192_v5  ;;  %v13057_v21 = vpop.f32.mrb[54].mxu1  ;;  %v4609_v10 = vpop.f32.mrb[55].mxu0  ;;  %v13603_v15 = vld [vmem:[%s13905_s22 + $0x920] sm:$0xff]  }
 0x157   : > { %19394 = vst [vmem:[#allocation40_spill] sm:$0xff] %v14826_v56  ;;  %v14830_v43 = vmax.f32 %v8164_v55, %v8190_v12  ;;  %v6273_v26 = vpop.f32.mrb[55].mxu1  ;;  %v14873_v13 = vld [vmem:[%s19205_s2] ss:$0 sm:$0xff] }
 0x158   : > { %19391 = vst [vmem:[#allocation37_spill] sm:$0xff] %v14818_v32  ;;  %19393 = vst [vmem:[#allocation39_spill] sm:$0xff] %v14824_v33  ;;  %12747 = vmatmul.mubr.msk.bf16.gmra.mrb[160].mxu0 %vm3115_vm0, %v13596_v42  ;;  %13163 = vmatmul.mubr.msk.bf16.gmra.mrb[160].mxu1 %vm3115_vm0, %v13597_v38  ;;  %v13604_v42 = vld [vmem:[%s13905_s22 + $0x2a8] sm:$0xff]   ;;  %v13608_v32 = vld [vmem:[%s13905_s22 + $0x2b8] sm:$0xff]   ;;  %v14876_v1 = vadd.f32 %v14873_v13, %v12640_v57  ;;  %v14893_v34 = vadd.f32 %v14873_v13, %v6270_v0 }
 0x159   : > { %19395 = vst [vmem:[#allocation41_spill] sm:$0xff] %v14830_v43  ;;  %12750 = vmatprep.mubr.msk.bf16.mxu0 %vm3115_vm0, %v13598_v2  ;;  %13166 = vmatprep.mubr.msk.bf16.mxu1 %vm3115_vm0, %v13599_v41  ;;  %v12644_v23 = vpop.f32.mrb[56].mxu0  ;;  %v13605_v2 = vld [vmem:[%s13905_s22 + $0x928] sm:$0xff]   ;;  %v13606_v41 = vld [vmem:[%s13905_s22 + $0x2b0] sm:$0xff]   ;;  %v14896_v57 = vadd.f32 %v14873_v13, %v12641_v11  ;;  %v14915_v11 = vadd.f32 %v14873_v13, %v6273_v26 }
 0x15a   : > { %v13060_v61 = vpop.f32.mrb[56].mxu1  ;;  %v4622_v36 = vpop.f32.mrb[57].mxu0  ;;  %v14922_v54 = vadd.f32 %v14873_v13, %v12644_v23  ;;  %v13613_v23 = vld [vmem:[%s13905_s22 + $0x948] sm:$0xff]   ;;  %v13614_v0 = vld [vmem:[%s13905_s22 + $0x2d0] sm:$0xff]  }
 0x15b   : > { %v6286_v29 = vpop.f32.mrb[57].mxu1  ;;  %v12645_v5 = vpop.f32.mrb[58].mxu0 }
 0x15c   : > { %v13061_v51 = vpop.f32.mrb[58].mxu1  ;;  %v4625_v55 = vpop.f32.mrb[59].mxu0  ;;  %v14943_v26 = vadd.f32 %v14873_v13, %v12645_v5 }
 0x15d   : > { %v14841_v12 = vpop.f32.mrb[59].mxu1 }
 0x15e   : > { %19396 = vst [vmem:[#allocation42_spill] sm:$0xff] %v14943_v26 }
 0x160   : > { %12751 = vmatmul.mubr.msk.bf16.gmra.mrb[164].mxu0 %vm3115_vm0, %v13600_v19  ;;  %13167 = vmatmul.mubr.msk.bf16.gmra.mrb[164].mxu1 %vm3115_vm0, %v13601_v4 }
 0x161   : > { %12754 = vmatprep.mubr.msk.bf16.mxu0 %vm3115_vm0, %v13602_v46  ;;  %13170 = vmatprep.mubr.msk.bf16.mxu1 %vm3115_vm0, %v13603_v15  ;;  %v12648_v38 = vpop.f32.mrb[60].mxu0  ;;  %v13607_v15 = vld [vmem:[%s13905_s22 + $0x930] sm:$0xff]  }
 0x162   : > { %v14850_v43 = vpop.f32.mrb[60].mxu1  ;;  %v14852_v56 = vpop.f32.mrb[61].mxu0  ;;  %v14961_v5 = vadd.f32 %v14873_v13, %v12648_v38 }
 0x163   : > { %v14854_v33 = vpop.f32.mrb[61].mxu1  ;;  %v14856_v19 = vpop.f32.mrb[62].mxu0  ;;  %v14970_v20 = vadd.f32 %v14873_v13, %v14852_v56  ;;  %v13617_v56 = vld [vmem:[%s13905_s22 + $0x958] sm:$0xff]  }
 0x164   : > { %v14858_v4 = vpop.f32.mrb[62].mxu1  ;;  %v14860_v46 = vpop.f32.mrb[63].mxu0  ;;  %19398 = vst [vmem:[#allocation44_spill] sm:$0xff] %v14961_v5  ;;  %v14976_v38 = vadd.f32 %v14873_v13, %v14854_v33  ;;  %v14980_v16 = vadd.f32 %v14873_v13, %v14856_v19 }
 0x165   : > { %v14863_v18 = vpop.f32.mrb[63].mxu1  ;;  %v14987_v59 = vadd.f32 %v14873_v13, %v14858_v4  ;;  %v14993_v19 = vadd.f32 %v14873_v13, %v14860_v46 }
 0x166   : > { %19400 = vst [vmem:[#allocation46_spill] sm:$0xff] %v14980_v16  ;;  %v14997_v50 = vadd.f32 %v14873_v13, %v14863_v18 }
 0x167   : > { %19401 = vst [vmem:[#allocation47_spill] sm:$0xff] %v14987_v59  ;;  %v13619_v59 = vld [vmem:[%s13905_s22 + $0x960] sm:$0xff]  }
 0x168   : > { %12755 = vmatmul.mubr.msk.bf16.gmra.mrb[168].mxu0 %vm3115_vm0, %v13604_v42  ;;  %13171 = vmatmul.mubr.msk.bf16.gmra.mrb[168].mxu1 %vm3115_vm0, %v13605_v2  ;;  %v13610_v42 = vld [vmem:[%s13905_s22 + $0x2c0] sm:$0xff]   ;;  %v14883_v2 = vadd.f32 %v14873_v13, %v13056_v60  ;;  %v14903_v60 = vadd.f32 %v14873_v13, %v13057_v21  ;;  %v14938_v21 = vadd.f32 %v14873_v13, %v6286_v29 }
 0x169   : > { %12758 = vmatprep.mubr.msk.bf16.mxu0 %vm3115_vm0, %v13606_v41  ;;  %13174 = vmatprep.mubr.msk.bf16.mxu1 %vm3115_vm0, %v13607_v15  ;;  %v14878_v62 = vpop.f32.mrb[64].mxu0  ;;  %v14886_v41 = vadd.f32 %v14873_v13, %v4606_v63  ;;  %v14906_v63 = vadd.f32 %v14873_v13, %v4609_v10  ;;  %v14925_v10 = vadd.f32 %v14873_v13, %v13060_v61 }
 0x16a   : > { %v14888_v15 = vpop.f32.mrb[64].mxu1  ;;  %v14890_v14 = vpop.f32.mrb[65].mxu0  ;;  %v14935_v61 = vadd.f32 %v14873_v13, %v4622_v36  ;;  %v13612_v36 = vld [vmem:[%s13905_s22 + $0x2c8] sm:$0xff]   ;;  %v15004_v33 = vadd.f32 %v14873_v13, %v14878_v62 }
 0x16b   : > { %v14898_v30 = vpop.f32.mrb[65].mxu1  ;;  %v14900_v8 = vpop.f32.mrb[66].mxu0  ;;  %v15008_v47 = vadd.f32 %v14873_v13, %v14888_v15  ;;  %v13616_v15 = vld [vmem:[%s13905_s22 + $0x2d8] sm:$0xff]  }
 0x16c   : > { %v14908_v3 = vpop.f32.mrb[66].mxu1  ;;  %v14910_v9 = vpop.f32.mrb[67].mxu0  ;;  %19402 = vst [vmem:[#allocation48_spill] sm:$0xff] %v15004_v33  ;;  %v15020_v62 = vadd.f32 %v14873_v13, %v14898_v30 }
 0x16d   : > { %v14917_v52 = vpop.f32.mrb[67].mxu1  ;;  %19403 = vst [vmem:[#allocation49_spill] sm:$0xff] %v15008_v47  ;;  %v15031_v46 = vadd.f32 %v14873_v13, %v14908_v3 }
 0x16e   : > { %19404 = vst [vmem:[#allocation50_spill] sm:$0xff] %v15020_v62 }
 0x16f   : > { %19406 = vst [vmem:[#allocation52_spill] sm:$0xff] %v15031_v46  ;;  %v13623_v46 = vld [vmem:[%s13905_s22 + $0x970] sm:$0xff]  }
 0x170   : > { %12759 = vmatmul.mubr.msk.bf16.gmra.mrb[172].mxu0 %vm3115_vm0, %v13608_v32  ;;  %13175 = vmatmul.mubr.msk.bf16.gmra.mrb[172].mxu1 %vm3115_vm0, %v13609_v22  ;;  %v14946_v22 = vadd.f32 %v14873_v13, %v13061_v51 }
 0x171   : > { %12762 = vmatprep.mubr.msk.bf16.mxu0 %vm3115_vm0, %v13610_v42  ;;  %13178 = vmatprep.mubr.msk.bf16.mxu1 %vm3115_vm0, %v13611_v39  ;;  %v14949_v42 = vadd.f32 %v14873_v13, %v4625_v55  ;;  %v12656_v17 = vpop.f32.mrb[68].mxu0  ;;  %v14958_v39 = vadd.f32 %v14873_v13, %v14841_v12  ;;  %v14966_v55 = vadd.f32 %v14873_v13, %v14850_v43 }
 0x172   : > { %19397 = vst [vmem:[#allocation43_spill] sm:$0xff] %v14946_v22  ;;  %v13072_v51 = vpop.f32.mrb[68].mxu1  ;;  %v4670_v32 = vpop.f32.mrb[69].mxu0 }
 0x173   : > { %19399 = vst [vmem:[#allocation45_spill] sm:$0xff] %v14966_v55  ;;  %v6334_v29 = vpop.f32.mrb[69].mxu1  ;;  %v12657_v48 = vpop.f32.mrb[70].mxu0  ;;  %v15052_v55 = vadd.f32 %v14873_v13, %v13072_v51 }
 0x174   : > { %v13073_v43 = vpop.f32.mrb[70].mxu1  ;;  %v4673_v28 = vpop.f32.mrb[71].mxu0  ;;  %v15060_v22 = vadd.f32 %v14873_v13, %v6334_v29  ;;  %v15063_v26 = vadd.f32 %v14873_v13, %v12657_v48  ;;  %v13622_v29 = vld [vmem:[%s13905_s22 + $0x2f0] sm:$0xff]  }
 0x175   : > { %v6337_v12 = vpop.f32.mrb[71].mxu1  ;;  %19408 = vst [vmem:[#allocation54_spill] sm:$0xff] %v15052_v55  ;;  %v15071_v33 = vadd.f32 %v14873_v13, %v13073_v43  ;;  %v15076_v48 = vadd.f32 %v14873_v13, %v4673_v28 }
 0x176   : > { %19409 = vst [vmem:[#allocation55_spill] sm:$0xff] %v15063_v26  ;;  %v15079_v62 = vadd.f32 %v14873_v13, %v6337_v12 }
 0x177   : > { %19410 = vst [vmem:[#allocation56_spill] sm:$0xff] %v15071_v33 }
 0x178   : > { %12763 = vmatmul.mubr.msk.bf16.gmra.mrb[176].mxu0 %vm3115_vm0, %v13612_v36  ;;  %13179 = vmatmul.mubr.msk.bf16.gmra.mrb[176].mxu1 %vm3115_vm0, %v13613_v23  ;;  %v15016_v36 = vadd.f32 %v14873_v13, %v14890_v14  ;;  %v15035_v14 = vadd.f32 %v14873_v13, %v14910_v9  ;;  %v15042_v23 = vadd.f32 %v14873_v13, %v14917_v52 }
 0x179   : > { %12766 = vmatprep.mubr.msk.bf16.mxu0 %vm3115_vm0, %v13614_v0  ;;  %13182 = vmatprep.mubr.msk.bf16.mxu1 %vm3115_vm0, %v13615_v25  ;;  %v15027_v0 = vadd.f32 %v14873_v13, %v14900_v8  ;;  %v12660_v30 = vpop.f32.mrb[72].mxu0  ;;  %v15045_v8 = vadd.f32 %v14873_v13, %v12656_v17  ;;  %v15055_v25 = vadd.f32 %v14873_v13, %v4670_v32 }
 0x17a   : > { %v13076_v4 = vpop.f32.mrb[72].mxu1  ;;  %v4686_v3 = vpop.f32.mrb[73].mxu0  ;;  %19411 = vst [vmem:[#allocation57_spill] sm:$0xff] %v15079_v62  ;;  %v15085_v43 = vadd.f32 %v14873_v13, %v12660_v30 }
 0x17b   : > { %19405 = vst [vmem:[#allocation51_spill] sm:$0xff] %v15027_v0  ;;  %19407 = vst [vmem:[#allocation53_spill] sm:$0xff] %v15045_v8  ;;  %v6350_v18 = vpop.f32.mrb[73].mxu1  ;;  %v12661_v52 = vpop.f32.mrb[74].mxu0  ;;  %v15088_v47 = vadd.f32 %v14873_v13, %v13076_v4  ;;  %v15098_v30 = vadd.f32 %v14873_v13, %v4686_v3 }
 0x17c   : > { %v15065_v9 = vpop.f32.mrb[74].mxu1  ;;  %v4689_v16 = vpop.f32.mrb[75].mxu0  ;;  %19412 = vst [vmem:[#allocation58_spill] sm:$0xff] %v15085_v43  ;;  %v15103_v51 = vadd.f32 %v14873_v13, %v6350_v18  ;;  %v15111_v33 = vadd.f32 %v14873_v13, %v12661_v52 }
 0x17d   : > { %v6353_v17 = vpop.f32.mrb[75].mxu1  ;;  %19413 = vst [vmem:[#allocation59_spill] sm:$0xff] %v15088_v47  ;;  %19414 = vst [vmem:[#allocation60_spill] sm:$0xff] %v15098_v30  ;;  %v15115_v26 = vadd.f32 %v14873_v13, %v4689_v16 }
 0x17e   : > { %19415 = vst [vmem:[#allocation61_spill] sm:$0xff] %v15111_v33 }
 0x180   : > { %12767 = vmatmul.mubr.msk.bf16.gmra.mrb[180].mxu0 %vm3115_vm0, %v13616_v15  ;;  %13183 = vmatmul.mubr.msk.bf16.gmra.mrb[180].mxu1 %vm3115_vm0, %v13617_v56  ;;  %v13620_v15 = vld [vmem:[%s13905_s22 + $0x2e8] sm:$0xff]  }
 0x181   : > { %12770 = vmatprep.mubr.msk.bf16.mxu0 %vm3115_vm0, %v13618_v58  ;;  %13186 = vmatprep.mubr.msk.bf16.mxu1 %vm3115_vm0, %v13619_v59  ;;  %v12664_v4 = vpop.f32.mrb[76].mxu0  ;;  %v13621_v59 = vld [vmem:[%s13905_s22 + $0x968] sm:$0xff]  }
 0x182   : > { %v4711_v58 = vadd.f32 %v14873_v13, %v12664_v4  ;;  %v13080_v28 = vpop.f32.mrb[76].mxu1  ;;  %v4702_v12 = vpop.f32.mrb[77].mxu0  ;;  %v15118_v4 = vadd.f32 %v14873_v13, %v6353_v17  ;;  %v19416_v17 = vmax.f32 %v14886_v41, 0.0 }
 0x183   : > { %v6375_v56 = vadd.f32 %v14873_v13, %v13080_v28  ;;  %v6366_v5 = vpop.f32.mrb[77].mxu1  ;;  %v12665_v18 = vpop.f32.mrb[78].mxu0  ;;  %v15124_v47 = vadd.f32 %v14873_v13, %v4702_v12  ;;  %v19417_v12 = vmax.f32 %v14893_v34, 0.0  ;;  %v15148_v34 = vadd.f32 %v14873_v13, %v15065_v9 }
 0x184   : > { %v7803_v55 = vmax.f32 %v4711_v58, 0.0  ;;  %v4714_v8 = vadd.f32 %v14873_v13, %v12665_v18  ;;  %v13081_v32 = vpop.f32.mrb[78].mxu1  ;;  %v4705_v43 = vpop.f32.mrb[79].mxu0  ;;  %v15132_v18 = vadd.f32 %v14873_v13, %v6366_v5  ;;  %v19418_v5 = vld [vmem:[#allocation9_spill] sm:$0xff] }
 0x185   : > { %v8219_v52 = vmax.f32 %v6375_v56, 0.0  ;;  %v6378_v28 = vadd.f32 %v14873_v13, %v13081_v32  ;;  %v6369_v16 = vpop.f32.mrb[79].mxu1  ;;  %19420 = vst [vmem:[#allocation9_spill] sm:$0xff] %v15148_v34  ;;  %v13626_v56 = vld [vmem:[%s13905_s22 + $0x300] sm:$0xff]  }
 0x186   : > { %v8765_v58 = vmax.f32 %v19416_v17, %v7803_v55  ;;  %v7804_v62 = vmax.f32 %v4714_v8, 0.0  ;;  %v19419_v8 = vmax.f32 %v14906_v63, 0.0  ;;  %v19423_v63 = vld [vmem:[#allocation11_spill] sm:$0xff] }
 0x187   : > { %v8869_v3 = vmax.f32 %v19417_v12, %v8219_v52  ;;  %v8220_v30 = vmax.f32 %v6378_v28, 0.0  ;;  %v19422_v28 = vmax.f32 %v14915_v11, 0.0  ;;  %v19425_v11 = vld [vmem:[#allocation12_spill] sm:$0xff] }
 0x188   : > { %12771 = vmatmul.mubr.msk.bf16.gmra.mrb[184].mxu0 %vm3115_vm0, %v13620_v15  ;;  %13187 = vmatmul.mubr.msk.bf16.gmra.mrb[184].mxu1 %vm3115_vm0, %v13621_v59  ;;  %v8973_v55 = vmax.f32 %v19418_v5, %v8765_v58  ;;  %v8766_v15 = vmax.f32 %v19419_v8, %v7804_v62  ;;  %v19421_v59 = vld [vmem:[#allocation10_spill] sm:$0xff] }
 0x189   : > { %12774 = vmatprep.mubr.msk.bf16.mxu0 %vm3115_vm0, %v13622_v29  ;;  %13190 = vmatprep.mubr.msk.bf16.mxu1 %vm3115_vm0, %v13623_v46  ;;  %v9077_v52 = vmax.f32 %v19421_v59, %v8869_v3  ;;  %v8870_v17 = vmax.f32 %v19422_v28, %v8220_v30  ;;  %v12668_v12 = vpop.f32.mrb[80].mxu0  ;;  %v15157_v46 = vadd.f32 %v14873_v13, %v4705_v43  ;;  %v13624_v3 = vld [vmem:[%s13905_s22 + $0x2f8] sm:$0xff]  }
 0x18a   : > { %v8974_v62 = vmax.f32 %v19423_v63, %v8766_v15  ;;  %v4727_v9 = vadd.f32 %v14873_v13, %v12668_v12  ;;  %v13084_v5 = vpop.f32.mrb[80].mxu1  ;;  %v4718_v8 = vpop.f32.mrb[81].mxu0  ;;  %v15170_v59 = vadd.f32 %v14873_v13, %v6369_v16  ;;  %v13625_v63 = vld [vmem:[%s13905_s22 + $0x978] sm:$0xff]   ;;  %v13627_v16 = vld [vmem:[%s13905_s22 + $0x980] sm:$0xff]  }
 0x18b   : > { %19424 = vst [vmem:[#allocation10_spill] sm:$0xff] %v15157_v46  ;;  %v9078_v30 = vmax.f32 %v19425_v11, %v8870_v17  ;;  %v6391_v43 = vadd.f32 %v14873_v13, %v13084_v5  ;;  %v4719_v15 = vadd.f32 %v14873_v13, %v4718_v8  ;;  %v6382_v28 = vpop.f32.mrb[81].mxu1  ;;  %v12669_v12 = vpop.f32.mrb[82].mxu0  ;;  %v19427_v46 = vmax.f32 %v14935_v61, 0.0 }
 0x18c   : > { %19426 = vst [vmem:[#allocation11_spill] sm:$0xff] %v15170_v59  ;;  %v11544_v58 = vpack.c.bf16 %v8974_v62, %v8973_v55  ;;  %v7807_v29 = vmax.f32 %v4727_v9, 0.0  ;;  %v6383_v41 = vadd.f32 %v14873_v13, %v6382_v28  ;;  %v4730_v32 = vadd.f32 %v14873_v13, %v12669_v12  ;;  %v13085_v17 = vpop.f32.mrb[82].mxu1  ;;  %v4721_v11 = vpop.f32.mrb[83].mxu0 }
 0x18d   : > { %v11804_v0 = vpack.c.bf16 %v9078_v30, %v9077_v52  ;;  %v8223_v33 = vmax.f32 %v6391_v43, 0.0  ;;  %v7805_v5 = vmax.f32 %v4719_v15, 0.0  ;;  %v6394_v8 = vadd.f32 %v14873_v13, %v13085_v17  ;;  %v6385_v59 = vpop.f32.mrb[83].mxu1 }
 0x18e   : > { %11545 = vst [vmem:[%s15166_s30] sm:$0xff] %v11544_v58   ;;  %v8769_v34 = vmax.f32 %v19427_v46, %v7807_v29  ;;  %v8221_v55 = vmax.f32 %v6383_v41, 0.0  ;;  %v7808_v62 = vmax.f32 %v4730_v32, 0.0  ;;  %v4722_v9 = vadd.f32 %v14873_v13, %v4721_v11 }
 0x18f   : > { %12112 = vst [vmem:[%s15166_s30 + $0x1a0] sm:$0xff] %v11804_v0   ;;  %v19428_v28 = vmax.f32 %v14938_v21, 0.0  ;;  %v19429_v52 = vmax.f32 %v14876_v1, 0.0  ;;  %v8224_v43 = vmax.f32 %v6394_v8, 0.0  ;;  %v6386_v15 = vadd.f32 %v14873_v13, %v6385_v59  ;;  %v13630_v8 = vld [vmem:[%s13905_s22 + $0x310] sm:$0xff]  }
 0x190   : > { %12775 = vmatmul.mubr.msk.bf16.gmra.mrb[188].mxu0 %vm3115_vm0, %v13624_v3  ;;  %13191 = vmatmul.mubr.msk.bf16.gmra.mrb[188].mxu1 %vm3115_vm0, %v13625_v63  ;;  %v8977_v61 = vmax.f32 %v14506_v31, %v8769_v34  ;;  %v19430_v32 = vmax.f32 %v14883_v2, 0.0  ;;  %v19431_v0 = vmax.f32 %v14949_v42, 0.0  ;;  %v19432_v58 = vmax.f32 %v14958_v39, 0.0 }
 0x191   : > { %v8873_v12 = vmax.f32 %v19428_v28, %v8223_v33  ;;  %v8767_v30 = vmax.f32 %v19429_v52, %v7805_v5  ;;  %12778 = vmatprep.mubr.msk.bf16.mxu0 %vm3115_vm0, %v13626_v56  ;;  %v7806_v33 = vmax.f32 %v4722_v9, 0.0  ;;  %13194 = vmatprep.mubr.msk.bf16.mxu1 %vm3115_vm0, %v13627_v16  ;;  %v8222_v56 = vmax.f32 %v6386_v15, 0.0  ;;  %v12672_v31 = vpop.f32.mrb[84].mxu0 }
 0x192   : > { %v8871_v41 = vmax.f32 %v19430_v32, %v8221_v55  ;;  %v8770_v21 = vmax.f32 %v19431_v0, %v7808_v62  ;;  %v8874_v46 = vmax.f32 %v19432_v58, %v8224_v43  ;;  %v19433_v42 = vmax.f32 %v14896_v57, 0.0  ;;  %v13088_v63 = vpop.f32.mrb[84].mxu1  ;;  %v13629_v57 = vld [vmem:[%s13905_s22 + $0x988] sm:$0xff]  }
 0x193   : > { %v9081_v1 = vmax.f32 %v14512_v45, %v8873_v12  ;;  %v8975_v29 = vmax.f32 %v14516_v44, %v8767_v30  ;;  %v4743_v59 = vadd.f32 %v14873_v13, %v12672_v31  ;;  %v4734_v45 = vpop.f32.mrb[85].mxu0  ;;  %v13628_v44 = vld [vmem:[%s13905_s22 + $0x308] sm:$0xff]   ;;  %v19434_v17 = vmax.f32 %v14903_v60, 0.0  ;;  %v6398_v5 = vpop.f32.mrb[85].mxu1  ;;  %v13631_v60 = vld [vmem:[%s13905_s22 + $0x990] sm:$0xff]  }
 0x194   : > { %v9079_v2 = vmax.f32 %v14523_v37, %v8871_v41  ;;  %v8978_v34 = vmax.f32 %v14527_v40, %v8770_v21  ;;  %v8768_v3 = vmax.f32 %v19433_v42, %v7806_v33  ;;  %v9082_v39 = vmax.f32 %v14534_v27, %v8874_v46  ;;  %v12673_v40 = vpop.f32.mrb[86].mxu0  ;;  %v13089_v27 = vpop.f32.mrb[86].mxu1 }
 0x195   : > { %v8872_v11 = vmax.f32 %v19434_v17, %v8222_v56  ;;  %v6407_v16 = vadd.f32 %v14873_v13, %v13088_v63  ;;  %v4735_v37 = vadd.f32 %v14873_v13, %v4734_v45  ;;  %v7811_v9 = vmax.f32 %v4743_v59, 0.0  ;;  %v4737_v12 = vpop.f32.mrb[87].mxu0  ;;  %v6401_v32 = vpop.f32.mrb[87].mxu1 }
 0x196   : > { %v11554_v55 = vpack.c.bf16 %v8978_v34, %v8977_v61  ;;  %v8976_v62 = vmax.f32 %v14538_v35, %v8768_v3  ;;  %v6399_v28 = vadd.f32 %v14873_v13, %v6398_v5  ;;  %v11814_v52 = vpack.c.bf16 %v9082_v39, %v9081_v1 }
 0x197   : > { %v9080_v30 = vmax.f32 %v14548_v53, %v8872_v11  ;;  %v8227_v43 = vmax.f32 %v6407_v16, 0.0  ;;  %v7809_v15 = vmax.f32 %v4735_v37, 0.0  ;;  %v19435_v61 = vmax.f32 %v14970_v20, 0.0  ;;  %v13632_v11 = vld [vmem:[%s13905_s22 + $0x318] sm:$0xff]  }
 0x198   : > { %12062 = vst [vmem:[%s15166_s30 + $0x10] sm:$0xff] %v11554_v55   ;;  %v11549_v41 = vpack.c.bf16 %v8976_v62, %v8975_v29  ;;  %v8225_v35 = vmax.f32 %v6399_v28, 0.0  ;;  %v4746_v21 = vadd.f32 %v14873_v13, %v12673_v40  ;;  %12779 = vmatmul.mubr.msk.bf16.gmra.mrb[192].mxu0 %vm3115_vm0, %v13628_v44  ;;  %12114 = vst [vmem:[%s15166_s30 + $0x1b0] sm:$0xff] %v11814_v52   ;;  %v19436_v1 = vmax.f32 %v14976_v38, 0.0  ;;  %v19442_v55 = vld [vmem:[#allocation42_spill] sm:$0xff] }
 0x199   : > { %v8773_v0 = vmax.f32 %v19435_v61, %v7811_v9  ;;  %v11809_v33 = vpack.c.bf16 %v9080_v30, %v9079_v2  ;;  %v19437_v58 = vmax.f32 %v14922_v54, 0.0  ;;  %v6410_v56 = vadd.f32 %v14873_v13, %v13089_v27  ;;  %13195 = vmatmul.mubr.msk.bf16.gmra.mrb[192].mxu1 %vm3115_vm0, %v13629_v57  ;;  %12782 = vmatprep.mubr.msk.bf16.mxu0 %vm3115_vm0, %v13630_v8  ;;  %v12676_v3 = vpop.f32.mrb[88].mxu0  ;;  %v19441_v57 = vld [vmem:[#allocation13_spill] sm:$0xff]  ;;  %v19444_v52 = vld [vmem:[#allocation14_spill] sm:$0xff] }
 0x19a   : > { %v8877_v53 = vmax.f32 %v19436_v1, %v8227_v43  ;;  %12061 = vst [vmem:[%s15166_s30 + $0x8] sm:$0xff] %v11549_v41   ;;  %v19438_v29 = vmax.f32 %v14925_v10, 0.0  ;;  %v7812_v34 = vmax.f32 %v4746_v21, 0.0  ;;  %v4738_v2 = vadd.f32 %v14873_v13, %v4737_v12  ;;  %13198 = vmatprep.mubr.msk.bf16.mxu1 %vm3115_vm0, %v13631_v60  ;;  %v13092_v39 = vpop.f32.mrb[88].mxu1  ;;  %v4750_v17 = vpop.f32.mrb[89].mxu0  ;;  %v13634_v60 = vld [vmem:[%s13905_s22 + $0x320] sm:$0xff]  }
 0x19b   : > { %v8771_v46 = vmax.f32 %v19437_v58, %v7809_v15  ;;  %v8981_v20 = vmax.f32 %v14567_v6, %v8773_v0  ;;  %12113 = vst [vmem:[%s15166_s30 + $0x1a8] sm:$0xff] %v11809_v33   ;;  %v8228_v42 = vmax.f32 %v6410_v56, 0.0  ;;  %v6402_v6 = vadd.f32 %v14873_v13, %v6401_v32  ;;  %v12677_v40 = vpop.f32.mrb[90].mxu0  ;;  %v19445_v43 = vld [vmem:[#allocation43_spill] sm:$0xff] }
 0x19c   : > { %v8875_v31 = vmax.f32 %v19438_v29, %v8225_v35  ;;  %v9085_v54 = vmax.f32 %v14573_v24, %v8877_v53  ;;  %v19439_v59 = vmax.f32 %v14993_v19, 0.0  ;;  %v7810_v45 = vmax.f32 %v4738_v2, 0.0  ;;  %v13633_v19 = vld [vmem:[%s13905_s22 + $0x998] sm:$0xff]   ;;  %v13635_v35 = vld [vmem:[%s13905_s22 + $0x9a0] sm:$0xff]   ;;  %v19447_v33 = vld [vmem:[#allocation15_spill] sm:$0xff] }
 0x19d   : > { %v8979_v38 = vmax.f32 %v14577_v49, %v8771_v46  ;;  %v4759_v44 = vadd.f32 %v14873_v13, %v12676_v3  ;;  %v19440_v24 = vmax.f32 %v14997_v50, 0.0  ;;  %v8226_v16 = vmax.f32 %v6402_v6, 0.0  ;;  %v4753_v50 = vpop.f32.mrb[91].mxu0  ;;  %v19449_v29 = vld [vmem:[#allocation16_spill] sm:$0xff] }
 0x19e   : > { %v9083_v10 = vmax.f32 %v14587_v7, %v8875_v31  ;;  %v8774_v63 = vmax.f32 %v19439_v59, %v7812_v34  ;;  %v6423_v37 = vadd.f32 %v14873_v13, %v13092_v39  ;;  %v4751_v5 = vadd.f32 %v14873_v13, %v4750_v17  ;;  %v6414_v7 = vpop.f32.mrb[89].mxu1  ;;  %v19450_v34 = vld [vmem:[#allocation50_spill] sm:$0xff]  ;;  %v19452_v6 = vld [vmem:[#allocation44_spill] sm:$0xff] }
 0x19f   : > { %v8878_v49 = vmax.f32 %v19440_v24, %v8228_v42  ;;  %v19443_v62 = vmax.f32 %v19442_v55, 0.0  ;;  %v7815_v28 = vmax.f32 %v4759_v44, 0.0  ;;  %v6415_v27 = vadd.f32 %v14873_v13, %v6414_v7  ;;  %v13093_v12 = vpop.f32.mrb[90].mxu1  ;;  %v13636_v55 = vld [vmem:[%s13905_s22 + $0x328] sm:$0xff]  }
 0x1a0   : > { %v8982_v8 = vmax.f32 %v19441_v57, %v8774_v63  ;;  %v19446_v15 = vmax.f32 %v19445_v43, 0.0  ;;  %v8231_v41 = vmax.f32 %v6423_v37, 0.0  ;;  %v7813_v61 = vmax.f32 %v4751_v5, 0.0  ;;  %v6417_v0 = vpop.f32.mrb[91].mxu1  ;;  %12783 = vmatmul.mubr.msk.bf16.gmra.mrb[196].mxu0 %vm3115_vm0, %v13632_v11  ;;  %v19457_v11 = vld [vmem:[#allocation18_spill] sm:$0xff]  ;;  %v19459_v5 = vld [vmem:[#allocation20_spill] sm:$0xff] }
 0x1a1   : > { %v8772_v9 = vmax.f32 %v19443_v62, %v7810_v45  ;;  %v9086_v30 = vmax.f32 %v19444_v52, %v8878_v49  ;;  %v19448_v53 = vmax.f32 %v15016_v36, 0.0  ;;  %v8229_v46 = vmax.f32 %v6415_v27, 0.0  ;;  %13199 = vmatmul.mubr.msk.bf16.gmra.mrb[196].mxu1 %vm3115_vm0, %v13633_v19  ;;  %v19454_v36 = vld [vmem:[#allocation17_spill] sm:$0xff]  ;;  %12786 = vmatprep.mubr.msk.bf16.mxu0 %vm3115_vm0, %v13634_v60  ;;  %v12680_v37 = vpop.f32.mrb[92].mxu0  ;;  %v13637_v62 = vld [vmem:[%s13905_s22 + $0x9a8] sm:$0xff]   ;;  %v13639_v43 = vld [vmem:[%s13905_s22 + $0x9b0] sm:$0xff]  }
 0x1a2   : > { %v8876_v32 = vmax.f32 %v19446_v15, %v8226_v16  ;;  %v11564_v21 = vpack.c.bf16 %v8982_v8, %v8981_v20  ;;  %v19451_v2 = vmax.f32 %v19450_v34, 0.0  ;;  %v19453_v3 = vmax.f32 %v19452_v6, 0.0  ;;  %v19455_v45 = vld [vmem:[#allocation45_spill] sm:$0xff]  ;;  %13202 = vmatprep.mubr.msk.bf16.mxu1 %vm3115_vm0, %v13635_v35  ;;  %v13096_v57 = vpop.f32.mrb[92].mxu1  ;;  %v4766_v8 = vpop.f32.mrb[93].mxu0 }
 0x1a3   : > { %v8980_v1 = vmax.f32 %v19447_v33, %v8772_v9  ;;  %v8777_v58 = vmax.f32 %v19448_v53, %v7815_v28  ;;  %v11824_v56 = vpack.c.bf16 %v9086_v30, %v9085_v54  ;;  %v19456_v44 = vmax.f32 %v19455_v45, 0.0  ;;  %v13638_v9 = vld [vmem:[%s13905_s22 + $0x330] sm:$0xff]   ;;  %v6430_v52 = vpop.f32.mrb[93].mxu1  ;;  %v12681_v30 = vpop.f32.mrb[94].mxu0 }
 0x1a4   : > { %v9084_v31 = vmax.f32 %v19449_v29, %v8876_v32  ;;  %v8881_v42 = vmax.f32 %v19451_v2, %v8231_v41  ;;  %v15271_v59 = vmax.f32 %v19453_v3, %v7813_v61  ;;  %12064 = vst [vmem:[%s15166_s30 + $0x20] sm:$0xff] %v11564_v21   ;;  %v4762_v54 = vadd.f32 %v14873_v13, %v12677_v40  ;;  %v4769_v35 = vpop.f32.mrb[95].mxu0  ;;  %v19465_v2 = vld [vmem:[#allocation47_spill] sm:$0xff] }
 0x1a5   : > { %v11559_v20 = vpack.c.bf16 %v8980_v1, %v8979_v38  ;;  %v8985_v63 = vmax.f32 %v19454_v36, %v8777_v58  ;;  %v15278_v39 = vmax.f32 %v19456_v44, %v8229_v46  ;;  %12116 = vst [vmem:[%s15166_s30 + $0x1c0] sm:$0xff] %v11824_v56   ;;  %v19458_v38 = vld [vmem:[#allocation19_spill] sm:$0xff]  ;;  %v6426_v16 = vadd.f32 %v14873_v13, %v13093_v12  ;;  %v19462_v56 = vld [vmem:[#allocation21_spill] sm:$0xff] }
 0x1a6   : > { %v11819_v17 = vpack.c.bf16 %v9084_v31, %v9083_v10  ;;  %v9089_v24 = vmax.f32 %v19457_v11, %v8881_v42  ;;  %v8983_v49 = vmax.f32 %v19458_v38, %v15271_v59  ;;  %v7816_v40 = vmax.f32 %v4762_v54, 0.0  ;;  %v19463_v31 = vld [vmem:[#allocation46_spill] sm:$0xff]  ;;  %v19472_v38 = vld [vmem:[#allocation23_spill] sm:$0xff] }
 0x1a7   : > { %12063 = vst [vmem:[%s15166_s30 + $0x18] sm:$0xff] %v11559_v20   ;;  %v9087_v7 = vmax.f32 %v19459_v5, %v15278_v39  ;;  %v4754_v19 = vadd.f32 %v14873_v13, %v4753_v50  ;;  %v6418_v10 = vadd.f32 %v14873_v13, %v6417_v0  ;;  %v8232_v28 = vmax.f32 %v6426_v16, 0.0  ;;  %v13097_v0 = vpop.f32.mrb[94].mxu1  ;;  %v19467_v59 = vld [vmem:[#allocation22_spill] sm:$0xff]  ;;  %v19470_v39 = vld [vmem:[#allocation48_spill] sm:$0xff] }
 0x1a8   : > { %12115 = vst [vmem:[%s15166_s30 + $0x1b8] sm:$0xff] %v11819_v17   ;;  %v4775_v27 = vadd.f32 %v14873_v13, %v12680_v37  ;;  %v6439_v12 = vadd.f32 %v14873_v13, %v13096_v57  ;;  %v4767_v60 = vadd.f32 %v14873_v13, %v4766_v8  ;;  %v19460_v50 = vmax.f32 %v15035_v14, 0.0  ;;  %v6433_v46 = vpop.f32.mrb[95].mxu1  ;;  %12787 = vmatmul.mubr.msk.bf16.gmra.mrb[200].mxu0 %vm3115_vm0, %v13636_v55  ;;  %v19473_v37 = vld [vmem:[#allocation24_spill] sm:$0xff]  ;;  %v19476_v57 = vld [vmem:[#allocation25_spill] sm:$0xff]  ;;  %v19477_v55 = vld [vmem:[#allocation26_spill] sm:$0xff] }
 0x1a9   : > { %v7814_v32 = vmax.f32 %v4754_v19, 0.0  ;;  %v8230_v41 = vmax.f32 %v6418_v10, 0.0  ;;  %v6431_v61 = vadd.f32 %v14873_v13, %v6430_v52  ;;  %v19461_v21 = vmax.f32 %v15042_v23, 0.0  ;;  %13203 = vmatmul.mubr.msk.bf16.gmra.mrb[200].mxu1 %vm3115_vm0, %v13637_v62  ;;  %12790 = vmatprep.mubr.msk.bf16.mxu0 %vm3115_vm0, %v13638_v9 }
 0x1aa   : > { %v8778_v15 = vmax.f32 %v19460_v50, %v7816_v40  ;;  %v7819_v1 = vmax.f32 %v4775_v27, 0.0  ;;  %v8235_v53 = vmax.f32 %v6439_v12, 0.0  ;;  %v7817_v58 = vmax.f32 %v4767_v60, 0.0  ;;  %v12684_v27 = vpop.f32.mrb[96].mxu0  ;;  %13206 = vmatprep.mubr.msk.bf16.mxu1 %vm3115_vm0, %v13639_v43  ;;  %v13641_v12 = vld [vmem:[%s13905_s22 + $0x9b8] sm:$0xff]  }
 0x1ab   : > { %v8882_v33 = vmax.f32 %v19461_v21, %v8232_v28  ;;  %v19464_v34 = vmax.f32 %v19463_v31, 0.0  ;;  %v19466_v42 = vmax.f32 %v19465_v2, 0.0  ;;  %v8233_v3 = vmax.f32 %v6431_v61, 0.0 }
 0x1ac   : > { %v8986_v29 = vmax.f32 %v19462_v56, %v8778_v15  ;;  %v19468_v23 = vmax.f32 %v15055_v25, 0.0  ;;  %v19469_v45 = vmax.f32 %v15060_v22, 0.0  ;;  %v19471_v54 = vmax.f32 %v19470_v39, 0.0  ;;  %v19474_v25 = vld [vmem:[#allocation49_spill] sm:$0xff]  ;;  %v13100_v15 = vpop.f32.mrb[96].mxu1  ;;  %v13642_v56 = vld [vmem:[%s13905_s22 + $0x340] sm:$0xff]  }
 0x1ad   : > { %v8776_v14 = vmax.f32 %v19464_v34, %v7814_v32  ;;  %v8880_v6 = vmax.f32 %v19466_v42, %v8230_v41  ;;  %v9090_v20 = vmax.f32 %v19467_v59, %v8882_v33  ;;  %v19475_v40 = vmax.f32 %v19474_v25, 0.0  ;;  %v13640_v22 = vld [vmem:[%s13905_s22 + $0x338] sm:$0xff]   ;;  %v4782_v32 = vpop.f32.mrb[97].mxu0  ;;  %v6446_v33 = vpop.f32.mrb[97].mxu1 }
 0x1ae   : > { %v15315_v36 = vmax.f32 %v19468_v23, %v7819_v1  ;;  %v15319_v44 = vmax.f32 %v19469_v45, %v8235_v53  ;;  %v15323_v17 = vmax.f32 %v19471_v54, %v7817_v58  ;;  %v11574_v11 = vpack.c.bf16 %v8986_v29, %v8985_v63  ;;  %v19478_v63 = vld [vmem:[#allocation27_spill] sm:$0xff]  ;;  %v13101_v58 = vpop.f32.mrb[98].mxu1  ;;  %v19485_v54 = vld [vmem:[#allocation52_spill] sm:$0xff] }
 0x1af   : > { %v8984_v16 = vmax.f32 %v19472_v38, %v8776_v14  ;;  %v9088_v5 = vmax.f32 %v19473_v37, %v8880_v6  ;;  %v15330_v19 = vmax.f32 %v19475_v40, %v8233_v3  ;;  %v11834_v10 = vpack.c.bf16 %v9090_v20, %v9089_v24  ;;  %v19479_v24 = vld [vmem:[#allocation28_spill] sm:$0xff]  ;;  %v6449_v34 = vpop.f32.mrb[99].mxu1  ;;  %v13643_v14 = vld [vmem:[%s13905_s22 + $0x9c0] sm:$0xff]   ;;  %v19481_v20 = vld [vmem:[#allocation57_spill] sm:$0xff] }
 0x1b0   : > { %v8989_v8 = vmax.f32 %v19476_v57, %v15315_v36  ;;  %v9093_v62 = vmax.f32 %v19477_v55, %v15319_v44  ;;  %v8987_v28 = vmax.f32 %v19478_v63, %v15323_v17  ;;  %12066 = vst [vmem:[%s15166_s30 + $0x30] sm:$0xff] %v11574_v11   ;;  %v4778_v50 = vadd.f32 %v14873_v13, %v12681_v30  ;;  %v19483_v36 = vld [vmem:[#allocation51_spill] sm:$0xff] }
 0x1b1   : > { %v11569_v9 = vpack.c.bf16 %v8984_v16, %v8983_v49  ;;  %v11829_v60 = vpack.c.bf16 %v9088_v5, %v9087_v7  ;;  %v9091_v52 = vmax.f32 %v19479_v24, %v15330_v19  ;;  %12118 = vst [vmem:[%s15166_s30 + $0x1d0] sm:$0xff] %v11834_v10   ;;  %v6442_v41 = vadd.f32 %v14873_v13, %v13097_v0  ;;  %v12685_v49 = vpop.f32.mrb[98].mxu0  ;;  %v19487_v16 = vld [vmem:[#allocation60_spill] sm:$0xff]  ;;  %v19489_v5 = vld [vmem:[#allocation29_spill] sm:$0xff]  ;;  %v13644_v24 = vld [vmem:[%s13905_s22 + $0x348] sm:$0xff]  }
 0x1b2   : > { %v4770_v61 = vadd.f32 %v14873_v13, %v4769_v35  ;;  %v6434_v43 = vadd.f32 %v14873_v13, %v6433_v46  ;;  %v4791_v21 = vadd.f32 %v14873_v13, %v12684_v27  ;;  %v7820_v7 = vmax.f32 %v4778_v50, 0.0  ;;  %v4785_v0 = vpop.f32.mrb[99].mxu0  ;;  %12791 = vmatmul.mubr.msk.bf16.gmra.mrb[204].mxu0 %vm3115_vm0, %v13640_v22  ;;  %13207 = vmatmul.mubr.msk.bf16.gmra.mrb[204].mxu1 %vm3115_vm0, %v13641_v12  ;;  %v19491_v22 = vld [vmem:[#allocation53_spill] sm:$0xff]  ;;  %v19493_v27 = vld [vmem:[#allocation54_spill] sm:$0xff] }
 0x1b3   : > { %12065 = vst [vmem:[%s15166_s30 + $0x28] sm:$0xff] %v11569_v9   ;;  %12117 = vst [vmem:[%s15166_s30 + $0x1c8] sm:$0xff] %v11829_v60   ;;  %v6455_v30 = vadd.f32 %v14873_v13, %v13100_v15  ;;  %v4783_v1 = vadd.f32 %v14873_v13, %v4782_v32  ;;  %v6447_v53 = vadd.f32 %v14873_v13, %v6446_v33  ;;  %v8236_v35 = vmax.f32 %v6442_v41, 0.0  ;;  %v19495_v50 = vld [vmem:[#allocation30_spill] sm:$0xff]  ;;  %v19496_v15 = vld [vmem:[#allocation31_spill] sm:$0xff] }
 0x1b4   : > { %v7818_v29 = vmax.f32 %v4770_v61, 0.0  ;;  %v8234_v46 = vmax.f32 %v6434_v43, 0.0  ;;  %v7823_v31 = vmax.f32 %v4791_v21, 0.0  ;;  %v19480_v2 = vmax.f32 %v15076_v48, 0.0  ;;  %12794 = vmatprep.mubr.msk.bf16.mxu0 %vm3115_vm0, %v13642_v56  ;;  %v19497_v41 = vld [vmem:[#allocation2_spill] sm:$0xff]  ;;  %v19498_v61 = vld [vmem:[#allocation4_spill] sm:$0xff]  ;;  %13210 = vmatprep.mubr.msk.bf16.mxu1 %vm3115_vm0, %v13643_v14 }
 0x1b5   : > { %v8239_v6 = vmax.f32 %v6455_v30, 0.0  ;;  %v7821_v3 = vmax.f32 %v4783_v1, 0.0  ;;  %v8237_v59 = vmax.f32 %v6447_v53, 0.0  ;;  %v19482_v13 = vmax.f32 %v19481_v20, 0.0  ;;  %v12688_v21 = vpop.f32.mrb[100].mxu0  ;;  %v13645_v33 = vld [vmem:[%s13905_s22 + $0x9c8] sm:$0xff]  }
 0x1b6   : > { %v8782_v42 = vmax.f32 %v19480_v2, %v7820_v7  ;;  %v19484_v45 = vmax.f32 %v19483_v36, 0.0  ;;  %v19486_v11 = vmax.f32 %v19485_v54, 0.0  ;;  %v19488_v37 = vmax.f32 %v19487_v16, 0.0  ;;  %v13646_v7 = vld [vmem:[%s13905_s22 + $0x350] sm:$0xff]   ;;  %v19499_v1 = vld [vmem:[#allocation5_spill] sm:$0xff]  ;;  %v19500_v56 = vld [vmem:[#allocation6_spill] sm:$0xff] }
 0x1b7   : > { %v8886_v23 = vmax.f32 %v19482_v13, %v8236_v35  ;;  %v19490_v40 = vmax.f32 %v15103_v51, 0.0  ;;  %v19492_v10 = vmax.f32 %v19491_v22, 0.0  ;;  %v19494_v9 = vmax.f32 %v19493_v27, 0.0  ;;  %v4798_v2 = vpop.f32.mrb[101].mxu0  ;;  %v19506_v27 = vld [vmem:[#allocation56_spill] sm:$0xff] }
 0x1b8   : > { %v8780_v39 = vmax.f32 %v19484_v45, %v7818_v29  ;;  %v8884_v38 = vmax.f32 %v19486_v11, %v8234_v46  ;;  %v15369_v48 = vmax.f32 %v19488_v37, %v7823_v31  ;;  %v8990_v25 = vmax.f32 %v19489_v5, %v8782_v42  ;;  %v19501_v29 = vld [vmem:[#allocation8_spill] sm:$0xff]  ;;  %v13104_v31 = vpop.f32.mrb[100].mxu1  ;;  %v12689_v13 = vpop.f32.mrb[102].mxu0 }
 0x1b9   : > { %v15375_v19 = vmax.f32 %v19490_v40, %v8239_v6  ;;  %v15379_v57 = vmax.f32 %v19492_v10, %v7821_v3  ;;  %v15383_v60 = vmax.f32 %v19494_v9, %v8237_v59  ;;  %v9094_v12 = vmax.f32 %v19495_v50, %v8886_v23  ;;  %v13647_v42 = vld [vmem:[%s13905_s22 + $0x9d0] sm:$0xff]   ;;  %v15411_v3 = vld [vmem:[%s19205_s2] ss:$0 sm:$0xff]  ;;  %v6462_v20 = vpop.f32.mrb[101].mxu1  ;;  %v19504_v40 = vld [vmem:[#allocation55_spill] sm:$0xff] }
 0x1ba   : > { %v8988_v32 = vmax.f32 %v19496_v15, %v8780_v39  ;;  %v9092_v51 = vmax.f32 %v19497_v41, %v8884_v38  ;;  %v8993_v43 = vmax.f32 %v19498_v61, %v15369_v48  ;;  %v11584_v30 = vpack.c.bf16 %v8990_v25, %v8989_v8  ;;  %v13105_v63 = vpop.f32.mrb[102].mxu1  ;;  %12795 = vmatmul.mubr.msk.bf16.gmra.mrb[208].mxu0 %vm3115_vm0, %v13644_v24  ;;  %v19509_v15 = vld [vmem:[#allocation7_spill] sm:$0xff] }
 0x1bb   : > { %v9097_v53 = vmax.f32 %v19499_v1, %v15375_v19  ;;  %v8991_v35 = vmax.f32 %v19500_v56, %v15379_v57  ;;  %v9095_v46 = vmax.f32 %v19501_v29, %v15383_v60  ;;  %v11844_v14 = vpack.c.bf16 %v9094_v12, %v9093_v62  ;;  %v6465_v45 = vpop.f32.mrb[103].mxu1  ;;  %13211 = vmatmul.mubr.msk.bf16.gmra.mrb[208].mxu1 %vm3115_vm0, %v13645_v33  ;;  %v13648_v12 = vld [vmem:[%s13905_s22 + $0x358] sm:$0xff]   ;;  %v19523_v56 = vld [vmem:[#allocation10_spill] sm:$0xff]  ;;  %v19524_v29 = vld [vmem:[#allocation11_spill] sm:$0xff] }
 0x1bc   : > { %v11579_v8 = vpack.c.bf16 %v8988_v32, %v8987_v28  ;;  %v11839_v6 = vpack.c.bf16 %v9092_v51, %v9091_v52  ;;  %v4794_v59 = vadd.f32 %v15411_v3, %v12685_v49  ;;  %12068 = vst [vmem:[%s15166_s30 + $0x40] sm:$0xff] %v11584_v30   ;;  %v6458_v44 = vadd.f32 %v15411_v3, %v13101_v58  ;;  %v4801_v28 = vpop.f32.mrb[103].mxu0  ;;  %v19511_v51 = vld [vmem:[#allocation58_spill] sm:$0xff] }
 0x1bd   : > { %v4786_v55 = vadd.f32 %v15411_v3, %v4785_v0  ;;  %v6450_v62 = vadd.f32 %v15411_v3, %v6449_v34  ;;  %v4807_v17 = vadd.f32 %v15411_v3, %v12688_v21  ;;  %12120 = vst [vmem:[%s15166_s30 + $0x1e0] sm:$0xff] %v11844_v14   ;;  %v6471_v23 = vadd.f32 %v15411_v3, %v13104_v31  ;;  %v13650_v14 = vld [vmem:[%s13905_s22 + $0x360] sm:$0xff]  }
 0x1be   : > { %12067 = vst [vmem:[%s15166_s30 + $0x38] sm:$0xff] %v11579_v8   ;;  %12119 = vst [vmem:[%s15166_s30 + $0x1d8] sm:$0xff] %v11839_v6   ;;  %v7824_v52 = vmax.f32 %v4794_v59, 0.0  ;;  %v4799_v49 = vadd.f32 %v15411_v3, %v4798_v2  ;;  %v6463_v36 = vadd.f32 %v15411_v3, %v6462_v20  ;;  %v8240_v58 = vmax.f32 %v6458_v44, 0.0  ;;  %12798 = vmatprep.mubr.msk.bf16.mxu0 %vm3115_vm0, %v13646_v7  ;;  %v19513_v7 = vld [vmem:[#allocation59_spill] sm:$0xff]  ;;  %v13649_v2 = vld [vmem:[%s13905_s22 + $0x9d8] sm:$0xff]  }
 0x1bf   : > { %v7822_v0 = vmax.f32 %v4786_v55, 0.0  ;;  %v8238_v39 = vmax.f32 %v6450_v62, 0.0  ;;  %v7827_v34 = vmax.f32 %v4807_v17, 0.0  ;;  %v19502_v54 = vmax.f32 %v15115_v26, 0.0  ;;  %13214 = vmatprep.mubr.msk.bf16.mxu1 %vm3115_vm0, %v13647_v42  ;;  %v19515_v42 = vld [vmem:[#allocation32_spill] sm:$0xff]  ;;  %v19516_v6 = vld [vmem:[#allocation33_spill] sm:$0xff] }
 0x1c0   : > { %v8243_v38 = vmax.f32 %v6471_v23, 0.0  ;;  %v7825_v16 = vmax.f32 %v4799_v49, 0.0  ;;  %v8241_v37 = vmax.f32 %v6463_v36, 0.0  ;;  %v19503_v5 = vmax.f32 %v15118_v4, 0.0  ;;  %v19517_v20 = vld [vmem:[#allocation34_spill] sm:$0xff]  ;;  %v19518_v44 = vld [vmem:[#allocation3_spill] sm:$0xff] }
 0x1c1   : > { %v8786_v11 = vmax.f32 %v19502_v54, %v7824_v52  ;;  %v19505_v22 = vmax.f32 %v19504_v40, 0.0  ;;  %v19507_v9 = vmax.f32 %v19506_v27, 0.0  ;;  %v19508_v26 = vmax.f32 %v15124_v47, 0.0  ;;  %v15455_v47 = vpop.f32.mrb[104].mxu0  ;;  %v15464_v62 = vpop.f32.mrb[104].mxu1  ;;  %v13651_v52 = vld [vmem:[%s13905_s22 + $0x9e0] sm:$0xff]  }
 0x1c2   : > { %v8890_v25 = vmax.f32 %v19503_v5, %v8240_v58  ;;  %v19510_v41 = vmax.f32 %v15132_v18, 0.0  ;;  %v19512_v21 = vmax.f32 %v19511_v51, 0.0  ;;  %v19514_v30 = vmax.f32 %v19513_v7, 0.0  ;;  %v15466_v17 = vpop.f32.mrb[105].mxu0  ;;  %v19519_v49 = vld [vmem:[#allocation35_spill] sm:$0xff]  ;;  %v19520_v58 = vld [vmem:[#allocation36_spill] sm:$0xff]  ;;  %12799 = vmatmul.mubr.msk.bf16.gmra.mrb[212].mxu0 %vm3115_vm0, %v13648_v12 }
 0x1c3   : > { %v8784_v10 = vmax.f32 %v19505_v22, %v7822_v0  ;;  %v8888_v24 = vmax.f32 %v19507_v9, %v8238_v39  ;;  %v15438_v50 = vmax.f32 %v19508_v26, %v7827_v34  ;;  %v8994_v32 = vmax.f32 %v19509_v15, %v8786_v11  ;;  %v19521_v39 = vld [vmem:[#allocation37_spill] sm:$0xff]  ;;  %v15478_v54 = vpop.f32.mrb[105].mxu1  ;;  %v15480_v11 = vpop.f32.mrb[106].mxu0  ;;  %13215 = vmatmul.mubr.msk.bf16.gmra.mrb[212].mxu1 %vm3115_vm0, %v13649_v2  ;;  %v13652_v26 = vld [vmem:[%s13905_s22 + $0x368] sm:$0xff]   ;;  %v19529_v51 = vld [vmem:[#allocation40_spill] sm:$0xff] }
 0x1c4   : > { %v15445_v4 = vmax.f32 %v19510_v41, %v8243_v38  ;;  %v15449_v33 = vmax.f32 %v19512_v21, %v7825_v16  ;;  %v15453_v31 = vmax.f32 %v19514_v30, %v8241_v37  ;;  %v9098_v8 = vmax.f32 %v19515_v42, %v8890_v25  ;;  %v15492_v16 = vpop.f32.mrb[106].mxu1  ;;  %v15494_v37 = vpop.f32.mrb[107].mxu0  ;;  %v19522_v5 = vld [vmem:[#allocation9_spill] sm:$0xff]  ;;  %12802 = vmatprep.mubr.msk.bf16.mxu0 %vm3115_vm0, %v13650_v14  ;;  %v19528_v41 = vld [vmem:[#allocation39_spill] sm:$0xff]  ;;  %v13654_v14 = vld [vmem:[%s13905_s22 + $0x370] sm:$0xff]  }
 0x1c5   : > { %v8992_v59 = vmax.f32 %v19516_v6, %v8784_v10  ;;  %v9096_v18 = vmax.f32 %v19517_v20, %v8888_v24  ;;  %v8997_v55 = vmax.f32 %v19518_v44, %v15438_v50  ;;  %v11594_v23 = vpack.c.bf16 %v8994_v32, %v8993_v43  ;;  %13218 = vmatprep.mubr.msk.bf16.mxu1 %vm3115_vm0, %v13651_v52  ;;  %v19525_v22 = vld [vmem:[#allocation61_spill] sm:$0xff]  ;;  %v15514_v24 = vpop.f32.mrb[108].mxu0  ;;  %v19527_v50 = vld [vmem:[#allocation38_spill] sm:$0xff]  ;;  %v13653_v2 = vld [vmem:[%s13905_s22 + $0x9e8] sm:$0xff]  }
 0x1c6   : > { %v9101_v36 = vmax.f32 %v19519_v49, %v15445_v4  ;;  %v8995_v0 = vmax.f32 %v19520_v58, %v15449_v33  ;;  %v9099_v34 = vmax.f32 %v19521_v39, %v15453_v31  ;;  %v11854_v48 = vpack.c.bf16 %v9098_v8, %v9097_v53  ;;  %v15501_v53 = vpop.f32.mrb[107].mxu1  ;;  %v15520_v32 = vpop.f32.mrb[109].mxu0  ;;  %v19530_v33 = vld [vmem:[#allocation41_spill] sm:$0xff] }
 0x1c7   : > { %v11589_v61 = vpack.c.bf16 %v8992_v59, %v8991_v35  ;;  %v11849_v43 = vpack.c.bf16 %v9096_v18, %v9095_v46  ;;  %v4810_v38 = vadd.f32 %v15411_v3, %v12689_v13  ;;  %v8216_v25 = vmax.f32 %v19522_v5, 0.0  ;;  %12070 = vst [vmem:[%s15166_s30 + $0x50] sm:$0xff] %v11594_v23   ;;  %v15518_v15 = vpop.f32.mrb[108].mxu1  ;;  %v15527_v31 = vpop.f32.mrb[110].mxu0  ;;  %v13655_v59 = vld [vmem:[%s13905_s22 + $0x9f0] sm:$0xff]   ;;  %v13656_v23 = vld [vmem:[%s13905_s22 + $0x378] sm:$0xff]  }
 0x1c8   : > { %v6474_v19 = vadd.f32 %v15411_v3, %v13105_v63  ;;  %v4802_v1 = vadd.f32 %v15411_v3, %v4801_v28  ;;  %v6466_v57 = vadd.f32 %v15411_v3, %v6465_v45  ;;  %v7802_v60 = vmax.f32 %v19523_v56, 0.0  ;;  %12122 = vst [vmem:[%s15166_s30 + $0x1f0] sm:$0xff] %v11854_v48   ;;  %v15525_v30 = vpop.f32.mrb[109].mxu1  ;;  %v15533_v6 = vpop.f32.mrb[111].mxu0  ;;  %v13657_v49 = vld [vmem:[%s13905_s22 + $0x9f8] sm:$0xff]   ;;  %v13660_v5 = vld [vmem:[%s13905_s22 + $0x388] sm:$0xff]  }
 0x1c9   : > { %12069 = vst [vmem:[%s15166_s30 + $0x48] sm:$0xff] %v11589_v61   ;;  %12121 = vst [vmem:[%s15166_s30 + $0x1e8] sm:$0xff] %v11849_v43   ;;  %v7828_v35 = vmax.f32 %v4810_v38, 0.0  ;;  %v8218_v46 = vmax.f32 %v19524_v29, 0.0  ;;  %v19526_v10 = vmax.f32 %v19525_v22, 0.0  ;;  %v15531_v8 = vpop.f32.mrb[110].mxu1 }
 0x1ca   : > { %v8244_v13 = vmax.f32 %v6474_v19, 0.0  ;;  %v7826_v40 = vmax.f32 %v4802_v1, 0.0  ;;  %v8242_v63 = vmax.f32 %v6466_v57, 0.0  ;;  %v15536_v52 = vpop.f32.mrb[111].mxu1  ;;  %12803 = vmatmul.mubr.msk.bf16.gmra.mrb[216].mxu0 %vm3115_vm0, %v13652_v26  ;;  %v13659_v43 = vld [vmem:[%s13905_s22 + $0xa00] sm:$0xff]   ;;  %v13661_v19 = vld [vmem:[%s13905_s22 + $0xa08] sm:$0xff]  }
 0x1cb   : > { %v8790_v28 = vmax.f32 %v7802_v60, %v7828_v35  ;;  %13219 = vmatmul.mubr.msk.bf16.gmra.mrb[216].mxu1 %vm3115_vm0, %v13653_v2  ;;  %12806 = vmatprep.mubr.msk.bf16.mxu0 %vm3115_vm0, %v13654_v14  ;;  %v15551_v58 = vpop.f32.mrb[112].mxu1  ;;  %v13662_v1 = vld [vmem:[%s13905_s22 + $0x390] sm:$0xff]   ;;  %v13666_v26 = vld [vmem:[%s13905_s22 + $0x3a0] sm:$0xff]   ;;  %v15645_v14 = vadd.f32 %v15411_v3, %v15492_v16  ;;  %v15663_v16 = vadd.f32 %v15411_v3, %v15514_v24 }
 0x1cc   : > { %v8894_v45 = vmax.f32 %v8218_v46, %v8244_v13  ;;  %v8788_v27 = vmax.f32 %v19526_v10, %v7826_v40  ;;  %v8892_v9 = vmax.f32 %v8216_v25, %v8242_v63  ;;  %13222 = vmatprep.mubr.msk.bf16.mxu1 %vm3115_vm0, %v13655_v59  ;;  %v15555_v39 = vpop.f32.mrb[113].mxu1  ;;  %v13663_v13 = vld [vmem:[%s13905_s22 + $0xa10] sm:$0xff]   ;;  %v15685_v24 = vadd.f32 %v15411_v3, %v15527_v31 }
 0x1cd   : > { %v8998_v12 = vmax.f32 %v19527_v50, %v8790_v28  ;;  %v15559_v48 = vpop.f32.mrb[114].mxu1  ;;  %v13664_v28 = vld [vmem:[%s13905_s22 + $0x398] sm:$0xff]  }
 0x1ce   : > { %v9102_v4 = vmax.f32 %v19528_v41, %v8894_v45  ;;  %v8996_v21 = vmax.f32 %v19529_v51, %v8788_v27  ;;  %v9100_v7 = vmax.f32 %v19530_v33, %v8892_v9  ;;  %v15564_v38 = vpop.f32.mrb[115].mxu1  ;;  %v13665_v9 = vld [vmem:[%s13905_s22 + $0xa18] sm:$0xff]   ;;  %v13667_v41 = vld [vmem:[%s13905_s22 + $0xa20] sm:$0xff]   ;;  %v15624_v33 = vadd.f32 %v15411_v3, %v15466_v17 }
 0x1cf   : > { %v11604_v42 = vpack.c.bf16 %v8998_v12, %v8997_v55  ;;  %v15546_v55 = vpop.f32.mrb[112].mxu0 }
 0x1d0   : > { %v11864_v20 = vpack.c.bf16 %v9102_v4, %v9101_v36  ;;  %v11599_v18 = vpack.c.bf16 %v8996_v21, %v8995_v0  ;;  %v11859_v44 = vpack.c.bf16 %v9100_v7, %v9099_v34  ;;  %v13658_v36 = vld [vmem:[%s13905_s22 + $0x380] sm:$0xff]   ;;  %v15553_v0 = vpop.f32.mrb[113].mxu0  ;;  %v15614_v4 = vadd.f32 %v15411_v3, %v15455_v47  ;;  %v13673_v47 = vld [vmem:[%s13905_s22 + $0xa38] sm:$0xff]  }
 0x1d1   : > { %12072 = vst [vmem:[%s15166_s30 + $0x60] sm:$0xff] %v11604_v42   ;;  %v15557_v34 = vpop.f32.mrb[114].mxu0  ;;  %v15620_v21 = vadd.f32 %v15411_v3, %v15464_v62  ;;  %v15629_v7 = vadd.f32 %v15411_v3, %v15478_v54  ;;  %v15641_v54 = vadd.f32 %v15411_v3, %v15480_v11  ;;  %v15659_v11 = vadd.f32 %v15411_v3, %v15501_v53 }
 0x1d2   : > { %12124 = vst [vmem:[%s15166_s30 + $0x200] sm:$0xff] %v11864_v20   ;;  %12071 = vst [vmem:[%s15166_s30 + $0x58] sm:$0xff] %v11599_v18   ;;  %v15561_v61 = vpop.f32.mrb[115].mxu0  ;;  %12807 = vmatmul.mubr.msk.bf16.gmra.mrb[220].mxu0 %vm3115_vm0, %v13656_v23  ;;  %v15575_v57 = vpop.f32.mrb[116].mxu1  ;;  %v13668_v20 = vld [vmem:[%s13905_s22 + $0x3a8] sm:$0xff]   ;;  %v15681_v53 = vadd.f32 %v15411_v3, %v15525_v30  ;;  %v15702_v30 = vadd.f32 %v15411_v3, %v15536_v52  ;;  %v15706_v31 = vadd.f32 %v15411_v3, %v15546_v55 }
 0x1d3   : > { %12123 = vst [vmem:[%s15166_s30 + $0x1f8] sm:$0xff] %v11859_v44   ;;  %13223 = vmatmul.mubr.msk.bf16.gmra.mrb[220].mxu1 %vm3115_vm0, %v13657_v49  ;;  %12810 = vmatprep.mubr.msk.bf16.mxu0 %vm3115_vm0, %v13658_v36  ;;  %v15571_v25 = vpop.f32.mrb[116].mxu0  ;;  %v15579_v60 = vpop.f32.mrb[117].mxu1  ;;  %v15655_v44 = vadd.f32 %v15411_v3, %v15494_v37  ;;  %v13669_v36 = vld [vmem:[%s13905_s22 + $0xa28] sm:$0xff]   ;;  %v15677_v37 = vadd.f32 %v15411_v3, %v15520_v32  ;;  %v8246_v55 = vmax.f32 %v15659_v11, 0.0 }
 0x1d4   : > { %13226 = vmatprep.mubr.msk.bf16.mxu1 %vm3115_vm0, %v13659_v43  ;;  %v15577_v56 = vpop.f32.mrb[117].mxu0  ;;  %v15583_v29 = vpop.f32.mrb[118].mxu1  ;;  %v13670_v43 = vld [vmem:[%s13905_s22 + $0x3b0] sm:$0xff]   ;;  %v15698_v32 = vadd.f32 %v15411_v3, %v15533_v6  ;;  %v15718_v6 = vadd.f32 %v15411_v3, %v15553_v0  ;;  %v15765_v0 = vadd.f32 %v15411_v3, %v15564_v38 }
 0x1d5   : > { %v15581_v35 = vpop.f32.mrb[118].mxu0  ;;  %v15588_v40 = vpop.f32.mrb[119].mxu1  ;;  %v7830_v52 = vmax.f32 %v15655_v44, 0.0  ;;  %v15743_v44 = vadd.f32 %v15411_v3, %v15557_v34 }
 0x1d6   : > { %v15585_v46 = vpop.f32.mrb[119].mxu0 }
 0x1d9   : > { %v15594_v63 = vpop.f32.mrb[120].mxu0 }
 0x1da   : > { %12811 = vmatmul.mubr.msk.bf16.gmra.mrb[224].mxu0 %vm3115_vm0, %v13660_v5  ;;  %v15597_v45 = vpop.f32.mrb[120].mxu1  ;;  %v15599_v22 = vpop.f32.mrb[121].mxu0  ;;  %v15673_v5 = vadd.f32 %v15411_v3, %v15518_v15  ;;  %v15694_v15 = vadd.f32 %v15411_v3, %v15531_v8  ;;  %v15714_v8 = vadd.f32 %v15411_v3, %v15551_v58  ;;  %v15756_v58 = vadd.f32 %v15411_v3, %v15561_v61 }
 0x1db   : > { %13227 = vmatmul.mubr.msk.bf16.gmra.mrb[224].mxu1 %vm3115_vm0, %v13661_v19  ;;  %12814 = vmatprep.mubr.msk.bf16.mxu0 %vm3115_vm0, %v13662_v1  ;;  %v15601_v10 = vpop.f32.mrb[121].mxu1  ;;  %v15603_v27 = vpop.f32.mrb[122].mxu0 }
 0x1dc   : > { %13230 = vmatprep.mubr.msk.bf16.mxu1 %vm3115_vm0, %v13663_v13  ;;  %v15607_v50 = vpop.f32.mrb[122].mxu1  ;;  %v15609_v12 = vpop.f32.mrb[123].mxu0  ;;  %v13671_v13 = vld [vmem:[%s13905_s22 + $0xa30] sm:$0xff]  }
 0x1dd   : > { %v15616_v51 = vpop.f32.mrb[123].mxu1 }
 0x1e1   : > { %v15635_v62 = vpop.f32.mrb[124].mxu0 }
 0x1e2   : > { %12815 = vmatmul.mubr.msk.bf16.gmra.mrb[228].mxu0 %vm3115_vm0, %v13664_v28  ;;  %v15647_v42 = vpop.f32.mrb[124].mxu1  ;;  %v15649_v59 = vpop.f32.mrb[125].mxu0 }
 0x1e3   : > { %13231 = vmatmul.mubr.msk.bf16.gmra.mrb[228].mxu1 %vm3115_vm0, %v13665_v9  ;;  %12818 = vmatprep.mubr.msk.bf16.mxu0 %vm3115_vm0, %v13666_v26  ;;  %v15665_v23 = vpop.f32.mrb[125].mxu1  ;;  %v15667_v49 = vpop.f32.mrb[126].mxu0  ;;  %v15726_v9 = vadd.f32 %v15411_v3, %v15555_v39  ;;  %v15769_v39 = vadd.f32 %v15411_v3, %v15571_v25 }
 0x1e4   : > { %13234 = vmatprep.mubr.msk.bf16.mxu1 %vm3115_vm0, %v13667_v41  ;;  %19531 = vst [vmem:[#allocation12_spill] sm:$0xff] %v15667_v49  ;;  %v15687_v19 = vpop.f32.mrb[126].mxu1  ;;  %v15689_v1 = vpop.f32.mrb[127].mxu0  ;;  %v13672_v41 = vld [vmem:[%s13905_s22 + $0x3b8] sm:$0xff]  }
 0x1e5   : > { %19532 = vst [vmem:[#allocation13_spill] sm:$0xff] %v15687_v19  ;;  %v15708_v28 = vpop.f32.mrb[127].mxu1  ;;  %v15777_v19 = vadd.f32 %v15411_v3, %v15575_v57  ;;  %v19538_v57 = vmax.f32 %v15624_v33, 0.0  ;;  %v13679_v33 = vld [vmem:[%s13905_s22 + $0xa50] sm:$0xff]  }
 0x1ea   : > { %12819 = vmatmul.mubr.msk.bf16.gmra.mrb[232].mxu0 %vm3115_vm0, %v13668_v20  ;;  %v13132_v11 = vpop.f32.mrb[128].mxu1  ;;  %v13674_v20 = vld [vmem:[%s13905_s22 + $0x3c0] sm:$0xff]  }
 0x1eb   : > { %13235 = vmatmul.mubr.msk.bf16.gmra.mrb[232].mxu1 %vm3115_vm0, %v13669_v36  ;;  %12822 = vmatprep.mubr.msk.bf16.mxu0 %vm3115_vm0, %v13670_v43  ;;  %v12716_v43 = vpop.f32.mrb[128].mxu0  ;;  %v15752_v36 = vadd.f32 %v15411_v3, %v15559_v48  ;;  %v6583_v34 = vadd.f32 %v15411_v3, %v13132_v11  ;;  %v15759_v26 = vpop.f32.mrb[129].mxu1  ;;  %v13675_v11 = vld [vmem:[%s13905_s22 + $0xa40] sm:$0xff]  }
 0x1ec   : > { %13238 = vmatprep.mubr.msk.bf16.mxu1 %vm3115_vm0, %v13671_v13  ;;  %v4919_v13 = vadd.f32 %v15411_v3, %v12716_v43  ;;  %v15746_v17 = vpop.f32.mrb[129].mxu0  ;;  %19534 = vst [vmem:[#allocation14_spill] sm:$0xff] %v15759_v26  ;;  %v13133_v61 = vpop.f32.mrb[130].mxu1  ;;  %v15781_v26 = vadd.f32 %v15411_v3, %v15577_v56  ;;  %v13678_v56 = vld [vmem:[%s13905_s22 + $0x3d0] sm:$0xff]  }
 0x1ed   : > { %19533 = vst [vmem:[#allocation42_spill] sm:$0xff] %v15746_v17  ;;  %v12717_v43 = vpop.f32.mrb[130].mxu0  ;;  %v8271_v38 = vmax.f32 %v6583_v34, 0.0  ;;  %v6586_v17 = vadd.f32 %v15411_v3, %v13133_v61  ;;  %v15784_v25 = vpop.f32.mrb[131].mxu1  ;;  %v15802_v34 = vadd.f32 %v15411_v3, %v15583_v29 }
 0x1ee   : > { %v7855_v48 = vmax.f32 %v4919_v13, 0.0  ;;  %v4922_v18 = vadd.f32 %v15411_v3, %v12717_v43  ;;  %v15772_v2 = vpop.f32.mrb[131].mxu0  ;;  %19536 = vst [vmem:[#allocation15_spill] sm:$0xff] %v15784_v25  ;;  %v15788_v13 = vadd.f32 %v15411_v3, %v15579_v60  ;;  %v15792_v43 = vadd.f32 %v15411_v3, %v15581_v35 }
 0x1ef   : > { %19535 = vst [vmem:[#allocation43_spill] sm:$0xff] %v15772_v2  ;;  %19540 = vst [vmem:[#allocation44_spill] sm:$0xff] %v15802_v34  ;;  %v19541_v60 = vmax.f32 %v15629_v7, 0.0  ;;  %v8272_v25 = vmax.f32 %v6586_v17, 0.0 }
 0x1f0   : > { %19537 = vst [vmem:[#allocation16_spill] sm:$0xff] %v15792_v43  ;;  %v15796_v2 = vmax.f32 %v19538_v57, %v7855_v48  ;;  %v7856_v49 = vmax.f32 %v4922_v18, 0.0 }
 0x1f1   : > { %v15806_v61 = vmax.f32 %v19541_v60, %v8271_v38  ;;  %v13676_v60 = vld [vmem:[%s13905_s22 + $0x3c8] sm:$0xff]  }
 0x1f2   : > { %19539 = vst [vmem:[#allocation50_spill] sm:$0xff] %v15796_v2  ;;  %12823 = vmatmul.mubr.msk.bf16.gmra.mrb[236].mxu0 %vm3115_vm0, %v13672_v41  ;;  %v15813_v41 = vmax.f32 %v7830_v52, %v7856_v49  ;;  %v15825_v49 = vadd.f32 %v15411_v3, %v15585_v46  ;;  %v13677_v46 = vld [vmem:[%s13905_s22 + $0xa48] sm:$0xff]   ;;  %v19545_v2 = vmax.f32 %v15677_v37, 0.0  ;;  %v19548_v37 = vmax.f32 %v15620_v21, 0.0 }
 0x1f3   : > { %19542 = vst [vmem:[#allocation17_spill] sm:$0xff] %v15806_v61  ;;  %13239 = vmatmul.mubr.msk.bf16.gmra.mrb[236].mxu1 %vm3115_vm0, %v13673_v47  ;;  %12826 = vmatprep.mubr.msk.bf16.mxu0 %vm3115_vm0, %v13674_v20  ;;  %v15819_v47 = vmax.f32 %v8246_v55, %v8272_v25  ;;  %v12720_v20 = vpop.f32.mrb[132].mxu0  ;;  %v15832_v55 = vadd.f32 %v15411_v3, %v15588_v40  ;;  %v19551_v21 = vmax.f32 %v15641_v54, 0.0  ;;  %v13680_v54 = vld [vmem:[%s13905_s22 + $0x3d8] sm:$0xff]  }
 0x1f4   : > { %19543 = vst [vmem:[#allocation45_spill] sm:$0xff] %v15813_v41  ;;  %13242 = vmatprep.mubr.msk.bf16.mxu1 %vm3115_vm0, %v13675_v11  ;;  %v4935_v52 = vadd.f32 %v15411_v3, %v12720_v20  ;;  %v13136_v11 = vpop.f32.mrb[132].mxu1  ;;  %v4926_v57 = vpop.f32.mrb[133].mxu0  ;;  %v15840_v20 = vadd.f32 %v15411_v3, %v15594_v63 }
 0x1f5   : > { %19544 = vst [vmem:[#allocation18_spill] sm:$0xff] %v15819_v47  ;;  %v6599_v25 = vadd.f32 %v15411_v3, %v13136_v11  ;;  %v4927_v38 = vadd.f32 %v15411_v3, %v4926_v57  ;;  %v6590_v29 = vpop.f32.mrb[133].mxu1  ;;  %v12721_v35 = vpop.f32.mrb[134].mxu0 }
 0x1f6   : > { %v7859_v48 = vmax.f32 %v4935_v52, 0.0  ;;  %v6591_v17 = vadd.f32 %v15411_v3, %v6590_v29  ;;  %v4938_v7 = vadd.f32 %v15411_v3, %v12721_v35  ;;  %v13137_v18 = vpop.f32.mrb[134].mxu1  ;;  %v4929_v40 = vpop.f32.mrb[135].mxu0  ;;  %v19546_v35 = vmax.f32 %v15681_v53, 0.0 }
 0x1f7   : > { %v8275_v47 = vmax.f32 %v6599_v25, 0.0  ;;  %v7857_v11 = vmax.f32 %v4927_v38, 0.0  ;;  %v6602_v57 = vadd.f32 %v15411_v3, %v13137_v18  ;;  %v4930_v41 = vadd.f32 %v15411_v3, %v4929_v40  ;;  %v6593_v61 = vpop.f32.mrb[135].mxu1 }
 0x1f8   : > { %v15849_v34 = vmax.f32 %v19545_v2, %v7859_v48  ;;  %v8273_v63 = vmax.f32 %v6591_v17, 0.0  ;;  %v7860_v52 = vmax.f32 %v4938_v7, 0.0  ;;  %v6594_v29 = vadd.f32 %v15411_v3, %v6593_v61 }
 0x1f9   : > { %v15855_v43 = vmax.f32 %v19546_v35, %v8275_v47  ;;  %v19547_v38 = vmax.f32 %v15614_v4, 0.0  ;;  %v8276_v25 = vmax.f32 %v6602_v57, 0.0  ;;  %v7858_v40 = vmax.f32 %v4930_v41, 0.0 }
 0x1fa   : > { %12827 = vmatmul.mubr.msk.bf16.gmra.mrb[240].mxu0 %vm3115_vm0, %v13676_v60  ;;  %v15866_v61 = vmax.f32 %v19548_v37, %v8273_v63  ;;  %v19549_v53 = vmax.f32 %v15698_v32, 0.0  ;;  %v8274_v4 = vmax.f32 %v6594_v29, 0.0  ;;  %v15876_v17 = vadd.f32 %v15411_v3, %v15597_v45  ;;  %v12724_v32 = vpop.f32.mrb[136].mxu0 }
 0x1fb   : > { %v15859_v18 = vmax.f32 %v19547_v38, %v7857_v11  ;;  %13243 = vmatmul.mubr.msk.bf16.gmra.mrb[240].mxu1 %vm3115_vm0, %v13677_v46  ;;  %12830 = vmatprep.mubr.msk.bf16.mxu0 %vm3115_vm0, %v13678_v56  ;;  %v19550_v56 = vmax.f32 %v15702_v30, 0.0  ;;  %v15884_v48 = vmax.f32 %v19551_v21, %v7858_v40  ;;  %v19552_v45 = vmax.f32 %v15645_v14, 0.0  ;;  %v13140_v11 = vpop.f32.mrb[136].mxu1  ;;  %v4942_v57 = vpop.f32.mrb[137].mxu0  ;;  %v13681_v38 = vld [vmem:[%s13905_s22 + $0xa58] sm:$0xff]  }
 0x1fc   : > { %v15870_v7 = vmax.f32 %v19549_v53, %v7860_v52  ;;  %13246 = vmatprep.mubr.msk.bf16.mxu1 %vm3115_vm0, %v13679_v33  ;;  %v15889_v33 = vadd.f32 %v15411_v3, %v15599_v22  ;;  %v4951_v30 = vadd.f32 %v15411_v3, %v12724_v32  ;;  %v15899_v63 = vadd.f32 %v15411_v3, %v15601_v10  ;;  %v6606_v29 = vpop.f32.mrb[137].mxu1  ;;  %v12725_v35 = vpop.f32.mrb[138].mxu0 }
 0x1fd   : > { %v15880_v47 = vmax.f32 %v19550_v56, %v8276_v25  ;;  %v15893_v46 = vmax.f32 %v19552_v45, %v8274_v4  ;;  %v15903_v52 = vadd.f32 %v15411_v3, %v15603_v27  ;;  %v6615_v22 = vadd.f32 %v15411_v3, %v13140_v11  ;;  %v13682_v25 = vld [vmem:[%s13905_s22 + $0x3e0] sm:$0xff]   ;;  %v13141_v4 = vpop.f32.mrb[138].mxu1  ;;  %v4945_v27 = vpop.f32.mrb[139].mxu0 }
 0x1fe   : > { %v4943_v14 = vadd.f32 %v15411_v3, %v4942_v57  ;;  %v15911_v40 = vadd.f32 %v15411_v3, %v15607_v50  ;;  %v7863_v37 = vmax.f32 %v4951_v30, 0.0  ;;  %v6607_v10 = vadd.f32 %v15411_v3, %v6606_v29  ;;  %v13683_v56 = vld [vmem:[%s13905_s22 + $0xa60] sm:$0xff]   ;;  %v6609_v57 = vpop.f32.mrb[139].mxu1 }
 0x1ff   : > { %v4954_v53 = vadd.f32 %v15411_v3, %v12725_v35  ;;  %v8279_v21 = vmax.f32 %v6615_v22, 0.0  ;;  %v6618_v45 = vadd.f32 %v15411_v3, %v13141_v4  ;;  %v4946_v11 = vadd.f32 %v15411_v3, %v4945_v27 }
 0x200   : > { %v7861_v32 = vmax.f32 %v4943_v14, 0.0  ;;  %v19553_v60 = vmax.f32 %v15718_v6, 0.0  ;;  %v8277_v50 = vmax.f32 %v6607_v10, 0.0  ;;  %v6610_v29 = vadd.f32 %v15411_v3, %v6609_v57 }
 0x201   : > { %v7864_v30 = vmax.f32 %v4954_v53, 0.0  ;;  %v19554_v35 = vmax.f32 %v15726_v9, 0.0  ;;  %v19555_v22 = vmax.f32 %v15663_v16, 0.0  ;;  %v8280_v4 = vmax.f32 %v6618_v45, 0.0 }
 0x202   : > { %v15920_v41 = vmax.f32 %v19553_v60, %v7863_v37  ;;  %12831 = vmatmul.mubr.msk.bf16.gmra.mrb[244].mxu0 %vm3115_vm0, %v13680_v54  ;;  %v7862_v27 = vmax.f32 %v4946_v11, 0.0  ;;  %v19556_v60 = vmax.f32 %v15673_v5, 0.0  ;;  %v19557_v9 = vmax.f32 %v15756_v58, 0.0  ;;  %v12728_v58 = vpop.f32.mrb[140].mxu0 }
 0x203   : > { %v15926_v2 = vmax.f32 %v19554_v35, %v8279_v21  ;;  %v15930_v14 = vmax.f32 %v19555_v22, %v7861_v32  ;;  %13247 = vmatmul.mubr.msk.bf16.gmra.mrb[244].mxu1 %vm3115_vm0, %v13681_v38  ;;  %12834 = vmatprep.mubr.msk.bf16.mxu0 %vm3115_vm0, %v13682_v25  ;;  %v8278_v16 = vmax.f32 %v6610_v29, 0.0  ;;  %v15947_v38 = vadd.f32 %v15411_v3, %v15609_v12  ;;  %v4958_v57 = vpop.f32.mrb[141].mxu0 }
 0x204   : > { %v15937_v54 = vmax.f32 %v19556_v60, %v8277_v50  ;;  %v15941_v37 = vmax.f32 %v19557_v9, %v7864_v30  ;;  %13250 = vmatprep.mubr.msk.bf16.mxu1 %vm3115_vm0, %v13683_v56  ;;  %v19559_v25 = vmax.f32 %v15765_v0, 0.0  ;;  %v19561_v5 = vmax.f32 %v15685_v24, 0.0  ;;  %v13144_v0 = vpop.f32.mrb[140].mxu1  ;;  %v13684_v50 = vld [vmem:[%s13905_s22 + $0x3e8] sm:$0xff]  }
 0x205   : > { %v19563_v45 = vmax.f32 %v15694_v15, 0.0  ;;  %v4967_v12 = vadd.f32 %v15411_v3, %v12728_v58  ;;  %v15968_v30 = vadd.f32 %v15411_v3, %v15616_v51  ;;  %v6631_v29 = vadd.f32 %v15411_v3, %v13144_v0  ;;  %v6622_v22 = vpop.f32.mrb[141].mxu1  ;;  %v12729_v15 = vpop.f32.mrb[142].mxu0  ;;  %v13687_v58 = vld [vmem:[%s13905_s22 + $0xa70] sm:$0xff]  }
 0x206   : > { %19558 = vst [vmem:[#allocation19_spill] sm:$0xff] %v15941_v37  ;;  %v15951_v53 = vmax.f32 %v19559_v25, %v8280_v4  ;;  %v15955_v21 = vmax.f32 %v19561_v5, %v7862_v27  ;;  %v4959_v35 = vadd.f32 %v15411_v3, %v4958_v57  ;;  %v13685_v4 = vld [vmem:[%s13905_s22 + $0xa68] sm:$0xff]   ;;  %v13686_v27 = vld [vmem:[%s13905_s22 + $0x3f0] sm:$0xff]   ;;  %v15976_v60 = vadd.f32 %v15411_v3, %v15635_v62  ;;  %v13145_v5 = vpop.f32.mrb[142].mxu1  ;;  %v4961_v51 = vpop.f32.mrb[143].mxu0 }
 0x207   : > { %v15961_v11 = vmax.f32 %v19563_v45, %v8278_v16  ;;  %v7867_v9 = vmax.f32 %v4967_v12, 0.0  ;;  %v6623_v16 = vadd.f32 %v15411_v3, %v6622_v22  ;;  %v4970_v25 = vadd.f32 %v15411_v3, %v12729_v15  ;;  %v6625_v56 = vpop.f32.mrb[143].mxu1 }
 0x208   : > { %19560 = vst [vmem:[#allocation20_spill] sm:$0xff] %v15951_v53  ;;  %19562 = vst [vmem:[#allocation21_spill] sm:$0xff] %v15955_v21  ;;  %v8283_v45 = vmax.f32 %v6631_v29, 0.0  ;;  %v7865_v0 = vmax.f32 %v4959_v35, 0.0  ;;  %v6634_v57 = vadd.f32 %v15411_v3, %v13145_v5  ;;  %v4962_v24 = vadd.f32 %v15411_v3, %v4961_v51  ;;  %v13721_v53 = vld [vmem:[%s13905_s22 + $0xaf8] sm:$0xff]  }
 0x209   : > { %19564 = vst [vmem:[#allocation46_spill] sm:$0xff] %v15961_v11  ;;  %v19565_v6 = vmax.f32 %v15781_v26, 0.0  ;;  %v8281_v62 = vmax.f32 %v6623_v16, 0.0  ;;  %v7868_v12 = vmax.f32 %v4970_v25, 0.0  ;;  %v6626_v22 = vadd.f32 %v15411_v3, %v6625_v56 }
 0x20a   : > { %12835 = vmatmul.mubr.msk.bf16.gmra.mrb[248].mxu0 %vm3115_vm0, %v13684_v50  ;;  %v19567_v15 = vmax.f32 %v15788_v13, 0.0  ;;  %v19569_v29 = vmax.f32 %v15706_v31, 0.0  ;;  %v8284_v5 = vmax.f32 %v6634_v57, 0.0  ;;  %v7866_v51 = vmax.f32 %v4962_v24, 0.0 }
 0x20b   : > { %v15985_v32 = vmax.f32 %v19565_v6, %v7867_v9  ;;  %13251 = vmatmul.mubr.msk.bf16.gmra.mrb[248].mxu1 %vm3115_vm0, %v13685_v4  ;;  %12838 = vmatprep.mubr.msk.bf16.mxu0 %vm3115_vm0, %v13686_v27  ;;  %v7846_v26 = vmax.f32 %v15947_v38, 0.0  ;;  %v19571_v6 = vmax.f32 %v15714_v8, 0.0  ;;  %v19573_v13 = vmax.f32 %v15825_v49, 0.0  ;;  %v12732_v49 = vpop.f32.mrb[144].mxu0 }
 0x20c   : > { %v15991_v10 = vmax.f32 %v19567_v15, %v8283_v45  ;;  %v15995_v35 = vmax.f32 %v19569_v29, %v7865_v0  ;;  %v8282_v31 = vmax.f32 %v6626_v22, 0.0  ;;  %13254 = vmatprep.mubr.msk.bf16.mxu1 %vm3115_vm0, %v13687_v58  ;;  %v8262_v24 = vmax.f32 %v15968_v30, 0.0  ;;  %v13148_v58 = vpop.f32.mrb[144].mxu1  ;;  %v4974_v45 = vpop.f32.mrb[145].mxu0  ;;  %v13689_v22 = vld [vmem:[%s13905_s22 + $0xa78] sm:$0xff]   ;;  %v13690_v15 = vld [vmem:[%s13905_s22 + $0x400] sm:$0xff]  }
 0x20d   : > { %19566 = vst [vmem:[#allocation47_spill] sm:$0xff] %v15985_v32  ;;  %v16002_v56 = vmax.f32 %v19571_v6, %v8281_v62  ;;  %v16006_v50 = vmax.f32 %v19573_v13, %v7868_v12  ;;  %v16012_v4 = vadd.f32 %v15411_v3, %v15647_v42  ;;  %v19575_v38 = vmax.f32 %v15832_v55, 0.0  ;;  %v6638_v62 = vpop.f32.mrb[145].mxu1  ;;  %v12733_v12 = vpop.f32.mrb[146].mxu0  ;;  %v13691_v13 = vld [vmem:[%s13905_s22 + $0xa80] sm:$0xff]   ;;  %v13719_v32 = vld [vmem:[%s13905_s22 + $0xaf0] sm:$0xff]  }
 0x20e   : > { %19568 = vst [vmem:[#allocation22_spill] sm:$0xff] %v15991_v10  ;;  %19570 = vst [vmem:[#allocation48_spill] sm:$0xff] %v15995_v35  ;;  %v19577_v8 = vmax.f32 %v15743_v44, 0.0  ;;  %v16025_v30 = vadd.f32 %v15411_v3, %v15649_v59  ;;  %v19579_v42 = vmax.f32 %v15752_v36, 0.0  ;;  %v4983_v55 = vadd.f32 %v15411_v3, %v12732_v49  ;;  %v13688_v44 = vld [vmem:[%s13905_s22 + $0x3f8] sm:$0xff]   ;;  %v13149_v6 = vpop.f32.mrb[146].mxu1 }
 0x20f   : > { %19572 = vst [vmem:[#allocation23_spill] sm:$0xff] %v16002_v56  ;;  %19574 = vst [vmem:[#allocation24_spill] sm:$0xff] %v16006_v50  ;;  %v16016_v27 = vmax.f32 %v19575_v38, %v8284_v5  ;;  %v16035_v0 = vadd.f32 %v15411_v3, %v15665_v23  ;;  %v16039_v57 = vadd.f32 %v15411_v3, %v15689_v1  ;;  %v4977_v1 = vpop.f32.mrb[147].mxu0  ;;  %v13717_v50 = vld [vmem:[%s13905_s22 + $0xae8] sm:$0xff]   ;;  %v13718_v56 = vld [vmem:[%s13905_s22 + $0x470] sm:$0xff]  }
 0x210   : > { %v16020_v9 = vmax.f32 %v19577_v8, %v7866_v51  ;;  %v16029_v25 = vmax.f32 %v19579_v42, %v8282_v31  ;;  %v6647_v59 = vadd.f32 %v15411_v3, %v13148_v58  ;;  %v4975_v36 = vadd.f32 %v15411_v3, %v4974_v45  ;;  %v6641_v42 = vpop.f32.mrb[147].mxu1 }
 0x211   : > { %19576 = vst [vmem:[#allocation49_spill] sm:$0xff] %v16016_v27  ;;  %v16047_v29 = vadd.f32 %v15411_v3, %v15708_v28  ;;  %v7871_v5 = vmax.f32 %v4983_v55, 0.0  ;;  %v6639_v23 = vadd.f32 %v15411_v3, %v6638_v62  ;;  %v4986_v51 = vadd.f32 %v15411_v3, %v12733_v12 }
 0x212   : > { %19578 = vst [vmem:[#allocation25_spill] sm:$0xff] %v16020_v9  ;;  %19580 = vst [vmem:[#allocation26_spill] sm:$0xff] %v16029_v25  ;;  %v8287_v31 = vmax.f32 %v6647_v59, 0.0  ;;  %v7869_v38 = vmax.f32 %v4975_v36, 0.0  ;;  %v6650_v8 = vadd.f32 %v15411_v3, %v13149_v6  ;;  %v4978_v49 = vadd.f32 %v15411_v3, %v4977_v1  ;;  %12839 = vmatmul.mubr.msk.bf16.gmra.mrb[252].mxu0 %vm3115_vm0, %v13688_v44 }
 0x213   : > { %v19581_v58 = vmax.f32 %v15889_v33, 0.0  ;;  %v8285_v28 = vmax.f32 %v6639_v23, 0.0  ;;  %v7872_v55 = vmax.f32 %v4986_v51, 0.0  ;;  %v6642_v62 = vadd.f32 %v15411_v3, %v6641_v42  ;;  %13255 = vmatmul.mubr.msk.bf16.gmra.mrb[252].mxu1 %vm3115_vm0, %v13689_v22  ;;  %12842 = vmatprep.mubr.msk.bf16.mxu0 %vm3115_vm0, %v13690_v15  ;;  %v19587_v33 = vld [vmem:[#allocation12_spill] sm:$0xff] }
 0x214   : > { %v19583_v12 = vmax.f32 %v15899_v63, 0.0  ;;  %v19585_v59 = vmax.f32 %v15769_v39, 0.0  ;;  %v8288_v6 = vmax.f32 %v6650_v8, 0.0  ;;  %v7870_v1 = vmax.f32 %v4978_v49, 0.0  ;;  %13258 = vmatprep.mubr.msk.bf16.mxu1 %vm3115_vm0, %v13691_v13  ;;  %v19592_v15 = vld [vmem:[#allocation16_spill] sm:$0xff] }
 0x215   : > { %v16056_v45 = vmax.f32 %v19581_v58, %v7871_v5  ;;  %v16072_v5 = vadd.f32 %v15411_v3, %v19587_v33  ;;  %v19588_v44 = vmax.f32 %v15777_v19, 0.0  ;;  %v16078_v63 = vmax.f32 %v7846_v26, %v7872_v55  ;;  %v12736_v19 = vpop.f32.mrb[148].mxu0  ;;  %v19595_v49 = vld [vmem:[#allocation44_spill] sm:$0xff]  ;;  %v19598_v55 = vld [vmem:[#allocation42_spill] sm:$0xff]  ;;  %v13693_v33 = vld [vmem:[%s13905_s22 + $0xa88] sm:$0xff]  }
 0x216   : > { %v16062_v16 = vmax.f32 %v19583_v12, %v8287_v31  ;;  %v16066_v36 = vmax.f32 %v19585_v59, %v7869_v38  ;;  %v8286_v39 = vmax.f32 %v6642_v62, 0.0  ;;  %v7849_v51 = vmax.f32 %v16025_v30, 0.0  ;;  %v4990_v58 = vpop.f32.mrb[149].mxu0 }
 0x217   : > { %19582 = vst [vmem:[#allocation27_spill] sm:$0xff] %v16056_v45  ;;  %v16076_v23 = vmax.f32 %v19588_v44, %v8285_v28  ;;  %19590 = vst [vmem:[#allocation52_spill] sm:$0xff] %v16078_v63  ;;  %v8265_v22 = vmax.f32 %v16035_v0, 0.0  ;;  %v16083_v31 = vmax.f32 %v8262_v24, %v8288_v6  ;;  %v19593_v38 = vmax.f32 %v19592_v15, 0.0  ;;  %v16098_v24 = vld [vmem:[%s19205_s2] ss:$0 sm:$0xff] }
 0x218   : > { %19584 = vst [vmem:[#allocation28_spill] sm:$0xff] %v16062_v16  ;;  %19586 = vst [vmem:[#allocation57_spill] sm:$0xff] %v16066_v36  ;;  %v7850_v8 = vmax.f32 %v16039_v57, 0.0  ;;  %v8266_v26 = vmax.f32 %v16047_v29, 0.0  ;;  %v19596_v42 = vmax.f32 %v19595_v49, 0.0  ;;  %v4999_v30 = vadd.f32 %v16098_v24, %v12736_v19  ;;  %v13152_v0 = vpop.f32.mrb[148].mxu1 }
 0x219   : > { %19589 = vst [vmem:[#allocation51_spill] sm:$0xff] %v16076_v23  ;;  %19591 = vst [vmem:[#allocation60_spill] sm:$0xff] %v16083_v31  ;;  %v16087_v3 = vmax.f32 %v19593_v38, %v7870_v1  ;;  %v13692_v28 = vld [vmem:[%s13905_s22 + $0x408] sm:$0xff]   ;;  %v16104_v57 = vadd.f32 %v16098_v24, %v19598_v55  ;;  %v19599_v29 = vld [vmem:[#allocation14_spill] sm:$0xff]  ;;  %v6663_v12 = vadd.f32 %v16098_v24, %v13152_v0  ;;  %v6654_v6 = vpop.f32.mrb[149].mxu1  ;;  %v12737_v1 = vpop.f32.mrb[150].mxu0 }
 0x21a   : > { %v16093_v13 = vmax.f32 %v19596_v42, %v8286_v39  ;;  %v16108_v62 = vadd.f32 %v16098_v24, %v19599_v29  ;;  %v4991_v59 = vadd.f32 %v16098_v24, %v4990_v58  ;;  %v13694_v44 = vld [vmem:[%s13905_s22 + $0x410] sm:$0xff]   ;;  %v19600_v39 = vld [vmem:[#allocation43_spill] sm:$0xff]  ;;  %v7875_v38 = vmax.f32 %v4999_v30, 0.0  ;;  %v13153_v42 = vpop.f32.mrb[150].mxu1  ;;  %v4993_v55 = vpop.f32.mrb[151].mxu0  ;;  %12843 = vmatmul.mubr.msk.bf16.gmra.mrb[0].mxu0 %vm3115_vm0, %v13692_v28 }
 0x21b   : > { %19594 = vst [vmem:[#allocation29_spill] sm:$0xff] %v16087_v3  ;;  %v16116_v15 = vadd.f32 %v16098_v24, %v19600_v39  ;;  %v6655_v19 = vadd.f32 %v16098_v24, %v6654_v6  ;;  %v5002_v49 = vadd.f32 %v16098_v24, %v12737_v1  ;;  %v13695_v29 = vld [vmem:[%s13905_s22 + $0xa90] sm:$0xff]   ;;  %v6666_v58 = vadd.f32 %v16098_v24, %v13153_v42  ;;  %v6657_v31 = vpop.f32.mrb[151].mxu1 }
 0x21c   : > { %19597 = vst [vmem:[#allocation53_spill] sm:$0xff] %v16093_v13  ;;  %v8291_v13 = vmax.f32 %v6663_v12, 0.0  ;;  %v7873_v0 = vmax.f32 %v4991_v59, 0.0  ;;  %v4994_v3 = vadd.f32 %v16098_v24, %v4993_v55  ;;  %v16123_v63 = vmax.f32 %v7849_v51, %v7875_v38  ;;  %13259 = vmatmul.mubr.msk.bf16.gmra.mrb[0].mxu1 %vm3115_vm0, %v13693_v33  ;;  %12846 = vmatprep.mubr.msk.bf16.mxu0 %vm3115_vm0, %v13694_v44  ;;  %v19605_v51 = vld [vmem:[#allocation15_spill] sm:$0xff] }
 0x21d   : > { %v8289_v23 = vmax.f32 %v6655_v19, 0.0  ;;  %v7876_v39 = vmax.f32 %v5002_v49, 0.0  ;;  %v6658_v30 = vadd.f32 %v16098_v24, %v6657_v31  ;;  %v19603_v1 = vmax.f32 %v15840_v20, 0.0  ;;  %13262 = vmatprep.mubr.msk.bf16.mxu1 %vm3115_vm0, %v13695_v29  ;;  %v13156_v29 = vpop.f32.mrb[152].mxu1 }
 0x21e   : > { %19601 = vst [vmem:[#allocation54_spill] sm:$0xff] %v16123_v63  ;;  %v16127_v6 = vmax.f32 %v8265_v22, %v8291_v13  ;;  %v8292_v12 = vmax.f32 %v6666_v58, 0.0  ;;  %v7874_v59 = vmax.f32 %v4994_v3, 0.0  ;;  %v6578_v38 = vadd.f32 %v16098_v24, %v19605_v51  ;;  %v19609_v3 = vld [vmem:[#allocation13_spill] sm:$0xff]  ;;  %v13715_v63 = vld [vmem:[%s13905_s22 + $0xae0] sm:$0xff]  }
 0x21f   : > { %v16131_v36 = vmax.f32 %v19603_v1, %v7873_v0  ;;  %v19606_v19 = vmax.f32 %v15876_v17, 0.0  ;;  %v16141_v22 = vmax.f32 %v7850_v8, %v7876_v39  ;;  %v8290_v13 = vmax.f32 %v6658_v30, 0.0  ;;  %v12740_v17 = vpop.f32.mrb[152].mxu0  ;;  %v13696_v0 = vld [vmem:[%s13905_s22 + $0x418] sm:$0xff]   ;;  %v6670_v30 = vpop.f32.mrb[153].mxu1 }
 0x220   : > { %19602 = vst [vmem:[#allocation30_spill] sm:$0xff] %v16127_v6  ;;  %v8267_v20 = vmax.f32 %v16012_v4, 0.0  ;;  %v6570_v28 = vadd.f32 %v16098_v24, %v19609_v3  ;;  %v16147_v33 = vmax.f32 %v8266_v26, %v8292_v12  ;;  %v19611_v44 = vmax.f32 %v15903_v52, 0.0  ;;  %v5006_v26 = vpop.f32.mrb[153].mxu0  ;;  %v13697_v1 = vld [vmem:[%s13905_s22 + $0xa98] sm:$0xff]  }
 0x221   : > { %19604 = vst [vmem:[#allocation31_spill] sm:$0xff] %v16131_v36  ;;  %v16139_v31 = vmax.f32 %v19606_v19, %v8289_v23  ;;  %19608 = vst [vmem:[#allocation4_spill] sm:$0xff] %v16141_v22  ;;  %v7852_v23 = vmax.f32 %v16072_v5, 0.0  ;;  %v7853_v8 = vmax.f32 %v16104_v57, 0.0  ;;  %v19613_v42 = vmax.f32 %v15911_v40, 0.0  ;;  %v12741_v57 = vpop.f32.mrb[154].mxu0 }
 0x222   : > { %19610 = vst [vmem:[#allocation5_spill] sm:$0xff] %v16147_v33  ;;  %v16151_v49 = vmax.f32 %v19611_v44, %v7874_v59  ;;  %v5015_v4 = vadd.f32 %v16098_v24, %v12740_v17  ;;  %v8269_v52 = vmax.f32 %v16108_v62, 0.0  ;;  %v7854_v58 = vmax.f32 %v16116_v15, 0.0  ;;  %v13698_v40 = vld [vmem:[%s13905_s22 + $0x420] sm:$0xff]   ;;  %v5009_v3 = vpop.f32.mrb[155].mxu0  ;;  %12847 = vmatmul.mubr.msk.bf16.gmra.mrb[4].mxu0 %vm3115_vm0, %v13696_v0  ;;  %v13712_v33 = vld [vmem:[%s13905_s22 + $0x458] sm:$0xff]  }
 0x223   : > { %19607 = vst [vmem:[#allocation2_spill] sm:$0xff] %v16139_v31  ;;  %v16157_v55 = vmax.f32 %v19613_v42, %v8290_v13  ;;  %v6679_v39 = vadd.f32 %v16098_v24, %v13156_v29  ;;  %v5007_v5 = vadd.f32 %v16098_v24, %v5006_v26  ;;  %v8270_v12 = vmax.f32 %v6578_v38, 0.0  ;;  %v13157_v13 = vpop.f32.mrb[154].mxu1  ;;  %v13699_v44 = vld [vmem:[%s13905_s22 + $0xaa0] sm:$0xff]   ;;  %12850 = vmatprep.mubr.msk.bf16.mxu0 %vm3115_vm0, %v13698_v40  ;;  %v13700_v40 = vld [vmem:[%s13905_s22 + $0x428] sm:$0xff]   ;;  %v13713_v36 = vld [vmem:[%s13905_s22 + $0xad8] sm:$0xff]  }
 0x224   : > { %19612 = vst [vmem:[#allocation6_spill] sm:$0xff] %v16151_v49  ;;  %v7879_v59 = vmax.f32 %v5015_v4, 0.0  ;;  %v6671_v51 = vadd.f32 %v16098_v24, %v6670_v30  ;;  %v5018_v19 = vadd.f32 %v16098_v24, %v12741_v57  ;;  %v6682_v15 = vadd.f32 %v16098_v24, %v13157_v13  ;;  %v6673_v29 = vpop.f32.mrb[155].mxu1  ;;  %13263 = vmatmul.mubr.msk.bf16.gmra.mrb[4].mxu1 %vm3115_vm0, %v13697_v1 }
 0x225   : > { %19614 = vst [vmem:[#allocation8_spill] sm:$0xff] %v16157_v55  ;;  %v8295_v62 = vmax.f32 %v6679_v39, 0.0  ;;  %v7877_v17 = vmax.f32 %v5007_v5, 0.0  ;;  %v5010_v42 = vadd.f32 %v16098_v24, %v5009_v3  ;;  %v6674_v38 = vadd.f32 %v16098_v24, %v6673_v29  ;;  %13266 = vmatprep.mubr.msk.bf16.mxu1 %vm3115_vm0, %v13699_v44  ;;  %v13160_v1 = vpop.f32.mrb[156].mxu1  ;;  %v13703_v44 = vld [vmem:[%s13905_s22 + $0xab0] sm:$0xff]  }
 0x226   : > { %v16172_v26 = vmax.f32 %v7853_v8, %v7879_v59  ;;  %v8293_v55 = vmax.f32 %v6671_v51, 0.0  ;;  %v7880_v49 = vmax.f32 %v5018_v19, 0.0  ;;  %v19617_v30 = vmax.f32 %v15976_v60, 0.0  ;;  %v12744_v19 = vpop.f32.mrb[156].mxu0 }
 0x227   : > { %v16176_v4 = vmax.f32 %v8269_v52, %v8295_v62  ;;  %v8296_v39 = vmax.f32 %v6682_v15, 0.0  ;;  %v7878_v5 = vmax.f32 %v5010_v42, 0.0  ;;  %v8268_v8 = vmax.f32 %v6570_v28, 0.0  ;;  %v5022_v3 = vpop.f32.mrb[157].mxu0  ;;  %v6686_v28 = vpop.f32.mrb[157].mxu1  ;;  %v13704_v42 = vld [vmem:[%s13905_s22 + $0x438] sm:$0xff]  }
 0x228   : > { %19615 = vst [vmem:[#allocation55_spill] sm:$0xff] %v16172_v26  ;;  %v16180_v57 = vmax.f32 %v19617_v30, %v7877_v17  ;;  %v16184_v59 = vmax.f32 %v8267_v20, %v8293_v55  ;;  %v16186_v51 = vmax.f32 %v7854_v58, %v7880_v49  ;;  %v8294_v0 = vmax.f32 %v6674_v38, 0.0  ;;  %v12745_v20 = vpop.f32.mrb[158].mxu0  ;;  %v13701_v55 = vld [vmem:[%s13905_s22 + $0xaa8] sm:$0xff]   ;;  %v13702_v49 = vld [vmem:[%s13905_s22 + $0x430] sm:$0xff]   ;;  %v13161_v58 = vpop.f32.mrb[158].mxu1 }
 0x229   : > { %19616 = vst [vmem:[#allocation56_spill] sm:$0xff] %v16176_v4  ;;  %v16189_v60 = vmax.f32 %v8270_v12, %v8296_v39  ;;  %v16191_v52 = vmax.f32 %v7852_v23, %v7878_v5  ;;  %v5025_v62 = vpop.f32.mrb[159].mxu0  ;;  %v6689_v12 = vpop.f32.mrb[159].mxu1  ;;  %v13705_v30 = vld [vmem:[%s13905_s22 + $0xab8] sm:$0xff]   ;;  %v13706_v39 = vld [vmem:[%s13905_s22 + $0x440] sm:$0xff]   ;;  %v16263_v6 = vadd.f32 %v16098_v24, %v12744_v19  ;;  %v16274_v16 = vadd.f32 %v16098_v24, %v5022_v3 }
 0x22a   : > { %19618 = vst [vmem:[#allocation7_spill] sm:$0xff] %v16180_v57  ;;  %19619 = vst [vmem:[#allocation58_spill] sm:$0xff] %v16184_v59  ;;  %v16193_v13 = vmax.f32 %v8268_v8, %v8294_v0  ;;  %12851 = vmatmul.mubr.msk.bf16.gmra.mrb[8].mxu0 %vm3115_vm0, %v13700_v40  ;;  %v13707_v0 = vld [vmem:[%s13905_s22 + $0xac0] sm:$0xff]   ;;  %v16277_v45 = vadd.f32 %v16098_v24, %v6686_v28  ;;  %v16280_v25 = vadd.f32 %v16098_v24, %v12745_v20 }
 0x22b   : > { %19620 = vst [vmem:[#allocation59_spill] sm:$0xff] %v16186_v51  ;;  %19621 = vst [vmem:[#allocation32_spill] sm:$0xff] %v16189_v60  ;;  %12854 = vmatprep.mubr.msk.bf16.mxu0 %vm3115_vm0, %v13702_v49  ;;  %v12748_v23 = vpop.f32.mrb[160].mxu0  ;;  %v16203_v17 = vpop.f32.mrb[160].mxu1  ;;  %v13709_v51 = vld [vmem:[%s13905_s22 + $0xac8] sm:$0xff]   ;;  %v16283_v19 = vadd.f32 %v16098_v24, %v13161_v58  ;;  %v16291_v27 = vadd.f32 %v16098_v24, %v6689_v12 }
 0x22c   : > { %19622 = vst [vmem:[#allocation33_spill] sm:$0xff] %v16191_v52  ;;  %19623 = vst [vmem:[#allocation34_spill] sm:$0xff] %v16193_v13  ;;  %13267 = vmatmul.mubr.msk.bf16.gmra.mrb[8].mxu1 %vm3115_vm0, %v13701_v55  ;;  %v16205_v15 = vpop.f32.mrb[161].mxu0  ;;  %v16208_v29 = vpop.f32.mrb[161].mxu1  ;;  %v13708_v13 = vld [vmem:[%s13905_s22 + $0x448] sm:$0xff]   ;;  %v16295_v3 = vadd.f32 %v16098_v24, %v12748_v23  ;;  %v16312_v20 = vadd.f32 %v16098_v24, %v16203_v17 }
 0x22d   : > { %13270 = vmatprep.mubr.msk.bf16.mxu1 %vm3115_vm0, %v13703_v44  ;;  %v16210_v38 = vpop.f32.mrb[162].mxu0  ;;  %v16214_v5 = vpop.f32.mrb[162].mxu1  ;;  %v13716_v12 = vld [vmem:[%s13905_s22 + $0x468] sm:$0xff]   ;;  %v16324_v23 = vadd.f32 %v16098_v24, %v16208_v29 }
 0x22e   : > { %v16216_v8 = vpop.f32.mrb[163].mxu0  ;;  %v16219_v40 = vpop.f32.mrb[163].mxu1  ;;  %v16332_v17 = vadd.f32 %v16098_v24, %v16214_v5 }
 0x22f   : > { %v16338_v35 = vadd.f32 %v16098_v24, %v16216_v8  ;;  %v16342_v29 = vadd.f32 %v16098_v24, %v16219_v40 }
 0x230   : > { %19625 = vst [vmem:[#allocation35_spill] sm:$0xff] %v16332_v17 }
 0x232   : > { %12855 = vmatmul.mubr.msk.bf16.gmra.mrb[12].mxu0 %vm3115_vm0, %v13704_v42  ;;  %v13710_v42 = vld [vmem:[%s13905_s22 + $0x450] sm:$0xff]  }
 0x233   : > { %12858 = vmatprep.mubr.msk.bf16.mxu0 %vm3115_vm0, %v13706_v39  ;;  %v16225_v55 = vpop.f32.mrb[164].mxu0  ;;  %v16227_v49 = vpop.f32.mrb[164].mxu1 }
 0x234   : > { %13271 = vmatmul.mubr.msk.bf16.gmra.mrb[12].mxu1 %vm3115_vm0, %v13705_v30  ;;  %v16229_v44 = vpop.f32.mrb[165].mxu0  ;;  %v16232_v52 = vpop.f32.mrb[165].mxu1  ;;  %v16350_v5 = vadd.f32 %v16098_v24, %v16227_v49 }
 0x235   : > { %13274 = vmatprep.mubr.msk.bf16.mxu1 %vm3115_vm0, %v13707_v0  ;;  %v16234_v60 = vpop.f32.mrb[166].mxu0  ;;  %v16238_v30 = vpop.f32.mrb[166].mxu1  ;;  %v13711_v0 = vld [vmem:[%s13905_s22 + $0xad0] sm:$0xff]   ;;  %v16355_v11 = vadd.f32 %v16098_v24, %v16229_v44  ;;  %v16359_v8 = vadd.f32 %v16098_v24, %v16232_v52 }
 0x236   : > { %v16240_v39 = vpop.f32.mrb[167].mxu0  ;;  %v16243_v59 = vpop.f32.mrb[167].mxu1  ;;  %19627 = vst [vmem:[#allocation37_spill] sm:$0xff] %v16350_v5  ;;  %v16363_v40 = vadd.f32 %v16098_v24, %v16234_v60  ;;  %v13723_v5 = vld [vmem:[%s13905_s22 + $0xb00] sm:$0xff]  }
 0x237   : > { %v16373_v44 = vadd.f32 %v16098_v24, %v16240_v39  ;;  %v16377_v52 = vadd.f32 %v16098_v24, %v16243_v59 }
 0x238   : > { %19628 = vst [vmem:[#allocation9_spill] sm:$0xff] %v16363_v40 }
 0x239   : > { %19630 = vst [vmem:[#allocation11_spill] sm:$0xff] %v16373_v44  ;;  %19631 = vst [vmem:[#allocation61_spill] sm:$0xff] %v16377_v52 }
 0x23a   : > { %12859 = vmatmul.mubr.msk.bf16.gmra.mrb[16].mxu0 %vm3115_vm0, %v13708_v13  ;;  %v13714_v13 = vld [vmem:[%s13905_s22 + $0x460] sm:$0xff]  }
 0x23b   : > { %12862 = vmatprep.mubr.msk.bf16.mxu0 %vm3115_vm0, %v13710_v42  ;;  %v16249_v57 = vpop.f32.mrb[168].mxu0  ;;  %v16251_v4 = vpop.f32.mrb[168].mxu1 }
 0x23c   : > { %13275 = vmatmul.mubr.msk.bf16.gmra.mrb[16].mxu1 %vm3115_vm0, %v13709_v51  ;;  %v16253_v26 = vpop.f32.mrb[169].mxu0  ;;  %v16256_v22 = vpop.f32.mrb[169].mxu1  ;;  %v16266_v51 = vadd.f32 %v16098_v24, %v13160_v1  ;;  %v16288_v1 = vadd.f32 %v16098_v24, %v5025_v62  ;;  %v16385_v21 = vadd.f32 %v16098_v24, %v16249_v57  ;;  %v16402_v60 = vadd.f32 %v16098_v24, %v16251_v4 }
 0x23d   : > { %13278 = vmatprep.mubr.msk.bf16.mxu1 %vm3115_vm0, %v13711_v0  ;;  %v16258_v31 = vpop.f32.mrb[170].mxu0  ;;  %v16268_v42 = vpop.f32.mrb[170].mxu1  ;;  %v16412_v37 = vadd.f32 %v16098_v24, %v16256_v22 }
 0x23e   : > { %v16270_v0 = vpop.f32.mrb[171].mxu0  ;;  %v16285_v9 = vpop.f32.mrb[171].mxu1  ;;  %19632 = vst [vmem:[#allocation38_spill] sm:$0xff] %v16385_v21  ;;  %v16416_v59 = vadd.f32 %v16098_v24, %v16258_v31  ;;  %v16420_v4 = vadd.f32 %v16098_v24, %v16268_v42 }
 0x23f   : > { %v16426_v40 = vadd.f32 %v16098_v24, %v16270_v0  ;;  %v16430_v22 = vadd.f32 %v16098_v24, %v16285_v9 }
 0x240   : > { %19633 = vst [vmem:[#allocation39_spill] sm:$0xff] %v16416_v59  ;;  %19634 = vst [vmem:[#allocation40_spill] sm:$0xff] %v16420_v4 }
 0x242   : > { %12863 = vmatmul.mubr.msk.bf16.gmra.mrb[20].mxu0 %vm3115_vm0, %v13712_v33 }
 0x243   : > { %12866 = vmatprep.mubr.msk.bf16.mxu0 %vm3115_vm0, %v13714_v13  ;;  %v13176_v28 = vpop.f32.mrb[172].mxu1  ;;  %v16328_v13 = vadd.f32 %v16098_v24, %v16210_v38  ;;  %v16346_v38 = vadd.f32 %v16098_v24, %v16225_v55  ;;  %v16367_v55 = vadd.f32 %v16098_v24, %v16238_v30  ;;  %v13720_v30 = vld [vmem:[%s13905_s22 + $0x478] sm:$0xff]  }
 0x244   : > { %13279 = vmatmul.mubr.msk.bf16.gmra.mrb[20].mxu1 %vm3115_vm0, %v13713_v36  ;;  %v16306_v36 = vpop.f32.mrb[172].mxu0 }
 0x245   : > { %13282 = vmatprep.mubr.msk.bf16.mxu1 %vm3115_vm0, %v13715_v63  ;;  %v16316_v63 = vadd.f32 %v16098_v24, %v16205_v15  ;;  %v16318_v33 = vpop.f32.mrb[173].mxu0  ;;  %19624 = vst [vmem:[#allocation3_spill] sm:$0xff] %v16328_v13  ;;  %v6750_v15 = vpop.f32.mrb[173].mxu1  ;;  %19626 = vst [vmem:[#allocation36_spill] sm:$0xff] %v16346_v38  ;;  %v16434_v31 = vadd.f32 %v16098_v24, %v16306_v36 }
 0x246   : > { %v12761_v58 = vpop.f32.mrb[174].mxu0  ;;  %v13177_v62 = vpop.f32.mrb[174].mxu1  ;;  %19629 = vst [vmem:[#allocation10_spill] sm:$0xff] %v16367_v55  ;;  %v13722_v55 = vld [vmem:[%s13905_s22 + $0x480] sm:$0xff]   ;;  %v16442_v38 = vadd.f32 %v16098_v24, %v16318_v33  ;;  %v16445_v0 = vadd.f32 %v16098_v24, %v6750_v15 }
 0x247   : > { %v5089_v10 = vpop.f32.mrb[175].mxu0  ;;  %v6753_v49 = vpop.f32.mrb[175].mxu1  ;;  %19635 = vst [vmem:[#allocation41_spill] sm:$0xff] %v16434_v31  ;;  %v16448_v9 = vadd.f32 %v16098_v24, %v12761_v58  ;;  %v16451_v17 = vadd.f32 %v16098_v24, %v13177_v62  ;;  %v13727_v31 = vld [vmem:[%s13905_s22 + $0xb10] sm:$0xff]  }
 0x248   : > { %v16456_v52 = vadd.f32 %v16098_v24, %v5089_v10  ;;  %v16459_v33 = vadd.f32 %v16098_v24, %v6753_v49 }
 0x249   : > { %19637 = vst [vmem:[#allocation16_spill] sm:$0xff] %v16448_v9  ;;  %19638 = vst [vmem:[#allocation44_spill] sm:$0xff] %v16451_v17  ;;  %v13726_v17 = vld [vmem:[%s13905_s22 + $0x490] sm:$0xff]  }
 0x24a   : > { %12867 = vmatmul.mubr.msk.bf16.gmra.mrb[24].mxu0 %vm3115_vm0, %v13716_v12  ;;  %19639 = vst [vmem:[#allocation42_spill] sm:$0xff] %v16456_v52  ;;  %19640 = vst [vmem:[#allocation14_spill] sm:$0xff] %v16459_v33 }
 0x24b   : > { %12870 = vmatprep.mubr.msk.bf16.mxu0 %vm3115_vm0, %v13718_v56  ;;  %v13180_v12 = vpop.f32.mrb[176].mxu1  ;;  %v16437_v56 = vadd.f32 %v16098_v24, %v13176_v28 }
 0x24c   : > { %13283 = vmatmul.mubr.msk.bf16.gmra.mrb[24].mxu1 %vm3115_vm0, %v13717_v50  ;;  %v12764_v50 = vpop.f32.mrb[176].mxu0 }
 0x24d   : > { %13286 = vmatprep.mubr.msk.bf16.mxu1 %vm3115_vm0, %v13719_v32  ;;  %v16406_v32 = vadd.f32 %v16098_v24, %v16253_v26  ;;  %v5102_v57 = vpop.f32.mrb[177].mxu0  ;;  %v6766_v26 = vpop.f32.mrb[177].mxu1  ;;  %19636 = vst [vmem:[#allocation12_spill] sm:$0xff] %v16437_v56  ;;  %v16466_v44 = vadd.f32 %v16098_v24, %v12764_v50  ;;  %v13724_v50 = vld [vmem:[%s13905_s22 + $0x488] sm:$0xff]  }
 0x24e   : > { %v12765_v39 = vpop.f32.mrb[178].mxu0  ;;  %v13181_v42 = vpop.f32.mrb[178].mxu1  ;;  %v16488_v15 = vadd.f32 %v16098_v24, %v5102_v57 }
 0x24f   : > { %v5105_v21 = vpop.f32.mrb[179].mxu0  ;;  %v6769_v36 = vpop.f32.mrb[179].mxu1  ;;  %19641 = vst [vmem:[#allocation43_spill] sm:$0xff] %v16466_v44 }
 0x250   : > { %v16500_v9 = vadd.f32 %v16098_v24, %v5105_v21  ;;  %v19644_v21 = vmax.f32 %v16274_v16, 0.0 }
 0x252   : > { %12871 = vmatmul.mubr.msk.bf16.gmra.mrb[28].mxu0 %vm3115_vm0, %v13720_v30  ;;  %v16482_v30 = vadd.f32 %v16098_v24, %v13180_v12  ;;  %v13725_v12 = vld [vmem:[%s13905_s22 + $0xb08] sm:$0xff]  }
 0x253   : > { %12874 = vmatprep.mubr.msk.bf16.mxu0 %vm3115_vm0, %v13722_v55  ;;  %v12768_v55 = vpop.f32.mrb[180].mxu0  ;;  %v13184_v28 = vpop.f32.mrb[180].mxu1 }
 0x254   : > { %13287 = vmatmul.mubr.msk.bf16.gmra.mrb[28].mxu1 %vm3115_vm0, %v13721_v53  ;;  %19642 = vst [vmem:[#allocation15_spill] sm:$0xff] %v16482_v30  ;;  %v5118_v62 = vpop.f32.mrb[181].mxu0  ;;  %v16491_v53 = vadd.f32 %v16098_v24, %v6766_v26  ;;  %v6791_v10 = vadd.f32 %v16098_v24, %v13184_v28  ;;  %v6782_v49 = vpop.f32.mrb[181].mxu1  ;;  %v16505_v26 = vadd.f32 %v16098_v24, %v6769_v36 }
 0x255   : > { %13290 = vmatprep.mubr.msk.bf16.mxu1 %vm3115_vm0, %v13723_v5  ;;  %v5127_v5 = vadd.f32 %v16098_v24, %v12768_v55  ;;  %v12769_v13 = vpop.f32.mrb[182].mxu0  ;;  %v16497_v55 = vadd.f32 %v16098_v24, %v12765_v39  ;;  %v13185_v57 = vpop.f32.mrb[182].mxu1  ;;  %v16508_v4 = vadd.f32 %v16098_v24, %v5118_v62  ;;  %v19646_v62 = vmax.f32 %v16277_v45, 0.0 }
 0x256   : > { %v5130_v58 = vadd.f32 %v16098_v24, %v12769_v13  ;;  %v5121_v44 = vpop.f32.mrb[183].mxu0  ;;  %v8323_v28 = vmax.f32 %v6791_v10, 0.0  ;;  %v6794_v59 = vadd.f32 %v16098_v24, %v13185_v57  ;;  %v6785_v39 = vpop.f32.mrb[183].mxu1  ;;  %v16515_v13 = vadd.f32 %v16098_v24, %v6782_v49 }
 0x257   : > { %19643 = vst [vmem:[#allocation13_spill] sm:$0xff] %v16497_v55  ;;  %v7907_v56 = vmax.f32 %v5127_v5, 0.0  ;;  %v16520_v10 = vadd.f32 %v16098_v24, %v13181_v42  ;;  %v19649_v42 = vld [vmem:[#allocation17_spill] sm:$0xff] }
 0x258   : > { %v7908_v33 = vmax.f32 %v5130_v58, 0.0  ;;  %v8895_v57 = vmax.f32 %v19646_v62, %v8323_v28  ;;  %v8324_v52 = vmax.f32 %v6794_v59, 0.0  ;;  %v19647_v58 = vld [vmem:[#allocation50_spill] sm:$0xff] }
 0x259   : > { %v8791_v5 = vmax.f32 %v19644_v21, %v7907_v56  ;;  %19645 = vst [vmem:[#allocation62_spill] sm:$0xff] %v16520_v10  ;;  %v19655_v10 = vmax.f32 %v16316_v63, 0.0 }
 0x25a   : > { %12875 = vmatmul.mubr.msk.bf16.gmra.mrb[32].mxu0 %vm3115_vm0, %v13724_v50  ;;  %v19648_v50 = vmax.f32 %v16288_v1, 0.0  ;;  %v9103_v59 = vmax.f32 %v19649_v42, %v8895_v57  ;;  %v16540_v1 = vadd.f32 %v16098_v24, %v5121_v44  ;;  %v13728_v57 = vld [vmem:[%s13905_s22 + $0x498] sm:$0xff]   ;;  %v19653_v42 = vld [vmem:[#allocation18_spill] sm:$0xff] }
 0x25b   : > { %12878 = vmatprep.mubr.msk.bf16.mxu0 %vm3115_vm0, %v13726_v17  ;;  %v8999_v49 = vmax.f32 %v19647_v58, %v8791_v5  ;;  %v19650_v17 = vmax.f32 %v16291_v27, 0.0  ;;  %v12772_v62 = vpop.f32.mrb[184].mxu0  ;;  %v19651_v5 = vld [vmem:[#allocation45_spill] sm:$0xff]  ;;  %v16546_v27 = vadd.f32 %v16098_v24, %v6785_v39  ;;  %v13731_v39 = vld [vmem:[%s13905_s22 + $0xb20] sm:$0xff]  }
 0x25c   : > { %13291 = vmatmul.mubr.msk.bf16.gmra.mrb[32].mxu1 %vm3115_vm0, %v13725_v12  ;;  %v8792_v21 = vmax.f32 %v19648_v50, %v7908_v33  ;;  %19652 = vst [vmem:[#allocation50_spill] sm:$0xff] %v16540_v1  ;;  %v13188_v33 = vpop.f32.mrb[184].mxu1  ;;  %v5134_v50 = vpop.f32.mrb[185].mxu0  ;;  %v13729_v44 = vld [vmem:[%s13905_s22 + $0xb18] sm:$0xff]  }
 0x25d   : > { %13294 = vmatprep.mubr.msk.bf16.mxu1 %vm3115_vm0, %v13727_v31  ;;  %v8896_v28 = vmax.f32 %v19650_v17, %v8324_v52  ;;  %v5143_v31 = vadd.f32 %v16098_v24, %v12772_v62  ;;  %19654 = vst [vmem:[#allocation17_spill] sm:$0xff] %v16546_v27  ;;  %v6807_v52 = vadd.f32 %v16098_v24, %v13188_v33  ;;  %v6798_v55 = vpop.f32.mrb[185].mxu1 }
 0x25e   : > { %v9000_v58 = vmax.f32 %v19651_v5, %v8792_v21  ;;  %v5135_v17 = vadd.f32 %v16098_v24, %v5134_v50  ;;  %v12773_v21 = vpop.f32.mrb[186].mxu0  ;;  %v13730_v5 = vld [vmem:[%s13905_s22 + $0x4a0] sm:$0xff]   ;;  %v6799_v56 = vadd.f32 %v16098_v24, %v6798_v55 }
 0x25f   : > { %v9104_v12 = vmax.f32 %v19653_v42, %v8896_v28  ;;  %v7911_v62 = vmax.f32 %v5143_v31, 0.0  ;;  %v5146_v16 = vadd.f32 %v16098_v24, %v12773_v21  ;;  %v13189_v28 = vpop.f32.mrb[186].mxu1  ;;  %v5137_v42 = vpop.f32.mrb[187].mxu0  ;;  %v8327_v27 = vmax.f32 %v6807_v52, 0.0 }
 0x260   : > { %v11609_v45 = vpack.c.bf16 %v9000_v58, %v8999_v49  ;;  %v7909_v33 = vmax.f32 %v5135_v17, 0.0  ;;  %v6810_v50 = vadd.f32 %v16098_v24, %v13189_v28  ;;  %v6801_v1 = vpop.f32.mrb[187].mxu1  ;;  %v8325_v49 = vmax.f32 %v6799_v56, 0.0 }
 0x261   : > { %v11869_v36 = vpack.c.bf16 %v9104_v12, %v9103_v59  ;;  %v8795_v30 = vmax.f32 %v19655_v10, %v7911_v62  ;;  %v7912_v58 = vmax.f32 %v5146_v16, 0.0  ;;  %v5138_v55 = vadd.f32 %v16098_v24, %v5137_v42 }
 0x262   : > { %12073 = vst [vmem:[%s15166_s30 + $0x68] sm:$0xff] %v11609_v45   ;;  %12879 = vmatmul.mubr.msk.bf16.gmra.mrb[36].mxu0 %vm3115_vm0, %v13728_v57  ;;  %v19656_v31 = vmax.f32 %v16324_v23, 0.0  ;;  %v19657_v59 = vmax.f32 %v16263_v6, 0.0  ;;  %v8328_v52 = vmax.f32 %v6810_v50, 0.0  ;;  %v6802_v17 = vadd.f32 %v16098_v24, %v6801_v1 }
 0x263   : > { %12125 = vst [vmem:[%s15166_s30 + $0x208] sm:$0xff] %v11869_v36   ;;  %12882 = vmatprep.mubr.msk.bf16.mxu0 %vm3115_vm0, %v13730_v5  ;;  %v9003_v63 = vmax.f32 %v15849_v34, %v8795_v30  ;;  %v19658_v10 = vmax.f32 %v16266_v51, 0.0  ;;  %v19659_v36 = vmax.f32 %v16338_v35, 0.0  ;;  %v7910_v56 = vmax.f32 %v5138_v55, 0.0  ;;  %v12776_v34 = vpop.f32.mrb[188].mxu0  ;;  %v13192_v62 = vpop.f32.mrb[188].mxu1 }
 0x264   : > { %v8899_v21 = vmax.f32 %v19656_v31, %v8327_v27  ;;  %v8793_v12 = vmax.f32 %v19657_v59, %v7909_v33  ;;  %13295 = vmatmul.mubr.msk.bf16.gmra.mrb[36].mxu1 %vm3115_vm0, %v13729_v44  ;;  %v19660_v1 = vmax.f32 %v16342_v29, 0.0  ;;  %v8326_v27 = vmax.f32 %v6802_v17, 0.0  ;;  %v13733_v33 = vld [vmem:[%s13905_s22 + $0xb28] sm:$0xff]  }
 0x265   : > { %v8897_v16 = vmax.f32 %v19658_v10, %v8325_v49  ;;  %v8796_v23 = vmax.f32 %v19659_v36, %v7912_v58  ;;  %13298 = vmatprep.mubr.msk.bf16.mxu1 %vm3115_vm0, %v13731_v39  ;;  %v19661_v35 = vmax.f32 %v16280_v25, 0.0  ;;  %v5159_v5 = vadd.f32 %v16098_v24, %v12776_v34 }
 0x266   : > { %v9107_v6 = vmax.f32 %v15855_v43, %v8899_v21  ;;  %v9001_v45 = vmax.f32 %v15859_v18, %v8793_v12  ;;  %v8900_v57 = vmax.f32 %v19660_v1, %v8328_v52  ;;  %v5150_v43 = vpop.f32.mrb[189].mxu0  ;;  %v13732_v18 = vld [vmem:[%s13905_s22 + $0x4a8] sm:$0xff]   ;;  %v19662_v28 = vmax.f32 %v16283_v19, 0.0  ;;  %v13734_v21 = vld [vmem:[%s13905_s22 + $0x4b0] sm:$0xff]  }
 0x267   : > { %v9105_v51 = vmax.f32 %v15866_v61, %v8897_v16  ;;  %v9004_v30 = vmax.f32 %v15870_v7, %v8796_v23  ;;  %v8794_v44 = vmax.f32 %v19661_v35, %v7910_v56  ;;  %v6823_v39 = vadd.f32 %v16098_v24, %v13192_v62  ;;  %v6814_v7 = vpop.f32.mrb[189].mxu1  ;;  %v12777_v25 = vpop.f32.mrb[190].mxu0  ;;  %v13735_v19 = vld [vmem:[%s13905_s22 + $0xb30] sm:$0xff]  }
 0x268   : > { %v9108_v29 = vmax.f32 %v15880_v47, %v8900_v57  ;;  %v8898_v42 = vmax.f32 %v19662_v28, %v8326_v27  ;;  %v5151_v61 = vadd.f32 %v16098_v24, %v5150_v43  ;;  %v7915_v58 = vmax.f32 %v5159_v5, 0.0  ;;  %v13193_v31 = vpop.f32.mrb[190].mxu1  ;;  %v5153_v47 = vpop.f32.mrb[191].mxu0  ;;  %v19667_v5 = vld [vmem:[#allocation11_spill] sm:$0xff] }
 0x269   : > { %v11619_v50 = vpack.c.bf16 %v9004_v30, %v9003_v63  ;;  %v9002_v49 = vmax.f32 %v15884_v48, %v8794_v44  ;;  %v6815_v55 = vadd.f32 %v16098_v24, %v6814_v7  ;;  %v8331_v52 = vmax.f32 %v6823_v39, 0.0  ;;  %v6817_v10 = vpop.f32.mrb[191].mxu1  ;;  %v13736_v39 = vld [vmem:[%s13905_s22 + $0x4b8] sm:$0xff]  }
 0x26a   : > { %v11879_v59 = vpack.c.bf16 %v9108_v29, %v9107_v6  ;;  %v9106_v12 = vmax.f32 %v15893_v46, %v8898_v42  ;;  %v7913_v17 = vmax.f32 %v5151_v61, 0.0  ;;  %v19663_v63 = vmax.f32 %v16355_v11, 0.0  ;;  %12883 = vmatmul.mubr.msk.bf16.gmra.mrb[40].mxu0 %vm3115_vm0, %v13732_v18 }
 0x26b   : > { %12075 = vst [vmem:[%s15166_s30 + $0x78] sm:$0xff] %v11619_v50   ;;  %v11614_v16 = vpack.c.bf16 %v9002_v49, %v9001_v45  ;;  %v8329_v36 = vmax.f32 %v6815_v55, 0.0  ;;  %v5162_v23 = vadd.f32 %v16098_v24, %v12777_v25  ;;  %v19664_v6 = vmax.f32 %v16359_v8, 0.0  ;;  %12886 = vmatprep.mubr.msk.bf16.mxu0 %vm3115_vm0, %v13734_v21  ;;  %v12780_v44 = vpop.f32.mrb[192].mxu0  ;;  %v13737_v49 = vld [vmem:[%s13905_s22 + $0xb38] sm:$0xff]  }
 0x26c   : > { %v8799_v48 = vmax.f32 %v19663_v63, %v7915_v58  ;;  %12127 = vst [vmem:[%s15166_s30 + $0x218] sm:$0xff] %v11879_v59   ;;  %v11874_v56 = vpack.c.bf16 %v9106_v12, %v9105_v51  ;;  %v19665_v1 = vmax.f32 %v16295_v3, 0.0  ;;  %v6826_v27 = vadd.f32 %v16098_v24, %v13193_v31  ;;  %13299 = vmatmul.mubr.msk.bf16.gmra.mrb[40].mxu1 %vm3115_vm0, %v13733_v33  ;;  %v13196_v28 = vpop.f32.mrb[192].mxu1  ;;  %v5166_v42 = vpop.f32.mrb[193].mxu0  ;;  %v19671_v58 = vld [vmem:[#allocation19_spill] sm:$0xff] }
 0x26d   : > { %v8903_v46 = vmax.f32 %v19664_v6, %v8331_v52  ;;  %12074 = vst [vmem:[%s15166_s30 + $0x70] sm:$0xff] %v11614_v16   ;;  %v19666_v45 = vmax.f32 %v16312_v20, 0.0  ;;  %v7916_v30 = vmax.f32 %v5162_v23, 0.0  ;;  %v5154_v51 = vadd.f32 %v16098_v24, %v5153_v47  ;;  %13302 = vmatprep.mubr.msk.bf16.mxu1 %vm3115_vm0, %v13735_v19  ;;  %v12781_v50 = vpop.f32.mrb[194].mxu0  ;;  %v19672_v31 = vld [vmem:[#allocation3_spill] sm:$0xff] }
 0x26e   : > { %v8797_v57 = vmax.f32 %v19665_v1, %v7913_v17  ;;  %v9007_v11 = vmax.f32 %v15920_v41, %v8799_v48  ;;  %12126 = vst [vmem:[%s15166_s30 + $0x210] sm:$0xff] %v11874_v56   ;;  %v8332_v35 = vmax.f32 %v6826_v27, 0.0  ;;  %v6818_v41 = vadd.f32 %v16098_v24, %v6817_v10  ;;  %v5169_v52 = vpop.f32.mrb[195].mxu0  ;;  %v13738_v17 = vld [vmem:[%s13905_s22 + $0x4c0] sm:$0xff]   ;;  %v19674_v10 = vld [vmem:[#allocation20_spill] sm:$0xff]  ;;  %v19675_v63 = vld [vmem:[#allocation35_spill] sm:$0xff] }
 0x26f   : > { %v8901_v34 = vmax.f32 %v19666_v45, %v8329_v36  ;;  %v9111_v3 = vmax.f32 %v15926_v2, %v8903_v46  ;;  %v19668_v62 = vmax.f32 %v19667_v5, 0.0  ;;  %v7914_v18 = vmax.f32 %v5154_v51, 0.0  ;;  %v19669_v2 = vld [vmem:[#allocation61_spill] sm:$0xff]  ;;  %v13739_v46 = vld [vmem:[%s13905_s22 + $0xb40] sm:$0xff]  }
 0x270   : > { %v9005_v8 = vmax.f32 %v15930_v14, %v8797_v57  ;;  %v5175_v29 = vadd.f32 %v16098_v24, %v12780_v44  ;;  %v19670_v61 = vmax.f32 %v19669_v2, 0.0  ;;  %v8330_v7 = vmax.f32 %v6818_v41, 0.0  ;;  %v19677_v57 = vld [vmem:[#allocation21_spill] sm:$0xff]  ;;  %v19686_v2 = vld [vmem:[#allocation22_spill] sm:$0xff] }
 0x271   : > { %v9109_v20 = vmax.f32 %v15937_v54, %v8901_v34  ;;  %v8800_v43 = vmax.f32 %v19668_v62, %v7916_v30  ;;  %v6839_v25 = vadd.f32 %v16098_v24, %v13196_v28  ;;  %v5167_v33 = vadd.f32 %v16098_v24, %v5166_v42  ;;  %v6830_v54 = vpop.f32.mrb[193].mxu1  ;;  %v19681_v62 = vld [vmem:[#allocation36_spill] sm:$0xff]  ;;  %v19684_v28 = vld [vmem:[#allocation37_spill] sm:$0xff] }
 0x272   : > { %v8904_v14 = vmax.f32 %v19670_v61, %v8332_v35  ;;  %v19673_v47 = vmax.f32 %v19672_v31, 0.0  ;;  %v7919_v19 = vmax.f32 %v5175_v29, 0.0  ;;  %v6831_v59 = vadd.f32 %v16098_v24, %v6830_v54  ;;  %v13197_v12 = vpop.f32.mrb[194].mxu1  ;;  %12887 = vmatmul.mubr.msk.bf16.gmra.mrb[44].mxu0 %vm3115_vm0, %v13736_v39  ;;  %v19679_v35 = vld [vmem:[#allocation46_spill] sm:$0xff]  ;;  %v13740_v31 = vld [vmem:[%s13905_s22 + $0x4c8] sm:$0xff]  }
 0x273   : > { %v9008_v55 = vmax.f32 %v19671_v58, %v8800_v43  ;;  %v19676_v48 = vmax.f32 %v19675_v63, 0.0  ;;  %v8335_v23 = vmax.f32 %v6839_v25, 0.0  ;;  %v7917_v56 = vmax.f32 %v5167_v33, 0.0  ;;  %v6833_v6 = vpop.f32.mrb[195].mxu1  ;;  %12890 = vmatprep.mubr.msk.bf16.mxu0 %vm3115_vm0, %v13738_v17  ;;  %v12784_v25 = vpop.f32.mrb[196].mxu0  ;;  %v19688_v33 = vld [vmem:[#allocation23_spill] sm:$0xff] }
 0x274   : > { %v8798_v21 = vmax.f32 %v19673_v47, %v7914_v18  ;;  %v9112_v16 = vmax.f32 %v19674_v10, %v8904_v14  ;;  %v19678_v45 = vmax.f32 %v16406_v32, 0.0  ;;  %v8333_v30 = vmax.f32 %v6831_v59, 0.0  ;;  %13303 = vmatmul.mubr.msk.bf16.gmra.mrb[44].mxu1 %vm3115_vm0, %v13737_v49  ;;  %v19683_v32 = vld [vmem:[#allocation47_spill] sm:$0xff]  ;;  %v19687_v14 = vld [vmem:[#allocation48_spill] sm:$0xff]  ;;  %v13200_v58 = vpop.f32.mrb[196].mxu1 }
 0x275   : > { %v8902_v36 = vmax.f32 %v19676_v48, %v8330_v7  ;;  %v11629_v1 = vpack.c.bf16 %v9008_v55, %v9007_v11  ;;  %v19680_v44 = vmax.f32 %v16412_v37, 0.0  ;;  %v19682_v43 = vmax.f32 %v19681_v62, 0.0  ;;  %13306 = vmatprep.mubr.msk.bf16.mxu1 %vm3115_vm0, %v13739_v46  ;;  %v5182_v55 = vpop.f32.mrb[197].mxu0  ;;  %v13741_v10 = vld [vmem:[%s13905_s22 + $0xb48] sm:$0xff]  }
 0x276   : > { %v9006_v27 = vmax.f32 %v19677_v57, %v8798_v21  ;;  %v8803_v34 = vmax.f32 %v19678_v45, %v7919_v19  ;;  %v11889_v51 = vpack.c.bf16 %v9112_v16, %v9111_v3  ;;  %v19685_v42 = vmax.f32 %v19684_v28, 0.0  ;;  %v12785_v17 = vpop.f32.mrb[198].mxu0 }
 0x277   : > { %v9110_v41 = vmax.f32 %v19679_v35, %v8902_v36  ;;  %v8907_v5 = vmax.f32 %v19680_v44, %v8335_v23  ;;  %v16647_v18 = vmax.f32 %v19682_v43, %v7917_v56  ;;  %12077 = vst [vmem:[%s15166_s30 + $0x88] sm:$0xff] %v11629_v1   ;;  %v5178_v3 = vadd.f32 %v16098_v24, %v12781_v50  ;;  %v5185_v56 = vpop.f32.mrb[199].mxu0 }
 0x278   : > { %v11624_v11 = vpack.c.bf16 %v9006_v27, %v9005_v8  ;;  %v9011_v29 = vmax.f32 %v19683_v32, %v8803_v34  ;;  %v16654_v39 = vmax.f32 %v19685_v42, %v8333_v30  ;;  %12129 = vst [vmem:[%s15166_s30 + $0x228] sm:$0xff] %v11889_v51   ;;  %v6842_v8 = vadd.f32 %v16098_v24, %v13197_v12  ;;  %v6846_v12 = vpop.f32.mrb[197].mxu1  ;;  %v13743_v30 = vld [vmem:[%s13905_s22 + $0xb50] sm:$0xff]  }
 0x279   : > { %v11884_v37 = vpack.c.bf16 %v9110_v41, %v9109_v20  ;;  %v9115_v61 = vmax.f32 %v19686_v2, %v8907_v5  ;;  %v9009_v7 = vmax.f32 %v19687_v14, %v16647_v18  ;;  %v7920_v50 = vmax.f32 %v5178_v3, 0.0  ;;  %v13201_v23 = vpop.f32.mrb[198].mxu1  ;;  %v19691_v51 = vld [vmem:[#allocation24_spill] sm:$0xff]  ;;  %v19692_v41 = vld [vmem:[#allocation9_spill] sm:$0xff]  ;;  %v19694_v5 = vld [vmem:[#allocation10_spill] sm:$0xff] }
 0x27a   : > { %12076 = vst [vmem:[%s15166_s30 + $0x80] sm:$0xff] %v11624_v11   ;;  %v9113_v54 = vmax.f32 %v19688_v33, %v16654_v39  ;;  %v5170_v49 = vadd.f32 %v16098_v24, %v5169_v52  ;;  %v6834_v20 = vadd.f32 %v16098_v24, %v6833_v6  ;;  %v8336_v47 = vmax.f32 %v6842_v8, 0.0  ;;  %v13742_v6 = vld [vmem:[%s13905_s22 + $0x4d0] sm:$0xff]   ;;  %v6849_v34 = vpop.f32.mrb[199].mxu1  ;;  %12891 = vmatmul.mubr.msk.bf16.gmra.mrb[48].mxu0 %vm3115_vm0, %v13740_v31  ;;  %v19696_v18 = vld [vmem:[#allocation49_spill] sm:$0xff]  ;;  %v19699_v39 = vld [vmem:[#allocation38_spill] sm:$0xff] }
 0x27b   : > { %12128 = vst [vmem:[%s15166_s30 + $0x220] sm:$0xff] %v11884_v37   ;;  %v5191_v21 = vadd.f32 %v16098_v24, %v12784_v25  ;;  %v6855_v19 = vadd.f32 %v16098_v24, %v13200_v58  ;;  %v5183_v59 = vadd.f32 %v16098_v24, %v5182_v55  ;;  %v19689_v52 = vmax.f32 %v16426_v40, 0.0  ;;  %v19701_v14 = vld [vmem:[#allocation25_spill] sm:$0xff]  ;;  %v19702_v25 = vld [vmem:[#allocation26_spill] sm:$0xff]  ;;  %12894 = vmatprep.mubr.msk.bf16.mxu0 %vm3115_vm0, %v13742_v6  ;;  %v19705_v58 = vld [vmem:[#allocation28_spill] sm:$0xff] }
 0x27c   : > { %v7918_v63 = vmax.f32 %v5170_v49, 0.0  ;;  %v8334_v48 = vmax.f32 %v6834_v20, 0.0  ;;  %v6847_v36 = vadd.f32 %v16098_v24, %v6846_v12  ;;  %v19690_v46 = vmax.f32 %v16430_v22, 0.0  ;;  %13307 = vmatmul.mubr.msk.bf16.gmra.mrb[48].mxu1 %vm3115_vm0, %v13741_v10  ;;  %v19704_v49 = vld [vmem:[#allocation27_spill] sm:$0xff]  ;;  %v13204_v10 = vpop.f32.mrb[200].mxu1 }
 0x27d   : > { %v8804_v16 = vmax.f32 %v19689_v52, %v7920_v50  ;;  %v7923_v57 = vmax.f32 %v5191_v21, 0.0  ;;  %v8339_v27 = vmax.f32 %v6855_v19, 0.0  ;;  %v7921_v45 = vmax.f32 %v5183_v59, 0.0  ;;  %13310 = vmatprep.mubr.msk.bf16.mxu1 %vm3115_vm0, %v13743_v30  ;;  %v19707_v19 = vld [vmem:[#allocation51_spill] sm:$0xff]  ;;  %v16722_v59 = vld [vmem:[%s19205_s2] ss:$0 sm:$0xff] }
 0x27e   : > { %v8908_v1 = vmax.f32 %v19690_v46, %v8336_v47  ;;  %v19693_v40 = vmax.f32 %v19692_v41, 0.0  ;;  %v19695_v62 = vmax.f32 %v19694_v5, 0.0  ;;  %v8337_v24 = vmax.f32 %v6847_v36, 0.0  ;;  %v12788_v47 = vpop.f32.mrb[200].mxu0  ;;  %v6862_v36 = vpop.f32.mrb[201].mxu1  ;;  %v13745_v46 = vld [vmem:[%s13905_s22 + $0xb58] sm:$0xff]  }
 0x27f   : > { %v9012_v35 = vmax.f32 %v19691_v51, %v8804_v16  ;;  %v19697_v22 = vmax.f32 %v16442_v38, 0.0  ;;  %v19698_v28 = vmax.f32 %v16445_v0, 0.0  ;;  %v19700_v3 = vmax.f32 %v19699_v39, 0.0  ;;  %v5198_v52 = vpop.f32.mrb[201].mxu0  ;;  %v13744_v16 = vld [vmem:[%s13905_s22 + $0x4d8] sm:$0xff]  }
 0x280   : > { %v8802_v44 = vmax.f32 %v19693_v40, %v7918_v63  ;;  %v8906_v43 = vmax.f32 %v19695_v62, %v8334_v48  ;;  %v9116_v11 = vmax.f32 %v19696_v18, %v8908_v1  ;;  %v19703_v38 = vmax.f32 %v16402_v60, 0.0  ;;  %v12789_v6 = vpop.f32.mrb[202].mxu0  ;;  %v13747_v40 = vld [vmem:[%s13905_s22 + $0xb60] sm:$0xff]  }
 0x281   : > { %v16691_v32 = vmax.f32 %v19697_v22, %v7923_v57  ;;  %v16695_v42 = vmax.f32 %v19698_v28, %v8339_v27  ;;  %v16699_v37 = vmax.f32 %v19700_v3, %v7921_v45  ;;  %v11639_v2 = vpack.c.bf16 %v9012_v35, %v9011_v29  ;;  %v19706_v29 = vld [vmem:[#allocation57_spill] sm:$0xff]  ;;  %v5201_v45 = vpop.f32.mrb[203].mxu0  ;;  %v19712_v28 = vld [vmem:[#allocation39_spill] sm:$0xff] }
 0x282   : > { %v9010_v8 = vmax.f32 %v19701_v14, %v8802_v44  ;;  %v9114_v33 = vmax.f32 %v19702_v25, %v8906_v43  ;;  %v16706_v50 = vmax.f32 %v19703_v38, %v8337_v24  ;;  %v11899_v0 = vpack.c.bf16 %v9116_v11, %v9115_v61  ;;  %v19708_v44 = vld [vmem:[#allocation42_spill] sm:$0xff]  ;;  %12895 = vmatmul.mubr.msk.bf16.gmra.mrb[52].mxu0 %vm3115_vm0, %v13744_v16  ;;  %v19717_v38 = vld [vmem:[#allocation52_spill] sm:$0xff]  ;;  %v19724_v16 = vld [vmem:[#allocation29_spill] sm:$0xff] }
 0x283   : > { %v9015_v20 = vmax.f32 %v19704_v49, %v16691_v32  ;;  %v9119_v55 = vmax.f32 %v19705_v58, %v16695_v42  ;;  %v9013_v31 = vmax.f32 %v19706_v29, %v16699_v37  ;;  %12079 = vst [vmem:[%s15166_s30 + $0x98] sm:$0xff] %v11639_v2   ;;  %v5194_v12 = vadd.f32 %v16722_v59, %v12785_v17  ;;  %v19710_v11 = vld [vmem:[#allocation14_spill] sm:$0xff]  ;;  %v19714_v2 = vld [vmem:[#allocation40_spill] sm:$0xff] }
 0x284   : > { %v11634_v60 = vpack.c.bf16 %v9010_v8, %v9009_v7  ;;  %v11894_v21 = vpack.c.bf16 %v9114_v33, %v9113_v54  ;;  %v9117_v61 = vmax.f32 %v19707_v19, %v16706_v50  ;;  %12131 = vst [vmem:[%s15166_s30 + $0x238] sm:$0xff] %v11899_v0   ;;  %v6858_v7 = vadd.f32 %v16722_v59, %v13201_v23  ;;  %v13205_v23 = vpop.f32.mrb[202].mxu1  ;;  %v19721_v19 = vld [vmem:[#allocation12_spill] sm:$0xff] }
 0x285   : > { %v5186_v54 = vadd.f32 %v16722_v59, %v5185_v56  ;;  %v6850_v63 = vadd.f32 %v16722_v59, %v6849_v34  ;;  %v5207_v48 = vadd.f32 %v16722_v59, %v12788_v47  ;;  %v7924_v17 = vmax.f32 %v5194_v12, 0.0  ;;  %v13746_v56 = vld [vmem:[%s13905_s22 + $0x4e0] sm:$0xff]   ;;  %v6865_v41 = vpop.f32.mrb[203].mxu1  ;;  %13311 = vmatmul.mubr.msk.bf16.gmra.mrb[52].mxu1 %vm3115_vm0, %v13745_v46  ;;  %v19719_v47 = vld [vmem:[#allocation41_spill] sm:$0xff] }
 0x286   : > { %12078 = vst [vmem:[%s15166_s30 + $0x90] sm:$0xff] %v11634_v60   ;;  %12130 = vst [vmem:[%s15166_s30 + $0x230] sm:$0xff] %v11894_v21   ;;  %v6871_v1 = vadd.f32 %v16722_v59, %v13204_v10  ;;  %v5199_v57 = vadd.f32 %v16722_v59, %v5198_v52  ;;  %v6863_v27 = vadd.f32 %v16722_v59, %v6862_v36  ;;  %v8340_v30 = vmax.f32 %v6858_v7, 0.0  ;;  %v12792_v36 = vpop.f32.mrb[204].mxu0 }
 0x287   : > { %v7922_v34 = vmax.f32 %v5186_v54, 0.0  ;;  %v8338_v51 = vmax.f32 %v6850_v63, 0.0  ;;  %v7927_v35 = vmax.f32 %v5207_v48, 0.0  ;;  %v19709_v5 = vmax.f32 %v19708_v44, 0.0  ;;  %12898 = vmatprep.mubr.msk.bf16.mxu0 %vm3115_vm0, %v13746_v56  ;;  %v19725_v54 = vld [vmem:[#allocation53_spill] sm:$0xff]  ;;  %13314 = vmatprep.mubr.msk.bf16.mxu1 %vm3115_vm0, %v13747_v40  ;;  %v19729_v56 = vld [vmem:[#allocation2_spill] sm:$0xff] }
 0x288   : > { %v8343_v43 = vmax.f32 %v6871_v1, 0.0  ;;  %v7925_v24 = vmax.f32 %v5199_v57, 0.0  ;;  %v8341_v18 = vmax.f32 %v6863_v27, 0.0  ;;  %v19711_v22 = vmax.f32 %v19710_v11, 0.0  ;;  %v19728_v57 = vld [vmem:[#allocation31_spill] sm:$0xff] }
 0x289   : > { %v8808_v62 = vmax.f32 %v19709_v5, %v7924_v17  ;;  %v19713_v39 = vmax.f32 %v19712_v28, 0.0  ;;  %v19715_v14 = vmax.f32 %v19714_v2, 0.0  ;;  %v19716_v25 = vmax.f32 %v16488_v15, 0.0  ;;  %v19723_v15 = vld [vmem:[#allocation60_spill] sm:$0xff]  ;;  %v19727_v17 = vld [vmem:[#allocation30_spill] sm:$0xff] }
 0x28a   : > { %v8912_v32 = vmax.f32 %v19711_v22, %v8340_v30  ;;  %v19718_v0 = vmax.f32 %v16491_v53, 0.0  ;;  %v19720_v60 = vmax.f32 %v19719_v47, 0.0  ;;  %v19722_v12 = vmax.f32 %v19721_v19, 0.0  ;;  %v19726_v53 = vld [vmem:[#allocation54_spill] sm:$0xff] }
 0x28b   : > { %v8806_v3 = vmax.f32 %v19713_v39, %v7922_v34  ;;  %v8910_v8 = vmax.f32 %v19715_v14, %v8338_v51  ;;  %v16750_v33 = vmax.f32 %v19716_v25, %v7927_v35  ;;  %v9016_v50 = vmax.f32 %v19717_v38, %v8808_v62  ;;  %v13208_v34 = vpop.f32.mrb[204].mxu1  ;;  %v5214_v51 = vpop.f32.mrb[205].mxu0  ;;  %v13748_v35 = vld [vmem:[%s13905_s22 + $0x4e8] sm:$0xff]  }
 0x28c   : > { %v16756_v49 = vmax.f32 %v19718_v0, %v8343_v43  ;;  %v16760_v21 = vmax.f32 %v19720_v60, %v7925_v24  ;;  %v16764_v10 = vmax.f32 %v19722_v12, %v8341_v18  ;;  %v9120_v52 = vmax.f32 %v19723_v15, %v8912_v32  ;;  %v6878_v62 = vpop.f32.mrb[205].mxu1  ;;  %v12793_v43 = vpop.f32.mrb[206].mxu0  ;;  %v13749_v24 = vld [vmem:[%s13905_s22 + $0xb68] sm:$0xff]   ;;  %v13750_v18 = vld [vmem:[%s13905_s22 + $0x4f0] sm:$0xff]   ;;  %12899 = vmatmul.mubr.msk.bf16.gmra.mrb[56].mxu0 %vm3115_vm0, %v13748_v35 }
 0x28d   : > { %v9014_v7 = vmax.f32 %v19724_v16, %v8806_v3  ;;  %v9118_v63 = vmax.f32 %v19725_v54, %v8910_v8  ;;  %v9019_v48 = vmax.f32 %v19726_v53, %v16750_v33  ;;  %v11649_v46 = vpack.c.bf16 %v9016_v50, %v9015_v20  ;;  %v5217_v29 = vpop.f32.mrb[207].mxu0  ;;  %13315 = vmatmul.mubr.msk.bf16.gmra.mrb[56].mxu1 %vm3115_vm0, %v13749_v24  ;;  %v19732_v50 = vld [vmem:[#allocation16_spill] sm:$0xff] }
 0x28e   : > { %v9123_v1 = vmax.f32 %v19727_v17, %v16756_v49  ;;  %v9017_v27 = vmax.f32 %v19728_v57, %v16760_v21  ;;  %v9121_v30 = vmax.f32 %v19729_v56, %v16764_v10  ;;  %v11909_v44 = vpack.c.bf16 %v9120_v52, %v9119_v55  ;;  %v13209_v55 = vpop.f32.mrb[206].mxu1  ;;  %12902 = vmatprep.mubr.msk.bf16.mxu0 %vm3115_vm0, %v13750_v18  ;;  %v19734_v60 = vld [vmem:[#allocation44_spill] sm:$0xff]  ;;  %v19750_v57 = vld [vmem:[#allocation13_spill] sm:$0xff] }
 0x28f   : > { %v11644_v20 = vpack.c.bf16 %v9014_v7, %v9013_v31  ;;  %v11904_v40 = vpack.c.bf16 %v9118_v63, %v9117_v61  ;;  %v5210_v5 = vadd.f32 %v16722_v59, %v12789_v6  ;;  %12081 = vst [vmem:[%s15166_s30 + $0xa8] sm:$0xff] %v11649_v46   ;;  %v6874_v11 = vadd.f32 %v16722_v59, %v13205_v23  ;;  %v13751_v31 = vld [vmem:[%s13905_s22 + $0xb70] sm:$0xff]   ;;  %v6881_v23 = vpop.f32.mrb[207].mxu1 }
 0x290   : > { %v5202_v42 = vadd.f32 %v16722_v59, %v5201_v45  ;;  %v6866_v58 = vadd.f32 %v16722_v59, %v6865_v41  ;;  %v5223_v37 = vadd.f32 %v16722_v59, %v12792_v36  ;;  %12133 = vst [vmem:[%s15166_s30 + $0x248] sm:$0xff] %v11909_v44   ;;  %v6887_v6 = vadd.f32 %v16722_v59, %v13208_v34  ;;  %v19737_v52 = vld [vmem:[#allocation4_spill] sm:$0xff]  ;;  %v19741_v36 = vld [vmem:[#allocation15_spill] sm:$0xff]  ;;  %v19744_v44 = vld [vmem:[#allocation6_spill] sm:$0xff]  ;;  %v16837_v24 = vpop.f32.mrb[208].mxu1 }
 0x291   : > { %12080 = vst [vmem:[%s15166_s30 + $0xa0] sm:$0xff] %v11644_v20   ;;  %12132 = vst [vmem:[%s15166_s30 + $0x240] sm:$0xff] %v11904_v40   ;;  %v7928_v61 = vmax.f32 %v5210_v5, 0.0  ;;  %v5215_v22 = vadd.f32 %v16722_v59, %v5214_v51  ;;  %v6879_v32 = vadd.f32 %v16722_v59, %v6878_v62  ;;  %v8344_v28 = vmax.f32 %v6874_v11, 0.0  ;;  %13318 = vmatprep.mubr.msk.bf16.mxu1 %vm3115_vm0, %v13751_v31  ;;  %v19743_v51 = vld [vmem:[#allocation5_spill] sm:$0xff]  ;;  %v19745_v40 = vld [vmem:[#allocation8_spill] sm:$0xff] }
 0x292   : > { %v7926_v45 = vmax.f32 %v5202_v42, 0.0  ;;  %v8342_v39 = vmax.f32 %v6866_v58, 0.0  ;;  %v7931_v41 = vmax.f32 %v5223_v37, 0.0  ;;  %v19730_v3 = vmax.f32 %v16500_v9, 0.0  ;;  %v19746_v5 = vld [vmem:[#allocation55_spill] sm:$0xff]  ;;  %v13752_v11 = vld [vmem:[%s13905_s22 + $0x4f8] sm:$0xff]  }
 0x293   : > { %v8347_v14 = vmax.f32 %v6887_v6, 0.0  ;;  %v7929_v8 = vmax.f32 %v5215_v22, 0.0  ;;  %v8345_v25 = vmax.f32 %v6879_v32, 0.0  ;;  %v19731_v33 = vmax.f32 %v16505_v26, 0.0  ;;  %v19739_v26 = vld [vmem:[#allocation43_spill] sm:$0xff]  ;;  %v19747_v58 = vld [vmem:[#allocation56_spill] sm:$0xff] }
 0x294   : > { %v8812_v2 = vmax.f32 %v19730_v3, %v7928_v61  ;;  %v19733_v0 = vmax.f32 %v19732_v50, 0.0  ;;  %v19735_v19 = vmax.f32 %v19734_v60, 0.0  ;;  %v19736_v9 = vmax.f32 %v16508_v4, 0.0  ;;  %v16830_v4 = vpop.f32.mrb[208].mxu0  ;;  %v19748_v31 = vld [vmem:[#allocation7_spill] sm:$0xff]  ;;  %v19749_v6 = vld [vmem:[#allocation58_spill] sm:$0xff]  ;;  %12903 = vmatmul.mubr.msk.bf16.gmra.mrb[60].mxu0 %vm3115_vm0, %v13752_v11 }
 0x295   : > { %v8916_v38 = vmax.f32 %v19731_v33, %v8344_v28  ;;  %v19738_v7 = vmax.f32 %v16515_v13, 0.0  ;;  %v19740_v63 = vmax.f32 %v19739_v26, 0.0  ;;  %v19742_v46 = vmax.f32 %v19741_v36, 0.0  ;;  %v16839_v18 = vpop.f32.mrb[209].mxu0  ;;  %v16848_v32 = vpop.f32.mrb[209].mxu1  ;;  %v19757_v36 = vld [vmem:[#allocation34_spill] sm:$0xff] }
 0x296   : > { %v8810_v47 = vmax.f32 %v19733_v0, %v7926_v45  ;;  %v8914_v12 = vmax.f32 %v19735_v19, %v8342_v39  ;;  %v16814_v15 = vmax.f32 %v19736_v9, %v7931_v41  ;;  %v9020_v16 = vmax.f32 %v19737_v52, %v8812_v2  ;;  %v16850_v28 = vpop.f32.mrb[210].mxu0  ;;  %v13753_v45 = vld [vmem:[%s13905_s22 + $0xb78] sm:$0xff]   ;;  %v13754_v39 = vld [vmem:[%s13905_s22 + $0x500] sm:$0xff]   ;;  %v19754_v9 = vld [vmem:[#allocation59_spill] sm:$0xff] }
 0x297   : > { %v16820_v54 = vmax.f32 %v19738_v7, %v8347_v14  ;;  %v16824_v53 = vmax.f32 %v19740_v63, %v7929_v8  ;;  %v16828_v34 = vmax.f32 %v19742_v46, %v8345_v25  ;;  %v9124_v35 = vmax.f32 %v19743_v51, %v8916_v38  ;;  %v16864_v14 = vpop.f32.mrb[210].mxu1  ;;  %v16866_v8 = vpop.f32.mrb[211].mxu0  ;;  %v13755_v25 = vld [vmem:[%s13905_s22 + $0xb80] sm:$0xff]   ;;  %v19753_v38 = vld [vmem:[#allocation17_spill] sm:$0xff]  ;;  %13319 = vmatmul.mubr.msk.bf16.gmra.mrb[60].mxu1 %vm3115_vm0, %v13753_v45  ;;  %v13756_v7 = vld [vmem:[%s13905_s22 + $0x508] sm:$0xff]  }
 0x298   : > { %v9018_v20 = vmax.f32 %v19744_v44, %v8810_v47  ;;  %v9122_v13 = vmax.f32 %v19745_v40, %v8914_v12  ;;  %v9023_v62 = vmax.f32 %v19746_v5, %v16814_v15  ;;  %v11659_v42 = vpack.c.bf16 %v9020_v16, %v9019_v48  ;;  %12906 = vmatprep.mubr.msk.bf16.mxu0 %vm3115_vm0, %v13754_v39  ;;  %v16886_v12 = vpop.f32.mrb[212].mxu0  ;;  %v19756_v63 = vld [vmem:[#allocation33_spill] sm:$0xff]  ;;  %v13758_v44 = vld [vmem:[%s13905_s22 + $0x510] sm:$0xff]  }
 0x299   : > { %v9127_v37 = vmax.f32 %v19747_v58, %v16820_v54  ;;  %v9021_v61 = vmax.f32 %v19748_v31, %v16824_v53  ;;  %v9125_v22 = vmax.f32 %v19749_v6, %v16828_v34  ;;  %v11919_v48 = vpack.c.bf16 %v9124_v35, %v9123_v1  ;;  %v16873_v1 = vpop.f32.mrb[211].mxu1  ;;  %13322 = vmatprep.mubr.msk.bf16.mxu1 %vm3115_vm0, %v13755_v25  ;;  %v16891_v16 = vpop.f32.mrb[213].mxu0  ;;  %v19755_v54 = vld [vmem:[#allocation32_spill] sm:$0xff]  ;;  %v13757_v35 = vld [vmem:[%s13905_s22 + $0xb88] sm:$0xff]   ;;  %v13760_v6 = vld [vmem:[%s13905_s22 + $0x518] sm:$0xff]  }
 0x29a   : > { %v11654_v41 = vpack.c.bf16 %v9018_v20, %v9017_v27  ;;  %v11914_v3 = vpack.c.bf16 %v9122_v13, %v9121_v30  ;;  %v5226_v2 = vadd.f32 %v16722_v59, %v12793_v43  ;;  %12083 = vst [vmem:[%s15166_s30 + $0xb8] sm:$0xff] %v11659_v42   ;;  %v6890_v49 = vadd.f32 %v16722_v59, %v13209_v55  ;;  %v19751_v27 = vld [vmem:[#allocation62_spill] sm:$0xff]  ;;  %v16889_v52 = vpop.f32.mrb[212].mxu1  ;;  %v16899_v51 = vpop.f32.mrb[214].mxu0  ;;  %v13759_v5 = vld [vmem:[%s13905_s22 + $0xb90] sm:$0xff]   ;;  %v13761_v39 = vld [vmem:[%s13905_s22 + $0xb98] sm:$0xff]  }
 0x29b   : > { %v5218_v17 = vadd.f32 %v16722_v59, %v5217_v29  ;;  %v6882_v21 = vadd.f32 %v16722_v59, %v6881_v23  ;;  %v7904_v10 = vmax.f32 %v19750_v57, 0.0  ;;  %v8320_v56 = vmax.f32 %v19751_v27, 0.0  ;;  %v19752_v30 = vld [vmem:[#allocation50_spill] sm:$0xff]  ;;  %12135 = vst [vmem:[%s15166_s30 + $0x258] sm:$0xff] %v11919_v48   ;;  %v16897_v34 = vpop.f32.mrb[213].mxu1  ;;  %v16905_v13 = vpop.f32.mrb[215].mxu0 }
 0x29c   : > { %v7906_v43 = vmax.f32 %v19752_v30, 0.0  ;;  %12082 = vst [vmem:[%s15166_s30 + $0xb0] sm:$0xff] %v11654_v41   ;;  %12134 = vst [vmem:[%s15166_s30 + $0x250] sm:$0xff] %v11914_v3   ;;  %v7932_v33 = vmax.f32 %v5226_v2, 0.0  ;;  %v8322_v55 = vmax.f32 %v19753_v38, 0.0  ;;  %v8348_v29 = vmax.f32 %v6890_v49, 0.0  ;;  %12907 = vmatmul.mubr.msk.bf16.gmra.mrb[64].mxu0 %vm3115_vm0, %v13756_v7 }
 0x29d   : > { %v7930_v50 = vmax.f32 %v5218_v17, 0.0  ;;  %v8346_v23 = vmax.f32 %v6882_v21, 0.0  ;;  %v16903_v40 = vpop.f32.mrb[214].mxu1  ;;  %12910 = vmatprep.mubr.msk.bf16.mxu0 %vm3115_vm0, %v13758_v44  ;;  %v13762_v48 = vld [vmem:[%s13905_s22 + $0x520] sm:$0xff]   ;;  %v13764_v57 = vld [vmem:[%s13905_s22 + $0x528] sm:$0xff]   ;;  %v13766_v30 = vld [vmem:[%s13905_s22 + $0x530] sm:$0xff]   ;;  %v17017_v44 = vadd.f32 %v16722_v59, %v16864_v14  ;;  %v17035_v14 = vadd.f32 %v16722_v59, %v16886_v12 }
 0x29e   : > { %v8816_v0 = vmax.f32 %v7906_v43, %v7932_v33  ;;  %v8920_v47 = vmax.f32 %v8322_v55, %v8348_v29  ;;  %v16908_v31 = vpop.f32.mrb[215].mxu1  ;;  %v13763_v2 = vld [vmem:[%s13905_s22 + $0xba0] sm:$0xff]   ;;  %v13767_v38 = vld [vmem:[%s13905_s22 + $0xbb0] sm:$0xff]   ;;  %v17057_v12 = vadd.f32 %v16722_v59, %v16899_v51 }
 0x29f   : > { %v8814_v60 = vmax.f32 %v7904_v10, %v7930_v50  ;;  %v8918_v19 = vmax.f32 %v8320_v56, %v8346_v23  ;;  %13323 = vmatmul.mubr.msk.bf16.gmra.mrb[64].mxu1 %vm3115_vm0, %v13757_v35  ;;  %v13765_v56 = vld [vmem:[%s13905_s22 + $0xba8] sm:$0xff]  }
 0x2a0   : > { %v9024_v15 = vmax.f32 %v19754_v9, %v8816_v0  ;;  %v9128_v26 = vmax.f32 %v19755_v54, %v8920_v47  ;;  %13326 = vmatprep.mubr.msk.bf16.mxu1 %vm3115_vm0, %v13759_v5  ;;  %v13768_v0 = vld [vmem:[%s13905_s22 + $0x538] sm:$0xff]   ;;  %v13770_v9 = vld [vmem:[%s13905_s22 + $0x540] sm:$0xff]  }
 0x2a1   : > { %v9022_v53 = vmax.f32 %v19756_v63, %v8814_v60  ;;  %v9126_v46 = vmax.f32 %v19757_v36, %v8918_v19  ;;  %v13769_v19 = vld [vmem:[%s13905_s22 + $0xbb8] sm:$0xff]   ;;  %v13771_v54 = vld [vmem:[%s13905_s22 + $0xbc0] sm:$0xff]   ;;  %v16996_v36 = vadd.f32 %v16722_v59, %v16839_v18 }
 0x2a2   : > { %v11669_v20 = vpack.c.bf16 %v9024_v15, %v9023_v62  ;;  %v11929_v11 = vpack.c.bf16 %v9128_v26, %v9127_v37  ;;  %v16918_v62 = vpop.f32.mrb[216].mxu0  ;;  %v16920_v37 = vpop.f32.mrb[216].mxu1  ;;  %v16986_v26 = vadd.f32 %v16722_v59, %v16830_v4  ;;  %v13777_v4 = vld [vmem:[%s13905_s22 + $0xbd8] sm:$0xff]  }
 0x2a3   : > { %v11664_v42 = vpack.c.bf16 %v9022_v53, %v9021_v61  ;;  %v11924_v58 = vpack.c.bf16 %v9126_v46, %v9125_v22  ;;  %v16922_v61 = vpop.f32.mrb[217].mxu0  ;;  %v16925_v22 = vpop.f32.mrb[217].mxu1  ;;  %v16992_v53 = vadd.f32 %v16722_v59, %v16837_v24  ;;  %v17001_v46 = vadd.f32 %v16722_v59, %v16848_v32 }
 0x2a4   : > { %12085 = vst [vmem:[%s15166_s30 + $0xc8] sm:$0xff] %v11669_v20   ;;  %12137 = vst [vmem:[%s15166_s30 + $0x268] sm:$0xff] %v11929_v11   ;;  %v16927_v45 = vpop.f32.mrb[218].mxu0  ;;  %v16931_v41 = vpop.f32.mrb[218].mxu1  ;;  %12911 = vmatmul.mubr.msk.bf16.gmra.mrb[68].mxu0 %vm3115_vm0, %v13760_v6  ;;  %v17013_v32 = vadd.f32 %v16722_v59, %v16850_v28  ;;  %v13772_v11 = vld [vmem:[%s13905_s22 + $0x548] sm:$0xff]   ;;  %v17031_v28 = vadd.f32 %v16722_v59, %v16873_v1  ;;  %v17053_v1 = vadd.f32 %v16722_v59, %v16897_v34 }
 0x2a5   : > { %12084 = vst [vmem:[%s15166_s30 + $0xc0] sm:$0xff] %v11664_v42   ;;  %12136 = vst [vmem:[%s15166_s30 + $0x260] sm:$0xff] %v11924_v58   ;;  %v16933_v3 = vpop.f32.mrb[219].mxu0  ;;  %v16936_v25 = vpop.f32.mrb[219].mxu1  ;;  %12914 = vmatprep.mubr.msk.bf16.mxu0 %vm3115_vm0, %v13762_v48  ;;  %v17027_v58 = vadd.f32 %v16722_v59, %v16866_v8  ;;  %v13773_v48 = vld [vmem:[%s13905_s22 + $0xbc8] sm:$0xff]   ;;  %v17049_v8 = vadd.f32 %v16722_v59, %v16891_v16  ;;  %v17070_v16 = vadd.f32 %v16722_v59, %v16905_v13 }
 0x2a6   : > { %v16942_v49 = vpop.f32.mrb[220].mxu0  ;;  %v16944_v17 = vpop.f32.mrb[220].mxu1  ;;  %v17074_v34 = vadd.f32 %v16722_v59, %v16908_v31  ;;  %v17078_v51 = vadd.f32 %v16722_v59, %v16918_v62  ;;  %v17090_v13 = vadd.f32 %v16722_v59, %v16922_v61  ;;  %v8350_v62 = vmax.f32 %v17031_v28, 0.0 }
 0x2a7   : > { %13327 = vmatmul.mubr.msk.bf16.gmra.mrb[68].mxu1 %vm3115_vm0, %v13761_v39  ;;  %v16946_v21 = vpop.f32.mrb[221].mxu0  ;;  %v16949_v10 = vpop.f32.mrb[221].mxu1  ;;  %v7934_v31 = vmax.f32 %v17027_v58, 0.0  ;;  %v17115_v58 = vadd.f32 %v16722_v59, %v16927_v45  ;;  %v17137_v61 = vadd.f32 %v16722_v59, %v16936_v25 }
 0x2a8   : > { %13330 = vmatprep.mubr.msk.bf16.mxu1 %vm3115_vm0, %v13763_v2  ;;  %v16951_v27 = vpop.f32.mrb[222].mxu0  ;;  %v16955_v43 = vpop.f32.mrb[222].mxu1  ;;  %v13774_v2 = vld [vmem:[%s13905_s22 + $0x550] sm:$0xff]  }
 0x2a9   : > { %v16957_v33 = vpop.f32.mrb[223].mxu0  ;;  %v16960_v55 = vpop.f32.mrb[223].mxu1 }
 0x2ac   : > { %12915 = vmatmul.mubr.msk.bf16.gmra.mrb[72].mxu0 %vm3115_vm0, %v13764_v57  ;;  %v17045_v57 = vadd.f32 %v16722_v59, %v16889_v52  ;;  %v17066_v52 = vadd.f32 %v16722_v59, %v16903_v40  ;;  %v17086_v40 = vadd.f32 %v16722_v59, %v16920_v37  ;;  %v17128_v37 = vadd.f32 %v16722_v59, %v16933_v3 }
 0x2ad   : > { %12918 = vmatprep.mubr.msk.bf16.mxu0 %vm3115_vm0, %v13766_v30  ;;  %v16966_v29 = vpop.f32.mrb[224].mxu0 }
 0x2ae   : > { %v16968_v50 = vpop.f32.mrb[224].mxu1  ;;  %v16970_v23 = vpop.f32.mrb[225].mxu0 }
 0x2af   : > { %13331 = vmatmul.mubr.msk.bf16.gmra.mrb[72].mxu1 %vm3115_vm0, %v13765_v56  ;;  %v16973_v47 = vpop.f32.mrb[225].mxu1  ;;  %v16975_v60 = vpop.f32.mrb[226].mxu0 }
 0x2b0   : > { %13334 = vmatprep.mubr.msk.bf16.mxu1 %vm3115_vm0, %v13767_v38  ;;  %v16979_v15 = vpop.f32.mrb[226].mxu1  ;;  %v16981_v7 = vpop.f32.mrb[227].mxu0  ;;  %v13775_v38 = vld [vmem:[%s13905_s22 + $0xbd0] sm:$0xff]  }
 0x2b1   : > { %v16988_v63 = vpop.f32.mrb[227].mxu1 }
 0x2b4   : > { %12919 = vmatmul.mubr.msk.bf16.gmra.mrb[76].mxu0 %vm3115_vm0, %v13768_v0 }
 0x2b5   : > { %12922 = vmatprep.mubr.msk.bf16.mxu0 %vm3115_vm0, %v13770_v9  ;;  %v17007_v24 = vpop.f32.mrb[228].mxu0 }
 0x2b6   : > { %v17019_v20 = vpop.f32.mrb[228].mxu1  ;;  %v17021_v5 = vpop.f32.mrb[229].mxu0 }
 0x2b7   : > { %13335 = vmatmul.mubr.msk.bf16.gmra.mrb[76].mxu1 %vm3115_vm0, %v13769_v19  ;;  %v17037_v6 = vpop.f32.mrb[229].mxu1  ;;  %v17039_v39 = vpop.f32.mrb[230].mxu0  ;;  %v17098_v19 = vadd.f32 %v16722_v59, %v16925_v22  ;;  %v17141_v22 = vadd.f32 %v16722_v59, %v16942_v49 }
 0x2b8   : > { %13338 = vmatprep.mubr.msk.bf16.mxu1 %vm3115_vm0, %v13771_v54  ;;  %19758 = vst [vmem:[#allocation45_spill] sm:$0xff] %v17039_v39  ;;  %v17059_v56 = vpop.f32.mrb[230].mxu1  ;;  %v17061_v30 = vpop.f32.mrb[231].mxu0  ;;  %v13776_v54 = vld [vmem:[%s13905_s22 + $0x558] sm:$0xff]  }
 0x2b9   : > { %19759 = vst [vmem:[#allocation18_spill] sm:$0xff] %v17059_v56  ;;  %v17080_v0 = vpop.f32.mrb[231].mxu1  ;;  %v17149_v56 = vadd.f32 %v16722_v59, %v16944_v17  ;;  %v19765_v17 = vmax.f32 %v16996_v36, 0.0  ;;  %v13783_v36 = vld [vmem:[%s13905_s22 + $0xbf0] sm:$0xff]  }
 0x2bc   : > { %12923 = vmatmul.mubr.msk.bf16.gmra.mrb[80].mxu0 %vm3115_vm0, %v13772_v11  ;;  %v13778_v11 = vld [vmem:[%s13905_s22 + $0x560] sm:$0xff]  }
 0x2bd   : > { %12926 = vmatprep.mubr.msk.bf16.mxu0 %vm3115_vm0, %v13774_v2  ;;  %v12820_v2 = vpop.f32.mrb[232].mxu0 }
 0x2be   : > { %v13236_v28 = vpop.f32.mrb[232].mxu1  ;;  %v17118_v18 = vpop.f32.mrb[233].mxu0 }
 0x2bf   : > { %13339 = vmatmul.mubr.msk.bf16.gmra.mrb[80].mxu1 %vm3115_vm0, %v13773_v48  ;;  %19760 = vst [vmem:[#allocation11_spill] sm:$0xff] %v17118_v18  ;;  %v17124_v48 = vadd.f32 %v16722_v59, %v16931_v41  ;;  %v6999_v45 = vadd.f32 %v16722_v59, %v13236_v28  ;;  %v17131_v9 = vpop.f32.mrb[233].mxu1  ;;  %v13779_v28 = vld [vmem:[%s13905_s22 + $0xbe0] sm:$0xff]  }
 0x2c0   : > { %13342 = vmatprep.mubr.msk.bf16.mxu1 %vm3115_vm0, %v13775_v38  ;;  %v5335_v38 = vadd.f32 %v16722_v59, %v12820_v2  ;;  %19761 = vst [vmem:[#allocation61_spill] sm:$0xff] %v17131_v9  ;;  %v12821_v2 = vpop.f32.mrb[234].mxu0  ;;  %v13237_v3 = vpop.f32.mrb[234].mxu1  ;;  %v17153_v9 = vadd.f32 %v16722_v59, %v16946_v21  ;;  %v13782_v21 = vld [vmem:[%s13905_s22 + $0x570] sm:$0xff]  }
 0x2c1   : > { %v5338_v42 = vadd.f32 %v16722_v59, %v12821_v2  ;;  %v17144_v35 = vpop.f32.mrb[235].mxu0  ;;  %v8375_v25 = vmax.f32 %v6999_v45, 0.0  ;;  %v7002_v18 = vadd.f32 %v16722_v59, %v13237_v3  ;;  %v17156_v49 = vpop.f32.mrb[235].mxu1  ;;  %v17164_v2 = vadd.f32 %v16722_v59, %v16951_v27 }
 0x2c2   : > { %v7959_v41 = vmax.f32 %v5335_v38, 0.0  ;;  %19762 = vst [vmem:[#allocation19_spill] sm:$0xff] %v17144_v35  ;;  %19763 = vst [vmem:[#allocation3_spill] sm:$0xff] %v17156_v49  ;;  %v17160_v38 = vadd.f32 %v16722_v59, %v16949_v10  ;;  %v17174_v45 = vadd.f32 %v16722_v59, %v16955_v43  ;;  %v19768_v10 = vmax.f32 %v17001_v46, 0.0 }
 0x2c3   : > { %19764 = vst [vmem:[#allocation20_spill] sm:$0xff] %v17164_v2  ;;  %v7960_v39 = vmax.f32 %v5338_v42, 0.0  ;;  %v8376_v49 = vmax.f32 %v7002_v18, 0.0 }
 0x2c4   : > { %v17168_v35 = vmax.f32 %v19765_v17, %v7959_v41  ;;  %12927 = vmatmul.mubr.msk.bf16.gmra.mrb[84].mxu0 %vm3115_vm0, %v13776_v54  ;;  %19767 = vst [vmem:[#allocation21_spill] sm:$0xff] %v17174_v45  ;;  %v17178_v3 = vmax.f32 %v19768_v10, %v8375_v25  ;;  %v13780_v10 = vld [vmem:[%s13905_s22 + $0x568] sm:$0xff]  }
 0x2c5   : > { %12930 = vmatprep.mubr.msk.bf16.mxu0 %vm3115_vm0, %v13778_v11  ;;  %v17185_v54 = vmax.f32 %v7934_v31, %v7960_v39  ;;  %v12824_v11 = vpop.f32.mrb[236].mxu0  ;;  %v17197_v39 = vadd.f32 %v16722_v59, %v16957_v33  ;;  %v13781_v33 = vld [vmem:[%s13905_s22 + $0xbe8] sm:$0xff]  }
 0x2c6   : > { %19766 = vst [vmem:[#allocation35_spill] sm:$0xff] %v17168_v35  ;;  %19769 = vst [vmem:[#allocation46_spill] sm:$0xff] %v17178_v3  ;;  %v5351_v31 = vadd.f32 %v16722_v59, %v12824_v11  ;;  %v5342_v17 = vpop.f32.mrb[237].mxu0  ;;  %v17212_v11 = vadd.f32 %v16722_v59, %v16966_v29  ;;  %v19772_v35 = vmax.f32 %v17049_v8, 0.0  ;;  %v19775_v8 = vmax.f32 %v16992_v53, 0.0 }
 0x2c7   : > { %13343 = vmatmul.mubr.msk.bf16.gmra.mrb[84].mxu1 %vm3115_vm0, %v13777_v4  ;;  %19770 = vst [vmem:[#allocation36_spill] sm:$0xff] %v17185_v54  ;;  %v17191_v4 = vmax.f32 %v8350_v62, %v8376_v49  ;;  %v17204_v62 = vadd.f32 %v16722_v59, %v16960_v55  ;;  %v5343_v25 = vadd.f32 %v16722_v59, %v5342_v17  ;;  %v12825_v27 = vpop.f32.mrb[238].mxu0  ;;  %v19778_v53 = vmax.f32 %v17013_v32, 0.0  ;;  %v13784_v32 = vld [vmem:[%s13905_s22 + $0x578] sm:$0xff]  }
 0x2c8   : > { %13346 = vmatprep.mubr.msk.bf16.mxu1 %vm3115_vm0, %v13779_v28  ;;  %v13240_v28 = vpop.f32.mrb[236].mxu1  ;;  %v7963_v41 = vmax.f32 %v5351_v31, 0.0  ;;  %v5354_v46 = vadd.f32 %v16722_v59, %v12825_v27  ;;  %v5345_v55 = vpop.f32.mrb[239].mxu0  ;;  %v19773_v27 = vmax.f32 %v17053_v1, 0.0  ;;  %v19776_v1 = vmax.f32 %v17070_v16, 0.0 }
 0x2c9   : > { %19771 = vst [vmem:[#allocation47_spill] sm:$0xff] %v17191_v4  ;;  %v7015_v49 = vadd.f32 %v16722_v59, %v13240_v28  ;;  %v7006_v43 = vpop.f32.mrb[237].mxu1  ;;  %v7961_v28 = vmax.f32 %v5343_v25, 0.0  ;;  %v5346_v54 = vadd.f32 %v16722_v59, %v5345_v55  ;;  %v19774_v25 = vmax.f32 %v16986_v26, 0.0 }
 0x2ca   : > { %v7007_v18 = vadd.f32 %v16722_v59, %v7006_v43  ;;  %v13241_v42 = vpop.f32.mrb[238].mxu1  ;;  %v17221_v45 = vmax.f32 %v19772_v35, %v7963_v41  ;;  %v7964_v31 = vmax.f32 %v5354_v46, 0.0 }
 0x2cb   : > { %v8379_v4 = vmax.f32 %v7015_v49, 0.0  ;;  %v7018_v17 = vadd.f32 %v16722_v59, %v13241_v42  ;;  %v7009_v3 = vpop.f32.mrb[239].mxu1  ;;  %v17231_v42 = vmax.f32 %v19774_v25, %v7961_v28  ;;  %v7962_v55 = vmax.f32 %v5346_v54, 0.0  ;;  %v13785_v25 = vld [vmem:[%s13905_s22 + $0xbf8] sm:$0xff]  }
 0x2cc   : > { %v8377_v29 = vmax.f32 %v7007_v18, 0.0  ;;  %v7010_v43 = vadd.f32 %v16722_v59, %v7009_v3  ;;  %12931 = vmatmul.mubr.msk.bf16.gmra.mrb[88].mxu0 %vm3115_vm0, %v13780_v10  ;;  %v17242_v46 = vmax.f32 %v19776_v1, %v7964_v31  ;;  %v17248_v18 = vadd.f32 %v16722_v59, %v16968_v50 }
 0x2cd   : > { %v17227_v2 = vmax.f32 %v19773_v27, %v8379_v4  ;;  %v8380_v49 = vmax.f32 %v7018_v17, 0.0  ;;  %12934 = vmatprep.mubr.msk.bf16.mxu0 %vm3115_vm0, %v13782_v21  ;;  %v19777_v21 = vmax.f32 %v17074_v34, 0.0  ;;  %v17256_v41 = vmax.f32 %v19778_v53, %v7962_v55  ;;  %v12828_v16 = vpop.f32.mrb[240].mxu0 }
 0x2ce   : > { %v17238_v3 = vmax.f32 %v19775_v8, %v8377_v29  ;;  %v8378_v26 = vmax.f32 %v7010_v43, 0.0  ;;  %v19779_v50 = vmax.f32 %v17017_v44, 0.0  ;;  %v5367_v34 = vadd.f32 %v16722_v59, %v12828_v16  ;;  %v13244_v28 = vpop.f32.mrb[240].mxu1  ;;  %v5358_v17 = vpop.f32.mrb[241].mxu0 }
 0x2cf   : > { %13347 = vmatmul.mubr.msk.bf16.gmra.mrb[88].mxu1 %vm3115_vm0, %v13781_v33  ;;  %v17252_v4 = vmax.f32 %v19777_v21, %v8380_v49  ;;  %v17271_v29 = vadd.f32 %v16722_v59, %v16973_v47  ;;  %v17275_v31 = vadd.f32 %v16722_v59, %v16975_v60  ;;  %v5359_v44 = vadd.f32 %v16722_v59, %v5358_v17  ;;  %v7022_v43 = vpop.f32.mrb[241].mxu1  ;;  %v12829_v27 = vpop.f32.mrb[242].mxu0  ;;  %v13786_v49 = vld [vmem:[%s13905_s22 + $0x580] sm:$0xff]  }
 0x2d0   : > { %13350 = vmatprep.mubr.msk.bf16.mxu1 %vm3115_vm0, %v13783_v36  ;;  %v17261_v36 = vadd.f32 %v16722_v59, %v16970_v23  ;;  %v17265_v33 = vmax.f32 %v19779_v50, %v8378_v26  ;;  %v7031_v23 = vadd.f32 %v16722_v59, %v13244_v28  ;;  %v17283_v55 = vadd.f32 %v16722_v59, %v16979_v15  ;;  %v13245_v26 = vpop.f32.mrb[242].mxu1  ;;  %v5361_v60 = vpop.f32.mrb[243].mxu0  ;;  %v13787_v21 = vld [vmem:[%s13905_s22 + $0xc00] sm:$0xff]  }
 0x2d1   : > { %v7967_v8 = vmax.f32 %v5367_v34, 0.0  ;;  %v7023_v47 = vadd.f32 %v16722_v59, %v7022_v43  ;;  %v5370_v1 = vadd.f32 %v16722_v59, %v12829_v27  ;;  %v7965_v16 = vmax.f32 %v5359_v44, 0.0  ;;  %v7025_v17 = vpop.f32.mrb[243].mxu1 }
 0x2d2   : > { %v8383_v53 = vmax.f32 %v7031_v23, 0.0  ;;  %v7034_v50 = vadd.f32 %v16722_v59, %v13245_v26  ;;  %v5362_v28 = vadd.f32 %v16722_v59, %v5361_v60  ;;  %v19780_v10 = vmax.f32 %v17090_v13, 0.0 }
 0x2d3   : > { %v8381_v15 = vmax.f32 %v7023_v47, 0.0  ;;  %v7968_v34 = vmax.f32 %v5370_v1, 0.0  ;;  %v7026_v43 = vadd.f32 %v16722_v59, %v7025_v17  ;;  %v19781_v27 = vmax.f32 %v17098_v19, 0.0 }
 0x2d4   : > { %v17292_v54 = vmax.f32 %v19780_v10, %v7967_v8  ;;  %12935 = vmatmul.mubr.msk.bf16.gmra.mrb[92].mxu0 %vm3115_vm0, %v13784_v32  ;;  %v19782_v23 = vmax.f32 %v17035_v14, 0.0  ;;  %v8384_v26 = vmax.f32 %v7034_v50, 0.0  ;;  %v7966_v60 = vmax.f32 %v5362_v28, 0.0 }
 0x2d5   : > { %v17298_v35 = vmax.f32 %v19781_v27, %v8383_v53  ;;  %12938 = vmatprep.mubr.msk.bf16.mxu0 %vm3115_vm0, %v13786_v49  ;;  %v19783_v10 = vmax.f32 %v17045_v57, 0.0  ;;  %v19784_v19 = vmax.f32 %v17128_v37, 0.0  ;;  %v8382_v14 = vmax.f32 %v7026_v43, 0.0  ;;  %v12832_v37 = vpop.f32.mrb[244].mxu0 }
 0x2d6   : > { %v17302_v44 = vmax.f32 %v19782_v23, %v7965_v16  ;;  %v19786_v49 = vmax.f32 %v17137_v61, 0.0  ;;  %v19788_v57 = vmax.f32 %v17057_v12, 0.0  ;;  %v19790_v50 = vmax.f32 %v17066_v52, 0.0  ;;  %v13248_v61 = vpop.f32.mrb[244].mxu1  ;;  %v5374_v17 = vpop.f32.mrb[245].mxu0 }
 0x2d7   : > { %13351 = vmatmul.mubr.msk.bf16.gmra.mrb[92].mxu1 %vm3115_vm0, %v13785_v25  ;;  %v17309_v32 = vmax.f32 %v19783_v10, %v8381_v15  ;;  %v17313_v8 = vmax.f32 %v19784_v19, %v7968_v34  ;;  %v17319_v25 = vadd.f32 %v16722_v59, %v16981_v7  ;;  %v5383_v7 = vadd.f32 %v16722_v59, %v12832_v37  ;;  %v13788_v15 = vld [vmem:[%s13905_s22 + $0x588] sm:$0xff]   ;;  %v7038_v23 = vpop.f32.mrb[245].mxu1  ;;  %v12833_v52 = vpop.f32.mrb[246].mxu0  ;;  %v13791_v37 = vld [vmem:[%s13905_s22 + $0xc10] sm:$0xff]  }
 0x2d8   : > { %13354 = vmatprep.mubr.msk.bf16.mxu1 %vm3115_vm0, %v13787_v21  ;;  %v17323_v1 = vmax.f32 %v19786_v49, %v8384_v26  ;;  %v17327_v53 = vmax.f32 %v19788_v57, %v7966_v60  ;;  %v17333_v28 = vmax.f32 %v19790_v50, %v8382_v14  ;;  %v17340_v34 = vadd.f32 %v16722_v59, %v16988_v63  ;;  %v13789_v26 = vld [vmem:[%s13905_s22 + $0xc08] sm:$0xff]   ;;  %v13790_v60 = vld [vmem:[%s13905_s22 + $0x590] sm:$0xff]   ;;  %v13249_v57 = vpop.f32.mrb[246].mxu1  ;;  %v5377_v63 = vpop.f32.mrb[247].mxu0 }
 0x2d9   : > { %19785 = vst [vmem:[#allocation37_spill] sm:$0xff] %v17313_v8  ;;  %v7047_v43 = vadd.f32 %v16722_v59, %v13248_v61  ;;  %v5375_v27 = vadd.f32 %v16722_v59, %v5374_v17  ;;  %v17348_v10 = vadd.f32 %v16722_v59, %v17007_v24  ;;  %v7971_v19 = vmax.f32 %v5383_v7, 0.0  ;;  %v7041_v21 = vpop.f32.mrb[247].mxu1 }
 0x2da   : > { %19787 = vst [vmem:[#allocation22_spill] sm:$0xff] %v17323_v1  ;;  %19789 = vst [vmem:[#allocation48_spill] sm:$0xff] %v17327_v53  ;;  %v7039_v14 = vadd.f32 %v16722_v59, %v7038_v23  ;;  %v5386_v49 = vadd.f32 %v16722_v59, %v12833_v52  ;;  %v7050_v17 = vadd.f32 %v16722_v59, %v13249_v57  ;;  %v19792_v13 = vmax.f32 %v17153_v9, 0.0  ;;  %v13825_v1 = vld [vmem:[%s13905_s22 + $0xc98] sm:$0xff]  }
 0x2db   : > { %19791 = vst [vmem:[#allocation23_spill] sm:$0xff] %v17333_v28  ;;  %v8387_v50 = vmax.f32 %v7047_v43, 0.0  ;;  %v7969_v61 = vmax.f32 %v5375_v27, 0.0  ;;  %v5378_v12 = vadd.f32 %v16722_v59, %v5377_v63  ;;  %v7042_v23 = vadd.f32 %v16722_v59, %v7041_v21 }
 0x2dc   : > { %v17357_v16 = vmax.f32 %v19792_v13, %v7971_v19  ;;  %v8385_v24 = vmax.f32 %v7039_v14, 0.0  ;;  %v7972_v7 = vmax.f32 %v5386_v49, 0.0  ;;  %12939 = vmatmul.mubr.msk.bf16.gmra.mrb[96].mxu0 %vm3115_vm0, %v13788_v15  ;;  %v19794_v52 = vmax.f32 %v17160_v38, 0.0 }
 0x2dd   : > { %v19796_v43 = vmax.f32 %v17078_v51, 0.0  ;;  %v8388_v57 = vmax.f32 %v7050_v17, 0.0  ;;  %v7970_v63 = vmax.f32 %v5378_v12, 0.0  ;;  %12942 = vmatprep.mubr.msk.bf16.mxu0 %vm3115_vm0, %v13790_v60  ;;  %v7950_v9 = vmax.f32 %v17319_v25, 0.0 }
 0x2de   : > { %19793 = vst [vmem:[#allocation24_spill] sm:$0xff] %v17357_v16  ;;  %v17363_v47 = vmax.f32 %v19794_v52, %v8387_v50  ;;  %v19798_v13 = vmax.f32 %v17086_v40, 0.0  ;;  %v19800_v38 = vmax.f32 %v17197_v39, 0.0  ;;  %v8386_v51 = vmax.f32 %v7042_v23, 0.0  ;;  %v12836_v39 = vpop.f32.mrb[248].mxu0  ;;  %v13793_v23 = vld [vmem:[%s13905_s22 + $0xc18] sm:$0xff]  }
 0x2df   : > { %v17367_v27 = vmax.f32 %v19796_v43, %v7969_v61  ;;  %13355 = vmatmul.mubr.msk.bf16.gmra.mrb[96].mxu1 %vm3115_vm0, %v13789_v26  ;;  %v8366_v12 = vmax.f32 %v17340_v34, 0.0  ;;  %v17384_v26 = vadd.f32 %v16722_v59, %v17019_v20  ;;  %v19802_v25 = vmax.f32 %v17204_v62, 0.0  ;;  %v5390_v50 = vpop.f32.mrb[249].mxu0  ;;  %v13794_v52 = vld [vmem:[%s13905_s22 + $0x5a0] sm:$0xff]   ;;  %v13823_v16 = vld [vmem:[%s13905_s22 + $0xc90] sm:$0xff]  }
 0x2e0   : > { %19795 = vst [vmem:[#allocation9_spill] sm:$0xff] %v17363_v47  ;;  %v17374_v21 = vmax.f32 %v19798_v13, %v8385_v24  ;;  %v17378_v15 = vmax.f32 %v19800_v38, %v7972_v7  ;;  %13358 = vmatprep.mubr.msk.bf16.mxu1 %vm3115_vm0, %v13791_v37  ;;  %v19804_v40 = vmax.f32 %v17115_v58, 0.0  ;;  %v17397_v34 = vadd.f32 %v16722_v59, %v17021_v5  ;;  %v13252_v37 = vpop.f32.mrb[248].mxu1  ;;  %v13792_v58 = vld [vmem:[%s13905_s22 + $0x598] sm:$0xff]   ;;  %v12837_v7 = vpop.f32.mrb[250].mxu0  ;;  %v13795_v38 = vld [vmem:[%s13905_s22 + $0xc20] sm:$0xff]  }
 0x2e1   : > { %19797 = vst [vmem:[#allocation10_spill] sm:$0xff] %v17367_v27  ;;  %v17388_v60 = vmax.f32 %v19802_v25, %v8388_v57  ;;  %v19806_v20 = vmax.f32 %v17124_v48, 0.0  ;;  %v5399_v62 = vadd.f32 %v16722_v59, %v12836_v39  ;;  %v17407_v61 = vadd.f32 %v16722_v59, %v17037_v6  ;;  %v7054_v24 = vpop.f32.mrb[249].mxu1 }
 0x2e2   : > { %19799 = vst [vmem:[#allocation49_spill] sm:$0xff] %v17374_v21  ;;  %19801 = vst [vmem:[#allocation38_spill] sm:$0xff] %v17378_v15  ;;  %v17392_v19 = vmax.f32 %v19804_v40, %v7970_v63  ;;  %v17411_v17 = vadd.f32 %v16722_v59, %v17061_v30  ;;  %v7063_v5 = vadd.f32 %v16722_v59, %v13252_v37  ;;  %v13253_v13 = vpop.f32.mrb[250].mxu1  ;;  %v5393_v30 = vpop.f32.mrb[251].mxu0  ;;  %v19808_v37 = vmax.f32 %v17261_v36, 0.0  ;;  %v19814_v36 = vld [vmem:[#allocation45_spill] sm:$0xff] }
 0x2e3   : > { %19803 = vst [vmem:[#allocation25_spill] sm:$0xff] %v17388_v60  ;;  %v17401_v49 = vmax.f32 %v19806_v20, %v8386_v51  ;;  %v5391_v48 = vadd.f32 %v16722_v59, %v5390_v50  ;;  %v17419_v43 = vadd.f32 %v16722_v59, %v17080_v0  ;;  %v7975_v57 = vmax.f32 %v5399_v62, 0.0  ;;  %v7057_v20 = vpop.f32.mrb[251].mxu1  ;;  %v13821_v15 = vld [vmem:[%s13905_s22 + $0xc88] sm:$0xff]   ;;  %v13822_v21 = vld [vmem:[%s13905_s22 + $0x610] sm:$0xff]  }
 0x2e4   : > { %19805 = vst [vmem:[#allocation26_spill] sm:$0xff] %v17392_v19  ;;  %v7055_v6 = vadd.f32 %v16722_v59, %v7054_v24  ;;  %v5402_v63 = vadd.f32 %v16722_v59, %v12837_v7  ;;  %v8391_v51 = vmax.f32 %v7063_v5, 0.0  ;;  %v7066_v40 = vadd.f32 %v16722_v59, %v13253_v13  ;;  %12943 = vmatmul.mubr.msk.bf16.gmra.mrb[100].mxu0 %vm3115_vm0, %v13792_v58 }
 0x2e5   : > { %19807 = vst [vmem:[#allocation27_spill] sm:$0xff] %v17401_v49  ;;  %v7973_v25 = vmax.f32 %v5391_v48, 0.0  ;;  %v5394_v39 = vadd.f32 %v16722_v59, %v5393_v30  ;;  %v17428_v50 = vmax.f32 %v19808_v37, %v7975_v57  ;;  %v7058_v24 = vadd.f32 %v16722_v59, %v7057_v20  ;;  %12946 = vmatprep.mubr.msk.bf16.mxu0 %vm3115_vm0, %v13794_v52  ;;  %v19819_v52 = vld [vmem:[#allocation20_spill] sm:$0xff] }
 0x2e6   : > { %v8389_v0 = vmax.f32 %v7055_v6, 0.0  ;;  %v7976_v62 = vmax.f32 %v5402_v63, 0.0  ;;  %v19810_v7 = vmax.f32 %v17271_v29, 0.0  ;;  %v19812_v5 = vmax.f32 %v17141_v22, 0.0 }
 0x2e7   : > { %19809 = vst [vmem:[#allocation28_spill] sm:$0xff] %v17428_v50  ;;  %v8392_v13 = vmax.f32 %v7066_v40, 0.0  ;;  %v7974_v30 = vmax.f32 %v5394_v39, 0.0  ;;  %13359 = vmatmul.mubr.msk.bf16.gmra.mrb[100].mxu1 %vm3115_vm0, %v13793_v23  ;;  %v17444_v57 = vadd.f32 %v16722_v59, %v19814_v36  ;;  %v19815_v58 = vmax.f32 %v17149_v56, 0.0  ;;  %v12840_v56 = vpop.f32.mrb[252].mxu0  ;;  %v19822_v39 = vld [vmem:[#allocation21_spill] sm:$0xff] }
 0x2e8   : > { %v17434_v14 = vmax.f32 %v19810_v7, %v8391_v51  ;;  %v17438_v48 = vmax.f32 %v19812_v5, %v7973_v25  ;;  %v17450_v29 = vmax.f32 %v7950_v9, %v7976_v62  ;;  %v8390_v22 = vmax.f32 %v7058_v24, 0.0  ;;  %13362 = vmatprep.mubr.msk.bf16.mxu1 %vm3115_vm0, %v13795_v38  ;;  %v5406_v37 = vpop.f32.mrb[253].mxu0  ;;  %v19825_v62 = vld [vmem:[#allocation11_spill] sm:$0xff] }
 0x2e9   : > { %v17448_v6 = vmax.f32 %v19815_v58, %v8389_v0  ;;  %v7953_v63 = vmax.f32 %v17397_v34, 0.0  ;;  %v8369_v23 = vmax.f32 %v17407_v61, 0.0  ;;  %v17455_v51 = vmax.f32 %v8366_v12, %v8392_v13  ;;  %v17470_v12 = vld [vmem:[%s19205_s2] ss:$0 sm:$0xff]  ;;  %v13256_v61 = vpop.f32.mrb[252].mxu1  ;;  %v13796_v0 = vld [vmem:[%s13905_s22 + $0x5a8] sm:$0xff]  }
 0x2ea   : > { %19811 = vst [vmem:[#allocation57_spill] sm:$0xff] %v17434_v14  ;;  %19813 = vst [vmem:[#allocation51_spill] sm:$0xff] %v17438_v48  ;;  %v19820_v25 = vmax.f32 %v19819_v52, 0.0  ;;  %v7954_v40 = vmax.f32 %v17411_v17, 0.0  ;;  %v8370_v9 = vmax.f32 %v17419_v43, 0.0  ;;  %v19823_v20 = vmax.f32 %v19822_v39, 0.0 }
 0x2eb   : > { %19816 = vst [vmem:[#allocation42_spill] sm:$0xff] %v17448_v6  ;;  %19817 = vst [vmem:[#allocation14_spill] sm:$0xff] %v17450_v29  ;;  %v5415_v34 = vadd.f32 %v17470_v12, %v12840_v56  ;;  %v17476_v17 = vadd.f32 %v17470_v12, %v19825_v62  ;;  %v19826_v43 = vld [vmem:[#allocation61_spill] sm:$0xff]  ;;  %v7079_v7 = vadd.f32 %v17470_v12, %v13256_v61  ;;  %v7070_v13 = vpop.f32.mrb[253].mxu1  ;;  %v13797_v36 = vld [vmem:[%s13905_s22 + $0xc28] sm:$0xff]  }
 0x2ec   : > { %19818 = vst [vmem:[#allocation39_spill] sm:$0xff] %v17455_v51  ;;  %v17459_v59 = vmax.f32 %v19820_v25, %v7974_v30  ;;  %v17465_v38 = vmax.f32 %v19823_v20, %v8390_v22  ;;  %v17480_v24 = vadd.f32 %v17470_v12, %v19826_v43  ;;  %v5407_v5 = vadd.f32 %v17470_v12, %v5406_v37  ;;  %v12841_v30 = vpop.f32.mrb[254].mxu0  ;;  %v13798_v58 = vld [vmem:[%s13905_s22 + $0x5b0] sm:$0xff]   ;;  %v19827_v22 = vld [vmem:[#allocation19_spill] sm:$0xff]  ;;  %v13257_v20 = vpop.f32.mrb[254].mxu1 }
 0x2ed   : > { %v17488_v52 = vadd.f32 %v17470_v12, %v19827_v22  ;;  %v7979_v25 = vmax.f32 %v5415_v34, 0.0  ;;  %v7071_v56 = vadd.f32 %v17470_v12, %v7070_v13  ;;  %v5418_v39 = vadd.f32 %v17470_v12, %v12841_v30  ;;  %v5409_v62 = vpop.f32.mrb[255].mxu0  ;;  %v13799_v43 = vld [vmem:[%s13905_s22 + $0xc30] sm:$0xff]   ;;  %v7073_v51 = vpop.f32.mrb[255].mxu1  ;;  %12947 = vmatmul.mubr.msk.bf16.gmra.mrb[104].mxu0 %vm3115_vm0, %v13796_v0 }
 0x2ee   : > { %19821 = vst [vmem:[#allocation40_spill] sm:$0xff] %v17459_v59  ;;  %19824 = vst [vmem:[#allocation52_spill] sm:$0xff] %v17465_v38  ;;  %v8395_v38 = vmax.f32 %v7079_v7, 0.0  ;;  %v7977_v61 = vmax.f32 %v5407_v5, 0.0  ;;  %v7082_v37 = vadd.f32 %v17470_v12, %v13257_v20  ;;  %v5410_v59 = vadd.f32 %v17470_v12, %v5409_v62  ;;  %12950 = vmatprep.mubr.msk.bf16.mxu0 %vm3115_vm0, %v13798_v58 }
 0x2ef   : > { %v17495_v29 = vmax.f32 %v7953_v63, %v7979_v25  ;;  %v8393_v6 = vmax.f32 %v7071_v56, 0.0  ;;  %v7980_v22 = vmax.f32 %v5418_v39, 0.0  ;;  %v7074_v34 = vadd.f32 %v17470_v12, %v7073_v51  ;;  %13363 = vmatmul.mubr.msk.bf16.gmra.mrb[104].mxu1 %vm3115_vm0, %v13797_v36  ;;  %v19832_v63 = vld [vmem:[#allocation3_spill] sm:$0xff] }
 0x2f0   : > { %v17499_v13 = vmax.f32 %v8369_v23, %v8395_v38  ;;  %v19830_v30 = vmax.f32 %v17212_v11, 0.0  ;;  %v8396_v7 = vmax.f32 %v7082_v37, 0.0  ;;  %v7978_v5 = vmax.f32 %v5410_v59, 0.0  ;;  %13366 = vmatprep.mubr.msk.bf16.mxu1 %vm3115_vm0, %v13799_v43  ;;  %v19836_v59 = vld [vmem:[#allocation18_spill] sm:$0xff]  ;;  %v13260_v43 = vpop.f32.mrb[0].mxu1 }
 0x2f1   : > { %19828 = vst [vmem:[#allocation41_spill] sm:$0xff] %v17495_v29  ;;  %v6994_v25 = vadd.f32 %v17470_v12, %v19832_v63  ;;  %v19833_v56 = vmax.f32 %v17248_v18, 0.0  ;;  %v17513_v23 = vmax.f32 %v7954_v40, %v7980_v22  ;;  %v8394_v38 = vmax.f32 %v7074_v34, 0.0  ;;  %v12844_v18 = vpop.f32.mrb[0].mxu0  ;;  %v7086_v34 = vpop.f32.mrb[1].mxu1  ;;  %v13819_v29 = vld [vmem:[%s13905_s22 + $0xc80] sm:$0xff]  }
 0x2f2   : > { %19829 = vst [vmem:[#allocation12_spill] sm:$0xff] %v17499_v13  ;;  %v17503_v48 = vmax.f32 %v19830_v30, %v7977_v61  ;;  %v8371_v11 = vmax.f32 %v17384_v26, 0.0  ;;  %v6986_v0 = vadd.f32 %v17470_v12, %v19836_v59  ;;  %v17519_v36 = vmax.f32 %v8370_v9, %v8396_v7  ;;  %v5422_v9 = vpop.f32.mrb[1].mxu0  ;;  %v13800_v61 = vld [vmem:[%s13905_s22 + $0x5b8] sm:$0xff]  }
 0x2f3   : > { %v17511_v51 = vmax.f32 %v19833_v56, %v8393_v6  ;;  %19835 = vst [vmem:[#allocation53_spill] sm:$0xff] %v17513_v23  ;;  %v19838_v58 = vmax.f32 %v17275_v31, 0.0  ;;  %v7956_v6 = vmax.f32 %v17444_v57, 0.0  ;;  %v7957_v40 = vmax.f32 %v17476_v17, 0.0  ;;  %v12845_v17 = vpop.f32.mrb[2].mxu0  ;;  %v13801_v30 = vld [vmem:[%s13905_s22 + $0xc38] sm:$0xff]  }
 0x2f4   : > { %19831 = vst [vmem:[#allocation60_spill] sm:$0xff] %v17503_v48  ;;  %19837 = vst [vmem:[#allocation54_spill] sm:$0xff] %v17519_v36  ;;  %v19840_v20 = vmax.f32 %v17283_v55, 0.0  ;;  %v5431_v26 = vadd.f32 %v17470_v12, %v12844_v18  ;;  %v8373_v31 = vmax.f32 %v17480_v24, 0.0  ;;  %v7958_v37 = vmax.f32 %v17488_v52, 0.0  ;;  %v13802_v55 = vld [vmem:[%s13905_s22 + $0x5c0] sm:$0xff]  }
 0x2f5   : > { %19834 = vst [vmem:[#allocation29_spill] sm:$0xff] %v17511_v51  ;;  %v17523_v39 = vmax.f32 %v19838_v58, %v7978_v5  ;;  %v7095_v22 = vadd.f32 %v17470_v12, %v13260_v43  ;;  %v5423_v57 = vadd.f32 %v17470_v12, %v5422_v9  ;;  %v8374_v7 = vmax.f32 %v6994_v25, 0.0  ;;  %v5425_v59 = vpop.f32.mrb[3].mxu0  ;;  %v13803_v58 = vld [vmem:[%s13905_s22 + $0xc40] sm:$0xff]   ;;  %12951 = vmatmul.mubr.msk.bf16.gmra.mrb[108].mxu0 %vm3115_vm0, %v13800_v61  ;;  %v13816_v36 = vld [vmem:[%s13905_s22 + $0x5f8] sm:$0xff]  }
 0x2f6   : > { %v17529_v62 = vmax.f32 %v19840_v20, %v8394_v38  ;;  %v7983_v5 = vmax.f32 %v5431_v26, 0.0  ;;  %v7087_v63 = vadd.f32 %v17470_v12, %v7086_v34  ;;  %v5434_v56 = vadd.f32 %v17470_v12, %v12845_v17  ;;  %v13261_v38 = vpop.f32.mrb[2].mxu1  ;;  %12954 = vmatprep.mubr.msk.bf16.mxu0 %vm3115_vm0, %v13802_v55  ;;  %v13804_v55 = vld [vmem:[%s13905_s22 + $0x5c8] sm:$0xff]   ;;  %v13817_v48 = vld [vmem:[%s13905_s22 + $0xc78] sm:$0xff]  }
 0x2f7   : > { %19839 = vst [vmem:[#allocation30_spill] sm:$0xff] %v17523_v39  ;;  %v8399_v24 = vmax.f32 %v7095_v22, 0.0  ;;  %v7981_v18 = vmax.f32 %v5423_v57, 0.0  ;;  %v7098_v52 = vadd.f32 %v17470_v12, %v13261_v38  ;;  %v5426_v20 = vadd.f32 %v17470_v12, %v5425_v59  ;;  %v7089_v43 = vpop.f32.mrb[3].mxu1  ;;  %13367 = vmatmul.mubr.msk.bf16.gmra.mrb[108].mxu1 %vm3115_vm0, %v13801_v30 }
 0x2f8   : > { %19841 = vst [vmem:[#allocation31_spill] sm:$0xff] %v17529_v62  ;;  %v17544_v9 = vmax.f32 %v7957_v40, %v7983_v5  ;;  %v8397_v62 = vmax.f32 %v7087_v63, 0.0  ;;  %v7984_v39 = vmax.f32 %v5434_v56, 0.0  ;;  %v7090_v25 = vadd.f32 %v17470_v12, %v7089_v43  ;;  %13370 = vmatprep.mubr.msk.bf16.mxu1 %vm3115_vm0, %v13803_v58  ;;  %v12848_v56 = vpop.f32.mrb[4].mxu0  ;;  %v13264_v30 = vpop.f32.mrb[4].mxu1  ;;  %v13807_v58 = vld [vmem:[%s13905_s22 + $0xc50] sm:$0xff]  }
 0x2f9   : > { %v17548_v26 = vmax.f32 %v8373_v31, %v8399_v24  ;;  %v19844_v34 = vmax.f32 %v17348_v10, 0.0  ;;  %v8400_v22 = vmax.f32 %v7098_v52, 0.0  ;;  %v7982_v57 = vmax.f32 %v5426_v20, 0.0  ;;  %v5438_v59 = vpop.f32.mrb[5].mxu0  ;;  %v13808_v20 = vld [vmem:[%s13905_s22 + $0x5d8] sm:$0xff]  }
 0x2fa   : > { %19842 = vst [vmem:[#allocation2_spill] sm:$0xff] %v17544_v9  ;;  %v8372_v40 = vmax.f32 %v6986_v0, 0.0  ;;  %v17556_v5 = vmax.f32 %v8371_v11, %v8397_v62  ;;  %v17558_v63 = vmax.f32 %v7958_v37, %v7984_v39  ;;  %v8398_v61 = vmax.f32 %v7090_v25, 0.0  ;;  %v7102_v0 = vpop.f32.mrb[5].mxu1  ;;  %v12849_v11 = vpop.f32.mrb[6].mxu0  ;;  %v13805_v62 = vld [vmem:[%s13905_s22 + $0xc48] sm:$0xff]  }
 0x2fb   : > { %19843 = vst [vmem:[#allocation16_spill] sm:$0xff] %v17548_v26  ;;  %v17552_v17 = vmax.f32 %v19844_v34, %v7981_v18  ;;  %v17561_v10 = vmax.f32 %v8374_v7, %v8400_v22  ;;  %v17563_v31 = vmax.f32 %v7956_v6, %v7982_v57  ;;  %v13806_v39 = vld [vmem:[%s13905_s22 + $0x5d0] sm:$0xff]   ;;  %v13265_v37 = vpop.f32.mrb[6].mxu1  ;;  %v5441_v24 = vpop.f32.mrb[7].mxu0  ;;  %v13809_v34 = vld [vmem:[%s13905_s22 + $0xc58] sm:$0xff]   ;;  %v13810_v22 = vld [vmem:[%s13905_s22 + $0x5e0] sm:$0xff]   ;;  %v17635_v13 = vadd.f32 %v17470_v12, %v12848_v56 }
 0x2fc   : > { %19846 = vst [vmem:[#allocation4_spill] sm:$0xff] %v17556_v5  ;;  %19847 = vst [vmem:[#allocation43_spill] sm:$0xff] %v17558_v63  ;;  %v17565_v38 = vmax.f32 %v8372_v40, %v8398_v61  ;;  %v7105_v7 = vpop.f32.mrb[7].mxu1  ;;  %v13811_v61 = vld [vmem:[%s13905_s22 + $0xc60] sm:$0xff]   ;;  %v13813_v63 = vld [vmem:[%s13905_s22 + $0xc68] sm:$0xff]   ;;  %v17646_v14 = vadd.f32 %v17470_v12, %v5438_v59  ;;  %v17649_v50 = vadd.f32 %v17470_v12, %v7102_v0 }
 0x2fd   : > { %19845 = vst [vmem:[#allocation44_spill] sm:$0xff] %v17552_v17  ;;  %19848 = vst [vmem:[#allocation15_spill] sm:$0xff] %v17561_v10  ;;  %12955 = vmatmul.mubr.msk.bf16.gmra.mrb[112].mxu0 %vm3115_vm0, %v13804_v55  ;;  %v12852_v6 = vpop.f32.mrb[8].mxu0  ;;  %v17652_v49 = vadd.f32 %v17470_v12, %v12849_v11  ;;  %v17655_v56 = vadd.f32 %v17470_v12, %v13265_v37  ;;  %v17663_v60 = vadd.f32 %v17470_v12, %v7105_v7  ;;  %v13820_v7 = vld [vmem:[%s13905_s22 + $0x608] sm:$0xff]  }
 0x2fe   : > { %19849 = vst [vmem:[#allocation5_spill] sm:$0xff] %v17563_v31  ;;  %19850 = vst [vmem:[#allocation6_spill] sm:$0xff] %v17565_v38  ;;  %12958 = vmatprep.mubr.msk.bf16.mxu0 %vm3115_vm0, %v13806_v39  ;;  %v17577_v52 = vpop.f32.mrb[9].mxu0  ;;  %v13812_v38 = vld [vmem:[%s13905_s22 + $0x5e8] sm:$0xff]   ;;  %v17667_v59 = vadd.f32 %v17470_v12, %v12852_v6 }
 0x2ff   : > { %13371 = vmatmul.mubr.msk.bf16.gmra.mrb[112].mxu1 %vm3115_vm0, %v13805_v62  ;;  %v17575_v18 = vpop.f32.mrb[8].mxu1  ;;  %v17582_v25 = vpop.f32.mrb[10].mxu0 }
 0x300   : > { %13374 = vmatprep.mubr.msk.bf16.mxu1 %vm3115_vm0, %v13807_v58  ;;  %v17580_v43 = vpop.f32.mrb[9].mxu1  ;;  %v17588_v40 = vpop.f32.mrb[11].mxu0  ;;  %v17684_v11 = vadd.f32 %v17470_v12, %v17575_v18 }
 0x301   : > { %v17586_v57 = vpop.f32.mrb[10].mxu1  ;;  %v17696_v6 = vadd.f32 %v17470_v12, %v17580_v43  ;;  %v17710_v27 = vadd.f32 %v17470_v12, %v17588_v40 }
 0x302   : > { %v17591_v55 = vpop.f32.mrb[11].mxu1  ;;  %v17704_v18 = vadd.f32 %v17470_v12, %v17586_v57 }
 0x303   : > { %v17714_v43 = vadd.f32 %v17470_v12, %v17591_v55 }
 0x304   : > { %19852 = vst [vmem:[#allocation55_spill] sm:$0xff] %v17704_v18 }
 0x305   : > { %12959 = vmatmul.mubr.msk.bf16.gmra.mrb[116].mxu0 %vm3115_vm0, %v13808_v20  ;;  %v17597_v62 = vpop.f32.mrb[12].mxu0  ;;  %v13814_v20 = vld [vmem:[%s13905_s22 + $0x5f0] sm:$0xff]  }
 0x306   : > { %12962 = vmatprep.mubr.msk.bf16.mxu0 %vm3115_vm0, %v13810_v22  ;;  %v17601_v58 = vpop.f32.mrb[13].mxu0 }
 0x307   : > { %13375 = vmatmul.mubr.msk.bf16.gmra.mrb[116].mxu1 %vm3115_vm0, %v13809_v34  ;;  %v17599_v39 = vpop.f32.mrb[12].mxu1  ;;  %v17606_v10 = vpop.f32.mrb[14].mxu0  ;;  %v17727_v28 = vadd.f32 %v17470_v12, %v17601_v58 }
 0x308   : > { %13378 = vmatprep.mubr.msk.bf16.mxu1 %vm3115_vm0, %v13811_v61  ;;  %v17604_v31 = vpop.f32.mrb[13].mxu1  ;;  %v17612_v22 = vpop.f32.mrb[15].mxu0  ;;  %v13815_v61 = vld [vmem:[%s13905_s22 + $0xc70] sm:$0xff]   ;;  %v17722_v57 = vadd.f32 %v17470_v12, %v17599_v39  ;;  %v17735_v55 = vadd.f32 %v17470_v12, %v17606_v10 }
 0x309   : > { %v17610_v34 = vpop.f32.mrb[14].mxu1  ;;  %v17731_v40 = vadd.f32 %v17470_v12, %v17604_v31  ;;  %v17745_v58 = vadd.f32 %v17470_v12, %v17612_v22 }
 0x30a   : > { %v17615_v5 = vpop.f32.mrb[15].mxu1  ;;  %19854 = vst [vmem:[#allocation7_spill] sm:$0xff] %v17722_v57  ;;  %19855 = vst [vmem:[#allocation58_spill] sm:$0xff] %v17735_v55  ;;  %v13827_v57 = vld [vmem:[%s13905_s22 + $0xca0] sm:$0xff]  }
 0x30b   : > { %19857 = vst [vmem:[#allocation62_spill] sm:$0xff] %v17745_v58  ;;  %v17749_v31 = vadd.f32 %v17470_v12, %v17615_v5 }
 0x30d   : > { %12963 = vmatmul.mubr.msk.bf16.gmra.mrb[120].mxu0 %vm3115_vm0, %v13812_v38  ;;  %v17621_v17 = vpop.f32.mrb[16].mxu0  ;;  %v13818_v38 = vld [vmem:[%s13905_s22 + $0x600] sm:$0xff]   ;;  %19858 = vst [vmem:[#allocation50_spill] sm:$0xff] %v17749_v31 }
 0x30e   : > { %12966 = vmatprep.mubr.msk.bf16.mxu0 %vm3115_vm0, %v13814_v20  ;;  %v17625_v9 = vpop.f32.mrb[17].mxu0  ;;  %v17757_v53 = vadd.f32 %v17470_v12, %v17621_v17 }
 0x30f   : > { %13379 = vmatmul.mubr.msk.bf16.gmra.mrb[120].mxu1 %vm3115_vm0, %v13813_v63  ;;  %v17623_v26 = vpop.f32.mrb[16].mxu1  ;;  %v17630_v51 = vpop.f32.mrb[18].mxu0  ;;  %v17638_v63 = vadd.f32 %v17470_v12, %v13264_v30  ;;  %v17660_v30 = vadd.f32 %v17470_v12, %v5441_v24 }
 0x310   : > { %13382 = vmatprep.mubr.msk.bf16.mxu1 %vm3115_vm0, %v13815_v61  ;;  %v17628_v23 = vpop.f32.mrb[17].mxu1  ;;  %v17642_v61 = vpop.f32.mrb[19].mxu0  ;;  %19859 = vst [vmem:[#allocation17_spill] sm:$0xff] %v17757_v53  ;;  %v17774_v10 = vadd.f32 %v17470_v12, %v17623_v26  ;;  %v17788_v5 = vadd.f32 %v17470_v12, %v17630_v51 }
 0x311   : > { %v17640_v20 = vpop.f32.mrb[18].mxu1  ;;  %v17784_v8 = vadd.f32 %v17470_v12, %v17628_v23  ;;  %v17798_v55 = vadd.f32 %v17470_v12, %v17642_v61 }
 0x312   : > { %v17657_v19 = vpop.f32.mrb[19].mxu1  ;;  %19860 = vst [vmem:[#allocation59_spill] sm:$0xff] %v17788_v5  ;;  %v17792_v26 = vadd.f32 %v17470_v12, %v17640_v20 }
 0x313   : > { %v17802_v23 = vadd.f32 %v17470_v12, %v17657_v19 }
 0x314   : > { %19861 = vst [vmem:[#allocation32_spill] sm:$0xff] %v17792_v26 }
 0x315   : > { %12967 = vmatmul.mubr.msk.bf16.gmra.mrb[124].mxu0 %vm3115_vm0, %v13816_v36 }
 0x316   : > { %12970 = vmatprep.mubr.msk.bf16.mxu0 %vm3115_vm0, %v13818_v38  ;;  %v17700_v38 = vadd.f32 %v17470_v12, %v17582_v25  ;;  %v17718_v25 = vadd.f32 %v17470_v12, %v17597_v62  ;;  %v17739_v62 = vadd.f32 %v17470_v12, %v17610_v34  ;;  %v13824_v34 = vld [vmem:[%s13905_s22 + $0x618] sm:$0xff]  }
 0x317   : > { %13383 = vmatmul.mubr.msk.bf16.gmra.mrb[124].mxu1 %vm3115_vm0, %v13817_v48  ;;  %v17678_v48 = vpop.f32.mrb[20].mxu0  ;;  %v13280_v0 = vpop.f32.mrb[20].mxu1 }
 0x318   : > { %13386 = vmatprep.mubr.msk.bf16.mxu1 %vm3115_vm0, %v13819_v29  ;;  %v17688_v29 = vadd.f32 %v17470_v12, %v17577_v52  ;;  %v17690_v36 = vpop.f32.mrb[21].mxu0  ;;  %19851 = vst [vmem:[#allocation8_spill] sm:$0xff] %v17700_v38  ;;  %v7166_v52 = vpop.f32.mrb[21].mxu1  ;;  %19853 = vst [vmem:[#allocation56_spill] sm:$0xff] %v17718_v25  ;;  %v17806_v51 = vadd.f32 %v17470_v12, %v17678_v48 }
 0x319   : > { %v12865_v37 = vpop.f32.mrb[22].mxu0  ;;  %v13281_v24 = vpop.f32.mrb[22].mxu1  ;;  %19856 = vst [vmem:[#allocation13_spill] sm:$0xff] %v17739_v62  ;;  %v13826_v62 = vld [vmem:[%s13905_s22 + $0x620] sm:$0xff]   ;;  %v17814_v25 = vadd.f32 %v17470_v12, %v17690_v36  ;;  %v17817_v61 = vadd.f32 %v17470_v12, %v7166_v52 }
 0x31a   : > { %v5505_v47 = vpop.f32.mrb[23].mxu0  ;;  %v7169_v39 = vpop.f32.mrb[23].mxu1  ;;  %19862 = vst [vmem:[#allocation33_spill] sm:$0xff] %v17806_v51  ;;  %v17820_v19 = vadd.f32 %v17470_v12, %v12865_v37  ;;  %v17823_v18 = vadd.f32 %v17470_v12, %v13281_v24  ;;  %v13831_v51 = vld [vmem:[%s13905_s22 + $0xcb0] sm:$0xff]  }
 0x31b   : > { %v17828_v31 = vadd.f32 %v17470_v12, %v5505_v47  ;;  %v17831_v36 = vadd.f32 %v17470_v12, %v7169_v39 }
 0x31c   : > { %19864 = vst [vmem:[#allocation45_spill] sm:$0xff] %v17820_v19  ;;  %19865 = vst [vmem:[#allocation20_spill] sm:$0xff] %v17823_v18  ;;  %v13830_v18 = vld [vmem:[%s13905_s22 + $0x630] sm:$0xff]  }
 0x31d   : > { %12971 = vmatmul.mubr.msk.bf16.gmra.mrb[128].mxu0 %vm3115_vm0, %v13820_v7  ;;  %19866 = vst [vmem:[#allocation21_spill] sm:$0xff] %v17828_v31  ;;  %19867 = vst [vmem:[#allocation11_spill] sm:$0xff] %v17831_v36 }
 0x31e   : > { %12974 = vmatprep.mubr.msk.bf16.mxu0 %vm3115_vm0, %v13822_v21  ;;  %v17809_v21 = vadd.f32 %v17470_v12, %v13280_v0 }
 0x31f   : > { %13387 = vmatmul.mubr.msk.bf16.gmra.mrb[128].mxu1 %vm3115_vm0, %v13821_v15  ;;  %v12868_v15 = vpop.f32.mrb[24].mxu0  ;;  %v13284_v7 = vpop.f32.mrb[24].mxu1 }
 0x320   : > { %13390 = vmatprep.mubr.msk.bf16.mxu1 %vm3115_vm0, %v13823_v16  ;;  %v17778_v16 = vadd.f32 %v17470_v12, %v17625_v9  ;;  %v5518_v17 = vpop.f32.mrb[25].mxu0  ;;  %v7182_v9 = vpop.f32.mrb[25].mxu1  ;;  %19863 = vst [vmem:[#allocation34_spill] sm:$0xff] %v17809_v21  ;;  %v17838_v58 = vadd.f32 %v17470_v12, %v12868_v15  ;;  %v13828_v15 = vld [vmem:[%s13905_s22 + $0x628] sm:$0xff]  }
 0x321   : > { %v12869_v22 = vpop.f32.mrb[26].mxu0  ;;  %v13285_v20 = vpop.f32.mrb[26].mxu1  ;;  %v17860_v52 = vadd.f32 %v17470_v12, %v5518_v17 }
 0x322   : > { %v5521_v53 = vpop.f32.mrb[27].mxu0  ;;  %v7185_v48 = vpop.f32.mrb[27].mxu1  ;;  %19868 = vst [vmem:[#allocation61_spill] sm:$0xff] %v17838_v58 }
 0x323   : > { %v17872_v19 = vadd.f32 %v17470_v12, %v5521_v53  ;;  %v19871_v53 = vmax.f32 %v17646_v14, 0.0 }
 0x325   : > { %12975 = vmatmul.mubr.msk.bf16.gmra.mrb[132].mxu0 %vm3115_vm0, %v13824_v34  ;;  %v17854_v34 = vadd.f32 %v17470_v12, %v13284_v7  ;;  %v13829_v7 = vld [vmem:[%s13905_s22 + $0xca8] sm:$0xff]  }
 0x326   : > { %12978 = vmatprep.mubr.msk.bf16.mxu0 %vm3115_vm0, %v13826_v62  ;;  %v12872_v62 = vpop.f32.mrb[28].mxu0 }
 0x327   : > { %13391 = vmatmul.mubr.msk.bf16.gmra.mrb[132].mxu1 %vm3115_vm0, %v13825_v1  ;;  %19869 = vst [vmem:[#allocation19_spill] sm:$0xff] %v17854_v34  ;;  %v13288_v0 = vpop.f32.mrb[28].mxu1  ;;  %v5534_v24 = vpop.f32.mrb[29].mxu0  ;;  %v17863_v1 = vadd.f32 %v17470_v12, %v7182_v9  ;;  %v17877_v9 = vadd.f32 %v17470_v12, %v7185_v48 }
 0x328   : > { %13394 = vmatprep.mubr.msk.bf16.mxu1 %vm3115_vm0, %v13827_v57  ;;  %v5543_v57 = vadd.f32 %v17470_v12, %v12872_v62  ;;  %v7207_v47 = vadd.f32 %v17470_v12, %v13288_v0  ;;  %v7198_v39 = vpop.f32.mrb[29].mxu1  ;;  %v12873_v38 = vpop.f32.mrb[30].mxu0  ;;  %v17869_v62 = vadd.f32 %v17470_v12, %v12869_v22  ;;  %v17880_v26 = vadd.f32 %v17470_v12, %v5534_v24 }
 0x329   : > { %v5546_v37 = vadd.f32 %v17470_v12, %v12873_v38  ;;  %v13289_v17 = vpop.f32.mrb[30].mxu1  ;;  %v5537_v58 = vpop.f32.mrb[31].mxu0  ;;  %v17887_v38 = vadd.f32 %v17470_v12, %v7198_v39  ;;  %v19873_v24 = vmax.f32 %v17649_v50, 0.0 }
 0x32a   : > { %19870 = vst [vmem:[#allocation3_spill] sm:$0xff] %v17869_v62  ;;  %v8011_v21 = vmax.f32 %v5543_v57, 0.0  ;;  %v8427_v0 = vmax.f32 %v7207_v47, 0.0  ;;  %v7210_v5 = vadd.f32 %v17470_v12, %v13289_v17  ;;  %v7201_v22 = vpop.f32.mrb[31].mxu1  ;;  %v17892_v47 = vadd.f32 %v17470_v12, %v13285_v20  ;;  %v19876_v20 = vld [vmem:[#allocation46_spill] sm:$0xff] }
 0x32b   : > { %v8012_v36 = vmax.f32 %v5546_v37, 0.0  ;;  %v19874_v37 = vld [vmem:[#allocation35_spill] sm:$0xff] }
 0x32c   : > { %v8817_v57 = vmax.f32 %v19871_v53, %v8011_v21  ;;  %19872 = vst [vmem:[#allocation18_spill] sm:$0xff] %v17892_v47  ;;  %v8921_v17 = vmax.f32 %v19873_v24, %v8427_v0  ;;  %v8428_v31 = vmax.f32 %v7210_v5, 0.0  ;;  %v19882_v47 = vmax.f32 %v17688_v29, 0.0 }
 0x32d   : > { %12979 = vmatmul.mubr.msk.bf16.gmra.mrb[136].mxu0 %vm3115_vm0, %v13828_v15  ;;  %v19875_v15 = vmax.f32 %v17660_v30, 0.0  ;;  %v12876_v24 = vpop.f32.mrb[32].mxu0  ;;  %v17912_v30 = vadd.f32 %v17470_v12, %v5537_v58  ;;  %v13833_v58 = vld [vmem:[%s13905_s22 + $0xcb8] sm:$0xff]  }
 0x32e   : > { %12982 = vmatprep.mubr.msk.bf16.mxu0 %vm3115_vm0, %v13830_v18  ;;  %v9025_v39 = vmax.f32 %v19874_v37, %v8817_v57  ;;  %v9129_v5 = vmax.f32 %v19876_v20, %v8921_v17  ;;  %v19877_v18 = vmax.f32 %v17663_v60, 0.0  ;;  %v19878_v57 = vld [vmem:[#allocation36_spill] sm:$0xff]  ;;  %v13832_v17 = vld [vmem:[%s13905_s22 + $0x638] sm:$0xff]   ;;  %v19880_v20 = vld [vmem:[#allocation47_spill] sm:$0xff]  ;;  %v17918_v60 = vadd.f32 %v17470_v12, %v7201_v22 }
 0x32f   : > { %13395 = vmatmul.mubr.msk.bf16.gmra.mrb[136].mxu1 %vm3115_vm0, %v13829_v7  ;;  %v8818_v53 = vmax.f32 %v19875_v15, %v8012_v36  ;;  %19879 = vst [vmem:[#allocation35_spill] sm:$0xff] %v17912_v30  ;;  %v13292_v36 = vpop.f32.mrb[32].mxu1  ;;  %v5550_v15 = vpop.f32.mrb[33].mxu0  ;;  %v13835_v22 = vld [vmem:[%s13905_s22 + $0xcc0] sm:$0xff]  }
 0x330   : > { %13398 = vmatprep.mubr.msk.bf16.mxu1 %vm3115_vm0, %v13831_v51  ;;  %v8922_v0 = vmax.f32 %v19877_v18, %v8428_v31  ;;  %v5559_v51 = vadd.f32 %v17470_v12, %v12876_v24  ;;  %19881 = vst [vmem:[#allocation46_spill] sm:$0xff] %v17918_v60  ;;  %v7223_v31 = vadd.f32 %v17470_v12, %v13292_v36  ;;  %v7214_v62 = vpop.f32.mrb[33].mxu1 }
 0x331   : > { %v9026_v37 = vmax.f32 %v19878_v57, %v8818_v53  ;;  %v5551_v18 = vadd.f32 %v17470_v12, %v5550_v15  ;;  %v12877_v53 = vpop.f32.mrb[34].mxu0  ;;  %v13834_v57 = vld [vmem:[%s13905_s22 + $0x640] sm:$0xff]   ;;  %v7215_v21 = vadd.f32 %v17470_v12, %v7214_v62 }
 0x332   : > { %v9130_v7 = vmax.f32 %v19880_v20, %v8922_v0  ;;  %v8015_v24 = vmax.f32 %v5559_v51, 0.0  ;;  %v5562_v14 = vadd.f32 %v17470_v12, %v12877_v53  ;;  %v13293_v0 = vpop.f32.mrb[34].mxu1  ;;  %v5553_v20 = vpop.f32.mrb[35].mxu0  ;;  %v8431_v60 = vmax.f32 %v7223_v31, 0.0 }
 0x333   : > { %v11674_v50 = vpack.c.bf16 %v9026_v37, %v9025_v39  ;;  %v8013_v36 = vmax.f32 %v5551_v18, 0.0  ;;  %v7226_v15 = vadd.f32 %v17470_v12, %v13293_v0  ;;  %v7217_v30 = vpop.f32.mrb[35].mxu1  ;;  %v8429_v39 = vmax.f32 %v7215_v21, 0.0 }
 0x334   : > { %v11934_v48 = vpack.c.bf16 %v9130_v7, %v9129_v5  ;;  %v8821_v34 = vmax.f32 %v19882_v47, %v8015_v24  ;;  %v8016_v37 = vmax.f32 %v5562_v14, 0.0  ;;  %v5554_v62 = vadd.f32 %v17470_v12, %v5553_v20 }
 0x335   : > { %12086 = vst [vmem:[%s15166_s30 + $0xd0] sm:$0xff] %v11674_v50   ;;  %12983 = vmatmul.mubr.msk.bf16.gmra.mrb[140].mxu0 %vm3115_vm0, %v13832_v17  ;;  %v19883_v51 = vmax.f32 %v17696_v6, 0.0  ;;  %v19884_v5 = vmax.f32 %v17635_v13, 0.0  ;;  %v8432_v31 = vmax.f32 %v7226_v15, 0.0  ;;  %v7218_v18 = vadd.f32 %v17470_v12, %v7217_v30 }
 0x336   : > { %12138 = vst [vmem:[%s15166_s30 + $0x270] sm:$0xff] %v11934_v48   ;;  %12986 = vmatprep.mubr.msk.bf16.mxu0 %vm3115_vm0, %v13834_v57  ;;  %v9029_v29 = vmax.f32 %v17221_v45, %v8821_v34  ;;  %v19885_v47 = vmax.f32 %v17638_v63, 0.0  ;;  %v19886_v48 = vmax.f32 %v17710_v27, 0.0  ;;  %v8014_v21 = vmax.f32 %v5554_v62, 0.0  ;;  %v12880_v45 = vpop.f32.mrb[36].mxu0 }
 0x337   : > { %v8925_v53 = vmax.f32 %v19883_v51, %v8431_v60  ;;  %v8819_v7 = vmax.f32 %v19884_v5, %v8013_v36  ;;  %13399 = vmatmul.mubr.msk.bf16.gmra.mrb[140].mxu1 %vm3115_vm0, %v13833_v58  ;;  %v19887_v30 = vmax.f32 %v17714_v43, 0.0  ;;  %v8430_v60 = vmax.f32 %v7218_v18, 0.0  ;;  %v13296_v24 = vpop.f32.mrb[36].mxu1  ;;  %v13837_v36 = vld [vmem:[%s13905_s22 + $0xcc8] sm:$0xff]  }
 0x338   : > { %v8923_v14 = vmax.f32 %v19885_v47, %v8429_v39  ;;  %v8822_v6 = vmax.f32 %v19886_v48, %v8016_v37  ;;  %13402 = vmatprep.mubr.msk.bf16.mxu1 %vm3115_vm0, %v13835_v22  ;;  %v19888_v27 = vmax.f32 %v17652_v49, 0.0  ;;  %v5575_v57 = vadd.f32 %v17470_v12, %v12880_v45 }
 0x339   : > { %v9133_v13 = vmax.f32 %v17227_v2, %v8925_v53  ;;  %v9027_v50 = vmax.f32 %v17231_v42, %v8819_v7  ;;  %v8926_v17 = vmax.f32 %v19887_v30, %v8432_v31  ;;  %v5566_v2 = vpop.f32.mrb[37].mxu0  ;;  %v13836_v42 = vld [vmem:[%s13905_s22 + $0x648] sm:$0xff]   ;;  %v19889_v0 = vmax.f32 %v17655_v56, 0.0  ;;  %v13838_v53 = vld [vmem:[%s13905_s22 + $0x650] sm:$0xff]  }
 0x33a   : > { %v9131_v63 = vmax.f32 %v17238_v3, %v8923_v14  ;;  %v9030_v34 = vmax.f32 %v17242_v46, %v8822_v6  ;;  %v8820_v58 = vmax.f32 %v19888_v27, %v8014_v21  ;;  %v7239_v22 = vadd.f32 %v17470_v12, %v13296_v24  ;;  %v7230_v46 = vpop.f32.mrb[37].mxu1  ;;  %v12881_v49 = vpop.f32.mrb[38].mxu0  ;;  %v13839_v56 = vld [vmem:[%s13905_s22 + $0xcd0] sm:$0xff]  }
 0x33b   : > { %v9134_v43 = vmax.f32 %v17252_v4, %v8926_v17  ;;  %v8924_v20 = vmax.f32 %v19889_v0, %v8430_v60  ;;  %v5567_v3 = vadd.f32 %v17470_v12, %v5566_v2  ;;  %v8019_v37 = vmax.f32 %v5575_v57, 0.0  ;;  %v13297_v51 = vpop.f32.mrb[38].mxu1  ;;  %v5569_v4 = vpop.f32.mrb[39].mxu0  ;;  %v19894_v57 = vld [vmem:[#allocation62_spill] sm:$0xff] }
 0x33c   : > { %v11684_v15 = vpack.c.bf16 %v9030_v34, %v9029_v29  ;;  %v9028_v39 = vmax.f32 %v17256_v41, %v8820_v58  ;;  %v7231_v62 = vadd.f32 %v17470_v12, %v7230_v46  ;;  %v8435_v31 = vmax.f32 %v7239_v22, 0.0  ;;  %v7233_v47 = vpop.f32.mrb[39].mxu1  ;;  %v13840_v22 = vld [vmem:[%s13905_s22 + $0x658] sm:$0xff]  }
 0x33d   : > { %v11944_v5 = vpack.c.bf16 %v9134_v43, %v9133_v13  ;;  %v9132_v7 = vmax.f32 %v17265_v33, %v8924_v20  ;;  %v8017_v18 = vmax.f32 %v5567_v3, 0.0  ;;  %v19890_v29 = vmax.f32 %v17727_v28, 0.0  ;;  %12987 = vmatmul.mubr.msk.bf16.gmra.mrb[144].mxu0 %vm3115_vm0, %v13836_v42  ;;  %v12884_v58 = vpop.f32.mrb[40].mxu0 }
 0x33e   : > { %12088 = vst [vmem:[%s15166_s30 + $0xe0] sm:$0xff] %v11684_v15   ;;  %v11679_v14 = vpack.c.bf16 %v9028_v39, %v9027_v50  ;;  %v8433_v48 = vmax.f32 %v7231_v62, 0.0  ;;  %v5578_v6 = vadd.f32 %v17470_v12, %v12881_v49  ;;  %v19891_v13 = vmax.f32 %v17731_v40, 0.0  ;;  %12990 = vmatprep.mubr.msk.bf16.mxu0 %vm3115_vm0, %v13838_v53  ;;  %v5582_v20 = vpop.f32.mrb[41].mxu0  ;;  %v13841_v39 = vld [vmem:[%s13905_s22 + $0xcd8] sm:$0xff]  }
 0x33f   : > { %v8825_v41 = vmax.f32 %v19890_v29, %v8019_v37  ;;  %12140 = vst [vmem:[%s15166_s30 + $0x280] sm:$0xff] %v11944_v5   ;;  %v11939_v21 = vpack.c.bf16 %v9132_v7, %v9131_v63  ;;  %v19892_v30 = vmax.f32 %v17667_v59, 0.0  ;;  %v7242_v60 = vadd.f32 %v17470_v12, %v13297_v51  ;;  %13403 = vmatmul.mubr.msk.bf16.gmra.mrb[144].mxu1 %vm3115_vm0, %v13837_v36  ;;  %v13300_v0 = vpop.f32.mrb[40].mxu1  ;;  %v12885_v15 = vpop.f32.mrb[42].mxu0  ;;  %v19898_v37 = vld [vmem:[#allocation37_spill] sm:$0xff]  ;;  %v19899_v51 = vld [vmem:[#allocation8_spill] sm:$0xff] }
 0x340   : > { %v8929_v33 = vmax.f32 %v19891_v13, %v8435_v31  ;;  %12087 = vst [vmem:[%s15166_s30 + $0xd8] sm:$0xff] %v11679_v14   ;;  %v19893_v50 = vmax.f32 %v17684_v11, 0.0  ;;  %v8020_v34 = vmax.f32 %v5578_v6, 0.0  ;;  %v5570_v63 = vadd.f32 %v17470_v12, %v5569_v4  ;;  %13406 = vmatprep.mubr.msk.bf16.mxu1 %vm3115_vm0, %v13839_v56  ;;  %v5585_v31 = vpop.f32.mrb[43].mxu0  ;;  %v19902_v29 = vld [vmem:[#allocation55_spill] sm:$0xff] }
 0x341   : > { %v8823_v17 = vmax.f32 %v19892_v30, %v8017_v18  ;;  %v9033_v28 = vmax.f32 %v17292_v54, %v8825_v41  ;;  %12139 = vst [vmem:[%s15166_s30 + $0x278] sm:$0xff] %v11939_v21   ;;  %v8436_v27 = vmax.f32 %v7242_v60, 0.0  ;;  %v7234_v54 = vadd.f32 %v17470_v12, %v7233_v47  ;;  %v13842_v18 = vld [vmem:[%s13905_s22 + $0x660] sm:$0xff]  }
 0x342   : > { %v8927_v45 = vmax.f32 %v19893_v50, %v8433_v48  ;;  %v9137_v59 = vmax.f32 %v17298_v35, %v8929_v33  ;;  %v19895_v24 = vmax.f32 %v19894_v57, 0.0  ;;  %v8018_v42 = vmax.f32 %v5570_v63, 0.0  ;;  %v19896_v35 = vld [vmem:[#allocation50_spill] sm:$0xff] }
 0x343   : > { %v9031_v40 = vmax.f32 %v17302_v44, %v8823_v17  ;;  %v5591_v43 = vadd.f32 %v17470_v12, %v12884_v58  ;;  %v19897_v3 = vmax.f32 %v19896_v35, 0.0  ;;  %v8434_v46 = vmax.f32 %v7234_v54, 0.0  ;;  %v19901_v47 = vld [vmem:[#allocation22_spill] sm:$0xff]  ;;  %v19904_v17 = vld [vmem:[#allocation48_spill] sm:$0xff]  ;;  %v19913_v35 = vld [vmem:[#allocation9_spill] sm:$0xff] }
 0x344   : > { %v9135_v11 = vmax.f32 %v17309_v32, %v8927_v45  ;;  %v8826_v2 = vmax.f32 %v19895_v24, %v8020_v34  ;;  %v7255_v49 = vadd.f32 %v17470_v12, %v13300_v0  ;;  %v5583_v36 = vadd.f32 %v17470_v12, %v5582_v20  ;;  %v7246_v32 = vpop.f32.mrb[41].mxu1  ;;  %v13843_v33 = vld [vmem:[%s13905_s22 + $0xce0] sm:$0xff]   ;;  %v19908_v24 = vld [vmem:[#allocation56_spill] sm:$0xff]  ;;  %v19911_v0 = vld [vmem:[#allocation7_spill] sm:$0xff] }
 0x345   : > { %v8930_v44 = vmax.f32 %v19897_v3, %v8436_v27  ;;  %v19900_v4 = vmax.f32 %v19899_v51, 0.0  ;;  %v8023_v56 = vmax.f32 %v5591_v43, 0.0  ;;  %v7247_v5 = vadd.f32 %v17470_v12, %v7246_v32  ;;  %v13301_v7 = vpop.f32.mrb[42].mxu1  ;;  %12991 = vmatmul.mubr.msk.bf16.gmra.mrb[148].mxu0 %vm3115_vm0, %v13840_v22  ;;  %v19906_v27 = vld [vmem:[#allocation23_spill] sm:$0xff] }
 0x346   : > { %v9034_v62 = vmax.f32 %v19898_v37, %v8826_v2  ;;  %v19903_v41 = vmax.f32 %v19902_v29, 0.0  ;;  %v8439_v6 = vmax.f32 %v7255_v49, 0.0  ;;  %v8021_v21 = vmax.f32 %v5583_v36, 0.0  ;;  %v7249_v13 = vpop.f32.mrb[43].mxu1  ;;  %12994 = vmatprep.mubr.msk.bf16.mxu0 %vm3115_vm0, %v13842_v18  ;;  %v12888_v49 = vpop.f32.mrb[44].mxu0  ;;  %v19915_v36 = vld [vmem:[#allocation49_spill] sm:$0xff] }
 0x347   : > { %v8824_v53 = vmax.f32 %v19900_v4, %v8018_v42  ;;  %v9138_v14 = vmax.f32 %v19901_v47, %v8930_v44  ;;  %v19905_v50 = vmax.f32 %v17778_v16, 0.0  ;;  %v8437_v34 = vmax.f32 %v7247_v5, 0.0  ;;  %13407 = vmatmul.mubr.msk.bf16.gmra.mrb[148].mxu1 %vm3115_vm0, %v13841_v39  ;;  %v19910_v16 = vld [vmem:[#allocation24_spill] sm:$0xff]  ;;  %v19914_v44 = vld [vmem:[#allocation10_spill] sm:$0xff]  ;;  %v13304_v37 = vpop.f32.mrb[44].mxu1  ;;  %v13844_v51 = vld [vmem:[%s13905_s22 + $0x668] sm:$0xff]  }
 0x348   : > { %v8928_v48 = vmax.f32 %v19903_v41, %v8434_v46  ;;  %v11694_v30 = vpack.c.bf16 %v9034_v62, %v9033_v28  ;;  %v19907_v58 = vmax.f32 %v17784_v8, 0.0  ;;  %v19909_v2 = vmax.f32 %v19908_v24, 0.0  ;;  %13410 = vmatprep.mubr.msk.bf16.mxu1 %vm3115_vm0, %v13843_v33  ;;  %v5598_v62 = vpop.f32.mrb[45].mxu0  ;;  %v13845_v47 = vld [vmem:[%s13905_s22 + $0xce8] sm:$0xff]  }
 0x349   : > { %v9032_v60 = vmax.f32 %v19904_v17, %v8824_v53  ;;  %v8829_v45 = vmax.f32 %v19905_v50, %v8023_v56  ;;  %v11954_v63 = vpack.c.bf16 %v9138_v14, %v9137_v59  ;;  %v19912_v20 = vmax.f32 %v19911_v0, 0.0  ;;  %v12889_v18 = vpop.f32.mrb[46].mxu0 }
 0x34a   : > { %v9136_v54 = vmax.f32 %v19906_v27, %v8928_v48  ;;  %v8933_v57 = vmax.f32 %v19907_v58, %v8439_v6  ;;  %v18019_v42 = vmax.f32 %v19909_v2, %v8021_v21  ;;  %12090 = vst [vmem:[%s15166_s30 + $0xf0] sm:$0xff] %v11694_v30   ;;  %v5594_v59 = vadd.f32 %v17470_v12, %v12885_v15  ;;  %v5601_v21 = vpop.f32.mrb[47].mxu0 }
 0x34b   : > { %v11689_v28 = vpack.c.bf16 %v9032_v60, %v9031_v40  ;;  %v9037_v43 = vmax.f32 %v19910_v16, %v8829_v45  ;;  %v18026_v22 = vmax.f32 %v19912_v20, %v8437_v34  ;;  %12142 = vst [vmem:[%s15166_s30 + $0x290] sm:$0xff] %v11954_v63   ;;  %v7258_v40 = vadd.f32 %v17470_v12, %v13301_v7  ;;  %v7262_v7 = vpop.f32.mrb[45].mxu1  ;;  %v13847_v34 = vld [vmem:[%s13905_s22 + $0xcf0] sm:$0xff]   ;;  %v19918_v63 = vld [vmem:[#allocation38_spill] sm:$0xff] }
 0x34c   : > { %v11949_v8 = vpack.c.bf16 %v9136_v54, %v9135_v11  ;;  %v9141_v3 = vmax.f32 %v19913_v35, %v8933_v57  ;;  %v9035_v46 = vmax.f32 %v19914_v44, %v18019_v42  ;;  %v8024_v15 = vmax.f32 %v5594_v59, 0.0  ;;  %v13305_v6 = vpop.f32.mrb[46].mxu1  ;;  %v19919_v54 = vld [vmem:[#allocation58_spill] sm:$0xff]  ;;  %v19921_v57 = vld [vmem:[#allocation13_spill] sm:$0xff] }
 0x34d   : > { %12089 = vst [vmem:[%s15166_s30 + $0xe8] sm:$0xff] %v11689_v28   ;;  %v9139_v32 = vmax.f32 %v19915_v36, %v18026_v22  ;;  %v5586_v39 = vadd.f32 %v17470_v12, %v5585_v31  ;;  %v7250_v11 = vadd.f32 %v17470_v12, %v7249_v13  ;;  %v8440_v4 = vmax.f32 %v7258_v40, 0.0  ;;  %v13846_v13 = vld [vmem:[%s13905_s22 + $0x670] sm:$0xff]   ;;  %v7265_v45 = vpop.f32.mrb[47].mxu1  ;;  %12995 = vmatmul.mubr.msk.bf16.gmra.mrb[152].mxu0 %vm3115_vm0, %v13844_v51  ;;  %v19923_v42 = vld [vmem:[#allocation25_spill] sm:$0xff]  ;;  %v19928_v44 = vld [vmem:[#allocation26_spill] sm:$0xff] }
 0x34e   : > { %12141 = vst [vmem:[%s15166_s30 + $0x288] sm:$0xff] %v11949_v8   ;;  %v5607_v53 = vadd.f32 %v17470_v12, %v12888_v49  ;;  %v7271_v56 = vadd.f32 %v17470_v12, %v13304_v37  ;;  %v5599_v5 = vadd.f32 %v17470_v12, %v5598_v62  ;;  %v19916_v31 = vmax.f32 %v17798_v55, 0.0  ;;  %v19926_v22 = vld [vmem:[#allocation17_spill] sm:$0xff]  ;;  %v19929_v49 = vld [vmem:[#allocation27_spill] sm:$0xff]  ;;  %12998 = vmatprep.mubr.msk.bf16.mxu0 %vm3115_vm0, %v13846_v13 }
 0x34f   : > { %v8022_v29 = vmax.f32 %v5586_v39, 0.0  ;;  %v8438_v41 = vmax.f32 %v7250_v11, 0.0  ;;  %v7263_v48 = vadd.f32 %v17470_v12, %v7262_v7  ;;  %v19917_v33 = vmax.f32 %v17802_v23, 0.0  ;;  %13411 = vmatmul.mubr.msk.bf16.gmra.mrb[152].mxu1 %vm3115_vm0, %v13845_v47  ;;  %v19931_v39 = vld [vmem:[#allocation28_spill] sm:$0xff]  ;;  %v19932_v37 = vld [vmem:[#allocation57_spill] sm:$0xff]  ;;  %v13308_v47 = vpop.f32.mrb[48].mxu1 }
 0x350   : > { %v8830_v14 = vmax.f32 %v19916_v31, %v8024_v15  ;;  %v8027_v17 = vmax.f32 %v5607_v53, 0.0  ;;  %v8443_v60 = vmax.f32 %v7271_v56, 0.0  ;;  %v8025_v50 = vmax.f32 %v5599_v5, 0.0  ;;  %13414 = vmatprep.mubr.msk.bf16.mxu1 %vm3115_vm0, %v13847_v34  ;;  %v19934_v56 = vld [vmem:[#allocation42_spill] sm:$0xff] }
 0x351   : > { %v8934_v30 = vmax.f32 %v19917_v33, %v8440_v4  ;;  %v19920_v55 = vmax.f32 %v19919_v54, 0.0  ;;  %v19922_v24 = vmax.f32 %v19921_v57, 0.0  ;;  %v8441_v12 = vmax.f32 %v7263_v48, 0.0  ;;  %v12892_v4 = vpop.f32.mrb[48].mxu0  ;;  %v18094_v5 = vld [vmem:[%s19205_s2] ss:$0 sm:$0xff] }
 0x352   : > { %v9038_v27 = vmax.f32 %v19918_v63, %v8830_v14  ;;  %v19924_v23 = vmax.f32 %v17814_v25, 0.0  ;;  %v19925_v0 = vmax.f32 %v17817_v61, 0.0  ;;  %v19927_v59 = vmax.f32 %v19926_v22, 0.0  ;;  %v5614_v31 = vpop.f32.mrb[49].mxu0  ;;  %v13848_v14 = vld [vmem:[%s13905_s22 + $0x678] sm:$0xff]   ;;  %v7278_v48 = vpop.f32.mrb[49].mxu1 }
 0x353   : > { %v8828_v58 = vmax.f32 %v19920_v55, %v8022_v29  ;;  %v8932_v2 = vmax.f32 %v19922_v24, %v8438_v41  ;;  %v9142_v28 = vmax.f32 %v19923_v42, %v8934_v30  ;;  %v19930_v25 = vmax.f32 %v17774_v10, 0.0  ;;  %v12893_v13 = vpop.f32.mrb[50].mxu0  ;;  %v13849_v33 = vld [vmem:[%s13905_s22 + $0xcf8] sm:$0xff]  }
 0x354   : > { %v18063_v16 = vmax.f32 %v19924_v23, %v8027_v17  ;;  %v18067_v20 = vmax.f32 %v19925_v0, %v8443_v60  ;;  %v18071_v8 = vmax.f32 %v19927_v59, %v8025_v50  ;;  %v11704_v35 = vpack.c.bf16 %v9038_v27, %v9037_v43  ;;  %v19933_v43 = vld [vmem:[#allocation51_spill] sm:$0xff]  ;;  %v13309_v50 = vpop.f32.mrb[50].mxu1  ;;  %v19935_v54 = vld [vmem:[#allocation21_spill] sm:$0xff] }
 0x355   : > { %v9036_v40 = vmax.f32 %v19928_v44, %v8828_v58  ;;  %v9140_v36 = vmax.f32 %v19929_v49, %v8932_v2  ;;  %v18078_v15 = vmax.f32 %v19930_v25, %v8441_v12  ;;  %v11964_v61 = vpack.c.bf16 %v9142_v28, %v9141_v3  ;;  %v7281_v27 = vpop.f32.mrb[51].mxu1  ;;  %12999 = vmatmul.mubr.msk.bf16.gmra.mrb[156].mxu0 %vm3115_vm0, %v13848_v14  ;;  %v19937_v12 = vld [vmem:[#allocation11_spill] sm:$0xff]  ;;  %v19944_v44 = vld [vmem:[#allocation14_spill] sm:$0xff]  ;;  %v19946_v25 = vld [vmem:[#allocation33_spill] sm:$0xff] }
 0x356   : > { %v9041_v11 = vmax.f32 %v19931_v39, %v18063_v16  ;;  %v9145_v62 = vmax.f32 %v19932_v37, %v18067_v20  ;;  %v9039_v51 = vmax.f32 %v19933_v43, %v18071_v8  ;;  %12092 = vst [vmem:[%s15166_s30 + $0x100] sm:$0xff] %v11704_v35   ;;  %v5610_v7 = vadd.f32 %v18094_v5, %v12889_v18  ;;  %v19939_v23 = vld [vmem:[#allocation59_spill] sm:$0xff]  ;;  %v19941_v20 = vld [vmem:[#allocation32_spill] sm:$0xff]  ;;  %v19948_v39 = vld [vmem:[#allocation34_spill] sm:$0xff] }
 0x357   : > { %v11699_v10 = vpack.c.bf16 %v9036_v40, %v9035_v46  ;;  %v11959_v53 = vpack.c.bf16 %v9140_v36, %v9139_v32  ;;  %v9143_v3 = vmax.f32 %v19934_v56, %v18078_v15  ;;  %12144 = vst [vmem:[%s15166_s30 + $0x2a0] sm:$0xff] %v11964_v61   ;;  %v7274_v29 = vadd.f32 %v18094_v5, %v13305_v6  ;;  %v5617_v6 = vpop.f32.mrb[51].mxu0  ;;  %v19952_v56 = vld [vmem:[#allocation52_spill] sm:$0xff] }
 0x358   : > { %v5602_v46 = vadd.f32 %v18094_v5, %v5601_v21  ;;  %v7266_v32 = vadd.f32 %v18094_v5, %v7265_v45  ;;  %v5623_v41 = vadd.f32 %v18094_v5, %v12892_v4  ;;  %v8028_v30 = vmax.f32 %v5610_v7, 0.0  ;;  %13415 = vmatmul.mubr.msk.bf16.gmra.mrb[156].mxu1 %vm3115_vm0, %v13849_v33  ;;  %v19950_v4 = vld [vmem:[#allocation39_spill] sm:$0xff] }
 0x359   : > { %12091 = vst [vmem:[%s15166_s30 + $0xf8] sm:$0xff] %v11699_v10   ;;  %12143 = vst [vmem:[%s15166_s30 + $0x298] sm:$0xff] %v11959_v53   ;;  %v7287_v18 = vadd.f32 %v18094_v5, %v13308_v47  ;;  %v5615_v17 = vadd.f32 %v18094_v5, %v5614_v31  ;;  %v7279_v60 = vadd.f32 %v18094_v5, %v7278_v48  ;;  %v8444_v34 = vmax.f32 %v7274_v29, 0.0  ;;  %v19953_v47 = vld [vmem:[#allocation41_spill] sm:$0xff]  ;;  %v19954_v29 = vld [vmem:[#allocation12_spill] sm:$0xff] }
 0x35a   : > { %v8026_v21 = vmax.f32 %v5602_v46, 0.0  ;;  %v8442_v63 = vmax.f32 %v7266_v32, 0.0  ;;  %v8031_v45 = vmax.f32 %v5623_v41, 0.0  ;;  %v19936_v55 = vmax.f32 %v19935_v54, 0.0  ;;  %v19955_v32 = vld [vmem:[#allocation60_spill] sm:$0xff]  ;;  %v19956_v48 = vld [vmem:[#allocation29_spill] sm:$0xff] }
 0x35b   : > { %v8447_v57 = vmax.f32 %v7287_v18, 0.0  ;;  %v8029_v24 = vmax.f32 %v5615_v17, 0.0  ;;  %v8445_v2 = vmax.f32 %v7279_v60, 0.0  ;;  %v19938_v42 = vmax.f32 %v19937_v12, 0.0 }
 0x35c   : > { %v8834_v58 = vmax.f32 %v19936_v55, %v8028_v30  ;;  %v19940_v16 = vmax.f32 %v19939_v23, 0.0  ;;  %v19942_v22 = vmax.f32 %v19941_v20, 0.0  ;;  %v19943_v8 = vmax.f32 %v17860_v52, 0.0  ;;  %v19951_v52 = vld [vmem:[#allocation40_spill] sm:$0xff]  ;;  %v13312_v30 = vpop.f32.mrb[52].mxu1 }
 0x35d   : > { %v8938_v28 = vmax.f32 %v19938_v42, %v8444_v34  ;;  %v19945_v49 = vmax.f32 %v17863_v1, 0.0  ;;  %v19947_v15 = vmax.f32 %v19946_v25, 0.0  ;;  %v19949_v37 = vmax.f32 %v19948_v39, 0.0  ;;  %v12896_v1 = vpop.f32.mrb[52].mxu0 }
 0x35e   : > { %v8832_v0 = vmax.f32 %v19940_v16, %v8026_v21  ;;  %v8936_v59 = vmax.f32 %v19942_v22, %v8442_v63  ;;  %v8837_v35 = vmax.f32 %v19943_v8, %v8031_v45  ;;  %v9042_v40 = vmax.f32 %v19944_v44, %v8834_v58  ;;  %v5630_v18 = vpop.f32.mrb[53].mxu0  ;;  %v19961_v44 = vld [vmem:[#allocation20_spill] sm:$0xff] }
 0x35f   : > { %v18124_v36 = vmax.f32 %v19945_v49, %v8447_v57  ;;  %v18128_v61 = vmax.f32 %v19947_v15, %v8029_v24  ;;  %v18132_v43 = vmax.f32 %v19949_v37, %v8445_v2  ;;  %v9146_v10 = vmax.f32 %v19950_v4, %v8938_v28  ;;  %v12897_v63 = vpop.f32.mrb[54].mxu0  ;;  %v19964_v15 = vld [vmem:[#allocation53_spill] sm:$0xff] }
 0x360   : > { %v9040_v53 = vmax.f32 %v19951_v52, %v8832_v0  ;;  %v9144_v7 = vmax.f32 %v19952_v56, %v8936_v59  ;;  %v9045_v31 = vmax.f32 %v19953_v47, %v8837_v35  ;;  %v11714_v14 = vpack.c.bf16 %v9042_v40, %v9041_v11  ;;  %v7294_v11 = vpop.f32.mrb[53].mxu1  ;;  %v5633_v24 = vpop.f32.mrb[55].mxu0  ;;  %v19959_v59 = vld [vmem:[#allocation45_spill] sm:$0xff]  ;;  %v19970_v56 = vld [vmem:[#allocation54_spill] sm:$0xff] }
 0x361   : > { %v9149_v46 = vmax.f32 %v19954_v29, %v18124_v36  ;;  %v9043_v41 = vmax.f32 %v19955_v32, %v18128_v61  ;;  %v9147_v33 = vmax.f32 %v19956_v48, %v18132_v43  ;;  %v11974_v17 = vpack.c.bf16 %v9146_v10, %v9145_v62  ;;  %v13313_v57 = vpop.f32.mrb[54].mxu1  ;;  %v19966_v37 = vld [vmem:[#allocation61_spill] sm:$0xff]  ;;  %v19968_v10 = vld [vmem:[#allocation19_spill] sm:$0xff]  ;;  %v19971_v47 = vld [vmem:[#allocation30_spill] sm:$0xff] }
 0x362   : > { %v11709_v60 = vpack.c.bf16 %v9040_v53, %v9039_v51  ;;  %v11969_v34 = vpack.c.bf16 %v9144_v7, %v9143_v3  ;;  %v5626_v21 = vadd.f32 %v18094_v5, %v12893_v13  ;;  %12094 = vst [vmem:[%s15166_s30 + $0x110] sm:$0xff] %v11714_v14   ;;  %v7290_v45 = vadd.f32 %v18094_v5, %v13309_v50  ;;  %v7297_v2 = vpop.f32.mrb[55].mxu1  ;;  %v18173_v53 = vpop.f32.mrb[56].mxu0  ;;  %v19972_v14 = vld [vmem:[#allocation31_spill] sm:$0xff]  ;;  %v19973_v29 = vld [vmem:[#allocation2_spill] sm:$0xff] }
 0x363   : > { %v5618_v54 = vadd.f32 %v18094_v5, %v5617_v6  ;;  %v7282_v55 = vadd.f32 %v18094_v5, %v7281_v27  ;;  %v5639_v58 = vadd.f32 %v18094_v5, %v12896_v1  ;;  %12146 = vst [vmem:[%s15166_s30 + $0x2b0] sm:$0xff] %v11974_v17   ;;  %v7303_v51 = vadd.f32 %v18094_v5, %v13312_v30  ;;  %v18179_v48 = vpop.f32.mrb[56].mxu1 }
 0x364   : > { %12093 = vst [vmem:[%s15166_s30 + $0x108] sm:$0xff] %v11709_v60   ;;  %12145 = vst [vmem:[%s15166_s30 + $0x2a8] sm:$0xff] %v11969_v34   ;;  %v8032_v62 = vmax.f32 %v5626_v21, 0.0  ;;  %v5631_v3 = vadd.f32 %v18094_v5, %v5630_v18  ;;  %v7295_v13 = vadd.f32 %v18094_v5, %v7294_v11  ;;  %v8448_v50 = vmax.f32 %v7290_v45, 0.0  ;;  %v19974_v18 = vld [vmem:[#allocation16_spill] sm:$0xff]  ;;  %v18186_v45 = vpop.f32.mrb[57].mxu1 }
 0x365   : > { %v8030_v12 = vmax.f32 %v5618_v54, 0.0  ;;  %v8446_v6 = vmax.f32 %v7282_v55, 0.0  ;;  %v8035_v42 = vmax.f32 %v5639_v58, 0.0  ;;  %v19957_v27 = vmax.f32 %v17872_v19, 0.0  ;;  %v19975_v60 = vld [vmem:[#allocation44_spill] sm:$0xff] }
 0x366   : > { %v8451_v23 = vmax.f32 %v7303_v51, 0.0  ;;  %v8033_v16 = vmax.f32 %v5631_v3, 0.0  ;;  %v8449_v0 = vmax.f32 %v7295_v13, 0.0  ;;  %v19958_v20 = vmax.f32 %v17877_v9, 0.0  ;;  %v19976_v21 = vld [vmem:[#allocation4_spill] sm:$0xff]  ;;  %v18191_v3 = vpop.f32.mrb[58].mxu1 }
 0x367   : > { %v8838_v28 = vmax.f32 %v19957_v27, %v8032_v62  ;;  %v19960_v8 = vmax.f32 %v19959_v59, 0.0  ;;  %v19962_v40 = vmax.f32 %v19961_v44, 0.0  ;;  %v19963_v36 = vmax.f32 %v17880_v26, 0.0  ;;  %v19978_v27 = vld [vmem:[#allocation18_spill] sm:$0xff] }
 0x368   : > { %v8942_v22 = vmax.f32 %v19958_v20, %v8448_v50  ;;  %v19965_v19 = vmax.f32 %v17887_v38, 0.0  ;;  %v19967_v43 = vmax.f32 %v19966_v37, 0.0  ;;  %v19969_v9 = vmax.f32 %v19968_v10, 0.0  ;;  %v18181_v38 = vpop.f32.mrb[57].mxu0 }
 0x369   : > { %v8836_v35 = vmax.f32 %v19960_v8, %v8030_v12  ;;  %v8940_v49 = vmax.f32 %v19962_v40, %v8446_v6  ;;  %v8841_v25 = vmax.f32 %v19963_v36, %v8035_v42  ;;  %v9046_v61 = vmax.f32 %v19964_v15, %v8838_v28  ;;  %v18188_v54 = vpop.f32.mrb[58].mxu0  ;;  %v18199_v6 = vpop.f32.mrb[59].mxu1  ;;  %v19977_v42 = vld [vmem:[#allocation3_spill] sm:$0xff]  ;;  %v19983_v15 = vld [vmem:[#allocation5_spill] sm:$0xff] }
 0x36a   : > { %v8945_v39 = vmax.f32 %v19965_v19, %v8451_v23  ;;  %v8839_v4 = vmax.f32 %v19967_v43, %v8033_v16  ;;  %v8943_v52 = vmax.f32 %v19969_v9, %v8449_v0  ;;  %v9150_v7 = vmax.f32 %v19970_v56, %v8942_v22  ;;  %v19980_v23 = vld [vmem:[#allocation46_spill] sm:$0xff]  ;;  %v13320_v40 = vpop.f32.mrb[60].mxu1  ;;  %v19982_v36 = vld [vmem:[#allocation15_spill] sm:$0xff] }
 0x36b   : > { %v9044_v1 = vmax.f32 %v19971_v47, %v8836_v35  ;;  %v9148_v26 = vmax.f32 %v19972_v14, %v8940_v49  ;;  %v9049_v32 = vmax.f32 %v19973_v29, %v8841_v25  ;;  %v11724_v30 = vpack.c.bf16 %v9046_v61, %v9045_v31  ;;  %v18193_v31 = vpop.f32.mrb[59].mxu0  ;;  %v19981_v35 = vld [vmem:[#allocation43_spill] sm:$0xff]  ;;  %v19984_v19 = vld [vmem:[#allocation6_spill] sm:$0xff]  ;;  %v7326_v37 = vpop.f32.mrb[61].mxu1 }
 0x36c   : > { %v9153_v17 = vmax.f32 %v19974_v18, %v8945_v39  ;;  %v9047_v34 = vmax.f32 %v19975_v60, %v8839_v4  ;;  %v9151_v11 = vmax.f32 %v19976_v21, %v8943_v52  ;;  %v11984_v55 = vpack.c.bf16 %v9150_v7, %v9149_v46  ;;  %v12904_v8 = vpop.f32.mrb[60].mxu0  ;;  %v13321_v10 = vpop.f32.mrb[62].mxu1 }
 0x36d   : > { %v11719_v58 = vpack.c.bf16 %v9044_v1, %v9043_v41  ;;  %v11979_v62 = vpack.c.bf16 %v9148_v26, %v9147_v33  ;;  %v5642_v51 = vadd.f32 %v18094_v5, %v12897_v63  ;;  %12096 = vst [vmem:[%s15166_s30 + $0x120] sm:$0xff] %v11724_v30   ;;  %v7306_v13 = vadd.f32 %v18094_v5, %v13313_v57  ;;  %v19979_v33 = vld [vmem:[#allocation35_spill] sm:$0xff]  ;;  %v5662_v49 = vpop.f32.mrb[61].mxu0  ;;  %v7329_v47 = vpop.f32.mrb[63].mxu1 }
 0x36e   : > { %v5634_v50 = vadd.f32 %v18094_v5, %v5633_v24  ;;  %v7298_v12 = vadd.f32 %v18094_v5, %v7297_v2  ;;  %v8008_v46 = vmax.f32 %v19977_v42, 0.0  ;;  %v8424_v41 = vmax.f32 %v19978_v27, 0.0  ;;  %12148 = vst [vmem:[%s15166_s30 + $0x2c0] sm:$0xff] %v11984_v55   ;;  %v12905_v43 = vpop.f32.mrb[62].mxu0 }
 0x36f   : > { %v8010_v28 = vmax.f32 %v19979_v33, 0.0  ;;  %12095 = vst [vmem:[%s15166_s30 + $0x118] sm:$0xff] %v11719_v58   ;;  %12147 = vst [vmem:[%s15166_s30 + $0x2b8] sm:$0xff] %v11979_v62   ;;  %v8036_v63 = vmax.f32 %v5642_v51, 0.0  ;;  %v8426_v16 = vmax.f32 %v19980_v23, 0.0  ;;  %v8452_v0 = vmax.f32 %v7306_v13, 0.0 }
 0x370   : > { %v8034_v57 = vmax.f32 %v5634_v50, 0.0  ;;  %v8450_v20 = vmax.f32 %v7298_v12, 0.0  ;;  %v5665_v9 = vpop.f32.mrb[63].mxu0  ;;  %v18256_v33 = vadd.f32 %v18094_v5, %v18173_v53  ;;  %v18266_v23 = vadd.f32 %v18094_v5, %v18181_v38 }
 0x371   : > { %v8842_v24 = vmax.f32 %v8010_v28, %v8036_v63  ;;  %v8946_v22 = vmax.f32 %v8426_v16, %v8452_v0  ;;  %v12908_v1 = vpop.f32.mrb[64].mxu0  ;;  %v18262_v63 = vadd.f32 %v18094_v5, %v18179_v48  ;;  %v18270_v16 = vadd.f32 %v18094_v5, %v18186_v45 }
 0x372   : > { %v8840_v2 = vmax.f32 %v8008_v46, %v8034_v57  ;;  %v8944_v59 = vmax.f32 %v8424_v41, %v8450_v20  ;;  %v13324_v14 = vpop.f32.mrb[64].mxu1  ;;  %v5678_v26 = vpop.f32.mrb[65].mxu0  ;;  %v18279_v48 = vadd.f32 %v18094_v5, %v18188_v54  ;;  %v18283_v38 = vadd.f32 %v18094_v5, %v18191_v3 }
 0x373   : > { %v9050_v44 = vmax.f32 %v19981_v35, %v8842_v24  ;;  %v9154_v25 = vmax.f32 %v19982_v36, %v8946_v22  ;;  %v7342_v29 = vpop.f32.mrb[65].mxu1  ;;  %v18216_v30 = vpop.f32.mrb[66].mxu0  ;;  %v18299_v54 = vadd.f32 %v18094_v5, %v12904_v8  ;;  %v18309_v36 = vadd.f32 %v18094_v5, %v5662_v49 }
 0x374   : > { %v9048_v61 = vmax.f32 %v19983_v15, %v8840_v2  ;;  %v9152_v39 = vmax.f32 %v19984_v19, %v8944_v59  ;;  %v18218_v18 = vpop.f32.mrb[66].mxu1  ;;  %v18220_v60 = vpop.f32.mrb[67].mxu0  ;;  %v18292_v2 = vadd.f32 %v18094_v5, %v18193_v31  ;;  %v18296_v59 = vadd.f32 %v18094_v5, %v18199_v6 }
 0x375   : > { %v11734_v4 = vpack.c.bf16 %v9050_v44, %v9049_v32  ;;  %v11994_v52 = vpack.c.bf16 %v9154_v25, %v9153_v17  ;;  %v18222_v32 = vpop.f32.mrb[67].mxu1  ;;  %v18306_v44 = vadd.f32 %v18094_v5, %v13320_v40  ;;  %v18312_v31 = vadd.f32 %v18094_v5, %v7326_v37 }
 0x376   : > { %v11729_v56 = vpack.c.bf16 %v9048_v61, %v9047_v34  ;;  %v11989_v7 = vpack.c.bf16 %v9152_v39, %v9151_v11  ;;  %v18315_v25 = vadd.f32 %v18094_v5, %v12905_v43  ;;  %v18322_v15 = vadd.f32 %v18094_v5, %v13321_v10 }
 0x377   : > { %12098 = vst [vmem:[%s15166_s30 + $0x130] sm:$0xff] %v11734_v4   ;;  %12150 = vst [vmem:[%s15166_s30 + $0x2d0] sm:$0xff] %v11994_v52   ;;  %v18224_v17 = vpop.f32.mrb[68].mxu0  ;;  %v18325_v61 = vadd.f32 %v18094_v5, %v5665_v9  ;;  %v18328_v40 = vadd.f32 %v18094_v5, %v7329_v47  ;;  %v18331_v49 = vadd.f32 %v18094_v5, %v12908_v1  ;;  %v8038_v10 = vmax.f32 %v18292_v2, 0.0 }
 0x378   : > { %12097 = vst [vmem:[%s15166_s30 + $0x128] sm:$0xff] %v11729_v56   ;;  %12149 = vst [vmem:[%s15166_s30 + $0x2c8] sm:$0xff] %v11989_v7   ;;  %v18228_v21 = vpop.f32.mrb[69].mxu0  ;;  %v18338_v43 = vadd.f32 %v18094_v5, %v13324_v14  ;;  %v18341_v4 = vadd.f32 %v18094_v5, %v5678_v26  ;;  %v8454_v9 = vmax.f32 %v18296_v59, 0.0  ;;  %v18347_v56 = vadd.f32 %v18094_v5, %v7342_v29 }
 0x379   : > { %v18232_v55 = vpop.f32.mrb[70].mxu0  ;;  %v18361_v7 = vadd.f32 %v18094_v5, %v18216_v30  ;;  %v18369_v2 = vadd.f32 %v18094_v5, %v18218_v18  ;;  %v18373_v29 = vadd.f32 %v18094_v5, %v18220_v60  ;;  %v18384_v26 = vadd.f32 %v18094_v5, %v18224_v17 }
 0x37a   : > { %v18226_v34 = vpop.f32.mrb[68].mxu1  ;;  %v18236_v62 = vpop.f32.mrb[71].mxu0 }
 0x37b   : > { %v18230_v11 = vpop.f32.mrb[69].mxu1  ;;  %v18391_v60 = vadd.f32 %v18094_v5, %v18226_v34  ;;  %v19990_v34 = vmax.f32 %v18266_v23, 0.0 }
 0x37c   : > { %v18234_v58 = vpop.f32.mrb[70].mxu1  ;;  %v18402_v17 = vadd.f32 %v18094_v5, %v18230_v11 }
 0x37d   : > { %v18238_v51 = vpop.f32.mrb[71].mxu1 }
 0x37f   : > { %v18240_v13 = vpop.f32.mrb[72].mxu0 }
 0x380   : > { %v18244_v12 = vpop.f32.mrb[73].mxu0 }
 0x381   : > { %v18248_v46 = vpop.f32.mrb[74].mxu0 }
 0x382   : > { %v18242_v50 = vpop.f32.mrb[72].mxu1  ;;  %v18252_v41 = vpop.f32.mrb[75].mxu0 }
 0x383   : > { %v18246_v42 = vpop.f32.mrb[73].mxu1 }
 0x384   : > { %v18250_v27 = vpop.f32.mrb[74].mxu1 }
 0x385   : > { %v18258_v28 = vpop.f32.mrb[75].mxu1 }
 0x387   : > { %v18273_v57 = vpop.f32.mrb[76].mxu0 }
 0x388   : > { %v18287_v45 = vpop.f32.mrb[77].mxu0 }
 0x389   : > { %v18303_v3 = vpop.f32.mrb[78].mxu0 }
 0x38a   : > { %v18285_v24 = vpop.f32.mrb[76].mxu1  ;;  %v18319_v8 = vpop.f32.mrb[79].mxu0 }
 0x38b   : > { %v18301_v35 = vpop.f32.mrb[77].mxu1 }
 0x38c   : > { %v18317_v6 = vpop.f32.mrb[78].mxu1 }
 0x38d   : > { %19985 = vst [vmem:[#allocation36_spill] sm:$0xff] %v18317_v6  ;;  %v18333_v19 = vpop.f32.mrb[79].mxu1 }
 0x38f   : > { %v12924_v52 = vpop.f32.mrb[80].mxu0 }
 0x390   : > { %v5751_v53 = vadd.f32 %v18094_v5, %v12924_v52  ;;  %v18364_v0 = vpop.f32.mrb[81].mxu0  ;;  %v18380_v52 = vadd.f32 %v18094_v5, %v18222_v32 }
 0x391   : > { %19986 = vst [vmem:[#allocation47_spill] sm:$0xff] %v18364_v0  ;;  %v12925_v30 = vpop.f32.mrb[82].mxu0 }
 0x392   : > { %v13340_v14 = vpop.f32.mrb[80].mxu1  ;;  %v8063_v37 = vmax.f32 %v5751_v53, 0.0  ;;  %v5754_v18 = vadd.f32 %v18094_v5, %v12925_v30  ;;  %v18387_v47 = vpop.f32.mrb[83].mxu0  ;;  %v18406_v53 = vadd.f32 %v18094_v5, %v18232_v55 }
 0x393   : > { %v7415_v59 = vadd.f32 %v18094_v5, %v13340_v14  ;;  %v18376_v39 = vpop.f32.mrb[81].mxu1  ;;  %19988 = vst [vmem:[#allocation50_spill] sm:$0xff] %v18387_v47  ;;  %v18395_v14 = vadd.f32 %v18094_v5, %v18228_v21 }
 0x394   : > { %19987 = vst [vmem:[#allocation62_spill] sm:$0xff] %v18376_v39  ;;  %v13341_v1 = vpop.f32.mrb[82].mxu1  ;;  %v18410_v30 = vmax.f32 %v19990_v34, %v8063_v37  ;;  %v8064_v6 = vmax.f32 %v5754_v18, 0.0  ;;  %v18441_v34 = vadd.f32 %v18094_v5, %v18238_v51 }
 0x395   : > { %v8479_v32 = vmax.f32 %v7415_v59, 0.0  ;;  %v7418_v22 = vadd.f32 %v18094_v5, %v13341_v1  ;;  %v18398_v20 = vpop.f32.mrb[83].mxu1  ;;  %v18415_v1 = vadd.f32 %v18094_v5, %v18234_v58  ;;  %v19992_v59 = vmax.f32 %v18270_v16, 0.0 }
 0x396   : > { %19989 = vst [vmem:[#allocation37_spill] sm:$0xff] %v18398_v20  ;;  %19991 = vst [vmem:[#allocation8_spill] sm:$0xff] %v18410_v30  ;;  %v18424_v37 = vmax.f32 %v8038_v10, %v8064_v6 }
 0x397   : > { %v18419_v20 = vmax.f32 %v19992_v59, %v8479_v32  ;;  %v8480_v11 = vmax.f32 %v7418_v22, 0.0  ;;  %v12928_v16 = vpop.f32.mrb[84].mxu0  ;;  %v18435_v59 = vadd.f32 %v18094_v5, %v18236_v62  ;;  %v18447_v62 = vadd.f32 %v18094_v5, %v18240_v13 }
 0x398   : > { %19994 = vst [vmem:[#allocation55_spill] sm:$0xff] %v18424_v37  ;;  %v5767_v6 = vadd.f32 %v18094_v5, %v12928_v16  ;;  %v5758_v47 = vpop.f32.mrb[85].mxu0 }
 0x399   : > { %19993 = vst [vmem:[#allocation22_spill] sm:$0xff] %v18419_v20  ;;  %v18429_v21 = vmax.f32 %v8454_v9, %v8480_v11  ;;  %v5759_v11 = vadd.f32 %v18094_v5, %v5758_v47  ;;  %v12929_v22 = vpop.f32.mrb[86].mxu0  ;;  %v19996_v20 = vmax.f32 %v18309_v36, 0.0  ;;  %v19999_v36 = vmax.f32 %v18262_v63, 0.0 }
 0x39a   : > { %v13344_v10 = vpop.f32.mrb[84].mxu1  ;;  %v8067_v58 = vmax.f32 %v5767_v6, 0.0  ;;  %v5770_v23 = vadd.f32 %v18094_v5, %v12929_v22  ;;  %v5761_v55 = vpop.f32.mrb[87].mxu0 }
 0x39b   : > { %19995 = vst [vmem:[#allocation48_spill] sm:$0xff] %v18429_v21  ;;  %v7431_v9 = vadd.f32 %v18094_v5, %v13344_v10  ;;  %v7422_v32 = vpop.f32.mrb[85].mxu1  ;;  %v8065_v51 = vmax.f32 %v5759_v11, 0.0  ;;  %v5762_v10 = vadd.f32 %v18094_v5, %v5761_v55 }
 0x39c   : > { %v7423_v16 = vadd.f32 %v18094_v5, %v7422_v32  ;;  %v13345_v18 = vpop.f32.mrb[86].mxu1  ;;  %v18455_v30 = vmax.f32 %v19996_v20, %v8067_v58  ;;  %v8068_v39 = vmax.f32 %v5770_v23, 0.0  ;;  %v19997_v32 = vmax.f32 %v18312_v31, 0.0 }
 0x39d   : > { %v8483_v21 = vmax.f32 %v7431_v9, 0.0  ;;  %v7434_v37 = vadd.f32 %v18094_v5, %v13345_v18  ;;  %v7425_v47 = vpop.f32.mrb[87].mxu1  ;;  %v19998_v9 = vmax.f32 %v18256_v33, 0.0  ;;  %v8066_v0 = vmax.f32 %v5762_v10, 0.0 }
 0x39e   : > { %v8481_v13 = vmax.f32 %v7423_v16, 0.0  ;;  %v7426_v6 = vadd.f32 %v18094_v5, %v7425_v47  ;;  %v20000_v23 = vmax.f32 %v18325_v61, 0.0  ;;  %v18478_v33 = vadd.f32 %v18094_v5, %v18242_v50 }
 0x39f   : > { %v18460_v22 = vmax.f32 %v19997_v32, %v8483_v21  ;;  %v18464_v11 = vmax.f32 %v19998_v9, %v8065_v51  ;;  %v8484_v18 = vmax.f32 %v7434_v37, 0.0  ;;  %v20001_v21 = vmax.f32 %v18328_v40, 0.0  ;;  %v12932_v10 = vpop.f32.mrb[88].mxu0 }
 0x3a0   : > { %v18469_v20 = vmax.f32 %v19999_v36, %v8481_v13  ;;  %v18473_v58 = vmax.f32 %v20000_v23, %v8068_v39  ;;  %v8482_v16 = vmax.f32 %v7426_v6, 0.0  ;;  %v20002_v51 = vmax.f32 %v18279_v48, 0.0  ;;  %v5774_v6 = vpop.f32.mrb[89].mxu0 }
 0x3a1   : > { %v18482_v37 = vmax.f32 %v20001_v21, %v8484_v18  ;;  %v18491_v39 = vadd.f32 %v18094_v5, %v18244_v12  ;;  %v20003_v47 = vmax.f32 %v18283_v38, 0.0  ;;  %v5783_v50 = vadd.f32 %v18094_v5, %v12932_v10  ;;  %v12933_v38 = vpop.f32.mrb[90].mxu0 }
 0x3a2   : > { %v18486_v63 = vmax.f32 %v20002_v51, %v8066_v0  ;;  %v13348_v40 = vpop.f32.mrb[88].mxu1  ;;  %v18500_v48 = vadd.f32 %v18094_v5, %v18246_v42  ;;  %v18504_v0 = vadd.f32 %v18094_v5, %v18248_v46  ;;  %v5775_v12 = vadd.f32 %v18094_v5, %v5774_v6  ;;  %v5777_v21 = vpop.f32.mrb[91].mxu0 }
 0x3a3   : > { %v18495_v13 = vmax.f32 %v20003_v47, %v8482_v16  ;;  %v7447_v32 = vadd.f32 %v18094_v5, %v13348_v40  ;;  %v7438_v9 = vpop.f32.mrb[89].mxu1  ;;  %v18510_v18 = vadd.f32 %v18094_v5, %v18250_v27  ;;  %v8071_v36 = vmax.f32 %v5783_v50, 0.0 }
 0x3a4   : > { %v7439_v23 = vadd.f32 %v18094_v5, %v7438_v9  ;;  %v5786_v42 = vadd.f32 %v18094_v5, %v12933_v38  ;;  %v13349_v16 = vpop.f32.mrb[90].mxu1  ;;  %v8069_v46 = vmax.f32 %v5775_v12, 0.0  ;;  %v5778_v47 = vadd.f32 %v18094_v5, %v5777_v21 }
 0x3a5   : > { %v8487_v51 = vmax.f32 %v7447_v32, 0.0  ;;  %v7450_v10 = vadd.f32 %v18094_v5, %v13349_v16  ;;  %v7441_v40 = vpop.f32.mrb[91].mxu1  ;;  %v20004_v6 = vmax.f32 %v18341_v4, 0.0  ;;  %v20005_v9 = vmax.f32 %v18347_v56, 0.0 }
 0x3a6   : > { %v8485_v27 = vmax.f32 %v7439_v23, 0.0  ;;  %v8072_v31 = vmax.f32 %v5786_v42, 0.0  ;;  %v7442_v50 = vadd.f32 %v18094_v5, %v7441_v40  ;;  %v20006_v32 = vmax.f32 %v18299_v54, 0.0 }
 0x3a7   : > { %v18518_v61 = vmax.f32 %v20004_v6, %v8071_v36  ;;  %v18523_v38 = vmax.f32 %v20005_v9, %v8487_v51  ;;  %v8488_v16 = vmax.f32 %v7450_v10, 0.0  ;;  %v8070_v55 = vmax.f32 %v5778_v47, 0.0  ;;  %v12936_v47 = vpop.f32.mrb[92].mxu0 }
 0x3a8   : > { %v18527_v12 = vmax.f32 %v20006_v32, %v8069_v46  ;;  %v20007_v4 = vmax.f32 %v18306_v44, 0.0  ;;  %v20008_v23 = vmax.f32 %v18373_v29, 0.0  ;;  %v8486_v40 = vmax.f32 %v7442_v50, 0.0  ;;  %v5790_v9 = vpop.f32.mrb[93].mxu0 }
 0x3a9   : > { %v18541_v54 = vadd.f32 %v18094_v5, %v18252_v41  ;;  %v20009_v51 = vmax.f32 %v18380_v52, 0.0  ;;  %v20011_v10 = vmax.f32 %v18315_v25, 0.0  ;;  %v20013_v6 = vmax.f32 %v18322_v15, 0.0 }
 0x3aa   : > { %v18532_v36 = vmax.f32 %v20007_v4, %v8485_v27  ;;  %v18536_v42 = vmax.f32 %v20008_v23, %v8072_v31  ;;  %v5799_v41 = vadd.f32 %v18094_v5, %v12936_v47  ;;  %v13352_v50 = vpop.f32.mrb[92].mxu1  ;;  %v18561_v25 = vadd.f32 %v18094_v5, %v18258_v28  ;;  %v12937_v4 = vpop.f32.mrb[94].mxu0 }
 0x3ab   : > { %v18545_v46 = vmax.f32 %v20009_v51, %v8488_v16  ;;  %v18549_v44 = vmax.f32 %v20011_v10, %v8070_v55  ;;  %v18555_v27 = vmax.f32 %v20013_v6, %v8486_v40  ;;  %v7463_v55 = vadd.f32 %v18094_v5, %v13352_v50  ;;  %v7454_v16 = vpop.f32.mrb[93].mxu1  ;;  %v5793_v47 = vpop.f32.mrb[95].mxu0 }
 0x3ac   : > { %v5791_v32 = vadd.f32 %v18094_v5, %v5790_v9  ;;  %v18567_v15 = vadd.f32 %v18094_v5, %v18273_v57  ;;  %v8075_v23 = vmax.f32 %v5799_v41, 0.0  ;;  %v7455_v40 = vadd.f32 %v18094_v5, %v7454_v16  ;;  %v13353_v10 = vpop.f32.mrb[94].mxu1 }
 0x3ad   : > { %20010 = vst [vmem:[#allocation23_spill] sm:$0xff] %v18545_v46  ;;  %20012 = vst [vmem:[#allocation56_spill] sm:$0xff] %v18549_v44  ;;  %v5802_v51 = vadd.f32 %v18094_v5, %v12937_v4  ;;  %v8491_v6 = vmax.f32 %v7463_v55, 0.0  ;;  %v7466_v52 = vadd.f32 %v18094_v5, %v13353_v10  ;;  %v5794_v50 = vadd.f32 %v18094_v5, %v5793_v47  ;;  %v7457_v9 = vpop.f32.mrb[95].mxu1 }
 0x3ae   : > { %20014 = vst [vmem:[#allocation24_spill] sm:$0xff] %v18555_v27  ;;  %v8073_v28 = vmax.f32 %v5791_v32, 0.0  ;;  %v20015_v31 = vmax.f32 %v18395_v14, 0.0  ;;  %v8489_v57 = vmax.f32 %v7455_v40, 0.0  ;;  %v7458_v41 = vadd.f32 %v18094_v5, %v7457_v9 }
 0x3af   : > { %v8076_v29 = vmax.f32 %v5802_v51, 0.0  ;;  %v20017_v16 = vmax.f32 %v18402_v17, 0.0  ;;  %v20019_v55 = vmax.f32 %v18331_v49, 0.0  ;;  %v8492_v10 = vmax.f32 %v7466_v52, 0.0 }
 0x3b0   : > { %v18575_v21 = vmax.f32 %v20015_v31, %v8075_v23  ;;  %v8074_v56 = vmax.f32 %v5794_v50, 0.0  ;;  %v8054_v47 = vmax.f32 %v18541_v54, 0.0  ;;  %v20021_v14 = vmax.f32 %v18338_v43, 0.0 }
 0x3b1   : > { %v18580_v4 = vmax.f32 %v20017_v16, %v8491_v6  ;;  %v18584_v32 = vmax.f32 %v20019_v55, %v8073_v28  ;;  %v20023_v23 = vmax.f32 %v18435_v59, 0.0  ;;  %v8490_v51 = vmax.f32 %v7458_v41, 0.0  ;;  %v12940_v28 = vpop.f32.mrb[96].mxu0 }
 0x3b2   : > { %20016 = vst [vmem:[#allocation7_spill] sm:$0xff] %v18575_v21  ;;  %v18589_v31 = vmax.f32 %v20021_v14, %v8489_v57  ;;  %v8470_v17 = vmax.f32 %v18561_v25, 0.0  ;;  %v18598_v49 = vadd.f32 %v18094_v5, %v18285_v24  ;;  %v20025_v52 = vmax.f32 %v18441_v34, 0.0  ;;  %v13356_v34 = vpop.f32.mrb[96].mxu1  ;;  %v5806_v9 = vpop.f32.mrb[97].mxu0 }
 0x3b3   : > { %20018 = vst [vmem:[#allocation9_spill] sm:$0xff] %v18580_v4  ;;  %20020 = vst [vmem:[#allocation10_spill] sm:$0xff] %v18584_v32  ;;  %v18593_v40 = vmax.f32 %v20023_v23, %v8076_v29  ;;  %v20027_v54 = vmax.f32 %v18361_v7, 0.0  ;;  %v18611_v29 = vadd.f32 %v18094_v5, %v18287_v45  ;;  %v20029_v25 = vmax.f32 %v18369_v2, 0.0  ;;  %v7470_v41 = vpop.f32.mrb[97].mxu1  ;;  %v12941_v16 = vpop.f32.mrb[98].mxu0 }
 0x3b4   : > { %20022 = vst [vmem:[#allocation49_spill] sm:$0xff] %v18589_v31  ;;  %v18602_v6 = vmax.f32 %v20025_v52, %v8492_v10  ;;  %v5815_v24 = vadd.f32 %v18094_v5, %v12940_v28  ;;  %v7391_v7 = vadd.f32 %v18094_v5, %v18301_v35  ;;  %v7479_v57 = vadd.f32 %v18094_v5, %v13356_v34  ;;  %v13357_v35 = vpop.f32.mrb[98].mxu1  ;;  %v5809_v23 = vpop.f32.mrb[99].mxu0 }
 0x3b5   : > { %20024 = vst [vmem:[#allocation38_spill] sm:$0xff] %v18593_v40  ;;  %v18606_v43 = vmax.f32 %v20027_v54, %v8074_v56  ;;  %v18615_v50 = vmax.f32 %v20029_v25, %v8490_v51  ;;  %v18622_v56 = vadd.f32 %v18094_v5, %v18319_v8  ;;  %v5807_v45 = vadd.f32 %v18094_v5, %v5806_v9  ;;  %v7473_v28 = vpop.f32.mrb[99].mxu1 }
 0x3b6   : > { %20026 = vst [vmem:[#allocation58_spill] sm:$0xff] %v18602_v6  ;;  %v18628_v2 = vadd.f32 %v18094_v5, %v18333_v19  ;;  %v8079_v55 = vmax.f32 %v5815_v24, 0.0  ;;  %v7471_v10 = vadd.f32 %v18094_v5, %v7470_v41  ;;  %v5818_v14 = vadd.f32 %v18094_v5, %v12941_v16 }
 0x3b7   : > { %20028 = vst [vmem:[#allocation13_spill] sm:$0xff] %v18606_v43  ;;  %20030 = vst [vmem:[#allocation25_spill] sm:$0xff] %v18615_v50  ;;  %v8495_v51 = vmax.f32 %v7479_v57, 0.0  ;;  %v8077_v8 = vmax.f32 %v5807_v45, 0.0  ;;  %v7482_v52 = vadd.f32 %v18094_v5, %v13357_v35  ;;  %v5810_v54 = vadd.f32 %v18094_v5, %v5809_v23 }
 0x3b8   : > { %v20031_v25 = vmax.f32 %v18491_v39, 0.0  ;;  %v8493_v19 = vmax.f32 %v7471_v10, 0.0  ;;  %v8080_v9 = vmax.f32 %v5818_v14, 0.0  ;;  %v7474_v24 = vadd.f32 %v18094_v5, %v7473_v28 }
 0x3b9   : > { %v20033_v41 = vmax.f32 %v18500_v48, 0.0  ;;  %v20035_v57 = vmax.f32 %v18384_v26, 0.0  ;;  %v8496_v35 = vmax.f32 %v7482_v52, 0.0  ;;  %v8078_v59 = vmax.f32 %v5810_v54, 0.0  ;;  %v12944_v52 = vpop.f32.mrb[100].mxu0 }
 0x3ba   : > { %v18636_v34 = vmax.f32 %v20031_v25, %v8079_v55  ;;  %v18649_v23 = vadd.f32 %v18094_v5, %v18303_v3  ;;  %v20037_v39 = vmax.f32 %v18391_v60, 0.0  ;;  %v18655_v10 = vmax.f32 %v8054_v47, %v8080_v9  ;;  %v20046_v9 = vld [vmem:[#allocation62_spill] sm:$0xff] }
 0x3bb   : > { %v18641_v16 = vmax.f32 %v20033_v41, %v8495_v51  ;;  %v18645_v45 = vmax.f32 %v20035_v57, %v8077_v8  ;;  %v8494_v14 = vmax.f32 %v7474_v24, 0.0  ;;  %v8057_v48 = vmax.f32 %v18611_v29, 0.0  ;;  %v5822_v29 = vpop.f32.mrb[101].mxu0  ;;  %v20047_v41 = vld [vmem:[#allocation50_spill] sm:$0xff] }
 0x3bc   : > { %20032 = vst [vmem:[#allocation17_spill] sm:$0xff] %v18636_v34  ;;  %v18653_v55 = vmax.f32 %v20037_v39, %v8493_v19  ;;  %20039 = vst [vmem:[#allocation57_spill] sm:$0xff] %v18655_v10  ;;  %v8473_v51 = vmax.f32 %v7391_v7, 0.0  ;;  %v18658_v28 = vmax.f32 %v8470_v17, %v8496_v35  ;;  %v20041_v26 = vmax.f32 %v18406_v53, 0.0  ;;  %v13360_v19 = vpop.f32.mrb[100].mxu1  ;;  %v20045_v7 = vld [vmem:[#allocation47_spill] sm:$0xff] }
 0x3bd   : > { %20034 = vst [vmem:[#allocation26_spill] sm:$0xff] %v18641_v16  ;;  %20036 = vst [vmem:[#allocation27_spill] sm:$0xff] %v18645_v45  ;;  %v8058_v3 = vmax.f32 %v18622_v56, 0.0  ;;  %v8474_v54 = vmax.f32 %v18628_v2, 0.0  ;;  %v20043_v60 = vmax.f32 %v18415_v1, 0.0  ;;  %v5831_v47 = vadd.f32 %v18094_v5, %v12944_v52  ;;  %v7486_v24 = vpop.f32.mrb[101].mxu1 }
 0x3be   : > { %20038 = vst [vmem:[#allocation28_spill] sm:$0xff] %v18653_v55  ;;  %20040 = vst [vmem:[#allocation51_spill] sm:$0xff] %v18658_v28  ;;  %v18662_v8 = vmax.f32 %v20041_v26, %v8078_v59  ;;  %v5743_v17 = vadd.f32 %v18094_v5, %v20045_v7  ;;  %v7407_v53 = vadd.f32 %v18094_v5, %v20046_v9  ;;  %v12945_v2 = vpop.f32.mrb[102].mxu0 }
 0x3bf   : > { %v18668_v25 = vmax.f32 %v20043_v60, %v8494_v14  ;;  %v7495_v59 = vadd.f32 %v18094_v5, %v13360_v19  ;;  %v5823_v56 = vadd.f32 %v18094_v5, %v5822_v29  ;;  %v5746_v1 = vadd.f32 %v18094_v5, %v20047_v41  ;;  %v13361_v14 = vpop.f32.mrb[102].mxu1  ;;  %v5825_v26 = vpop.f32.mrb[103].mxu0 }
 0x3c0   : > { %20042 = vst [vmem:[#allocation42_spill] sm:$0xff] %v18662_v8  ;;  %v8083_v57 = vmax.f32 %v5831_v47, 0.0  ;;  %v7487_v35 = vadd.f32 %v18094_v5, %v7486_v24  ;;  %v5834_v39 = vadd.f32 %v18094_v5, %v12945_v2  ;;  %v7498_v7 = vadd.f32 %v18094_v5, %v13361_v14  ;;  %v7489_v9 = vpop.f32.mrb[103].mxu1 }
 0x3c1   : > { %20044 = vst [vmem:[#allocation21_spill] sm:$0xff] %v18668_v25  ;;  %v8499_v52 = vmax.f32 %v7495_v59, 0.0  ;;  %v8081_v60 = vmax.f32 %v5823_v56, 0.0  ;;  %v5826_v19 = vadd.f32 %v18094_v5, %v5825_v26  ;;  %v7490_v41 = vadd.f32 %v18094_v5, %v7489_v9  ;;  %v20052_v56 = vld [vmem:[#allocation37_spill] sm:$0xff] }
 0x3c2   : > { %v18683_v29 = vmax.f32 %v8057_v48, %v8083_v57  ;;  %v8497_v25 = vmax.f32 %v7487_v35, 0.0  ;;  %v8084_v8 = vmax.f32 %v5834_v39, 0.0  ;;  %v20050_v24 = vmax.f32 %v18447_v62, 0.0 }
 0x3c3   : > { %v18686_v47 = vmax.f32 %v8473_v51, %v8499_v52  ;;  %v8500_v28 = vmax.f32 %v7498_v7, 0.0  ;;  %v8082_v59 = vmax.f32 %v5826_v19, 0.0  ;;  %v7410_v14 = vadd.f32 %v18094_v5, %v20052_v56  ;;  %v20056_v51 = vld [vmem:[#allocation36_spill] sm:$0xff]  ;;  %v12948_v7 = vpop.f32.mrb[104].mxu0 }
 0x3c4   : > { %20048 = vst [vmem:[#allocation11_spill] sm:$0xff] %v18683_v29  ;;  %v18690_v2 = vmax.f32 %v20050_v24, %v8081_v60  ;;  %v20053_v26 = vmax.f32 %v18478_v33, 0.0  ;;  %v18698_v48 = vmax.f32 %v8058_v3, %v8084_v8  ;;  %v8498_v57 = vmax.f32 %v7490_v41, 0.0  ;;  %v5838_v9 = vpop.f32.mrb[105].mxu0 }
 0x3c5   : > { %20049 = vst [vmem:[#allocation59_spill] sm:$0xff] %v18686_v47  ;;  %v8475_v35 = vmax.f32 %v18598_v49, 0.0  ;;  %v7402_v39 = vadd.f32 %v18094_v5, %v20056_v51  ;;  %v18703_v62 = vmax.f32 %v8474_v54, %v8500_v28  ;;  %v20058_v52 = vmax.f32 %v18504_v0, 0.0  ;;  %v13364_v49 = vpop.f32.mrb[104].mxu1 }
 0x3c6   : > { %20051 = vst [vmem:[#allocation32_spill] sm:$0xff] %v18690_v2  ;;  %v18696_v10 = vmax.f32 %v20053_v26, %v8497_v25  ;;  %20055 = vst [vmem:[#allocation33_spill] sm:$0xff] %v18698_v48  ;;  %v8060_v19 = vmax.f32 %v18649_v23, 0.0  ;;  %v8061_v33 = vmax.f32 %v5743_v17, 0.0  ;;  %v20060_v25 = vmax.f32 %v18510_v18, 0.0  ;;  %v7502_v54 = vpop.f32.mrb[105].mxu1 }
 0x3c7   : > { %20057 = vst [vmem:[#allocation34_spill] sm:$0xff] %v18703_v62  ;;  %v18707_v60 = vmax.f32 %v20058_v52, %v8082_v59  ;;  %v5847_v3 = vadd.f32 %v18094_v5, %v12948_v7  ;;  %v8477_v41 = vmax.f32 %v7407_v53, 0.0  ;;  %v8062_v24 = vmax.f32 %v5746_v1, 0.0  ;;  %v12949_v59 = vpop.f32.mrb[106].mxu0  ;;  %v13365_v17 = vpop.f32.mrb[106].mxu1 }
 0x3c8   : > { %20054 = vst [vmem:[#allocation14_spill] sm:$0xff] %v18696_v10  ;;  %v18712_v8 = vmax.f32 %v20060_v25, %v8498_v57  ;;  %v7511_v28 = vadd.f32 %v18094_v5, %v13364_v49  ;;  %v5839_v0 = vadd.f32 %v18094_v5, %v5838_v9  ;;  %v8478_v56 = vmax.f32 %v7410_v14, 0.0  ;;  %v5841_v57 = vpop.f32.mrb[107].mxu0  ;;  %v7505_v1 = vpop.f32.mrb[107].mxu1 }
 0x3c9   : > { %20059 = vst [vmem:[#allocation39_spill] sm:$0xff] %v18707_v60  ;;  %v8087_v26 = vmax.f32 %v5847_v3, 0.0  ;;  %v7503_v23 = vadd.f32 %v18094_v5, %v7502_v54  ;;  %v5850_v18 = vadd.f32 %v18094_v5, %v12949_v59  ;;  %v7514_v7 = vadd.f32 %v18094_v5, %v13365_v17 }
 0x3ca   : > { %20061 = vst [vmem:[#allocation40_spill] sm:$0xff] %v18712_v8  ;;  %v8503_v51 = vmax.f32 %v7511_v28, 0.0  ;;  %v8085_v52 = vmax.f32 %v5839_v0, 0.0  ;;  %v5842_v53 = vadd.f32 %v18094_v5, %v5841_v57  ;;  %v7506_v14 = vadd.f32 %v18094_v5, %v7505_v1 }
 0x3cb   : > { %v18721_v25 = vmax.f32 %v8061_v33, %v8087_v26  ;;  %v8501_v49 = vmax.f32 %v7503_v23, 0.0  ;;  %v8088_v9 = vmax.f32 %v5850_v18, 0.0  ;;  %v20064_v54 = vmax.f32 %v18567_v15, 0.0  ;;  %v12952_v23 = vpop.f32.mrb[108].mxu0 }
 0x3cc   : > { %v18724_v3 = vmax.f32 %v8477_v41, %v8503_v51  ;;  %v8504_v8 = vmax.f32 %v7514_v7, 0.0  ;;  %v8086_v28 = vmax.f32 %v5842_v53, 0.0  ;;  %v8476_v0 = vmax.f32 %v7402_v39, 0.0  ;;  %v13368_v41 = vpop.f32.mrb[108].mxu1  ;;  %v5854_v18 = vpop.f32.mrb[109].mxu0 }
 0x3cd   : > { %20062 = vst [vmem:[#allocation52_spill] sm:$0xff] %v18721_v25  ;;  %v18728_v59 = vmax.f32 %v20064_v54, %v8085_v52  ;;  %v18730_v60 = vmax.f32 %v8475_v35, %v8501_v49  ;;  %v18732_v17 = vmax.f32 %v8062_v24, %v8088_v9  ;;  %v8502_v57 = vmax.f32 %v7506_v14, 0.0  ;;  %v7518_v15 = vpop.f32.mrb[109].mxu1  ;;  %v12953_v51 = vpop.f32.mrb[110].mxu0  ;;  %v18751_v25 = vld [vmem:[%s19205_s2] ss:$0 sm:$0xff] }
 0x3ce   : > { %20063 = vst [vmem:[#allocation41_spill] sm:$0xff] %v18724_v3  ;;  %v18734_v33 = vmax.f32 %v8478_v56, %v8504_v8  ;;  %v18736_v26 = vmax.f32 %v8060_v19, %v8086_v28  ;;  %v13369_v52 = vpop.f32.mrb[110].mxu1  ;;  %v5857_v7 = vpop.f32.mrb[111].mxu0  ;;  %v18754_v62 = vadd.f32 %v18751_v25, %v12952_v23  ;;  %v18757_v48 = vadd.f32 %v18751_v25, %v13368_v41 }
 0x3cf   : > { %20065 = vst [vmem:[#allocation12_spill] sm:$0xff] %v18728_v59  ;;  %20066 = vst [vmem:[#allocation60_spill] sm:$0xff] %v18730_v60  ;;  %v18738_v5 = vmax.f32 %v8476_v0, %v8502_v57  ;;  %v7521_v53 = vpop.f32.mrb[111].mxu1  ;;  %v18764_v47 = vadd.f32 %v18751_v25, %v5854_v18  ;;  %v18767_v29 = vadd.f32 %v18751_v25, %v7518_v15 }
 0x3d0   : > { %20067 = vst [vmem:[#allocation29_spill] sm:$0xff] %v18732_v17  ;;  %20068 = vst [vmem:[#allocation45_spill] sm:$0xff] %v18734_v33  ;;  %v12956_v39 = vpop.f32.mrb[112].mxu0  ;;  %v18770_v55 = vadd.f32 %v18751_v25, %v12953_v51  ;;  %v18773_v45 = vadd.f32 %v18751_v25, %v13369_v52  ;;  %v18778_v41 = vadd.f32 %v18751_v25, %v5857_v7 }
 0x3d1   : > { %20069 = vst [vmem:[#allocation20_spill] sm:$0xff] %v18736_v26  ;;  %20070 = vst [vmem:[#allocation53_spill] sm:$0xff] %v18738_v5  ;;  %v5870_v1 = vpop.f32.mrb[113].mxu0  ;;  %v18781_v16 = vadd.f32 %v18751_v25, %v7521_v53  ;;  %v18784_v18 = vadd.f32 %v18751_v25, %v12956_v39 }
 0x3d2   : > { %v13372_v35 = vpop.f32.mrb[112].mxu1  ;;  %v12957_v49 = vpop.f32.mrb[114].mxu0  ;;  %v18798_v15 = vadd.f32 %v18751_v25, %v5870_v1 }
 0x3d3   : > { %v7534_v24 = vpop.f32.mrb[113].mxu1  ;;  %v5873_v8 = vpop.f32.mrb[115].mxu0  ;;  %v18795_v39 = vadd.f32 %v18751_v25, %v13372_v35  ;;  %v18805_v43 = vadd.f32 %v18751_v25, %v12957_v49 }
 0x3d4   : > { %v13373_v9 = vpop.f32.mrb[114].mxu1  ;;  %v18802_v52 = vadd.f32 %v18751_v25, %v7534_v24  ;;  %v18811_v35 = vadd.f32 %v18751_v25, %v5873_v8 }
 0x3d5   : > { %v7537_v56 = vpop.f32.mrb[115].mxu1  ;;  %20071 = vst [vmem:[#allocation61_spill] sm:$0xff] %v18805_v43  ;;  %v18808_v50 = vadd.f32 %v18751_v25, %v13373_v9 }
 0x3d6   : > { %v18814_v1 = vadd.f32 %v18751_v25, %v7537_v56 }
 0x3d7   : > { %20072 = vst [vmem:[#allocation19_spill] sm:$0xff] %v18808_v50 }
 0x3d8   : > { %v12960_v19 = vpop.f32.mrb[116].mxu0 }
 0x3d9   : > { %v5886_v54 = vpop.f32.mrb[117].mxu0  ;;  %v18817_v31 = vadd.f32 %v18751_v25, %v12960_v19 }
 0x3da   : > { %v13376_v14 = vpop.f32.mrb[116].mxu1  ;;  %v12961_v0 = vpop.f32.mrb[118].mxu0  ;;  %v18823_v32 = vadd.f32 %v18751_v25, %v5886_v54 }
 0x3db   : > { %v7550_v28 = vpop.f32.mrb[117].mxu1  ;;  %v5889_v5 = vpop.f32.mrb[119].mxu0  ;;  %20073 = vst [vmem:[#allocation54_spill] sm:$0xff] %v18817_v31  ;;  %v18820_v24 = vadd.f32 %v18751_v25, %v13376_v14  ;;  %v18829_v8 = vadd.f32 %v18751_v25, %v12961_v0 }
 0x3dc   : > { %v13377_v57 = vpop.f32.mrb[118].mxu1  ;;  %v18826_v9 = vadd.f32 %v18751_v25, %v7550_v28  ;;  %v18837_v21 = vadd.f32 %v18751_v25, %v5889_v5 }
 0x3dd   : > { %v7553_v26 = vpop.f32.mrb[119].mxu1  ;;  %20074 = vst [vmem:[#allocation30_spill] sm:$0xff] %v18820_v24  ;;  %20075 = vst [vmem:[#allocation31_spill] sm:$0xff] %v18829_v8  ;;  %v18832_v56 = vadd.f32 %v18751_v25, %v13377_v57 }
 0x3de   : > { %v18840_v54 = vadd.f32 %v18751_v25, %v7553_v26 }
 0x3df   : > { %20076 = vst [vmem:[#allocation2_spill] sm:$0xff] %v18832_v56 }
 0x3e0   : > { %v12964_v33 = vpop.f32.mrb[120].mxu0 }
 0x3e1   : > { %v18742_v60 = vpop.f32.mrb[121].mxu0  ;;  %v18846_v57 = vadd.f32 %v18751_v25, %v12964_v33 }
 0x3e2   : > { %v18740_v17 = vpop.f32.mrb[120].mxu1  ;;  %v18746_v3 = vpop.f32.mrb[122].mxu0  ;;  %v18864_v5 = vadd.f32 %v18751_v25, %v18742_v60 }
 0x3e3   : > { %v18744_v59 = vpop.f32.mrb[121].mxu1  ;;  %v18761_v2 = vpop.f32.mrb[123].mxu0  ;;  %20077 = vst [vmem:[#allocation16_spill] sm:$0xff] %v18846_v57  ;;  %v18860_v19 = vadd.f32 %v18751_v25, %v18740_v17  ;;  %v18873_v28 = vadd.f32 %v18751_v25, %v18746_v3 }
 0x3e4   : > { %v18759_v10 = vpop.f32.mrb[122].mxu1  ;;  %v18869_v27 = vadd.f32 %v18751_v25, %v18744_v59  ;;  %v18881_v60 = vadd.f32 %v18751_v25, %v18761_v2 }
 0x3e5   : > { %v18775_v23 = vpop.f32.mrb[123].mxu1  ;;  %20078 = vst [vmem:[#allocation44_spill] sm:$0xff] %v18860_v19  ;;  %20079 = vst [vmem:[#allocation4_spill] sm:$0xff] %v18873_v28  ;;  %v18877_v17 = vadd.f32 %v18751_v25, %v18759_v10 }
 0x3e6   : > { %v18885_v46 = vadd.f32 %v18751_v25, %v18775_v23 }
 0x3e7   : > { %20080 = vst [vmem:[#allocation3_spill] sm:$0xff] %v18877_v17 }
 0x3e8   : > { %v12968_v7 = vpop.f32.mrb[124].mxu0 }
 0x3e9   : > { %v5918_v40 = vpop.f32.mrb[125].mxu0  ;;  %v18888_v59 = vadd.f32 %v18751_v25, %v12968_v7 }
 0x3ea   : > { %v13384_v34 = vpop.f32.mrb[124].mxu1  ;;  %v12969_v6 = vpop.f32.mrb[126].mxu0  ;;  %v18894_v10 = vadd.f32 %v18751_v25, %v5918_v40 }
 0x3eb   : > { %v7582_v53 = vpop.f32.mrb[125].mxu1  ;;  %v5921_v49 = vpop.f32.mrb[127].mxu0  ;;  %20081 = vst [vmem:[#allocation18_spill] sm:$0xff] %v18888_v59  ;;  %v18891_v3 = vadd.f32 %v18751_v25, %v13384_v34  ;;  %v18900_v2 = vadd.f32 %v18751_v25, %v12969_v6 }
 0x3ec   : > { %v13385_v51 = vpop.f32.mrb[126].mxu1  ;;  %v18897_v56 = vadd.f32 %v18751_v25, %v7582_v53  ;;  %v18908_v24 = vadd.f32 %v18751_v25, %v5921_v49 }
 0x3ed   : > { %v7585_v4 = vpop.f32.mrb[127].mxu1  ;;  %20082 = vst [vmem:[#allocation35_spill] sm:$0xff] %v18891_v3  ;;  %20083 = vst [vmem:[#allocation46_spill] sm:$0xff] %v18900_v2  ;;  %v18903_v23 = vadd.f32 %v18751_v25, %v13385_v51 }
 0x3ee   : > { %v18911_v40 = vadd.f32 %v18751_v25, %v7585_v4 }
 0x3ef   : > { %20084 = vst [vmem:[#allocation43_spill] sm:$0xff] %v18903_v23 }
 0x3f0   : > { %v12972_v0 = vpop.f32.mrb[128].mxu0  ;;  %20085 = vst [vmem:[#allocation15_spill] sm:$0xff] %v18911_v40 }
 0x3f1   : > { %v5934_v26 = vpop.f32.mrb[129].mxu0  ;;  %v18917_v51 = vadd.f32 %v18751_v25, %v12972_v0 }
 0x3f2   : > { %v13388_v14 = vpop.f32.mrb[128].mxu1  ;;  %v12973_v33 = vpop.f32.mrb[130].mxu0  ;;  %v18935_v19 = vadd.f32 %v18751_v25, %v5934_v26 }
 0x3f3   : > { %v7598_v50 = vpop.f32.mrb[129].mxu1  ;;  %v5937_v57 = vpop.f32.mrb[131].mxu0  ;;  %20086 = vst [vmem:[#allocation5_spill] sm:$0xff] %v18917_v51  ;;  %v18930_v43 = vadd.f32 %v18751_v25, %v13388_v14  ;;  %v18942_v17 = vadd.f32 %v18751_v25, %v12973_v33 }
 0x3f4   : > { %v13389_v44 = vpop.f32.mrb[130].mxu1  ;;  %v18938_v53 = vadd.f32 %v18751_v25, %v7598_v50  ;;  %v18945_v14 = vadd.f32 %v18751_v25, %v5937_v57  ;;  %v20089_v57 = vmax.f32 %v18764_v47, 0.0 }
 0x3f5   : > { %v7601_v8 = vpop.f32.mrb[131].mxu1  ;;  %20087 = vst [vmem:[#allocation6_spill] sm:$0xff] %v18930_v43  ;;  %20088 = vst [vmem:[#allocation47_spill] sm:$0xff] %v18942_v17  ;;  %v20092_v43 = vld [vmem:[#allocation8_spill] sm:$0xff] }
 0x3f6   : > { %v18949_v26 = vadd.f32 %v18751_v25, %v7601_v8  ;;  %v18963_v8 = vadd.f32 %v18751_v25, %v13389_v44 }
 0x3f8   : > { %v12976_v6 = vpop.f32.mrb[132].mxu0  ;;  %20090 = vst [vmem:[#allocation62_spill] sm:$0xff] %v18963_v8  ;;  %v20095_v8 = vmax.f32 %v18781_v16, 0.0 }
 0x3f9   : > { %v5959_v34 = vadd.f32 %v18751_v25, %v12976_v6  ;;  %v5950_v49 = vpop.f32.mrb[133].mxu0 }
 0x3fa   : > { %v13392_v7 = vpop.f32.mrb[132].mxu1  ;;  %v12977_v23 = vpop.f32.mrb[134].mxu0  ;;  %v18952_v3 = vadd.f32 %v18751_v25, %v5950_v49 }
 0x3fb   : > { %v7623_v31 = vadd.f32 %v18751_v25, %v13392_v7  ;;  %v7614_v0 = vpop.f32.mrb[133].mxu1  ;;  %v8115_v6 = vmax.f32 %v5959_v34, 0.0  ;;  %v5962_v2 = vadd.f32 %v18751_v25, %v12977_v23  ;;  %v5953_v51 = vpop.f32.mrb[135].mxu0 }
 0x3fc   : > { %v13393_v4 = vpop.f32.mrb[134].mxu1  ;;  %v18959_v34 = vadd.f32 %v18751_v25, %v7614_v0  ;;  %v18980_v33 = vadd.f32 %v18751_v25, %v5953_v51 }
 0x3fd   : > { %v8531_v50 = vmax.f32 %v7623_v31, 0.0  ;;  %v7626_v7 = vadd.f32 %v18751_v25, %v13393_v4  ;;  %v7617_v59 = vpop.f32.mrb[135].mxu1  ;;  %v8843_v17 = vmax.f32 %v20089_v57, %v8115_v6  ;;  %v8116_v23 = vmax.f32 %v5962_v2, 0.0  ;;  %v20094_v57 = vld [vmem:[#allocation22_spill] sm:$0xff] }
 0x3fe   : > { %v20091_v31 = vmax.f32 %v18767_v29, 0.0  ;;  %v20093_v6 = vmax.f32 %v18778_v41, 0.0  ;;  %20097 = vst [vmem:[#allocation50_spill] sm:$0xff] %v18980_v33 }
 0x3ff   : > { %v8532_v40 = vmax.f32 %v7626_v7, 0.0  ;;  %v9051_v47 = vmax.f32 %v20092_v43, %v8843_v17 }
 0x400   : > { %v8947_v49 = vmax.f32 %v20091_v31, %v8531_v50  ;;  %v8844_v0 = vmax.f32 %v20093_v6, %v8116_v23  ;;  %v12980_v50 = vpop.f32.mrb[136].mxu0  ;;  %v20096_v31 = vld [vmem:[#allocation55_spill] sm:$0xff]  ;;  %v20098_v23 = vld [vmem:[#allocation48_spill] sm:$0xff] }
 0x401   : > { %v8948_v29 = vmax.f32 %v20095_v8, %v8532_v40  ;;  %v5975_v43 = vadd.f32 %v18751_v25, %v12980_v50  ;;  %v5966_v17 = vpop.f32.mrb[137].mxu0 }
 0x402   : > { %v9155_v28 = vmax.f32 %v20094_v57, %v8947_v49  ;;  %v9052_v4 = vmax.f32 %v20096_v31, %v8844_v0  ;;  %v13396_v41 = vpop.f32.mrb[136].mxu1  ;;  %v18985_v49 = vadd.f32 %v18751_v25, %v7617_v59  ;;  %v5967_v40 = vadd.f32 %v18751_v25, %v5966_v17  ;;  %v12981_v57 = vpop.f32.mrb[138].mxu0 }
 0x403   : > { %v9156_v6 = vmax.f32 %v20098_v23, %v8948_v29  ;;  %v7639_v16 = vadd.f32 %v18751_v25, %v13396_v41  ;;  %v7630_v8 = vpop.f32.mrb[137].mxu1  ;;  %v8119_v51 = vmax.f32 %v5975_v43, 0.0  ;;  %v5978_v50 = vadd.f32 %v18751_v25, %v12981_v57  ;;  %v5969_v44 = vpop.f32.mrb[139].mxu0 }
 0x404   : > { %20099 = vst [vmem:[#allocation37_spill] sm:$0xff] %v18985_v49  ;;  %v11739_v0 = vpack.c.bf16 %v9052_v4, %v9051_v47  ;;  %v7631_v31 = vadd.f32 %v18751_v25, %v7630_v8  ;;  %v13397_v7 = vpop.f32.mrb[138].mxu1  ;;  %v8117_v59 = vmax.f32 %v5967_v40, 0.0  ;;  %v20100_v41 = vmax.f32 %v18798_v15, 0.0 }
 0x405   : > { %v11999_v29 = vpack.c.bf16 %v9156_v6, %v9155_v28  ;;  %v8535_v23 = vmax.f32 %v7639_v16, 0.0  ;;  %v7642_v2 = vadd.f32 %v18751_v25, %v13397_v7  ;;  %v7633_v49 = vpop.f32.mrb[139].mxu1  ;;  %v8120_v4 = vmax.f32 %v5978_v50, 0.0 }
 0x406   : > { %12099 = vst [vmem:[%s15166_s30 + $0x138] sm:$0xff] %v11739_v0   ;;  %v8847_v17 = vmax.f32 %v20100_v41, %v8119_v51  ;;  %v8533_v33 = vmax.f32 %v7631_v31, 0.0  ;;  %v5970_v47 = vadd.f32 %v18751_v25, %v5969_v44  ;;  %v20101_v43 = vmax.f32 %v18802_v52, 0.0 }
 0x407   : > { %12151 = vst [vmem:[%s15166_s30 + $0x2d8] sm:$0xff] %v11999_v29   ;;  %v20102_v57 = vmax.f32 %v18754_v62, 0.0  ;;  %v8536_v6 = vmax.f32 %v7642_v2, 0.0  ;;  %v7634_v16 = vadd.f32 %v18751_v25, %v7633_v49  ;;  %v20103_v40 = vmax.f32 %v18757_v48, 0.0 }
 0x408   : > { %v8951_v8 = vmax.f32 %v20101_v43, %v8535_v23  ;;  %v9055_v7 = vmax.f32 %v18455_v30, %v8847_v17  ;;  %v20104_v0 = vmax.f32 %v18811_v35, 0.0  ;;  %v8118_v31 = vmax.f32 %v5970_v47, 0.0  ;;  %v12984_v2 = vpop.f32.mrb[140].mxu0 }
 0x409   : > { %v8845_v28 = vmax.f32 %v20102_v57, %v8117_v59  ;;  %v8949_v15 = vmax.f32 %v20103_v40, %v8533_v33  ;;  %v20105_v50 = vmax.f32 %v18814_v1, 0.0  ;;  %v8534_v29 = vmax.f32 %v7634_v16, 0.0  ;;  %v5982_v59 = vpop.f32.mrb[141].mxu0 }
 0x40a   : > { %v8848_v51 = vmax.f32 %v20104_v0, %v8120_v4  ;;  %v9159_v44 = vmax.f32 %v18460_v22, %v8951_v8  ;;  %v20106_v48 = vmax.f32 %v18770_v55, 0.0  ;;  %v5991_v35 = vadd.f32 %v18751_v25, %v12984_v2  ;;  %v13400_v23 = vpop.f32.mrb[140].mxu1  ;;  %v12985_v4 = vpop.f32.mrb[142].mxu0 }
 0x40b   : > { %v9053_v52 = vmax.f32 %v18464_v11, %v8845_v28  ;;  %v8952_v62 = vmax.f32 %v20105_v50, %v8536_v6  ;;  %v9157_v49 = vmax.f32 %v18469_v20, %v8949_v15  ;;  %v20107_v11 = vmax.f32 %v18773_v45, 0.0  ;;  %v7646_v20 = vpop.f32.mrb[141].mxu1  ;;  %v5985_v57 = vpop.f32.mrb[143].mxu0 }
 0x40c   : > { %v9056_v30 = vmax.f32 %v18473_v58, %v8848_v51  ;;  %v8846_v33 = vmax.f32 %v20106_v48, %v8118_v31  ;;  %v7655_v1 = vadd.f32 %v18751_v25, %v13400_v23  ;;  %v5983_v17 = vadd.f32 %v18751_v25, %v5982_v59  ;;  %v13401_v8 = vpop.f32.mrb[142].mxu1 }
 0x40d   : > { %v9160_v22 = vmax.f32 %v18482_v37, %v8952_v62  ;;  %v8950_v41 = vmax.f32 %v20107_v11, %v8534_v29  ;;  %v8123_v47 = vmax.f32 %v5991_v35, 0.0  ;;  %v7647_v43 = vadd.f32 %v18751_v25, %v7646_v20  ;;  %v7649_v16 = vpop.f32.mrb[143].mxu1 }
 0x40e   : > { %v11749_v58 = vpack.c.bf16 %v9056_v30, %v9055_v7  ;;  %v9054_v55 = vmax.f32 %v18486_v63, %v8846_v33  ;;  %v8539_v28 = vmax.f32 %v7655_v1, 0.0  ;;  %v8121_v6 = vmax.f32 %v5983_v17, 0.0 }
 0x40f   : > { %v12009_v37 = vpack.c.bf16 %v9160_v22, %v9159_v44  ;;  %v9158_v45 = vmax.f32 %v18495_v13, %v8950_v41  ;;  %v20108_v7 = vmax.f32 %v18823_v32, 0.0  ;;  %v8537_v0 = vmax.f32 %v7647_v43, 0.0 }
 0x410   : > { %12101 = vst [vmem:[%s15166_s30 + $0x148] sm:$0xff] %v11749_v58   ;;  %v11744_v40 = vpack.c.bf16 %v9054_v55, %v9053_v52  ;;  %v5994_v63 = vadd.f32 %v18751_v25, %v12985_v4  ;;  %v20109_v31 = vmax.f32 %v18826_v9, 0.0  ;;  %v20110_v44 = vmax.f32 %v18784_v18, 0.0  ;;  %v12988_v33 = vpop.f32.mrb[144].mxu0  ;;  %v20114_v58 = vld [vmem:[#allocation61_spill] sm:$0xff] }
 0x411   : > { %v8851_v15 = vmax.f32 %v20108_v7, %v8123_v47  ;;  %12153 = vst [vmem:[%s15166_s30 + $0x2e8] sm:$0xff] %v12009_v37   ;;  %v12004_v51 = vpack.c.bf16 %v9158_v45, %v9157_v49  ;;  %v7658_v62 = vadd.f32 %v18751_v25, %v13401_v8  ;;  %v20111_v52 = vmax.f32 %v18795_v39, 0.0  ;;  %v5998_v11 = vpop.f32.mrb[145].mxu0  ;;  %v20117_v45 = vld [vmem:[#allocation19_spill] sm:$0xff] }
 0x412   : > { %v8955_v50 = vmax.f32 %v20109_v31, %v8539_v28  ;;  %v8849_v13 = vmax.f32 %v20110_v44, %v8121_v6  ;;  %12100 = vst [vmem:[%s15166_s30 + $0x140] sm:$0xff] %v11744_v40   ;;  %v8124_v2 = vmax.f32 %v5994_v63, 0.0  ;;  %v5986_v30 = vadd.f32 %v18751_v25, %v5985_v57  ;;  %v13404_v22 = vpop.f32.mrb[144].mxu1  ;;  %v12989_v4 = vpop.f32.mrb[146].mxu0  ;;  %v20121_v44 = vld [vmem:[#allocation24_spill] sm:$0xff] }
 0x413   : > { %v9059_v29 = vmax.f32 %v18518_v61, %v8851_v15  ;;  %v8953_v32 = vmax.f32 %v20111_v52, %v8537_v0  ;;  %12152 = vst [vmem:[%s15166_s30 + $0x2e0] sm:$0xff] %v12004_v51   ;;  %v8540_v48 = vmax.f32 %v7658_v62, 0.0  ;;  %v7650_v18 = vadd.f32 %v18751_v25, %v7649_v16  ;;  %v7662_v20 = vpop.f32.mrb[145].mxu1  ;;  %v6001_v57 = vpop.f32.mrb[147].mxu0 }
 0x414   : > { %v9163_v49 = vmax.f32 %v18523_v38, %v8955_v50  ;;  %v9057_v9 = vmax.f32 %v18527_v12, %v8849_v13  ;;  %v20112_v23 = vmax.f32 %v18837_v21, 0.0  ;;  %v8122_v59 = vmax.f32 %v5986_v30, 0.0  ;;  %v13405_v8 = vpop.f32.mrb[146].mxu1 }
 0x415   : > { %v9161_v35 = vmax.f32 %v18532_v36, %v8953_v32  ;;  %v6007_v39 = vadd.f32 %v18751_v25, %v12988_v33  ;;  %v20113_v41 = vmax.f32 %v18840_v54, 0.0  ;;  %v8538_v38 = vmax.f32 %v7650_v18, 0.0  ;;  %v20116_v54 = vld [vmem:[#allocation23_spill] sm:$0xff]  ;;  %v7665_v7 = vpop.f32.mrb[147].mxu1  ;;  %v20123_v32 = vld [vmem:[#allocation54_spill] sm:$0xff] }
 0x416   : > { %v8852_v61 = vmax.f32 %v20112_v23, %v8124_v2  ;;  %v7671_v12 = vadd.f32 %v18751_v25, %v13404_v22  ;;  %v5999_v17 = vadd.f32 %v18751_v25, %v5998_v11  ;;  %v20115_v21 = vmax.f32 %v20114_v58, 0.0  ;;  %v20125_v18 = vld [vmem:[#allocation7_spill] sm:$0xff]  ;;  %v20126_v33 = vld [vmem:[#allocation30_spill] sm:$0xff] }
 0x417   : > { %v8956_v1 = vmax.f32 %v20113_v41, %v8540_v48  ;;  %v8127_v47 = vmax.f32 %v6007_v39, 0.0  ;;  %v7663_v43 = vadd.f32 %v18751_v25, %v7662_v20  ;;  %v20118_v28 = vmax.f32 %v20117_v45, 0.0  ;;  %v20129_v22 = vld [vmem:[#allocation10_spill] sm:$0xff] }
 0x418   : > { %v9060_v36 = vmax.f32 %v18536_v42, %v8852_v61  ;;  %v8850_v55 = vmax.f32 %v20115_v21, %v8122_v59  ;;  %v8543_v16 = vmax.f32 %v7671_v12, 0.0  ;;  %v8125_v40 = vmax.f32 %v5999_v17, 0.0  ;;  %v20119_v42 = vld [vmem:[#allocation56_spill] sm:$0xff]  ;;  %v20128_v59 = vld [vmem:[#allocation9_spill] sm:$0xff]  ;;  %v12992_v41 = vpop.f32.mrb[148].mxu0 }
 0x419   : > { %v9164_v37 = vmax.f32 %v20116_v54, %v8956_v1  ;;  %v8954_v6 = vmax.f32 %v20118_v28, %v8538_v38  ;;  %v20120_v63 = vmax.f32 %v18864_v5, 0.0  ;;  %v8541_v31 = vmax.f32 %v7663_v43, 0.0  ;;  %v20130_v1 = vld [vmem:[#allocation49_spill] sm:$0xff] }
 0x41a   : > { %v11759_v15 = vpack.c.bf16 %v9060_v36, %v9059_v29  ;;  %v9058_v0 = vmax.f32 %v20119_v42, %v8850_v55  ;;  %v20122_v62 = vmax.f32 %v18869_v27, 0.0  ;;  %v20124_v2 = vmax.f32 %v20123_v32, 0.0  ;;  %v13408_v20 = vpop.f32.mrb[148].mxu1  ;;  %v6014_v36 = vpop.f32.mrb[149].mxu0 }
 0x41b   : > { %v8855_v51 = vmax.f32 %v20120_v63, %v8127_v47  ;;  %v12019_v50 = vpack.c.bf16 %v9164_v37, %v9163_v49  ;;  %v9162_v13 = vmax.f32 %v20121_v44, %v8954_v6  ;;  %v20127_v23 = vmax.f32 %v20126_v33, 0.0  ;;  %v7678_v55 = vpop.f32.mrb[149].mxu1  ;;  %v12993_v47 = vpop.f32.mrb[150].mxu0 }
 0x41c   : > { %v8959_v52 = vmax.f32 %v20122_v62, %v8543_v16  ;;  %v8853_v30 = vmax.f32 %v20124_v2, %v8125_v40  ;;  %12103 = vst [vmem:[%s15166_s30 + $0x158] sm:$0xff] %v11759_v15   ;;  %v11754_v48 = vpack.c.bf16 %v9058_v0, %v9057_v9  ;;  %v6010_v61 = vadd.f32 %v18751_v25, %v12989_v4  ;;  %v13409_v45 = vpop.f32.mrb[150].mxu1  ;;  %v6017_v28 = vpop.f32.mrb[151].mxu0  ;;  %v20133_v0 = vld [vmem:[#allocation38_spill] sm:$0xff] }
 0x41d   : > { %v9063_v29 = vmax.f32 %v20125_v18, %v8855_v51  ;;  %v8957_v5 = vmax.f32 %v20127_v23, %v8541_v31  ;;  %12155 = vst [vmem:[%s15166_s30 + $0x2f8] sm:$0xff] %v12019_v50   ;;  %v12014_v49 = vpack.c.bf16 %v9162_v13, %v9161_v35  ;;  %v7674_v11 = vadd.f32 %v18751_v25, %v13405_v8  ;;  %v7681_v42 = vpop.f32.mrb[151].mxu1  ;;  %v20134_v51 = vld [vmem:[#allocation31_spill] sm:$0xff]  ;;  %v20141_v18 = vld [vmem:[#allocation16_spill] sm:$0xff] }
 0x41e   : > { %v9167_v39 = vmax.f32 %v20128_v59, %v8959_v52  ;;  %v9061_v27 = vmax.f32 %v20129_v22, %v8853_v30  ;;  %12102 = vst [vmem:[%s15166_s30 + $0x150] sm:$0xff] %v11754_v48   ;;  %v8128_v38 = vmax.f32 %v6010_v61, 0.0  ;;  %v6002_v12 = vadd.f32 %v18751_v25, %v6001_v57  ;;  %v20138_v52 = vld [vmem:[#allocation58_spill] sm:$0xff]  ;;  %v20143_v61 = vld [vmem:[#allocation13_spill] sm:$0xff] }
 0x41f   : > { %v9165_v9 = vmax.f32 %v20130_v1, %v8957_v5  ;;  %v7666_v17 = vadd.f32 %v18751_v25, %v7665_v7  ;;  %12154 = vst [vmem:[%s15166_s30 + $0x2f0] sm:$0xff] %v12014_v49   ;;  %v8544_v4 = vmax.f32 %v7674_v11, 0.0  ;;  %v6023_v35 = vadd.f32 %v18751_v25, %v12992_v41  ;;  %v20144_v59 = vld [vmem:[#allocation25_spill] sm:$0xff]  ;;  %v20145_v11 = vld [vmem:[#allocation44_spill] sm:$0xff] }
 0x420   : > { %v7687_v58 = vadd.f32 %v18751_v25, %v13408_v20  ;;  %v6015_v21 = vadd.f32 %v18751_v25, %v6014_v36  ;;  %v20131_v43 = vmax.f32 %v18881_v60, 0.0  ;;  %v8126_v54 = vmax.f32 %v6002_v12, 0.0  ;;  %v20136_v60 = vld [vmem:[#allocation2_spill] sm:$0xff]  ;;  %v20147_v12 = vld [vmem:[#allocation17_spill] sm:$0xff]  ;;  %v20149_v36 = vld [vmem:[#allocation27_spill] sm:$0xff] }
 0x421   : > { %v8542_v37 = vmax.f32 %v7666_v17, 0.0  ;;  %v7679_v57 = vadd.f32 %v18751_v25, %v7678_v55  ;;  %v20132_v6 = vmax.f32 %v18885_v46, 0.0  ;;  %v8131_v40 = vmax.f32 %v6023_v35, 0.0 }
 0x422   : > { %v8856_v8 = vmax.f32 %v20131_v43, %v8128_v38  ;;  %v8547_v7 = vmax.f32 %v7687_v58, 0.0  ;;  %v8129_v15 = vmax.f32 %v6015_v21, 0.0  ;;  %v20135_v31 = vmax.f32 %v20134_v51, 0.0  ;;  %v20150_v58 = vld [vmem:[#allocation28_spill] sm:$0xff]  ;;  %v13412_v43 = vpop.f32.mrb[152].mxu1 }
 0x423   : > { %v8960_v16 = vmax.f32 %v20132_v6, %v8544_v4  ;;  %v20137_v44 = vmax.f32 %v20136_v60, 0.0  ;;  %v8545_v62 = vmax.f32 %v7679_v57, 0.0  ;;  %v20139_v2 = vmax.f32 %v18894_v10, 0.0  ;;  %v20148_v10 = vld [vmem:[#allocation26_spill] sm:$0xff]  ;;  %v12996_v4 = vpop.f32.mrb[152].mxu0  ;;  %v7694_v6 = vpop.f32.mrb[153].mxu1 }
 0x424   : > { %v9064_v63 = vmax.f32 %v20133_v0, %v8856_v8  ;;  %v8854_v50 = vmax.f32 %v20135_v31, %v8126_v54  ;;  %v20140_v30 = vmax.f32 %v18897_v56, 0.0  ;;  %v20142_v33 = vmax.f32 %v20141_v18, 0.0  ;;  %v6030_v8 = vpop.f32.mrb[153].mxu0 }
 0x425   : > { %v8958_v13 = vmax.f32 %v20137_v44, %v8542_v37  ;;  %v9168_v32 = vmax.f32 %v20138_v52, %v8960_v16  ;;  %v8859_v46 = vmax.f32 %v20139_v2, %v8131_v40  ;;  %v20146_v41 = vmax.f32 %v20145_v11, 0.0  ;;  %v12997_v16 = vpop.f32.mrb[154].mxu0 }
 0x426   : > { %v8963_v48 = vmax.f32 %v20140_v30, %v8547_v7  ;;  %v8857_v23 = vmax.f32 %v20142_v33, %v8129_v15  ;;  %v11769_v5 = vpack.c.bf16 %v9064_v63, %v9063_v29  ;;  %v9062_v49 = vmax.f32 %v20143_v61, %v8854_v50  ;;  %v13413_v7 = vpop.f32.mrb[154].mxu1  ;;  %v6033_v15 = vpop.f32.mrb[155].mxu0  ;;  %v20156_v30 = vld [vmem:[#allocation3_spill] sm:$0xff] }
 0x427   : > { %v9166_v22 = vmax.f32 %v20144_v59, %v8958_v13  ;;  %v8961_v1 = vmax.f32 %v20146_v41, %v8545_v62  ;;  %v12029_v38 = vpack.c.bf16 %v9168_v32, %v9167_v39  ;;  %v9067_v17 = vmax.f32 %v20147_v12, %v8859_v46  ;;  %v20152_v13 = vld [vmem:[#allocation15_spill] sm:$0xff]  ;;  %v20154_v32 = vld [vmem:[#allocation4_spill] sm:$0xff]  ;;  %v20161_v59 = vld [vmem:[#allocation18_spill] sm:$0xff] }
 0x428   : > { %v9171_v20 = vmax.f32 %v20148_v10, %v8963_v48  ;;  %v9065_v56 = vmax.f32 %v20149_v36, %v8857_v23  ;;  %12105 = vst [vmem:[%s15166_s30 + $0x168] sm:$0xff] %v11769_v5   ;;  %v11764_v29 = vpack.c.bf16 %v9062_v49, %v9061_v27  ;;  %v6026_v55 = vadd.f32 %v18751_v25, %v12993_v47  ;;  %v20159_v5 = vld [vmem:[#allocation57_spill] sm:$0xff]  ;;  %v20163_v41 = vld [vmem:[#allocation35_spill] sm:$0xff]  ;;  %v20166_v36 = vld [vmem:[#allocation42_spill] sm:$0xff] }
 0x429   : > { %v12024_v35 = vpack.c.bf16 %v9166_v22, %v9165_v9  ;;  %v9169_v21 = vmax.f32 %v20150_v58, %v8961_v1  ;;  %12157 = vst [vmem:[%s15166_s30 + $0x308] sm:$0xff] %v12029_v38   ;;  %v7690_v39 = vadd.f32 %v18751_v25, %v13409_v45  ;;  %v6018_v54 = vadd.f32 %v18751_v25, %v6017_v28  ;;  %v20165_v12 = vld [vmem:[#allocation51_spill] sm:$0xff] }
 0x42a   : > { %v7682_v37 = vadd.f32 %v18751_v25, %v7681_v42  ;;  %v6039_v57 = vadd.f32 %v18751_v25, %v12996_v4  ;;  %12104 = vst [vmem:[%s15166_s30 + $0x160] sm:$0xff] %v11764_v29   ;;  %v8132_v27 = vmax.f32 %v6026_v55, 0.0  ;;  %v7703_v9 = vadd.f32 %v18751_v25, %v13412_v43  ;;  %v7697_v42 = vpop.f32.mrb[155].mxu1  ;;  %v20167_v29 = vld [vmem:[#allocation21_spill] sm:$0xff]  ;;  %v13000_v55 = vpop.f32.mrb[156].mxu0 }
 0x42b   : > { %12156 = vst [vmem:[%s15166_s30 + $0x300] sm:$0xff] %v12024_v35   ;;  %v6031_v47 = vadd.f32 %v18751_v25, %v6030_v8  ;;  %v7695_v40 = vadd.f32 %v18751_v25, %v7694_v6  ;;  %v8548_v45 = vmax.f32 %v7690_v39, 0.0  ;;  %v8130_v0 = vmax.f32 %v6018_v54, 0.0  ;;  %v20169_v8 = vld [vmem:[#allocation59_spill] sm:$0xff]  ;;  %v20170_v39 = vld [vmem:[#allocation32_spill] sm:$0xff]  ;;  %v13416_v6 = vpop.f32.mrb[156].mxu1 }
 0x42c   : > { %v8546_v28 = vmax.f32 %v7682_v37, 0.0  ;;  %v8135_v63 = vmax.f32 %v6039_v57, 0.0  ;;  %v20151_v51 = vmax.f32 %v18908_v24, 0.0  ;;  %v8551_v50 = vmax.f32 %v7703_v9, 0.0  ;;  %v20171_v37 = vld [vmem:[#allocation14_spill] sm:$0xff] }
 0x42d   : > { %v8133_v60 = vmax.f32 %v6031_v47, 0.0  ;;  %v8549_v44 = vmax.f32 %v7695_v40, 0.0  ;;  %v20153_v62 = vmax.f32 %v20152_v13, 0.0  ;;  %v20155_v2 = vmax.f32 %v20154_v32, 0.0 }
 0x42e   : > { %v8860_v31 = vmax.f32 %v20151_v51, %v8132_v27  ;;  %v20157_v48 = vmax.f32 %v20156_v30, 0.0  ;;  %v20158_v33 = vmax.f32 %v18935_v19, 0.0  ;;  %v20160_v24 = vmax.f32 %v18938_v53, 0.0  ;;  %v20168_v19 = vld [vmem:[#allocation11_spill] sm:$0xff]  ;;  %v6046_v27 = vpop.f32.mrb[157].mxu0 }
 0x42f   : > { %v8964_v52 = vmax.f32 %v20153_v62, %v8548_v45  ;;  %v8858_v46 = vmax.f32 %v20155_v2, %v8130_v0  ;;  %v20162_v22 = vmax.f32 %v20161_v59, 0.0  ;;  %v20164_v1 = vmax.f32 %v20163_v41, 0.0  ;;  %v7710_v0 = vpop.f32.mrb[157].mxu1 }
 0x430   : > { %v8962_v18 = vmax.f32 %v20157_v48, %v8546_v28  ;;  %v8863_v23 = vmax.f32 %v20158_v33, %v8135_v63  ;;  %v9068_v61 = vmax.f32 %v20159_v5, %v8860_v31  ;;  %v8967_v49 = vmax.f32 %v20160_v24, %v8551_v50  ;;  %v13001_v28 = vpop.f32.mrb[158].mxu0  ;;  %v13417_v50 = vpop.f32.mrb[158].mxu1  ;;  %v20176_v5 = vld [vmem:[#allocation43_spill] sm:$0xff] }
 0x431   : > { %v8861_v11 = vmax.f32 %v20162_v22, %v8133_v60  ;;  %v8965_v38 = vmax.f32 %v20164_v1, %v8549_v44  ;;  %v9172_v10 = vmax.f32 %v20165_v12, %v8964_v52  ;;  %v9066_v4 = vmax.f32 %v20166_v36, %v8858_v46  ;;  %v6049_v60 = vpop.f32.mrb[159].mxu0  ;;  %v7713_v44 = vpop.f32.mrb[159].mxu1  ;;  %v20179_v22 = vld [vmem:[#allocation33_spill] sm:$0xff] }
 0x432   : > { %v9170_v35 = vmax.f32 %v20167_v29, %v8962_v18  ;;  %v9071_v58 = vmax.f32 %v20168_v19, %v8863_v23  ;;  %v11779_v43 = vpack.c.bf16 %v9068_v61, %v9067_v17  ;;  %v9175_v53 = vmax.f32 %v20169_v8, %v8967_v49  ;;  %v20174_v18 = vld [vmem:[#allocation46_spill] sm:$0xff]  ;;  %v20181_v1 = vld [vmem:[#allocation5_spill] sm:$0xff] }
 0x433   : > { %v9069_v54 = vmax.f32 %v20170_v39, %v8861_v11  ;;  %v9173_v57 = vmax.f32 %v20171_v37, %v8965_v38  ;;  %v12039_v9 = vpack.c.bf16 %v9172_v10, %v9171_v20  ;;  %v11774_v47 = vpack.c.bf16 %v9066_v4, %v9065_v56  ;;  %v20185_v4 = vld [vmem:[#allocation34_spill] sm:$0xff]  ;;  %v20189_v37 = vld [vmem:[#allocation41_spill] sm:$0xff] }
 0x434   : > { %v12034_v40 = vpack.c.bf16 %v9170_v35, %v9169_v21  ;;  %v6042_v45 = vadd.f32 %v18751_v25, %v12997_v16  ;;  %12107 = vst [vmem:[%s15166_s30 + $0x178] sm:$0xff] %v11779_v43   ;;  %v7706_v17 = vadd.f32 %v18751_v25, %v13413_v7  ;;  %v6034_v63 = vadd.f32 %v18751_v25, %v6033_v15  ;;  %v20186_v35 = vld [vmem:[#allocation39_spill] sm:$0xff] }
 0x435   : > { %v7698_v51 = vadd.f32 %v18751_v25, %v7697_v42  ;;  %v6055_v31 = vadd.f32 %v18751_v25, %v13000_v55  ;;  %12159 = vst [vmem:[%s15166_s30 + $0x318] sm:$0xff] %v12039_v9   ;;  %12106 = vst [vmem:[%s15166_s30 + $0x170] sm:$0xff] %v11774_v47   ;;  %v7719_v56 = vadd.f32 %v18751_v25, %v13416_v6  ;;  %v20172_v42 = vmax.f32 %v18945_v14, 0.0  ;;  %v20187_v55 = vld [vmem:[#allocation40_spill] sm:$0xff] }
 0x436   : > { %12158 = vst [vmem:[%s15166_s30 + $0x310] sm:$0xff] %v12034_v40   ;;  %v8136_v20 = vmax.f32 %v6042_v45, 0.0  ;;  %v6047_v21 = vadd.f32 %v18751_v25, %v6046_v27  ;;  %v7711_v16 = vadd.f32 %v18751_v25, %v7710_v0  ;;  %v8552_v7 = vmax.f32 %v7706_v17, 0.0  ;;  %v20190_v6 = vld [vmem:[#allocation12_spill] sm:$0xff] }
 0x437   : > { %v8134_v13 = vmax.f32 %v6034_v63, 0.0  ;;  %v8550_v15 = vmax.f32 %v7698_v51, 0.0  ;;  %v8139_v62 = vmax.f32 %v6055_v31, 0.0  ;;  %v8555_v32 = vmax.f32 %v7719_v56, 0.0  ;;  %v20191_v9 = vld [vmem:[#allocation60_spill] sm:$0xff]  ;;  %v20192_v31 = vld [vmem:[#allocation47_spill] sm:$0xff] }
 0x438   : > { %v8864_v52 = vmax.f32 %v20172_v42, %v8136_v20  ;;  %v8137_v2 = vmax.f32 %v6047_v21, 0.0  ;;  %v8553_v46 = vmax.f32 %v7711_v16, 0.0  ;;  %v20173_v30 = vmax.f32 %v18949_v26, 0.0  ;;  %v20183_v26 = vld [vmem:[#allocation6_spill] sm:$0xff] }
 0x439   : > { %v20175_v33 = vmax.f32 %v20174_v18, 0.0  ;;  %v20177_v61 = vmax.f32 %v20176_v5, 0.0  ;;  %v20178_v49 = vmax.f32 %v18952_v3, 0.0  ;;  %v20180_v14 = vmax.f32 %v18959_v34, 0.0  ;;  %v20188_v3 = vld [vmem:[#allocation52_spill] sm:$0xff]  ;;  %v20193_v56 = vld [vmem:[#allocation62_spill] sm:$0xff] }
 0x43a   : > { %v8968_v48 = vmax.f32 %v20173_v30, %v8552_v7  ;;  %v9072_v11 = vmax.f32 %v20179_v22, %v8864_v52  ;;  %v20182_v38 = vmax.f32 %v20181_v1, 0.0  ;;  %v20184_v10 = vmax.f32 %v20183_v26, 0.0  ;;  %v20194_v16 = vld [vmem:[#allocation50_spill] sm:$0xff]  ;;  %v20197_v52 = vld [vmem:[#allocation45_spill] sm:$0xff] }
 0x43b   : > { %v8862_v23 = vmax.f32 %v20175_v33, %v8134_v13  ;;  %v8966_v24 = vmax.f32 %v20177_v61, %v8550_v15  ;;  %v8867_v59 = vmax.f32 %v20178_v49, %v8139_v62  ;;  %v8971_v41 = vmax.f32 %v20180_v14, %v8555_v32  ;;  %v20196_v62 = vld [vmem:[#allocation29_spill] sm:$0xff] }
 0x43c   : > { %v8865_v12 = vmax.f32 %v20182_v38, %v8137_v2  ;;  %v8969_v36 = vmax.f32 %v20184_v10, %v8553_v46  ;;  %v9176_v29 = vmax.f32 %v20185_v4, %v8968_v48  ;;  %v11789_v39 = vpack.c.bf16 %v9072_v11, %v9071_v58  ;;  %v20198_v2 = vld [vmem:[#allocation20_spill] sm:$0xff]  ;;  %v20199_v30 = vld [vmem:[#allocation53_spill] sm:$0xff] }
 0x43d   : > { %v9070_v19 = vmax.f32 %v20186_v35, %v8862_v23  ;;  %v9174_v43 = vmax.f32 %v20187_v55, %v8966_v24  ;;  %v9075_v8 = vmax.f32 %v20188_v3, %v8867_v59  ;;  %v9179_v34 = vmax.f32 %v20189_v37, %v8971_v41 }
 0x43e   : > { %v9073_v27 = vmax.f32 %v20190_v6, %v8865_v12  ;;  %v9177_v47 = vmax.f32 %v20191_v9, %v8969_v36  ;;  %v12049_v40 = vpack.c.bf16 %v9176_v29, %v9175_v53  ;;  %v6058_v17 = vadd.f32 %v18751_v25, %v13001_v28  ;;  %12109 = vst [vmem:[%s15166_s30 + $0x188] sm:$0xff] %v11789_v39  }
 0x43f   : > { %v11784_v45 = vpack.c.bf16 %v9070_v19, %v9069_v54  ;;  %v12044_v0 = vpack.c.bf16 %v9174_v43, %v9173_v57  ;;  %v7722_v63 = vadd.f32 %v18751_v25, %v13417_v50  ;;  %v6050_v51 = vadd.f32 %v18751_v25, %v6049_v60  ;;  %v20195_v54 = vld [vmem:[#allocation37_spill] sm:$0xff] }
 0x440   : > { %v7714_v58 = vadd.f32 %v18751_v25, %v7713_v44  ;;  %v8112_v20 = vmax.f32 %v20192_v31, 0.0  ;;  %v8528_v21 = vmax.f32 %v20193_v56, 0.0  ;;  %v8114_v7 = vmax.f32 %v20194_v16, 0.0  ;;  %12161 = vst [vmem:[%s15166_s30 + $0x328] sm:$0xff] %v12049_v40  }
 0x441   : > { %12108 = vst [vmem:[%s15166_s30 + $0x180] sm:$0xff] %v11784_v45   ;;  %12160 = vst [vmem:[%s15166_s30 + $0x320] sm:$0xff] %v12044_v0   ;;  %v8140_v53 = vmax.f32 %v6058_v17, 0.0  ;;  %v8530_v57 = vmax.f32 %v20195_v54, 0.0  ;;  %v8556_v28 = vmax.f32 %v7722_v63, 0.0  ;;  %v8138_v50 = vmax.f32 %v6050_v51, 0.0 }
 0x442   : > { %v8554_v60 = vmax.f32 %v7714_v58, 0.0 }
 0x443   : > { %v8868_v25 = vmax.f32 %v8114_v7, %v8140_v53  ;;  %v8972_v44 = vmax.f32 %v8530_v57, %v8556_v28  ;;  %v8866_v13 = vmax.f32 %v8112_v20, %v8138_v50 }
 0x444   : > { %v8970_v15 = vmax.f32 %v8528_v21, %v8554_v60 }
 0x445   : > { %v9076_v42 = vmax.f32 %v20196_v62, %v8868_v25  ;;  %v9180_v32 = vmax.f32 %v20197_v52, %v8972_v44  ;;  %v9074_v46 = vmax.f32 %v20198_v2, %v8866_v13 }
 0x446   : > { %v9178_v48 = vmax.f32 %v20199_v30, %v8970_v15 }
 0x447   : > { %v11799_v18 = vpack.c.bf16 %v9076_v42, %v9075_v8  ;;  %v12059_v33 = vpack.c.bf16 %v9180_v32, %v9179_v34  ;;  %v11794_v23 = vpack.c.bf16 %v9074_v46, %v9073_v27 }
 0x448   : > { %v12054_v5 = vpack.c.bf16 %v9178_v48, %v9177_v47 }
 0x449   : > { %12111 = vst [vmem:[%s15166_s30 + $0x198] sm:$0xff] %v11799_v18   ;;  %12163 = vst [vmem:[%s15166_s30 + $0x338] sm:$0xff] %v12059_v33  }
 0x44a   : > { %12110 = vst [vmem:[%s15166_s30 + $0x190] sm:$0xff] %v11794_v23   ;;  %12162 = vst [vmem:[%s15166_s30 + $0x330] sm:$0xff] %v12054_v5  }
 0x44b PF: > { %s13_s12 = sadd.s32 1, %s13863_s12  }
 0x44c   : > { %p10_p4 = scmp.ge.s32.totalorder %s13_s12, 4  }
 0x44e   :  { %12 = sbr.rel (!%p10_p4) target bundleno = 1 (0x1), region = 62 }

// kernel: lenet5_forward.4
= control target key start
LH: loop header
LB: loop body
LE: loop exit
PB: predicated region body
PF: predicated region fallthrough
CT: control target
= control target key end

     0   :  { %s2825_s12 = smov 0   ;;  %s3357_s0 = inlined_call_operand.vmem [shape: bf16[16,128,200], index: 0, kind: input, shape index: {}]   ;;  %s3358_s1 = inlined_call_operand.vmem [shape: bf16[200,128], index: 1, kind: input, shape index: {}]   ;;  %s3359_s2 = inlined_call_operand.vmem [shape: f32[1,128], index: 2, kind: input, shape index: {}]   ;;  %s3360_s3 = inlined_call_operand.vmem [shape: bf16[16,32,128], index: 3, kind: output, shape index: {}]  }
   0x1 LB: > { %s2175_s13 = sadd.s32 4294967295, %s2802_s12   ;;  %p2179_p0 = scmp.ge.s32.totalorder %s2802_s12, 1  ;;  %s2802_s12 = sphi %s2825_s12, %s13_s12  }
   0x2   : > { %p139_p1 = scmp.lt.s32.totalorder %s2802_s12, 3 }
   0x4   : > { %p140_p2 = pnand %p2179_p0, %p139_p1 }
   0x5   : > { %v2590_v0 = vld [vmem:[%s3358_s1] sm:$0xff] (!%p140_p2)   ;;  %v2804_v1 = vmov (!%p140_p2), 0   ;;  %v2591_v2 = vld [vmem:[%s3358_s1 + $0x8] sm:$0xff] (!%p140_p2)   ;;  %s2180_s18 = sshll.u32 (!%p140_p2), %s2175_s13, 3  ;;  %v2592_v3 = vld [vmem:[%s3358_s1 + $0x10] sm:$0xff] (!%p140_p2)   ;;  %vm991_vm0 = vcmask (!%p140_p2), 588800  }
   0x6   : > { %143 = sbr.rel (%p140_p2) target bundleno = 532 (0x214), region = 32  ;;  %1188 = vmatprep.subr.bf16.mxu0 (!%p140_p2), %v2804_v1  ;;  %2555 = vmatprep.subr.bf16.mxu1 (!%p140_p2), %v2804_v1  ;;  %p166_p3 = scmp.lt.s32.totalorder (!%p140_p2), %s2180_s18, 15  ;;  %v2593_v4 = vld [vmem:[%s3358_s1 + $0x18] sm:$0xff] (!%p140_p2)   ;;  %v2594_v6 = vld [vmem:[%s3358_s1 + $0x20] sm:$0xff] (!%p140_p2)   ;;  %v2595_v8 = vld [vmem:[%s3358_s1 + $0x28] sm:$0xff] (!%p140_p2)   ;;  %vm1184_vm1 = vcmask (!%p140_p2), 1043456  }
   0x7   : > { %1189 = vmatpush1.bf16.msra.mxu0 (!%p140_p2), %v2590_v0  ;;  %2568 = vmatpush1.bf16.msra.mxu1 (!%p140_p2), %v2590_v0  ;;  %v2596_v9 = vld [vmem:[%s3358_s1 + $0x30] sm:$0xff] (!%p140_p2)   ;;  %v2597_v10 = vld [vmem:[%s3358_s1 + $0x38] sm:$0xff] (!%p140_p2)   ;;  %v2598_v11 = vld [vmem:[%s3358_s1 + $0x40] sm:$0xff] (!%p140_p2)  }
   0x8   : > { %1190 = vmatprep.subr.bf16.mxu0 (!%p140_p2), %v2804_v1  ;;  %2556 = vmatprep.subr.bf16.mxu1 (!%p140_p2), %v2804_v1  ;;  %v2599_v12 = vld [vmem:[%s3358_s1 + $0x48] sm:$0xff] (!%p140_p2)   ;;  %v2600_v13 = vld [vmem:[%s3358_s1 + $0x50] sm:$0xff] (!%p140_p2)   ;;  %v2601_v14 = vld [vmem:[%s3358_s1 + $0x58] sm:$0xff] (!%p140_p2)  }
   0x9   : > { %v2602_v15 = vld [vmem:[%s3358_s1 + $0x60] ss:$0 sps:$4 sm:$0xff] (!%p140_p2)  }
   0xa   : > { %v1186_v16 = vsel (!%p140_p2), %vm1184_vm1, %v2602_v15, 0 }
   0xb   : > { %1191 = vmatpush1.bf16.msra.mxu0 (!%p140_p2), %v2591_v2  ;;  %2569 = vmatpush1.bf16.msra.mxu1 (!%p140_p2), %v2591_v2 }
   0xc   : > { %1192 = vmatprep.subr.bf16.mxu0 (!%p140_p2), %v2804_v1  ;;  %2557 = vmatprep.subr.bf16.mxu1 (!%p140_p2), %v2804_v1 }
   0xd   : > { %s3362_s18 = smov (!%p166_p3, %s2180_s18), 15 }
   0xe   : > { %s2426_s21 = sshll.u32 %s3362_s18, 7  ;;  %s2427_s22 = sshll.u32 %s3362_s18, 4 }
   0xf   : > { %1193 = vmatpush1.bf16.msra.mxu0 %v2592_v3  ;;  %2570 = vmatpush1.bf16.msra.mxu1 %v2592_v3  ;;  %s2857_s26 = scalar_lea.vmem %s3357_s0, %s2426_s21  ;;  %s3157_s24 = scalar_lea.vmem %s3360_s3, %s2427_s22 }
  0x10   : > { %1194 = vmatprep.subr.bf16.mxu0 %v2804_v1  ;;  %2558 = vmatprep.subr.bf16.mxu1 %v2804_v1  ;;  %v2605_v5 = vld [vmem:[%s2857_s26 + $0x4] ss:$8 sps:$4 sm:$0xff]   ;;  %v2603_v17 = vld [vmem:[%s2857_s26] ss:$8 sps:$4 sm:$0xff]   ;;  %v2609_v19 = vld [vmem:[%s2857_s26 + $0x14] ss:$8 sps:$4 sm:$0xff]  }
  0x11   : > { %v2608_v7 = vld [vmem:[%s2857_s26 + $0x204] ss:$8 sps:$4 sm:$0xff]   ;;  %2328 = vmatprep.mubr.msk.bf16.mxu0 %vm991_vm0, %v2605_v5  ;;  %v2606_v18 = vld [vmem:[%s2857_s26 + $0x200] ss:$8 sps:$4 sm:$0xff]   ;;  %v2611_v20 = vld [vmem:[%s2857_s26 + $0x214] ss:$8 sps:$4 sm:$0xff]  }
  0x12   : > { %2360 = vmatprep.mubr.msk.bf16.mxu1 %vm991_vm0, %v2608_v7  ;;  %v2613_v21 = vld [vmem:[%s2857_s26 + $0x10] ss:$8 sps:$4 sm:$0xff]   ;;  %v2615_v23 = vld [vmem:[%s2857_s26 + $0x24] ss:$8 sps:$4 sm:$0xff]   ;;  %v2619_v25 = vld [vmem:[%s2857_s26 + $0x20] ss:$8 sps:$4 sm:$0xff]  }
  0x13   : > { %1195 = vmatpush1.bf16.msra.mxu0 %v2593_v4  ;;  %2571 = vmatpush1.bf16.msra.mxu1 %v2593_v4  ;;  %v2614_v22 = vld [vmem:[%s2857_s26 + $0x210] ss:$8 sps:$4 sm:$0xff]   ;;  %v2617_v24 = vld [vmem:[%s2857_s26 + $0x224] ss:$8 sps:$4 sm:$0xff]   ;;  %v2620_v26 = vld [vmem:[%s2857_s26 + $0x220] ss:$8 sps:$4 sm:$0xff]  }
  0x14   : > { %1196 = vmatprep.subr.bf16.mxu0 %v2804_v1  ;;  %2559 = vmatprep.subr.bf16.mxu1 %v2804_v1  ;;  %v2621_v27 = vld [vmem:[%s2857_s26 + $0x34] ss:$8 sps:$4 sm:$0xff]   ;;  %v2625_v29 = vld [vmem:[%s2857_s26 + $0x30] ss:$8 sps:$4 sm:$0xff]   ;;  %v2627_v31 = vld [vmem:[%s2857_s26 + $0x44] ss:$8 sps:$4 sm:$0xff]  }
  0x15   : > { %v2623_v28 = vld [vmem:[%s2857_s26 + $0x234] ss:$8 sps:$4 sm:$0xff]   ;;  %v2626_v30 = vld [vmem:[%s2857_s26 + $0x230] ss:$8 sps:$4 sm:$0xff]   ;;  %v2629_v32 = vld [vmem:[%s2857_s26 + $0x244] ss:$8 sps:$4 sm:$0xff]  }
  0x16   : > { %v2631_v33 = vld [vmem:[%s2857_s26 + $0x40] ss:$8 sps:$4 sm:$0xff]   ;;  %v2633_v35 = vld [vmem:[%s2857_s26 + $0x54] ss:$8 sps:$4 sm:$0xff]   ;;  %v2637_v37 = vld [vmem:[%s2857_s26 + $0x50] ss:$8 sps:$4 sm:$0xff]  }
  0x17   : > { %1197 = vmatpush1.bf16.msra.mxu0 %v2594_v6  ;;  %2572 = vmatpush1.bf16.msra.mxu1 %v2594_v6  ;;  %v2632_v34 = vld [vmem:[%s2857_s26 + $0x240] ss:$8 sps:$4 sm:$0xff]   ;;  %v2635_v36 = vld [vmem:[%s2857_s26 + $0x254] ss:$8 sps:$4 sm:$0xff]   ;;  %v2638_v38 = vld [vmem:[%s2857_s26 + $0x250] ss:$8 sps:$4 sm:$0xff]  }
  0x18   : > { %1198 = vmatprep.subr.bf16.mxu0 %v2804_v1  ;;  %2560 = vmatprep.subr.bf16.mxu1 %v2804_v1  ;;  %v2639_v39 = vld [vmem:[%s2857_s26 + $0x64] ss:$8 sps:$4 sm:$0xff]   ;;  %v2643_v41 = vld [vmem:[%s2857_s26 + $0x60] ss:$8 sps:$4 sm:$0xff]   ;;  %v2645_v43 = vld [vmem:[%s2857_s26 + $0x74] ss:$8 sps:$4 sm:$0xff]  }
  0x19   : > { %v2641_v40 = vld [vmem:[%s2857_s26 + $0x264] ss:$8 sps:$4 sm:$0xff]   ;;  %v2644_v42 = vld [vmem:[%s2857_s26 + $0x260] ss:$8 sps:$4 sm:$0xff]   ;;  %v2647_v44 = vld [vmem:[%s2857_s26 + $0x274] ss:$8 sps:$4 sm:$0xff]  }
  0x1a   : > { %v2649_v45 = vld [vmem:[%s2857_s26 + $0x70] ss:$8 sps:$4 sm:$0xff]   ;;  %v2651_v47 = vld [vmem:[%s2857_s26 + $0x84] ss:$8 sps:$4 sm:$0xff]   ;;  %v2655_v49 = vld [vmem:[%s2857_s26 + $0x80] ss:$8 sps:$4 sm:$0xff]  }
  0x1b   : > { %1199 = vmatpush1.bf16.msra.mxu0 %v2595_v8  ;;  %2573 = vmatpush1.bf16.msra.mxu1 %v2595_v8  ;;  %v2650_v46 = vld [vmem:[%s2857_s26 + $0x270] ss:$8 sps:$4 sm:$0xff]   ;;  %v2653_v48 = vld [vmem:[%s2857_s26 + $0x284] ss:$8 sps:$4 sm:$0xff]   ;;  %v2656_v50 = vld [vmem:[%s2857_s26 + $0x280] ss:$8 sps:$4 sm:$0xff]  }
  0x1c   : > { %1200 = vmatprep.subr.bf16.mxu0 %v2804_v1  ;;  %2561 = vmatprep.subr.bf16.mxu1 %v2804_v1  ;;  %v2657_v51 = vld [vmem:[%s2857_s26 + $0x94] ss:$8 sps:$4 sm:$0xff]   ;;  %v2661_v53 = vld [vmem:[%s2857_s26 + $0x90] ss:$8 sps:$4 sm:$0xff]   ;;  %v2663_v55 = vld [vmem:[%s2857_s26 + $0xa4] ss:$8 sps:$4 sm:$0xff]  }
  0x1d   : > { %v2659_v52 = vld [vmem:[%s2857_s26 + $0x294] ss:$8 sps:$4 sm:$0xff]   ;;  %v2662_v54 = vld [vmem:[%s2857_s26 + $0x290] ss:$8 sps:$4 sm:$0xff]   ;;  %v2665_v56 = vld [vmem:[%s2857_s26 + $0x2a4] ss:$8 sps:$4 sm:$0xff]  }
  0x1e   : > { %v2667_v57 = vld [vmem:[%s2857_s26 + $0xa0] ss:$8 sps:$4 sm:$0xff]   ;;  %v2669_v59 = vld [vmem:[%s2857_s26 + $0xb4] ss:$8 sps:$4 sm:$0xff]   ;;  %v2673_v61 = vld [vmem:[%s2857_s26 + $0xb0] ss:$8 sps:$4 sm:$0xff]  }
  0x1f   : > { %1201 = vmatpush1.bf16.msra.mxu0 %v2596_v9  ;;  %2574 = vmatpush1.bf16.msra.mxu1 %v2596_v9  ;;  %v2668_v58 = vld [vmem:[%s2857_s26 + $0x2a0] ss:$8 sps:$4 sm:$0xff]   ;;  %v2671_v60 = vld [vmem:[%s2857_s26 + $0x2b4] ss:$8 sps:$4 sm:$0xff]   ;;  %v2674_v62 = vld [vmem:[%s2857_s26 + $0x2b0] ss:$8 sps:$4 sm:$0xff]  }
  0x20   : > { %1202 = vmatprep.subr.bf16.mxu0 %v2804_v1  ;;  %2562 = vmatprep.subr.bf16.mxu1 %v2804_v1  ;;  %v2675_v63 = vld [vmem:[%s2857_s26 + $0xc4] ss:$8 sps:$4 sm:$0xff]   ;;  %v2680_v2 = vld [vmem:[%s2857_s26 + $0x2c0] ss:$8 sps:$4 sm:$0xff]   ;;  %v2681_v3 = vld [vmem:[%s2857_s26 + $0xd4] ss:$8 sps:$4 sm:$0xff]  }
  0x21   : > { %v2677_v0 = vld [vmem:[%s2857_s26 + $0x2c4] ss:$8 sps:$4 sm:$0xff]   ;;  %v2683_v4 = vld [vmem:[%s2857_s26 + $0x2d4] ss:$8 sps:$4 sm:$0xff]   ;;  %v2685_v5 = vld [vmem:[%s2857_s26 + $0xd0] ss:$8 sps:$4 sm:$0xff]  }
  0x22   : > { %v2686_v6 = vld [vmem:[%s2857_s26 + $0x2d0] ss:$8 sps:$4 sm:$0xff]   ;;  %v2687_v7 = vld [vmem:[%s2857_s26 + $0xe4] ss:$8 sps:$4 sm:$0xff]   ;;  %v2691_v9 = vld [vmem:[%s2857_s26 + $0xe0] ss:$8 sps:$4 sm:$0xff]  }
  0x23   : > { %1203 = vmatpush1.bf16.msra.mxu0 %v2597_v10  ;;  %2575 = vmatpush1.bf16.msra.mxu1 %v2597_v10  ;;  %v2689_v8 = vld [vmem:[%s2857_s26 + $0x2e4] ss:$8 sps:$4 sm:$0xff]   ;;  %v2692_v10 = vld [vmem:[%s2857_s26 + $0x2e0] ss:$8 sps:$4 sm:$0xff]  }
  0x24   : > { %1204 = vmatprep.subr.bf16.mxu0 %v2804_v1  ;;  %2563 = vmatprep.subr.bf16.mxu1 %v2804_v1  ;;  %v2699_v15 = vld [vmem:[%s2857_s26 + $0x104] ss:$8 sps:$4 sm:$0xff]  }
  0x27   : > { %1205 = vmatpush1.bf16.msra.mxu0 %v2598_v11  ;;  %2576 = vmatpush1.bf16.msra.mxu1 %v2598_v11  ;;  %v2693_v11 = vld [vmem:[%s2857_s26 + $0xf4] ss:$8 sps:$4 sm:$0xff]  }
  0x28   : > { %1206 = vmatprep.subr.bf16.mxu0 %v2804_v1  ;;  %2564 = vmatprep.subr.bf16.mxu1 %v2804_v1 }
  0x2b   : > { %1207 = vmatpush1.bf16.msra.mxu0 %v2599_v12  ;;  %2577 = vmatpush1.bf16.msra.mxu1 %v2599_v12  ;;  %v2695_v12 = vld [vmem:[%s2857_s26 + $0x2f4] ss:$8 sps:$4 sm:$0xff]  }
  0x2c   : > { %1208 = vmatprep.subr.bf16.mxu0 %v2804_v1  ;;  %2565 = vmatprep.subr.bf16.mxu1 %v2804_v1 }
  0x2f   : > { %1209 = vmatpush1.bf16.msra.mxu0 %v2600_v13  ;;  %2578 = vmatpush1.bf16.msra.mxu1 %v2600_v13  ;;  %v2697_v13 = vld [vmem:[%s2857_s26 + $0xf0] ss:$8 sps:$4 sm:$0xff]  }
  0x30   : > { %1210 = vmatprep.subr.bf16.mxu0 %v2804_v1  ;;  %2566 = vmatprep.subr.bf16.mxu1 %v2804_v1 }
  0x33   : > { %1211 = vmatpush1.bf16.msra.mxu0 %v2601_v14  ;;  %2579 = vmatpush1.bf16.msra.mxu1 %v2601_v14  ;;  %v2698_v14 = vld [vmem:[%s2857_s26 + $0x2f0] ss:$8 sps:$4 sm:$0xff]  }
  0x34   : > { %1212 = vmatprep.subr.bf16.mxu0 %v2804_v1  ;;  %2567 = vmatprep.subr.bf16.mxu1 %v2804_v1  ;;  %v2679_v1 = vld [vmem:[%s2857_s26 + $0xc0] ss:$8 sps:$4 sm:$0xff]  }
  0x37   : > { %1213 = vmatpush1.bf16.msra.mxu0 %v1186_v16  ;;  %2580 = vmatpush1.bf16.msra.mxu1 %v1186_v16  ;;  %v2701_v16 = vld [vmem:[%s2857_s26 + $0x304] ss:$8 sps:$4 sm:$0xff]  }
  0x3a   : > { %1221 = vmatmul.mubr.bf16.vlgmr.msra.gmra.mrb[0].mxu0 %v2603_v17  ;;  %1477 = vmatmul.mubr.bf16.vlgmr.msra.gmra.mrb[0].mxu1 %v2606_v18  ;;  %v2703_v17 = vld [vmem:[%s2857_s26 + $0x100] ss:$8 sps:$4 sm:$0xff]  }
  0x3b   : > { %2329 = vmatprep.mubr.msk.bf16.mxu0 %vm991_vm0, %v2609_v19  ;;  %2361 = vmatprep.mubr.msk.bf16.mxu1 %vm991_vm0, %v2611_v20  ;;  %v2704_v18 = vld [vmem:[%s2857_s26 + $0x300] ss:$8 sps:$4 sm:$0xff]   ;;  %v2705_v19 = vld [vmem:[%s2857_s26 + $0x114] ss:$8 sps:$4 sm:$0xff]  }
  0x3c   : > { %v2707_v20 = vld [vmem:[%s2857_s26 + $0x314] ss:$8 sps:$4 sm:$0xff]  }
  0x42   : > { %1229 = vmatmul.mubr.bf16.gmra.mrb[4].mxu0 %v2613_v21  ;;  %1485 = vmatmul.mubr.bf16.gmra.mrb[4].mxu1 %v2614_v22  ;;  %v2709_v21 = vld [vmem:[%s2857_s26 + $0x110] ss:$8 sps:$4 sm:$0xff]  }
  0x43   : > { %2330 = vmatprep.mubr.msk.bf16.mxu0 %vm991_vm0, %v2615_v23  ;;  %2362 = vmatprep.mubr.msk.bf16.mxu1 %vm991_vm0, %v2617_v24  ;;  %v2710_v22 = vld [vmem:[%s2857_s26 + $0x310] ss:$8 sps:$4 sm:$0xff]   ;;  %v2711_v23 = vld [vmem:[%s2857_s26 + $0x124] ss:$8 sps:$4 sm:$0xff]  }
  0x44   : > { %v2713_v24 = vld [vmem:[%s2857_s26 + $0x324] ss:$8 sps:$4 sm:$0xff]  }
  0x4a   : > { %1237 = vmatmul.mubr.bf16.gmra.mrb[8].mxu0 %v2619_v25  ;;  %1493 = vmatmul.mubr.bf16.gmra.mrb[8].mxu1 %v2620_v26  ;;  %v2715_v25 = vld [vmem:[%s2857_s26 + $0x120] ss:$8 sps:$4 sm:$0xff]  }
  0x4b   : > { %2331 = vmatprep.mubr.msk.bf16.mxu0 %vm991_vm0, %v2621_v27  ;;  %2363 = vmatprep.mubr.msk.bf16.mxu1 %vm991_vm0, %v2623_v28  ;;  %v2716_v26 = vld [vmem:[%s2857_s26 + $0x320] ss:$8 sps:$4 sm:$0xff]   ;;  %v2717_v27 = vld [vmem:[%s2857_s26 + $0x134] ss:$8 sps:$4 sm:$0xff]  }
  0x4c   : > { %v2719_v28 = vld [vmem:[%s2857_s26 + $0x334] ss:$8 sps:$4 sm:$0xff]  }
  0x52   : > { %1245 = vmatmul.mubr.bf16.gmra.mrb[12].mxu0 %v2625_v29  ;;  %1501 = vmatmul.mubr.bf16.gmra.mrb[12].mxu1 %v2626_v30  ;;  %v2721_v29 = vld [vmem:[%s2857_s26 + $0x130] ss:$8 sps:$4 sm:$0xff]  }
  0x53   : > { %2332 = vmatprep.mubr.msk.bf16.mxu0 %vm991_vm0, %v2627_v31  ;;  %2364 = vmatprep.mubr.msk.bf16.mxu1 %vm991_vm0, %v2629_v32  ;;  %v2722_v30 = vld [vmem:[%s2857_s26 + $0x330] ss:$8 sps:$4 sm:$0xff]   ;;  %v2723_v31 = vld [vmem:[%s2857_s26 + $0x144] ss:$8 sps:$4 sm:$0xff]  }
  0x54   : > { %v2725_v32 = vld [vmem:[%s2857_s26 + $0x344] ss:$8 sps:$4 sm:$0xff]  }
  0x5a   : > { %1253 = vmatmul.mubr.bf16.gmra.mrb[16].mxu0 %v2631_v33  ;;  %1509 = vmatmul.mubr.bf16.gmra.mrb[16].mxu1 %v2632_v34  ;;  %v2727_v33 = vld [vmem:[%s2857_s26 + $0x140] ss:$8 sps:$4 sm:$0xff]  }
  0x5b   : > { %2333 = vmatprep.mubr.msk.bf16.mxu0 %vm991_vm0, %v2633_v35  ;;  %2365 = vmatprep.mubr.msk.bf16.mxu1 %vm991_vm0, %v2635_v36  ;;  %v2728_v34 = vld [vmem:[%s2857_s26 + $0x340] ss:$8 sps:$4 sm:$0xff]   ;;  %v2729_v35 = vld [vmem:[%s2857_s26 + $0x154] ss:$8 sps:$4 sm:$0xff]  }
  0x5c   : > { %v2731_v36 = vld [vmem:[%s2857_s26 + $0x354] ss:$8 sps:$4 sm:$0xff]  }
  0x62   : > { %1261 = vmatmul.mubr.bf16.gmra.mrb[20].mxu0 %v2637_v37  ;;  %1517 = vmatmul.mubr.bf16.gmra.mrb[20].mxu1 %v2638_v38  ;;  %v2733_v37 = vld [vmem:[%s2857_s26 + $0x150] ss:$8 sps:$4 sm:$0xff]  }
  0x63   : > { %2334 = vmatprep.mubr.msk.bf16.mxu0 %vm991_vm0, %v2639_v39  ;;  %2366 = vmatprep.mubr.msk.bf16.mxu1 %vm991_vm0, %v2641_v40  ;;  %v2734_v38 = vld [vmem:[%s2857_s26 + $0x350] ss:$8 sps:$4 sm:$0xff]   ;;  %v2735_v39 = vld [vmem:[%s2857_s26 + $0x164] ss:$8 sps:$4 sm:$0xff]  }
  0x64   : > { %v2737_v40 = vld [vmem:[%s2857_s26 + $0x364] ss:$8 sps:$4 sm:$0xff]  }
  0x6a   : > { %1269 = vmatmul.mubr.bf16.gmra.mrb[24].mxu0 %v2643_v41  ;;  %1525 = vmatmul.mubr.bf16.gmra.mrb[24].mxu1 %v2644_v42  ;;  %v2739_v41 = vld [vmem:[%s2857_s26 + $0x160] ss:$8 sps:$4 sm:$0xff]  }
  0x6b   : > { %2335 = vmatprep.mubr.msk.bf16.mxu0 %vm991_vm0, %v2645_v43  ;;  %2367 = vmatprep.mubr.msk.bf16.mxu1 %vm991_vm0, %v2647_v44  ;;  %v2740_v42 = vld [vmem:[%s2857_s26 + $0x360] ss:$8 sps:$4 sm:$0xff]   ;;  %v2741_v43 = vld [vmem:[%s2857_s26 + $0x174] ss:$8 sps:$4 sm:$0xff]  }
  0x6c   : > { %v2743_v44 = vld [vmem:[%s2857_s26 + $0x374] ss:$8 sps:$4 sm:$0xff]  }
  0x72   : > { %1277 = vmatmul.mubr.bf16.gmra.mrb[28].mxu0 %v2649_v45  ;;  %1533 = vmatmul.mubr.bf16.gmra.mrb[28].mxu1 %v2650_v46  ;;  %v2745_v45 = vld [vmem:[%s2857_s26 + $0x170] ss:$8 sps:$4 sm:$0xff]  }
  0x73   : > { %2336 = vmatprep.mubr.msk.bf16.mxu0 %vm991_vm0, %v2651_v47  ;;  %2368 = vmatprep.mubr.msk.bf16.mxu1 %vm991_vm0, %v2653_v48  ;;  %v2746_v46 = vld [vmem:[%s2857_s26 + $0x370] ss:$8 sps:$4 sm:$0xff]   ;;  %v2747_v47 = vld [vmem:[%s2857_s26 + $0x184] ss:$8 sps:$4 sm:$0xff]  }
  0x74   : > { %v2749_v48 = vld [vmem:[%s2857_s26 + $0x384] ss:$8 sps:$4 sm:$0xff]  }
  0x7a   : > { %1285 = vmatmul.mubr.bf16.gmra.mrb[32].mxu0 %v2655_v49  ;;  %1541 = vmatmul.mubr.bf16.gmra.mrb[32].mxu1 %v2656_v50  ;;  %v2751_v49 = vld [vmem:[%s2857_s26 + $0x180] ss:$8 sps:$4 sm:$0xff]  }
  0x7b   : > { %2337 = vmatprep.mubr.msk.bf16.mxu0 %vm991_vm0, %v2657_v51  ;;  %2369 = vmatprep.mubr.msk.bf16.mxu1 %vm991_vm0, %v2659_v52  ;;  %v2752_v50 = vld [vmem:[%s2857_s26 + $0x380] ss:$8 sps:$4 sm:$0xff]   ;;  %v2753_v51 = vld [vmem:[%s2857_s26 + $0x194] ss:$8 sps:$4 sm:$0xff]  }
  0x7c   : > { %v2755_v52 = vld [vmem:[%s2857_s26 + $0x394] ss:$8 sps:$4 sm:$0xff]  }
  0x82   : > { %1293 = vmatmul.mubr.bf16.gmra.mrb[36].mxu0 %v2661_v53  ;;  %1549 = vmatmul.mubr.bf16.gmra.mrb[36].mxu1 %v2662_v54  ;;  %v2757_v53 = vld [vmem:[%s2857_s26 + $0x190] ss:$8 sps:$4 sm:$0xff]  }
  0x83   : > { %2338 = vmatprep.mubr.msk.bf16.mxu0 %vm991_vm0, %v2663_v55  ;;  %2370 = vmatprep.mubr.msk.bf16.mxu1 %vm991_vm0, %v2665_v56  ;;  %v2758_v54 = vld [vmem:[%s2857_s26 + $0x390] ss:$8 sps:$4 sm:$0xff]   ;;  %v2759_v55 = vld [vmem:[%s2857_s26 + $0x1a4] ss:$8 sps:$4 sm:$0xff]  }
  0x84   : > { %v2761_v56 = vld [vmem:[%s2857_s26 + $0x3a4] ss:$8 sps:$4 sm:$0xff]  }
  0x8a   : > { %1301 = vmatmul.mubr.bf16.gmra.mrb[40].mxu0 %v2667_v57  ;;  %1557 = vmatmul.mubr.bf16.gmra.mrb[40].mxu1 %v2668_v58  ;;  %v2763_v57 = vld [vmem:[%s2857_s26 + $0x1a0] ss:$8 sps:$4 sm:$0xff]  }
  0x8b   : > { %2339 = vmatprep.mubr.msk.bf16.mxu0 %vm991_vm0, %v2669_v59  ;;  %2371 = vmatprep.mubr.msk.bf16.mxu1 %vm991_vm0, %v2671_v60  ;;  %v2764_v58 = vld [vmem:[%s2857_s26 + $0x3a0] ss:$8 sps:$4 sm:$0xff]   ;;  %v2765_v59 = vld [vmem:[%s2857_s26 + $0x1b4] ss:$8 sps:$4 sm:$0xff]  }
  0x8c   : > { %v2767_v60 = vld [vmem:[%s2857_s26 + $0x3b4] ss:$8 sps:$4 sm:$0xff]  }
  0x92   : > { %1309 = vmatmul.mubr.bf16.gmra.mrb[44].mxu0 %v2673_v61  ;;  %1565 = vmatmul.mubr.bf16.gmra.mrb[44].mxu1 %v2674_v62 }
  0x93   : > { %2340 = vmatprep.mubr.msk.bf16.mxu0 %vm991_vm0, %v2675_v63  ;;  %2372 = vmatprep.mubr.msk.bf16.mxu1 %vm991_vm0, %v2677_v0 }
  0x9a   : > { %1317 = vmatmul.mubr.bf16.gmra.mrb[48].mxu0 %v2679_v1  ;;  %1573 = vmatmul.mubr.bf16.gmra.mrb[48].mxu1 %v2680_v2  ;;  %v2769_v1 = vld [vmem:[%s2857_s26 + $0x1b0] ss:$8 sps:$4 sm:$0xff]  }
  0x9b   : > { %2341 = vmatprep.mubr.msk.bf16.mxu0 %vm991_vm0, %v2681_v3  ;;  %2373 = vmatprep.mubr.msk.bf16.mxu1 %vm991_vm0, %v2683_v4  ;;  %v2770_v2 = vld [vmem:[%s2857_s26 + $0x3b0] ss:$8 sps:$4 sm:$0xff]  }
  0xa2   : > { %1325 = vmatmul.mubr.bf16.gmra.mrb[52].mxu0 %v2685_v5  ;;  %1581 = vmatmul.mubr.bf16.gmra.mrb[52].mxu1 %v2686_v6  ;;  %v2771_v5 = vld [vmem:[%s2857_s26 + $0x1c4] ss:$8 sps:$4 sm:$0xff]  }
  0xa3   : > { %2342 = vmatprep.mubr.msk.bf16.mxu0 %vm991_vm0, %v2687_v7  ;;  %2374 = vmatprep.mubr.msk.bf16.mxu1 %vm991_vm0, %v2689_v8  ;;  %v2773_v6 = vld [vmem:[%s2857_s26 + $0x3c4] ss:$8 sps:$4 sm:$0xff]  }
  0xaa   : > { %1333 = vmatmul.mubr.bf16.gmra.mrb[56].mxu0 %v2691_v9  ;;  %1589 = vmatmul.mubr.bf16.gmra.mrb[56].mxu1 %v2692_v10 }
  0xab   : > { %2343 = vmatprep.mubr.msk.bf16.mxu0 %vm991_vm0, %v2693_v11  ;;  %2375 = vmatprep.mubr.msk.bf16.mxu1 %vm991_vm0, %v2695_v12 }
  0xb2   : > { %1341 = vmatmul.mubr.bf16.gmra.mrb[60].mxu0 %v2697_v13  ;;  %1597 = vmatmul.mubr.bf16.gmra.mrb[60].mxu1 %v2698_v14  ;;  %v2775_v13 = vld [vmem:[%s2857_s26 + $0x1c0] ss:$8 sps:$4 sm:$0xff]  }
  0xb3   : > { %2344 = vmatprep.mubr.msk.bf16.mxu0 %vm991_vm0, %v2699_v15  ;;  %2376 = vmatprep.mubr.msk.bf16.mxu1 %vm991_vm0, %v2701_v16  ;;  %v2776_v14 = vld [vmem:[%s2857_s26 + $0x3c0] ss:$8 sps:$4 sm:$0xff]  }
  0xba   : > { %1349 = vmatmul.mubr.bf16.gmra.mrb[64].mxu0 %v2703_v17  ;;  %1605 = vmatmul.mubr.bf16.gmra.mrb[64].mxu1 %v2704_v18  ;;  %v2777_v17 = vld [vmem:[%s2857_s26 + $0x1d4] ss:$8 sps:$4 sm:$0xff]  }
  0xbb   : > { %2345 = vmatprep.mubr.msk.bf16.mxu0 %vm991_vm0, %v2705_v19  ;;  %2377 = vmatprep.mubr.msk.bf16.mxu1 %vm991_vm0, %v2707_v20  ;;  %v2779_v18 = vld [vmem:[%s2857_s26 + $0x3d4] ss:$8 sps:$4 sm:$0xff]   ;;  %v3085_v19 = vld [vmem:[%s3359_s2] ss:$0 sm:$0xff] }
  0xc2   : > { %1357 = vmatmul.mubr.bf16.gmra.mrb[68].mxu0 %v2709_v21  ;;  %1613 = vmatmul.mubr.bf16.gmra.mrb[68].mxu1 %v2710_v22 }
  0xc3   : > { %2346 = vmatprep.mubr.msk.bf16.mxu0 %vm991_vm0, %v2711_v23  ;;  %2378 = vmatprep.mubr.msk.bf16.mxu1 %vm991_vm0, %v2713_v24 }
  0xca   : > { %1365 = vmatmul.mubr.bf16.gmra.mrb[72].mxu0 %v2715_v25  ;;  %1621 = vmatmul.mubr.bf16.gmra.mrb[72].mxu1 %v2716_v26 }
  0xcb   : > { %2347 = vmatprep.mubr.msk.bf16.mxu0 %vm991_vm0, %v2717_v27  ;;  %2379 = vmatprep.mubr.msk.bf16.mxu1 %vm991_vm0, %v2719_v28  ;;  %v2781_v28 = vld [vmem:[%s2857_s26 + $0x1d0] ss:$8 sps:$4 sm:$0xff]  }
  0xd2   : > { %1373 = vmatmul.mubr.bf16.gmra.mrb[76].mxu0 %v2721_v29  ;;  %1629 = vmatmul.mubr.bf16.gmra.mrb[76].mxu1 %v2722_v30 }
  0xd3   : > { %2348 = vmatprep.mubr.msk.bf16.mxu0 %vm991_vm0, %v2723_v31  ;;  %2380 = vmatprep.mubr.msk.bf16.mxu1 %vm991_vm0, %v2725_v32 }
  0xda   : > { %1381 = vmatmul.mubr.bf16.gmra.mrb[80].mxu0 %v2727_v33  ;;  %1637 = vmatmul.mubr.bf16.gmra.mrb[80].mxu1 %v2728_v34  ;;  %v2782_v33 = vld [vmem:[%s2857_s26 + $0x3d0] ss:$8 sps:$4 sm:$0xff]   ;;  %v2783_v34 = vld [vmem:[%s2857_s26 + $0x1e4] ss:$8 sps:$4 sm:$0xff]  }
  0xdb   : > { %2349 = vmatprep.mubr.msk.bf16.mxu0 %vm991_vm0, %v2729_v35  ;;  %2381 = vmatprep.mubr.msk.bf16.mxu1 %vm991_vm0, %v2731_v36 }
  0xe2   : > { %1389 = vmatmul.mubr.bf16.gmra.mrb[84].mxu0 %v2733_v37  ;;  %1645 = vmatmul.mubr.bf16.gmra.mrb[84].mxu1 %v2734_v38 }
  0xe3   : > { %2350 = vmatprep.mubr.msk.bf16.mxu0 %vm991_vm0, %v2735_v39  ;;  %2382 = vmatprep.mubr.msk.bf16.mxu1 %vm991_vm0, %v2737_v40  ;;  %v2785_v39 = vld [vmem:[%s2857_s26 + $0x3e4] ss:$8 sps:$4 sm:$0xff]  }
  0xea   : > { %1397 = vmatmul.mubr.bf16.gmra.mrb[88].mxu0 %v2739_v41  ;;  %1653 = vmatmul.mubr.bf16.gmra.mrb[88].mxu1 %v2740_v42 }
  0xeb   : > { %2351 = vmatprep.mubr.msk.bf16.mxu0 %vm991_vm0, %v2741_v43  ;;  %2383 = vmatprep.mubr.msk.bf16.mxu1 %vm991_vm0, %v2743_v44 }
  0xf2   : > { %1405 = vmatmul.mubr.bf16.gmra.mrb[92].mxu0 %v2745_v45  ;;  %1661 = vmatmul.mubr.bf16.gmra.mrb[92].mxu1 %v2746_v46 }
  0xf3   : > { %2352 = vmatprep.mubr.msk.bf16.mxu0 %vm991_vm0, %v2747_v47  ;;  %2384 = vmatprep.mubr.msk.bf16.mxu1 %vm991_vm0, %v2749_v48 }
  0xfa   : > { %1413 = vmatmul.mubr.bf16.gmra.mrb[96].mxu0 %v2751_v49  ;;  %1669 = vmatmul.mubr.bf16.gmra.mrb[96].mxu1 %v2752_v50 }
  0xfb   : > { %2353 = vmatprep.mubr.msk.bf16.mxu0 %vm991_vm0, %v2753_v51  ;;  %2385 = vmatprep.mubr.msk.bf16.mxu1 %vm991_vm0, %v2755_v52 }
 0x102   : > { %1421 = vmatmul.mubr.bf16.gmra.mrb[100].mxu0 %v2757_v53  ;;  %1677 = vmatmul.mubr.bf16.gmra.mrb[100].mxu1 %v2758_v54 }
 0x103   : > { %2354 = vmatprep.mubr.msk.bf16.mxu0 %vm991_vm0, %v2759_v55  ;;  %2386 = vmatprep.mubr.msk.bf16.mxu1 %vm991_vm0, %v2761_v56 }
 0x10a   : > { %1429 = vmatmul.mubr.bf16.gmra.mrb[104].mxu0 %v2763_v57  ;;  %1685 = vmatmul.mubr.bf16.gmra.mrb[104].mxu1 %v2764_v58 }
 0x10b   : > { %2355 = vmatprep.mubr.msk.bf16.mxu0 %vm991_vm0, %v2765_v59  ;;  %2387 = vmatprep.mubr.msk.bf16.mxu1 %vm991_vm0, %v2767_v60  ;;  %v2787_v60 = vld [vmem:[%s2857_s26 + $0x1e0] ss:$8 sps:$4 sm:$0xff]  }
 0x10d   : > { %v1222_v61 = vpop.f32.mrb[0].mxu0  ;;  %v1478_v62 = vpop.f32.mrb[0].mxu1 }
 0x10e   : > { %v1224_v63 = vpop.f32.mrb[1].mxu0  ;;  %v1480_v0 = vpop.f32.mrb[1].mxu1  ;;  %v1223_v22 = vadd.f32 %v3085_v19, %v1222_v61  ;;  %v1479_v23 = vadd.f32 %v3085_v19, %v1478_v62 }
 0x10f   : > { %v1225_v3 = vpop.f32.mrb[2].mxu0  ;;  %v1481_v4 = vpop.f32.mrb[2].mxu1 }
 0x110   : > { %v1227_v7 = vpop.f32.mrb[3].mxu0  ;;  %v1483_v8 = vpop.f32.mrb[3].mxu1  ;;  %v1226_v24 = vadd.f32 %v3085_v19, %v1225_v3  ;;  %v1482_v25 = vadd.f32 %v3085_v19, %v1481_v4  ;;  %v1733_v35 = vmax.f32 %v1223_v22, 0.0  ;;  %v1797_v36 = vmax.f32 %v1479_v23, 0.0 }
 0x111   : > { %v2791_v7 = vld [vmem:[%s2857_s26 + $0x3f4] ss:$8 sps:$4 sm:$0xff]  }
 0x112   : > { %1437 = vmatmul.mubr.bf16.gmra.mrb[108].mxu0 %v2769_v1  ;;  %1693 = vmatmul.mubr.bf16.gmra.mrb[108].mxu1 %v2770_v2  ;;  %v1734_v46 = vmax.f32 %v1226_v24, 0.0  ;;  %v1798_v47 = vmax.f32 %v1482_v25, 0.0  ;;  %v2788_v1 = vld [vmem:[%s2857_s26 + $0x3e0] ss:$8 sps:$4 sm:$0xff]   ;;  %v2789_v2 = vld [vmem:[%s2857_s26 + $0x1f4] ss:$8 sps:$4 sm:$0xff]  }
 0x113   : > { %2356 = vmatprep.mubr.msk.bf16.mxu0 %vm991_vm0, %v2771_v5  ;;  %2388 = vmatprep.mubr.msk.bf16.mxu1 %vm991_vm0, %v2773_v6 }
 0x115   : > { %v1230_v9 = vpop.f32.mrb[4].mxu0  ;;  %v1486_v10 = vpop.f32.mrb[4].mxu1 }
 0x116   : > { %v1232_v11 = vpop.f32.mrb[5].mxu0  ;;  %v1488_v12 = vpop.f32.mrb[5].mxu1  ;;  %v1231_v52 = vadd.f32 %v3085_v19, %v1230_v9  ;;  %v1487_v53 = vadd.f32 %v3085_v19, %v1486_v10 }
 0x117   : > { %v1233_v15 = vpop.f32.mrb[6].mxu0  ;;  %v1489_v16 = vpop.f32.mrb[6].mxu1 }
 0x118   : > { %v1235_v20 = vpop.f32.mrb[7].mxu0  ;;  %v1491_v21 = vpop.f32.mrb[7].mxu1  ;;  %v1234_v56 = vadd.f32 %v3085_v19, %v1233_v15  ;;  %v1490_v57 = vadd.f32 %v3085_v19, %v1489_v16  ;;  %v1735_v3 = vmax.f32 %v1231_v52, 0.0  ;;  %v1799_v4 = vmax.f32 %v1487_v53, 0.0 }
 0x11a   : > { %1445 = vmatmul.mubr.bf16.gmra.mrb[112].mxu0 %v2775_v13  ;;  %1701 = vmatmul.mubr.bf16.gmra.mrb[112].mxu1 %v2776_v14  ;;  %v1736_v14 = vmax.f32 %v1234_v56, 0.0  ;;  %v1800_v15 = vmax.f32 %v1490_v57, 0.0 }
 0x11b   : > { %2357 = vmatprep.mubr.msk.bf16.mxu0 %vm991_vm0, %v2777_v17  ;;  %2389 = vmatprep.mubr.msk.bf16.mxu1 %vm991_vm0, %v2779_v18 }
 0x11d   : > { %v1238_v26 = vpop.f32.mrb[8].mxu0  ;;  %v1494_v27 = vpop.f32.mrb[8].mxu1 }
 0x11e   : > { %v1239_v29 = vadd.f32 %v3085_v19, %v1238_v26  ;;  %v1495_v30 = vadd.f32 %v3085_v19, %v1494_v27  ;;  %v1240_v31 = vpop.f32.mrb[9].mxu0  ;;  %v1496_v32 = vpop.f32.mrb[9].mxu1  ;;  %v2793_v27 = vld [vmem:[%s2857_s26 + $0x1f0] ss:$8 sps:$4 sm:$0xff]  }
 0x11f   : > { %v1241_v37 = vpop.f32.mrb[10].mxu0  ;;  %v1497_v38 = vpop.f32.mrb[10].mxu1 }
 0x120   : > { %v1737_v40 = vmax.f32 %v1239_v29, 0.0  ;;  %v1801_v41 = vmax.f32 %v1495_v30, 0.0  ;;  %v1242_v42 = vadd.f32 %v3085_v19, %v1241_v37  ;;  %v1498_v43 = vadd.f32 %v3085_v19, %v1497_v38  ;;  %v1243_v44 = vpop.f32.mrb[11].mxu0  ;;  %v1499_v45 = vpop.f32.mrb[11].mxu1 }
 0x122   : > { %v3101_v48 = vmax.f32 %v1733_v35, %v1737_v40  ;;  %v3103_v49 = vmax.f32 %v1797_v36, %v1801_v41  ;;  %v1738_v50 = vmax.f32 %v1242_v42, 0.0  ;;  %v1802_v51 = vmax.f32 %v1498_v43, 0.0  ;;  %1453 = vmatmul.mubr.bf16.gmra.mrb[116].mxu0 %v2781_v28  ;;  %1709 = vmatmul.mubr.bf16.gmra.mrb[116].mxu1 %v2782_v33  ;;  %v2794_v28 = vld [vmem:[%s2857_s26 + $0x3f0] ss:$8 sps:$4 sm:$0xff]  }
 0x123   : > { %2358 = vmatprep.mubr.msk.bf16.mxu0 %vm991_vm0, %v2783_v34  ;;  %2390 = vmatprep.mubr.msk.bf16.mxu1 %vm991_vm0, %v2785_v39 }
 0x124   : > { %v3109_v54 = vmax.f32 %v1734_v46, %v1738_v50  ;;  %v3111_v55 = vmax.f32 %v1798_v47, %v1802_v51 }
 0x125   : > { %v1246_v58 = vpop.f32.mrb[12].mxu0  ;;  %v1502_v59 = vpop.f32.mrb[12].mxu1 }
 0x126   : > { %v1247_v61 = vadd.f32 %v3085_v19, %v1246_v58  ;;  %v1503_v62 = vadd.f32 %v3085_v19, %v1502_v59  ;;  %v1248_v63 = vpop.f32.mrb[13].mxu0  ;;  %v1504_v0 = vpop.f32.mrb[13].mxu1 }
 0x127   : > { %v1249_v5 = vpop.f32.mrb[14].mxu0  ;;  %v1505_v6 = vpop.f32.mrb[14].mxu1 }
 0x128   : > { %v1739_v8 = vmax.f32 %v1247_v61, 0.0  ;;  %v1803_v9 = vmax.f32 %v1503_v62, 0.0  ;;  %v1250_v10 = vadd.f32 %v3085_v19, %v1249_v5  ;;  %v1506_v11 = vadd.f32 %v3085_v19, %v1505_v6  ;;  %v1251_v12 = vpop.f32.mrb[15].mxu0  ;;  %v1507_v13 = vpop.f32.mrb[15].mxu1 }
 0x12a   : > { %v3123_v16 = vmax.f32 %v1735_v3, %v1739_v8  ;;  %v3125_v17 = vmax.f32 %v1799_v4, %v1803_v9  ;;  %v1740_v18 = vmax.f32 %v1250_v10, 0.0  ;;  %v1804_v20 = vmax.f32 %v1506_v11, 0.0  ;;  %1461 = vmatmul.mubr.bf16.gmra.mrb[120].mxu0 %v2787_v60  ;;  %1717 = vmatmul.mubr.bf16.gmra.mrb[120].mxu1 %v2788_v1 }
 0x12b   : > { %2359 = vmatprep.mubr.msk.bf16.mxu0 %vm991_vm0, %v2789_v2  ;;  %2391 = vmatprep.mubr.msk.bf16.mxu1 %vm991_vm0, %v2791_v7 }
 0x12c   : > { %v3129_v21 = vmax.f32 %v1736_v14, %v1740_v18  ;;  %v3131_v22 = vmax.f32 %v1800_v15, %v1804_v20 }
 0x12d   : > { %v1254_v23 = vpop.f32.mrb[16].mxu0  ;;  %v1510_v24 = vpop.f32.mrb[16].mxu1 }
 0x12e   : > { %v1256_v25 = vpop.f32.mrb[17].mxu0  ;;  %v1512_v26 = vpop.f32.mrb[17].mxu1  ;;  %v1255_v41 = vadd.f32 %v3085_v19, %v1254_v23  ;;  %v1511_v42 = vadd.f32 %v3085_v19, %v1510_v24 }
 0x12f   : > { %v1257_v29 = vpop.f32.mrb[18].mxu0  ;;  %v1513_v30 = vpop.f32.mrb[18].mxu1 }
 0x130   : > { %v1259_v31 = vpop.f32.mrb[19].mxu0  ;;  %v1515_v32 = vpop.f32.mrb[19].mxu1  ;;  %v1258_v43 = vadd.f32 %v3085_v19, %v1257_v29  ;;  %v1514_v44 = vadd.f32 %v3085_v19, %v1513_v30  ;;  %v1741_v53 = vmax.f32 %v1255_v41, 0.0  ;;  %v1805_v56 = vmax.f32 %v1511_v42, 0.0 }
 0x132   : > { %1469 = vmatmul.mubr.bf16.gmra.mrb[124].mxu0 %v2793_v27  ;;  %1725 = vmatmul.mubr.bf16.gmra.mrb[124].mxu1 %v2794_v28  ;;  %v1742_v1 = vmax.f32 %v1258_v43, 0.0  ;;  %v1806_v2 = vmax.f32 %v1514_v44, 0.0 }
 0x135   : > { %v1262_v33 = vpop.f32.mrb[20].mxu0  ;;  %v1518_v34 = vpop.f32.mrb[20].mxu1 }
 0x136   : > { %v1264_v35 = vpop.f32.mrb[21].mxu0  ;;  %v1520_v36 = vpop.f32.mrb[21].mxu1  ;;  %v1263_v7 = vadd.f32 %v3085_v19, %v1262_v33  ;;  %v1519_v8 = vadd.f32 %v3085_v19, %v1518_v34 }
 0x137   : > { %v1265_v37 = vpop.f32.mrb[22].mxu0  ;;  %v1521_v38 = vpop.f32.mrb[22].mxu1 }
 0x138   : > { %v1267_v39 = vpop.f32.mrb[23].mxu0  ;;  %v1523_v40 = vpop.f32.mrb[23].mxu1  ;;  %v1743_v26 = vmax.f32 %v1263_v7, 0.0  ;;  %v1807_v27 = vmax.f32 %v1519_v8, 0.0 }
 0x13d   : > { %v1270_v45 = vpop.f32.mrb[24].mxu0  ;;  %v1526_v46 = vpop.f32.mrb[24].mxu1 }
 0x13e   : > { %v1271_v47 = vadd.f32 %v3085_v19, %v1270_v45  ;;  %v1527_v50 = vadd.f32 %v3085_v19, %v1526_v46  ;;  %v1272_v51 = vpop.f32.mrb[25].mxu0  ;;  %v1528_v52 = vpop.f32.mrb[25].mxu1 }
 0x13f   : > { %v1273_v57 = vpop.f32.mrb[26].mxu0  ;;  %v1529_v58 = vpop.f32.mrb[26].mxu1 }
 0x140   : > { %v1745_v59 = vmax.f32 %v1271_v47, 0.0  ;;  %v1809_v60 = vmax.f32 %v1527_v50, 0.0  ;;  %v1274_v61 = vadd.f32 %v3085_v19, %v1273_v57  ;;  %v1530_v62 = vadd.f32 %v3085_v19, %v1529_v58  ;;  %v1275_v63 = vpop.f32.mrb[27].mxu0  ;;  %v1531_v0 = vpop.f32.mrb[27].mxu1 }
 0x142   : > { %v1893_v3 = vmax.f32 %v1741_v53, %v1745_v59  ;;  %v1909_v4 = vmax.f32 %v1805_v56, %v1809_v60  ;;  %v1746_v5 = vmax.f32 %v1274_v61, 0.0  ;;  %v1810_v6 = vmax.f32 %v1530_v62, 0.0 }
 0x144   : > { %v1925_v9 = vmax.f32 %v3101_v48, %v1893_v3  ;;  %v1941_v10 = vmax.f32 %v3103_v49, %v1909_v4  ;;  %v1894_v11 = vmax.f32 %v1742_v1, %v1746_v5  ;;  %v1910_v12 = vmax.f32 %v1806_v2, %v1810_v6 }
 0x145   : > { %v1278_v13 = vpop.f32.mrb[28].mxu0  ;;  %v1534_v14 = vpop.f32.mrb[28].mxu1  ;;  %v1266_v48 = vadd.f32 %v3085_v19, %v1265_v37  ;;  %v1522_v49 = vadd.f32 %v3085_v19, %v1521_v38 }
 0x146   : > { %v1926_v15 = vmax.f32 %v3109_v54, %v1894_v11  ;;  %v1942_v18 = vmax.f32 %v3111_v55, %v1910_v12  ;;  %v1279_v20 = vadd.f32 %v3085_v19, %v1278_v13  ;;  %v1535_v23 = vadd.f32 %v3085_v19, %v1534_v14  ;;  %v1280_v24 = vpop.f32.mrb[29].mxu0  ;;  %v1536_v25 = vpop.f32.mrb[29].mxu1 }
 0x147   : > { %v1281_v54 = vpop.f32.mrb[30].mxu0  ;;  %v1537_v55 = vpop.f32.mrb[30].mxu1  ;;  %v1744_v38 = vmax.f32 %v1266_v48, 0.0  ;;  %v1808_v39 = vmax.f32 %v1522_v49, 0.0 }
 0x148   : > { %v2463_v28 = vpack.c.bf16 %v1926_v15, %v1925_v9  ;;  %v2503_v29 = vpack.c.bf16 %v1942_v18, %v1941_v10  ;;  %v1747_v30 = vmax.f32 %v1279_v20, 0.0  ;;  %v1811_v31 = vmax.f32 %v1535_v23, 0.0  ;;  %v1283_v32 = vpop.f32.mrb[31].mxu0  ;;  %v1539_v33 = vpop.f32.mrb[31].mxu1 }
 0x149   : > { %v1282_v34 = vadd.f32 %v3085_v19, %v1281_v54  ;;  %v1538_v35 = vadd.f32 %v3085_v19, %v1537_v55 }
 0x14a   : > { %2464 = vst [vmem:[%s3157_s24] sm:$0xff] %v2463_v28   ;;  %2547 = vst [vmem:[%s3157_s24 + $0x40] sm:$0xff] %v2503_v29   ;;  %v1895_v36 = vmax.f32 %v1743_v26, %v1747_v30  ;;  %v1911_v37 = vmax.f32 %v1807_v27, %v1811_v31 }
 0x14b   : > { %v1748_v40 = vmax.f32 %v1282_v34, 0.0  ;;  %v1812_v41 = vmax.f32 %v1538_v35, 0.0 }
 0x14c   : > { %v1927_v42 = vmax.f32 %v3123_v16, %v1895_v36  ;;  %v1943_v43 = vmax.f32 %v3125_v17, %v1911_v37 }
 0x14d   : > { %v1896_v44 = vmax.f32 %v1744_v38, %v1748_v40  ;;  %v1912_v45 = vmax.f32 %v1808_v39, %v1812_v41  ;;  %v1286_v46 = vpop.f32.mrb[32].mxu0  ;;  %v1542_v47 = vpop.f32.mrb[32].mxu1 }
 0x14e   : > { %v1288_v50 = vpop.f32.mrb[33].mxu0  ;;  %v1544_v51 = vpop.f32.mrb[33].mxu1 }
 0x14f   : > { %v1928_v52 = vmax.f32 %v3129_v21, %v1896_v44  ;;  %v1944_v53 = vmax.f32 %v3131_v22, %v1912_v45  ;;  %v1289_v56 = vpop.f32.mrb[34].mxu0  ;;  %v1545_v57 = vpop.f32.mrb[34].mxu1  ;;  %v1287_v21 = vadd.f32 %v3085_v19, %v1286_v46  ;;  %v1543_v22 = vadd.f32 %v3085_v19, %v1542_v47 }
 0x150   : > { %v1291_v58 = vpop.f32.mrb[35].mxu0  ;;  %v1547_v59 = vpop.f32.mrb[35].mxu1  ;;  %v1290_v4 = vadd.f32 %v3085_v19, %v1289_v56  ;;  %v1546_v5 = vadd.f32 %v3085_v19, %v1545_v57 }
 0x151   : > { %v2468_v60 = vpack.c.bf16 %v1928_v52, %v1927_v42  ;;  %v2508_v16 = vpack.c.bf16 %v1944_v53, %v1943_v43  ;;  %v1749_v12 = vmax.f32 %v1287_v21, 0.0  ;;  %v1813_v13 = vmax.f32 %v1543_v22, 0.0 }
 0x152   : > { %v1750_v27 = vmax.f32 %v1290_v4, 0.0  ;;  %v1814_v48 = vmax.f32 %v1546_v5, 0.0 }
 0x153   : > { %2540 = vst [vmem:[%s3157_s24 + $0x8] sm:$0xff] %v2468_v60   ;;  %2548 = vst [vmem:[%s3157_s24 + $0x48] sm:$0xff] %v2508_v16  }
 0x155   : > { %v1294_v17 = vpop.f32.mrb[36].mxu0  ;;  %v1550_v61 = vpop.f32.mrb[36].mxu1 }
 0x156   : > { %v1296_v62 = vpop.f32.mrb[37].mxu0  ;;  %v1552_v63 = vpop.f32.mrb[37].mxu1  ;;  %v1295_v29 = vadd.f32 %v3085_v19, %v1294_v17  ;;  %v1551_v30 = vadd.f32 %v3085_v19, %v1550_v61 }
 0x157   : > { %v1297_v0 = vpop.f32.mrb[38].mxu0  ;;  %v1553_v1 = vpop.f32.mrb[38].mxu1 }
 0x158   : > { %v1299_v2 = vpop.f32.mrb[39].mxu0  ;;  %v1555_v3 = vpop.f32.mrb[39].mxu1  ;;  %v1298_v33 = vadd.f32 %v3085_v19, %v1297_v0  ;;  %v1554_v34 = vadd.f32 %v3085_v19, %v1553_v1  ;;  %v1751_v41 = vmax.f32 %v1295_v29, 0.0  ;;  %v1815_v42 = vmax.f32 %v1551_v30, 0.0 }
 0x15a   : > { %v1752_v53 = vmax.f32 %v1298_v33, 0.0  ;;  %v1816_v56 = vmax.f32 %v1554_v34, 0.0 }
 0x15d   : > { %v1302_v6 = vpop.f32.mrb[40].mxu0  ;;  %v1558_v7 = vpop.f32.mrb[40].mxu1 }
 0x15e   : > { %v1303_v8 = vadd.f32 %v3085_v19, %v1302_v6  ;;  %v1559_v9 = vadd.f32 %v3085_v19, %v1558_v7  ;;  %v1304_v10 = vpop.f32.mrb[41].mxu0  ;;  %v1560_v11 = vpop.f32.mrb[41].mxu1 }
 0x15f   : > { %v1305_v14 = vpop.f32.mrb[42].mxu0  ;;  %v1561_v15 = vpop.f32.mrb[42].mxu1 }
 0x160   : > { %v1753_v18 = vmax.f32 %v1303_v8, 0.0  ;;  %v1817_v20 = vmax.f32 %v1559_v9, 0.0  ;;  %v1306_v23 = vadd.f32 %v3085_v19, %v1305_v14  ;;  %v1562_v24 = vadd.f32 %v3085_v19, %v1561_v15  ;;  %v1307_v25 = vpop.f32.mrb[43].mxu0  ;;  %v1563_v26 = vpop.f32.mrb[43].mxu1 }
 0x162   : > { %v3177_v49 = vmax.f32 %v1749_v12, %v1753_v18  ;;  %v3179_v54 = vmax.f32 %v1813_v13, %v1817_v20  ;;  %v1754_v55 = vmax.f32 %v1306_v23, 0.0  ;;  %v1818_v28 = vmax.f32 %v1562_v24, 0.0 }
 0x164   : > { %v3183_v31 = vmax.f32 %v1750_v27, %v1754_v55  ;;  %v3185_v32 = vmax.f32 %v1814_v48, %v1818_v28 }
 0x165   : > { %v1310_v35 = vpop.f32.mrb[44].mxu0  ;;  %v1566_v36 = vpop.f32.mrb[44].mxu1 }
 0x166   : > { %v1311_v37 = vadd.f32 %v3085_v19, %v1310_v35  ;;  %v1567_v38 = vadd.f32 %v3085_v19, %v1566_v36  ;;  %v1312_v39 = vpop.f32.mrb[45].mxu0  ;;  %v1568_v40 = vpop.f32.mrb[45].mxu1 }
 0x167   : > { %v1313_v43 = vpop.f32.mrb[46].mxu0  ;;  %v1569_v44 = vpop.f32.mrb[46].mxu1 }
 0x168   : > { %v1755_v45 = vmax.f32 %v1311_v37, 0.0  ;;  %v1819_v46 = vmax.f32 %v1567_v38, 0.0  ;;  %v1314_v47 = vadd.f32 %v3085_v19, %v1313_v43  ;;  %v1570_v50 = vadd.f32 %v3085_v19, %v1569_v44  ;;  %v1315_v51 = vpop.f32.mrb[47].mxu0  ;;  %v1571_v52 = vpop.f32.mrb[47].mxu1 }
 0x16a   : > { %v3193_v57 = vmax.f32 %v1751_v41, %v1755_v45  ;;  %v3195_v58 = vmax.f32 %v1815_v42, %v1819_v46  ;;  %v1756_v59 = vmax.f32 %v1314_v47, 0.0  ;;  %v1820_v60 = vmax.f32 %v1570_v50, 0.0 }
 0x16c   : > { %v3197_v16 = vmax.f32 %v1752_v53, %v1756_v59  ;;  %v3199_v17 = vmax.f32 %v1816_v56, %v1820_v60 }
 0x16d   : > { %v1318_v61 = vpop.f32.mrb[48].mxu0  ;;  %v1574_v62 = vpop.f32.mrb[48].mxu1 }
 0x16e   : > { %v1320_v63 = vpop.f32.mrb[49].mxu0  ;;  %v1576_v0 = vpop.f32.mrb[49].mxu1  ;;  %v1319_v11 = vadd.f32 %v3085_v19, %v1318_v61  ;;  %v1575_v12 = vadd.f32 %v3085_v19, %v1574_v62 }
 0x16f   : > { %v1321_v1 = vpop.f32.mrb[50].mxu0  ;;  %v1577_v2 = vpop.f32.mrb[50].mxu1 }
 0x170   : > { %v1323_v3 = vpop.f32.mrb[51].mxu0  ;;  %v1579_v21 = vpop.f32.mrb[51].mxu1  ;;  %v1322_v13 = vadd.f32 %v3085_v19, %v1321_v1  ;;  %v1578_v14 = vadd.f32 %v3085_v19, %v1577_v2  ;;  %v1757_v26 = vmax.f32 %v1319_v11, 0.0  ;;  %v1821_v27 = vmax.f32 %v1575_v12, 0.0 }
 0x172   : > { %v1758_v36 = vmax.f32 %v1322_v13, 0.0  ;;  %v1822_v37 = vmax.f32 %v1578_v14, 0.0 }
 0x175   : > { %v1326_v22 = vpop.f32.mrb[52].mxu0  ;;  %v1582_v4 = vpop.f32.mrb[52].mxu1 }
 0x176   : > { %v1328_v5 = vpop.f32.mrb[53].mxu0  ;;  %v1584_v6 = vpop.f32.mrb[53].mxu1  ;;  %v1327_v42 = vadd.f32 %v3085_v19, %v1326_v22  ;;  %v1583_v43 = vadd.f32 %v3085_v19, %v1582_v4 }
 0x177   : > { %v1329_v7 = vpop.f32.mrb[54].mxu0  ;;  %v1585_v8 = vpop.f32.mrb[54].mxu1 }
 0x178   : > { %v1331_v9 = vpop.f32.mrb[55].mxu0  ;;  %v1587_v10 = vpop.f32.mrb[55].mxu1  ;;  %v1759_v62 = vmax.f32 %v1327_v42, 0.0  ;;  %v1586_v63 = vadd.f32 %v3085_v19, %v1585_v8 }
 0x17d   : > { %v1334_v15 = vpop.f32.mrb[56].mxu0  ;;  %v1590_v18 = vpop.f32.mrb[56].mxu1 }
 0x17e   : > { %v1335_v20 = vadd.f32 %v3085_v19, %v1334_v15  ;;  %v1591_v23 = vadd.f32 %v3085_v19, %v1590_v18  ;;  %v1336_v24 = vpop.f32.mrb[57].mxu0  ;;  %v1592_v25 = vpop.f32.mrb[57].mxu1 }
 0x17f   : > { %v1337_v48 = vpop.f32.mrb[58].mxu0  ;;  %v1593_v55 = vpop.f32.mrb[58].mxu1 }
 0x180   : > { %v1761_v28 = vmax.f32 %v1335_v20, 0.0  ;;  %v1825_v29 = vmax.f32 %v1591_v23, 0.0  ;;  %v1338_v30 = vadd.f32 %v3085_v19, %v1337_v48  ;;  %v1594_v33 = vadd.f32 %v3085_v19, %v1593_v55  ;;  %v1339_v34 = vpop.f32.mrb[59].mxu0  ;;  %v1595_v35 = vpop.f32.mrb[59].mxu1 }
 0x182   : > { %v1897_v38 = vmax.f32 %v1757_v26, %v1761_v28  ;;  %v1913_v39 = vmax.f32 %v1821_v27, %v1825_v29  ;;  %v1762_v40 = vmax.f32 %v1338_v30, 0.0  ;;  %v1826_v41 = vmax.f32 %v1594_v33, 0.0 }
 0x184   : > { %v1929_v44 = vmax.f32 %v3177_v49, %v1897_v38  ;;  %v1945_v45 = vmax.f32 %v3179_v54, %v1913_v39  ;;  %v1898_v46 = vmax.f32 %v1758_v36, %v1762_v40  ;;  %v1914_v47 = vmax.f32 %v1822_v37, %v1826_v41 }
 0x185   : > { %v1342_v50 = vpop.f32.mrb[60].mxu0  ;;  %v1598_v51 = vpop.f32.mrb[60].mxu1  ;;  %v1823_v49 = vmax.f32 %v1583_v43, 0.0  ;;  %v1330_v54 = vadd.f32 %v3085_v19, %v1329_v7  ;;  %v1824_v7 = vmax.f32 %v1586_v63, 0.0 }
 0x186   : > { %v1930_v52 = vmax.f32 %v3183_v31, %v1898_v46  ;;  %v1946_v53 = vmax.f32 %v3185_v32, %v1914_v47  ;;  %v1343_v56 = vadd.f32 %v3085_v19, %v1342_v50  ;;  %v1599_v59 = vadd.f32 %v3085_v19, %v1598_v51  ;;  %v1344_v60 = vpop.f32.mrb[61].mxu0  ;;  %v1600_v61 = vpop.f32.mrb[61].mxu1 }
 0x187   : > { %v1345_v0 = vpop.f32.mrb[62].mxu0  ;;  %v1601_v1 = vpop.f32.mrb[62].mxu1  ;;  %v1760_v10 = vmax.f32 %v1330_v54, 0.0 }
 0x188   : > { %v2473_v2 = vpack.c.bf16 %v1930_v52, %v1929_v44  ;;  %v2513_v31 = vpack.c.bf16 %v1946_v53, %v1945_v45  ;;  %v1763_v3 = vmax.f32 %v1343_v56, 0.0  ;;  %v1827_v32 = vmax.f32 %v1599_v59, 0.0  ;;  %v1347_v21 = vpop.f32.mrb[63].mxu0  ;;  %v1603_v22 = vpop.f32.mrb[63].mxu1 }
 0x189   : > { %v1346_v4 = vadd.f32 %v3085_v19, %v1345_v0  ;;  %v1602_v5 = vadd.f32 %v3085_v19, %v1601_v1 }
 0x18a   : > { %2541 = vst [vmem:[%s3157_s24 + $0x10] sm:$0xff] %v2473_v2   ;;  %2549 = vst [vmem:[%s3157_s24 + $0x50] sm:$0xff] %v2513_v31   ;;  %v1899_v6 = vmax.f32 %v1759_v62, %v1763_v3  ;;  %v1915_v9 = vmax.f32 %v1823_v49, %v1827_v32 }
 0x18b   : > { %v1764_v11 = vmax.f32 %v1346_v4, 0.0  ;;  %v1828_v8 = vmax.f32 %v1602_v5, 0.0 }
 0x18c   : > { %v1931_v12 = vmax.f32 %v3193_v57, %v1899_v6  ;;  %v1947_v13 = vmax.f32 %v3195_v58, %v1915_v9 }
 0x18d   : > { %v1900_v14 = vmax.f32 %v1760_v10, %v1764_v11  ;;  %v1916_v15 = vmax.f32 %v1824_v7, %v1828_v8  ;;  %v1350_v18 = vpop.f32.mrb[64].mxu0  ;;  %v1606_v20 = vpop.f32.mrb[64].mxu1 }
 0x18e   : > { %v1352_v23 = vpop.f32.mrb[65].mxu0  ;;  %v1608_v24 = vpop.f32.mrb[65].mxu1 }
 0x18f   : > { %v1932_v25 = vmax.f32 %v3197_v16, %v1900_v14  ;;  %v1948_v26 = vmax.f32 %v3199_v17, %v1916_v15  ;;  %v1353_v27 = vpop.f32.mrb[66].mxu0  ;;  %v1609_v48 = vpop.f32.mrb[66].mxu1  ;;  %v1351_v16 = vadd.f32 %v3085_v19, %v1350_v18  ;;  %v1607_v17 = vadd.f32 %v3085_v19, %v1606_v20 }
 0x190   : > { %v1355_v55 = vpop.f32.mrb[67].mxu0  ;;  %v1611_v28 = vpop.f32.mrb[67].mxu1  ;;  %v1354_v39 = vadd.f32 %v3085_v19, %v1353_v27  ;;  %v1610_v40 = vadd.f32 %v3085_v19, %v1609_v48 }
 0x191   : > { %v2478_v29 = vpack.c.bf16 %v1932_v25, %v1931_v12  ;;  %v2518_v57 = vpack.c.bf16 %v1948_v26, %v1947_v13  ;;  %v1765_v47 = vmax.f32 %v1351_v16, 0.0  ;;  %v1829_v50 = vmax.f32 %v1607_v17, 0.0 }
 0x192   : > { %v1766_v49 = vmax.f32 %v1354_v39, 0.0  ;;  %v1830_v54 = vmax.f32 %v1610_v40, 0.0 }
 0x193   : > { %2542 = vst [vmem:[%s3157_s24 + $0x18] sm:$0xff] %v2478_v29   ;;  %2550 = vst [vmem:[%s3157_s24 + $0x58] sm:$0xff] %v2518_v57  }
 0x195   : > { %v1358_v58 = vpop.f32.mrb[68].mxu0  ;;  %v1614_v30 = vpop.f32.mrb[68].mxu1 }
 0x196   : > { %v1360_v33 = vpop.f32.mrb[69].mxu0  ;;  %v1616_v34 = vpop.f32.mrb[69].mxu1  ;;  %v1359_v31 = vadd.f32 %v3085_v19, %v1358_v58  ;;  %v1615_v3 = vadd.f32 %v3085_v19, %v1614_v30 }
 0x197   : > { %v1361_v35 = vpop.f32.mrb[70].mxu0  ;;  %v1617_v36 = vpop.f32.mrb[70].mxu1 }
 0x198   : > { %v1363_v37 = vpop.f32.mrb[71].mxu0  ;;  %v1619_v38 = vpop.f32.mrb[71].mxu1  ;;  %v1362_v22 = vadd.f32 %v3085_v19, %v1361_v35  ;;  %v1618_v4 = vadd.f32 %v3085_v19, %v1617_v36  ;;  %v1767_v8 = vmax.f32 %v1359_v31, 0.0  ;;  %v1831_v12 = vmax.f32 %v1615_v3, 0.0 }
 0x19a   : > { %v1768_v26 = vmax.f32 %v1362_v22, 0.0  ;;  %v1832_v27 = vmax.f32 %v1618_v4, 0.0 }
 0x19d   : > { %v1366_v41 = vpop.f32.mrb[72].mxu0  ;;  %v1622_v42 = vpop.f32.mrb[72].mxu1 }
 0x19e   : > { %v1367_v43 = vadd.f32 %v3085_v19, %v1366_v41  ;;  %v1623_v44 = vadd.f32 %v3085_v19, %v1622_v42  ;;  %v1368_v45 = vpop.f32.mrb[73].mxu0  ;;  %v1624_v46 = vpop.f32.mrb[73].mxu1 }
 0x19f   : > { %v1369_v51 = vpop.f32.mrb[74].mxu0  ;;  %v1625_v52 = vpop.f32.mrb[74].mxu1 }
 0x1a0   : > { %v1769_v53 = vmax.f32 %v1367_v43, 0.0  ;;  %v1833_v56 = vmax.f32 %v1623_v44, 0.0  ;;  %v1370_v59 = vadd.f32 %v3085_v19, %v1369_v51  ;;  %v1626_v60 = vadd.f32 %v3085_v19, %v1625_v52  ;;  %v1371_v61 = vpop.f32.mrb[75].mxu0  ;;  %v1627_v62 = vpop.f32.mrb[75].mxu1 }
 0x1a2   : > { %v3237_v63 = vmax.f32 %v1765_v47, %v1769_v53  ;;  %v3239_v0 = vmax.f32 %v1829_v50, %v1833_v56  ;;  %v1770_v1 = vmax.f32 %v1370_v59, 0.0  ;;  %v1834_v2 = vmax.f32 %v1626_v60, 0.0 }
 0x1a4   : > { %v3243_v32 = vmax.f32 %v1766_v49, %v1770_v1  ;;  %v3245_v21 = vmax.f32 %v1830_v54, %v1834_v2 }
 0x1a5   : > { %v1374_v5 = vpop.f32.mrb[76].mxu0  ;;  %v1630_v6 = vpop.f32.mrb[76].mxu1 }
 0x1a6   : > { %v1375_v9 = vadd.f32 %v3085_v19, %v1374_v5  ;;  %v1631_v10 = vadd.f32 %v3085_v19, %v1630_v6  ;;  %v1376_v7 = vpop.f32.mrb[77].mxu0  ;;  %v1632_v11 = vpop.f32.mrb[77].mxu1 }
 0x1a7   : > { %v1377_v13 = vpop.f32.mrb[78].mxu0  ;;  %v1633_v14 = vpop.f32.mrb[78].mxu1 }
 0x1a8   : > { %v1771_v15 = vmax.f32 %v1375_v9, 0.0  ;;  %v1835_v18 = vmax.f32 %v1631_v10, 0.0  ;;  %v1378_v20 = vadd.f32 %v3085_v19, %v1377_v13  ;;  %v1634_v23 = vadd.f32 %v3085_v19, %v1633_v14  ;;  %v1379_v24 = vpop.f32.mrb[79].mxu0  ;;  %v1635_v25 = vpop.f32.mrb[79].mxu1 }
 0x1aa   : > { %v3253_v48 = vmax.f32 %v1767_v8, %v1771_v15  ;;  %v3255_v55 = vmax.f32 %v1831_v12, %v1835_v18  ;;  %v1772_v28 = vmax.f32 %v1378_v20, 0.0  ;;  %v1836_v29 = vmax.f32 %v1634_v23, 0.0 }
 0x1ac   : > { %v3257_v57 = vmax.f32 %v1768_v26, %v1772_v28  ;;  %v3259_v58 = vmax.f32 %v1832_v27, %v1836_v29 }
 0x1ad   : > { %v1382_v30 = vpop.f32.mrb[80].mxu0  ;;  %v1638_v33 = vpop.f32.mrb[80].mxu1 }
 0x1ae   : > { %v1384_v34 = vpop.f32.mrb[81].mxu0  ;;  %v1640_v35 = vpop.f32.mrb[81].mxu1  ;;  %v1383_v46 = vadd.f32 %v3085_v19, %v1382_v30  ;;  %v1639_v47 = vadd.f32 %v3085_v19, %v1638_v33 }
 0x1af   : > { %v1385_v36 = vpop.f32.mrb[82].mxu0  ;;  %v1641_v37 = vpop.f32.mrb[82].mxu1 }
 0x1b0   : > { %v1387_v38 = vpop.f32.mrb[83].mxu0  ;;  %v1643_v16 = vpop.f32.mrb[83].mxu1  ;;  %v1386_v50 = vadd.f32 %v3085_v19, %v1385_v36  ;;  %v1642_v51 = vadd.f32 %v3085_v19, %v1641_v37  ;;  %v1773_v62 = vmax.f32 %v1383_v46, 0.0  ;;  %v1837_v49 = vmax.f32 %v1639_v47, 0.0 }
 0x1b2   : > { %v1774_v6 = vmax.f32 %v1386_v50, 0.0  ;;  %v1838_v9 = vmax.f32 %v1642_v51, 0.0 }
 0x1b5   : > { %v1390_v17 = vpop.f32.mrb[84].mxu0  ;;  %v1646_v39 = vpop.f32.mrb[84].mxu1 }
 0x1b6   : > { %v1392_v40 = vpop.f32.mrb[85].mxu0  ;;  %v1648_v41 = vpop.f32.mrb[85].mxu1  ;;  %v1391_v12 = vadd.f32 %v3085_v19, %v1390_v17  ;;  %v1647_v13 = vadd.f32 %v3085_v19, %v1646_v39 }
 0x1b7   : > { %v1393_v42 = vpop.f32.mrb[86].mxu0  ;;  %v1649_v43 = vpop.f32.mrb[86].mxu1 }
 0x1b8   : > { %v1395_v44 = vpop.f32.mrb[87].mxu0  ;;  %v1651_v45 = vpop.f32.mrb[87].mxu1  ;;  %v1775_v33 = vmax.f32 %v1391_v12, 0.0  ;;  %v1650_v34 = vadd.f32 %v3085_v19, %v1649_v43 }
 0x1bd   : > { %v1398_v52 = vpop.f32.mrb[88].mxu0  ;;  %v1654_v53 = vpop.f32.mrb[88].mxu1 }
 0x1be   : > { %v1399_v56 = vadd.f32 %v3085_v19, %v1398_v52  ;;  %v1655_v59 = vadd.f32 %v3085_v19, %v1654_v53  ;;  %v1400_v60 = vpop.f32.mrb[89].mxu0  ;;  %v1656_v61 = vpop.f32.mrb[89].mxu1 }
 0x1bf   : > { %v1401_v54 = vpop.f32.mrb[90].mxu0  ;;  %v1657_v1 = vpop.f32.mrb[90].mxu1 }
 0x1c0   : > { %v1777_v2 = vmax.f32 %v1399_v56, 0.0  ;;  %v1841_v31 = vmax.f32 %v1655_v59, 0.0  ;;  %v1402_v3 = vadd.f32 %v3085_v19, %v1401_v54  ;;  %v1658_v22 = vadd.f32 %v3085_v19, %v1657_v1  ;;  %v1403_v4 = vpop.f32.mrb[91].mxu0  ;;  %v1659_v5 = vpop.f32.mrb[91].mxu1 }
 0x1c2   : > { %v1901_v10 = vmax.f32 %v1773_v62, %v1777_v2  ;;  %v1917_v7 = vmax.f32 %v1837_v49, %v1841_v31  ;;  %v1778_v11 = vmax.f32 %v1402_v3, 0.0  ;;  %v1842_v8 = vmax.f32 %v1658_v22, 0.0 }
 0x1c4   : > { %v1933_v14 = vmax.f32 %v3237_v63, %v1901_v10  ;;  %v1949_v15 = vmax.f32 %v3239_v0, %v1917_v7  ;;  %v1902_v18 = vmax.f32 %v1774_v6, %v1778_v11  ;;  %v1918_v20 = vmax.f32 %v1838_v9, %v1842_v8  ;;  %v3295_v11 = vld [vmem:[%s3359_s2] ss:$0 sm:$0xff] }
 0x1c5   : > { %v1406_v23 = vpop.f32.mrb[92].mxu0  ;;  %v1662_v24 = vpop.f32.mrb[92].mxu1  ;;  %v1839_v63 = vmax.f32 %v1647_v13, 0.0  ;;  %v1394_v0 = vadd.f32 %v3085_v19, %v1393_v42  ;;  %v1840_v42 = vmax.f32 %v1650_v34, 0.0 }
 0x1c6   : > { %v1934_v25 = vmax.f32 %v3243_v32, %v1902_v18  ;;  %v1950_v26 = vmax.f32 %v3245_v21, %v1918_v20  ;;  %v1407_v27 = vadd.f32 %v3085_v19, %v1406_v23  ;;  %v1663_v28 = vadd.f32 %v3085_v19, %v1662_v24  ;;  %v1408_v29 = vpop.f32.mrb[93].mxu0  ;;  %v1664_v30 = vpop.f32.mrb[93].mxu1 }
 0x1c7   : > { %v1409_v35 = vpop.f32.mrb[94].mxu0  ;;  %v1665_v36 = vpop.f32.mrb[94].mxu1  ;;  %v1776_v45 = vmax.f32 %v1394_v0, 0.0 }
 0x1c8   : > { %v2483_v37 = vpack.c.bf16 %v1934_v25, %v1933_v14  ;;  %v2523_v32 = vpack.c.bf16 %v1950_v26, %v1949_v15  ;;  %v1779_v38 = vmax.f32 %v1407_v27, 0.0  ;;  %v1843_v21 = vmax.f32 %v1663_v28, 0.0  ;;  %v1411_v16 = vpop.f32.mrb[95].mxu0  ;;  %v1667_v17 = vpop.f32.mrb[95].mxu1 }
 0x1c9   : > { %v1410_v39 = vadd.f32 %v3085_v19, %v1409_v35  ;;  %v1666_v40 = vadd.f32 %v3085_v19, %v1665_v36 }
 0x1ca   : > { %2543 = vst [vmem:[%s3157_s24 + $0x20] sm:$0xff] %v2483_v37   ;;  %2551 = vst [vmem:[%s3157_s24 + $0x60] sm:$0xff] %v2523_v32   ;;  %v1903_v41 = vmax.f32 %v1775_v33, %v1779_v38  ;;  %v1919_v44 = vmax.f32 %v1839_v63, %v1843_v21 }
 0x1cb   : > { %v1780_v46 = vmax.f32 %v1410_v39, 0.0  ;;  %v1844_v43 = vmax.f32 %v1666_v40, 0.0 }
 0x1cc   : > { %v1935_v47 = vmax.f32 %v3253_v48, %v1903_v41  ;;  %v1951_v50 = vmax.f32 %v3255_v55, %v1919_v44 }
 0x1cd   : > { %v1904_v51 = vmax.f32 %v1776_v45, %v1780_v46  ;;  %v1920_v52 = vmax.f32 %v1840_v42, %v1844_v43  ;;  %v1414_v53 = vpop.f32.mrb[96].mxu0  ;;  %v1670_v56 = vpop.f32.mrb[96].mxu1 }
 0x1ce   : > { %v1416_v59 = vpop.f32.mrb[97].mxu0  ;;  %v1672_v60 = vpop.f32.mrb[97].mxu1 }
 0x1cf   : > { %v1936_v61 = vmax.f32 %v3257_v57, %v1904_v51  ;;  %v1952_v62 = vmax.f32 %v3259_v58, %v1920_v52  ;;  %v1417_v49 = vpop.f32.mrb[98].mxu0  ;;  %v1673_v54 = vpop.f32.mrb[98].mxu1  ;;  %v1415_v57 = vadd.f32 %v3085_v19, %v1414_v53  ;;  %v1671_v58 = vadd.f32 %v3085_v19, %v1670_v56 }
 0x1d0   : > { %v1419_v1 = vpop.f32.mrb[99].mxu0  ;;  %v1675_v2 = vpop.f32.mrb[99].mxu1  ;;  %v1418_v7 = vadd.f32 %v3085_v19, %v1417_v49  ;;  %v1674_v8 = vadd.f32 %v3295_v11, %v1673_v54 }
 0x1d1   : > { %v2488_v31 = vpack.c.bf16 %v1936_v61, %v1935_v47  ;;  %v2528_v48 = vpack.c.bf16 %v1952_v62, %v1951_v50  ;;  %v1781_v23 = vmax.f32 %v1415_v57, 0.0  ;;  %v1845_v24 = vmax.f32 %v1671_v58, 0.0 }
 0x1d2   : > { %v1782_v63 = vmax.f32 %v1418_v7, 0.0  ;;  %v1846_v0 = vmax.f32 %v1674_v8, 0.0 }
 0x1d3   : > { %2544 = vst [vmem:[%s3157_s24 + $0x28] sm:$0xff] %v2488_v31   ;;  %2552 = vst [vmem:[%s3157_s24 + $0x68] sm:$0xff] %v2528_v48  }
 0x1d5   : > { %v1422_v55 = vpop.f32.mrb[100].mxu0  ;;  %v1678_v3 = vpop.f32.mrb[100].mxu1 }
 0x1d6   : > { %v1424_v22 = vpop.f32.mrb[101].mxu0  ;;  %v1680_v4 = vpop.f32.mrb[101].mxu1  ;;  %v1423_v32 = vadd.f32 %v3295_v11, %v1422_v55  ;;  %v1679_v38 = vadd.f32 %v3295_v11, %v1678_v3 }
 0x1d7   : > { %v1425_v5 = vpop.f32.mrb[102].mxu0  ;;  %v1681_v6 = vpop.f32.mrb[102].mxu1 }
 0x1d8   : > { %v1427_v9 = vpop.f32.mrb[103].mxu0  ;;  %v1683_v10 = vpop.f32.mrb[103].mxu1  ;;  %v1426_v17 = vadd.f32 %v3295_v11, %v1425_v5  ;;  %v1682_v39 = vadd.f32 %v3295_v11, %v1681_v6  ;;  %v1783_v43 = vmax.f32 %v1423_v32, 0.0  ;;  %v1847_v47 = vmax.f32 %v1679_v38, 0.0 }
 0x1da   : > { %v1784_v62 = vmax.f32 %v1426_v17, 0.0  ;;  %v1848_v49 = vmax.f32 %v1682_v39, 0.0 }
 0x1dd   : > { %v1430_v12 = vpop.f32.mrb[104].mxu0  ;;  %v1686_v13 = vpop.f32.mrb[104].mxu1 }
 0x1de   : > { %v1431_v14 = vadd.f32 %v3295_v11, %v1430_v12  ;;  %v1687_v15 = vadd.f32 %v3295_v11, %v1686_v13  ;;  %v1432_v18 = vpop.f32.mrb[105].mxu0  ;;  %v1688_v20 = vpop.f32.mrb[105].mxu1 }
 0x1df   : > { %v1433_v25 = vpop.f32.mrb[106].mxu0  ;;  %v1689_v26 = vpop.f32.mrb[106].mxu1 }
 0x1e0   : > { %v1785_v19 = vmax.f32 %v1431_v14, 0.0  ;;  %v1849_v27 = vmax.f32 %v1687_v15, 0.0  ;;  %v1434_v28 = vadd.f32 %v3295_v11, %v1433_v25  ;;  %v1690_v29 = vadd.f32 %v3295_v11, %v1689_v26  ;;  %v1435_v30 = vpop.f32.mrb[107].mxu0  ;;  %v1691_v33 = vpop.f32.mrb[107].mxu1 }
 0x1e2   : > { %v3302_v34 = vmax.f32 %v1781_v23, %v1785_v19  ;;  %v3304_v35 = vmax.f32 %v1845_v24, %v1849_v27  ;;  %v1786_v36 = vmax.f32 %v1434_v28, 0.0  ;;  %v1850_v37 = vmax.f32 %v1690_v29, 0.0 }
 0x1e4   : > { %v3308_v21 = vmax.f32 %v1782_v63, %v1786_v36  ;;  %v3310_v16 = vmax.f32 %v1846_v0, %v1850_v37 }
 0x1e5   : > { %v1438_v40 = vpop.f32.mrb[108].mxu0  ;;  %v1694_v41 = vpop.f32.mrb[108].mxu1 }
 0x1e6   : > { %v1439_v44 = vadd.f32 %v3295_v11, %v1438_v40  ;;  %v1695_v45 = vadd.f32 %v3295_v11, %v1694_v41  ;;  %v1440_v42 = vpop.f32.mrb[109].mxu0  ;;  %v1696_v46 = vpop.f32.mrb[109].mxu1 }
 0x1e7   : > { %v1441_v50 = vpop.f32.mrb[110].mxu0  ;;  %v1697_v51 = vpop.f32.mrb[110].mxu1 }
 0x1e8   : > { %v1787_v52 = vmax.f32 %v1439_v44, 0.0  ;;  %v1851_v53 = vmax.f32 %v1695_v45, 0.0  ;;  %v1442_v56 = vadd.f32 %v3295_v11, %v1441_v50  ;;  %v1698_v59 = vadd.f32 %v3295_v11, %v1697_v51  ;;  %v1443_v60 = vpop.f32.mrb[111].mxu0  ;;  %v1699_v61 = vpop.f32.mrb[111].mxu1 }
 0x1ea   : > { %v3318_v54 = vmax.f32 %v1783_v43, %v1787_v52  ;;  %v3320_v1 = vmax.f32 %v1847_v47, %v1851_v53  ;;  %v1788_v2 = vmax.f32 %v1442_v56, 0.0  ;;  %v1852_v31 = vmax.f32 %v1698_v59, 0.0 }
 0x1ec   : > { %v3322_v48 = vmax.f32 %v1784_v62, %v1788_v2  ;;  %v3324_v55 = vmax.f32 %v1848_v49, %v1852_v31 }
 0x1ed   : > { %v1446_v3 = vpop.f32.mrb[112].mxu0  ;;  %v1702_v22 = vpop.f32.mrb[112].mxu1 }
 0x1ee   : > { %v1448_v4 = vpop.f32.mrb[113].mxu0  ;;  %v1704_v5 = vpop.f32.mrb[113].mxu1  ;;  %v1447_v20 = vadd.f32 %v3295_v11, %v1446_v3  ;;  %v1703_v23 = vadd.f32 %v3295_v11, %v1702_v22 }
 0x1ef   : > { %v1449_v6 = vpop.f32.mrb[114].mxu0  ;;  %v1705_v9 = vpop.f32.mrb[114].mxu1 }
 0x1f0   : > { %v1451_v10 = vpop.f32.mrb[115].mxu0  ;;  %v1707_v57 = vpop.f32.mrb[115].mxu1  ;;  %v1450_v24 = vadd.f32 %v3295_v11, %v1449_v6  ;;  %v1706_v25 = vadd.f32 %v3295_v11, %v1705_v9  ;;  %v1789_v33 = vmax.f32 %v1447_v20, 0.0  ;;  %v1853_v63 = vmax.f32 %v1703_v23, 0.0 }
 0x1f2   : > { %v1790_v41 = vmax.f32 %v1450_v24, 0.0  ;;  %v1854_v44 = vmax.f32 %v1706_v25, 0.0 }
 0x1f5   : > { %v1454_v58 = vpop.f32.mrb[116].mxu0  ;;  %v1710_v7 = vpop.f32.mrb[116].mxu1 }
 0x1f6   : > { %v1456_v8 = vpop.f32.mrb[117].mxu0  ;;  %v1712_v12 = vpop.f32.mrb[117].mxu1  ;;  %v1455_v47 = vadd.f32 %v3295_v11, %v1454_v58  ;;  %v1711_v50 = vadd.f32 %v3295_v11, %v1710_v7 }
 0x1f7   : > { %v1457_v13 = vpop.f32.mrb[118].mxu0  ;;  %v1713_v14 = vpop.f32.mrb[118].mxu1 }
 0x1f8   : > { %v1459_v15 = vpop.f32.mrb[119].mxu0  ;;  %v1715_v18 = vpop.f32.mrb[119].mxu1  ;;  %v1791_v22 = vmax.f32 %v1455_v47, 0.0  ;;  %v1714_v4 = vadd.f32 %v3295_v11, %v1713_v14 }
 0x1fa   : > { %v1856_v14 = vmax.f32 %v1714_v4, 0.0 }
 0x1fd   : > { %v1462_v26 = vpop.f32.mrb[120].mxu0  ;;  %v1718_v19 = vpop.f32.mrb[120].mxu1 }
 0x1fe   : > { %v1463_v27 = vadd.f32 %v3295_v11, %v1462_v26  ;;  %v1719_v28 = vadd.f32 %v3295_v11, %v1718_v19  ;;  %v1464_v29 = vpop.f32.mrb[121].mxu0  ;;  %v1720_v30 = vpop.f32.mrb[121].mxu1 }
 0x1ff   : > { %v1465_v0 = vpop.f32.mrb[122].mxu0  ;;  %v1721_v36 = vpop.f32.mrb[122].mxu1 }
 0x200   : > { %v1793_v37 = vmax.f32 %v1463_v27, 0.0  ;;  %v1857_v32 = vmax.f32 %v1719_v28, 0.0  ;;  %v1466_v38 = vadd.f32 %v3295_v11, %v1465_v0  ;;  %v1722_v17 = vadd.f32 %v3295_v11, %v1721_v36  ;;  %v1467_v39 = vpop.f32.mrb[123].mxu0  ;;  %v1723_v40 = vpop.f32.mrb[123].mxu1 }
 0x202   : > { %v1905_v45 = vmax.f32 %v1789_v33, %v1793_v37  ;;  %v1921_v42 = vmax.f32 %v1853_v63, %v1857_v32  ;;  %v1794_v46 = vmax.f32 %v1466_v38, 0.0  ;;  %v1858_v43 = vmax.f32 %v1722_v17, 0.0 }
 0x204   : > { %v1937_v51 = vmax.f32 %v3302_v34, %v1905_v45  ;;  %v1953_v52 = vmax.f32 %v3304_v35, %v1921_v42  ;;  %v1906_v53 = vmax.f32 %v1790_v41, %v1794_v46  ;;  %v1922_v56 = vmax.f32 %v1854_v44, %v1858_v43 }
 0x205   : > { %v1470_v59 = vpop.f32.mrb[124].mxu0  ;;  %v1726_v60 = vpop.f32.mrb[124].mxu1  ;;  %v1855_v34 = vmax.f32 %v1711_v50, 0.0  ;;  %v1458_v35 = vadd.f32 %v3295_v11, %v1457_v13 }
 0x206   : > { %v1938_v61 = vmax.f32 %v3308_v21, %v1906_v53  ;;  %v1954_v62 = vmax.f32 %v3310_v16, %v1922_v56  ;;  %v1471_v49 = vadd.f32 %v3295_v11, %v1470_v59  ;;  %v1727_v2 = vadd.f32 %v3295_v11, %v1726_v60  ;;  %v1472_v31 = vpop.f32.mrb[125].mxu0  ;;  %v1728_v3 = vpop.f32.mrb[125].mxu1 }
 0x207   : > { %v1473_v5 = vpop.f32.mrb[126].mxu0  ;;  %v1729_v6 = vpop.f32.mrb[126].mxu1  ;;  %v1792_v15 = vmax.f32 %v1458_v35, 0.0 }
 0x208   : > { %v2493_v9 = vpack.c.bf16 %v1938_v61, %v1937_v51  ;;  %v2533_v21 = vpack.c.bf16 %v1954_v62, %v1953_v52  ;;  %v1795_v10 = vmax.f32 %v1471_v49, 0.0  ;;  %v1859_v16 = vmax.f32 %v1727_v2, 0.0  ;;  %v1475_v57 = vpop.f32.mrb[127].mxu0  ;;  %v1731_v58 = vpop.f32.mrb[127].mxu1 }
 0x209   : > { %v1474_v7 = vadd.f32 %v3295_v11, %v1473_v5  ;;  %v1730_v8 = vadd.f32 %v3295_v11, %v1729_v6 }
 0x20a   : > { %2545 = vst [vmem:[%s3157_s24 + $0x30] sm:$0xff] %v2493_v9   ;;  %2553 = vst [vmem:[%s3157_s24 + $0x70] sm:$0xff] %v2533_v21   ;;  %v1907_v12 = vmax.f32 %v1791_v22, %v1795_v10  ;;  %v1923_v13 = vmax.f32 %v1855_v34, %v1859_v16 }
 0x20b   : > { %v1796_v18 = vmax.f32 %v1474_v7, 0.0  ;;  %v1860_v20 = vmax.f32 %v1730_v8, 0.0 }
 0x20c   : > { %v1939_v23 = vmax.f32 %v3318_v54, %v1907_v12  ;;  %v1955_v24 = vmax.f32 %v3320_v1, %v1923_v13 }
 0x20d   : > { %v1908_v25 = vmax.f32 %v1792_v15, %v1796_v18  ;;  %v1924_v26 = vmax.f32 %v1856_v14, %v1860_v20 }
 0x20f   : > { %v1940_v19 = vmax.f32 %v3322_v48, %v1908_v25  ;;  %v1956_v11 = vmax.f32 %v3324_v55, %v1924_v26 }
 0x211   : > { %v2498_v27 = vpack.c.bf16 %v1940_v19, %v1939_v23  ;;  %v2538_v28 = vpack.c.bf16 %v1956_v11, %v1955_v24 }
 0x213   : > { %2546 = vst [vmem:[%s3157_s24 + $0x38] sm:$0xff] %v2498_v27   ;;  %2554 = vst [vmem:[%s3157_s24 + $0x78] sm:$0xff] %v2538_v28  }
 0x214 PF: > { %s13_s12 = sadd.s32 1, %s2802_s12  }
 0x215   : > { %p10_p4 = scmp.ge.s32.totalorder %s13_s12, 4  }
 0x217   :  { %12 = sbr.rel (!%p10_p4) target bundleno = 1 (0x1), region = 62 }

// kernel: lenet5_forward.5
= control target key start
LH: loop header
LB: loop body
LE: loop exit
PB: predicated region body
PF: predicated region fallthrough
CT: control target
= control target key end

     0   :  { %v766_v0 = vmov 0   ;;  %vm257_vm0 = vcmask 130048   ;;  %v767_v30 = vmov 0.0   ;;  %vm768_vm1 = vmmov 0   ;;  %s986_s1 = inlined_call_operand.vmem [shape: bf16[400,128], index: 1, kind: input, shape index: {}]   ;;  %s987_s0 = inlined_call_operand.vmem [shape: bf16[16,400], index: 0, kind: input, shape index: {}]   ;;  %s988_s3 = inlined_call_operand.vmem [shape: bf16[128,128], index: 3, kind: input, shape index: {}]   ;;  %s989_s5 = inlined_call_operand.vmem [shape: bf16[128,128], index: 5, kind: input, shape index: {}]   ;;  %s990_s2 = inlined_call_operand.vmem [shape: f32[1,128], index: 2, kind: input, shape index: {}]   ;;  %s991_s4 = inlined_call_operand.vmem [shape: f32[1,128], index: 4, kind: input, shape index: {}]   ;;  %s992_s6 = inlined_call_operand.vmem [shape: f32[1,128], index: 6, kind: input, shape index: {}]   ;;  %s993_s7 = inlined_call_operand.vmem [shape: f32[16,128], index: 7, kind: output, shape index: {}]  }
   0x1   :  { %302 = vmatprep.subr.bf16.mxu1 %v766_v0  ;;  %v719_v1 = vld [vmem:[%s986_s1 + $0x40] sm:$0xff]   ;;  %v722_v4 = vld [vmem:[%s986_s1 + $0x48] sm:$0xff]   ;;  %v725_v7 = vld [vmem:[%s986_s1 + $0x50] sm:$0xff]  }
   0x2   :  { %v720_v2 = vld [vmem:[%s986_s1 + $0x80] sm:$0xff]   ;;  %636 = vmatprep.subr.bf16.mxu0 %v719_v1  ;;  %v723_v5 = vld [vmem:[%s986_s1 + $0x88] sm:$0xff]   ;;  %v726_v8 = vld [vmem:[%s986_s1 + $0x90] sm:$0xff]  }
   0x3   :  { %v721_v3 = vld [vmem:[%s986_s1] sm:$0xff]   ;;  %303 = vmatpush1.bf16.msra.mxu1 %v720_v2  ;;  %v724_v6 = vld [vmem:[%s986_s1 + $0x8] sm:$0xff]   ;;  %v727_v9 = vld [vmem:[%s986_s1 + $0x10] sm:$0xff]  }
   0x4   :  { %637 = vmatpush3.bf16.msra.mxu0 %v721_v3  ;;  %304 = vmatprep.subr.bf16.mxu1 %v766_v0  ;;  %v728_v10 = vld [vmem:[%s986_s1 + $0x58] sm:$0xff]   ;;  %v731_v13 = vld [vmem:[%s986_s1 + $0x60] sm:$0xff]   ;;  %v734_v16 = vld [vmem:[%s986_s1 + $0x68] sm:$0xff]  }
   0x5   :  { %638 = vmatprep.subr.bf16.mxu0 %v722_v4  ;;  %v729_v11 = vld [vmem:[%s986_s1 + $0x98] sm:$0xff]   ;;  %v732_v14 = vld [vmem:[%s986_s1 + $0xa0] sm:$0xff]   ;;  %v735_v17 = vld [vmem:[%s986_s1 + $0xa8] sm:$0xff]  }
   0x6   :  { %v730_v12 = vld [vmem:[%s986_s1 + $0x18] sm:$0xff]   ;;  %v733_v15 = vld [vmem:[%s986_s1 + $0x20] sm:$0xff]   ;;  %v736_v18 = vld [vmem:[%s986_s1 + $0x28] sm:$0xff]  }
   0x7   :  { %305 = vmatpush1.bf16.msra.mxu1 %v723_v5  ;;  %v737_v19 = vld [vmem:[%s986_s1 + $0x70] sm:$0xff]   ;;  %v740_v22 = vld [vmem:[%s986_s1 + $0x78] sm:$0xff]   ;;  %v746_v28 = vld [vmem:[%s986_s1 + $0xc0] sm:$0xff]  }
   0x8   :  { %639 = vmatpush3.bf16.msra.mxu0 %v724_v6  ;;  %306 = vmatprep.subr.bf16.mxu1 %v766_v0  ;;  %v738_v20 = vld [vmem:[%s986_s1 + $0xb0] sm:$0xff]   ;;  %v741_v24 = vld [vmem:[%s986_s1 + $0xb8] sm:$0xff]   ;;  %v750_v29 = vld [vmem:[%s988_s3] sm:$0xff]  }
   0x9   :  { %640 = vmatprep.subr.bf16.mxu0 %v725_v7  ;;  %v739_v21 = vld [vmem:[%s986_s1 + $0x30] sm:$0xff]   ;;  %v749_v25 = vld [vmem:[%s987_s0 + $0xc] ss:$16 sps:$4 sm:$0xff]   ;;  %v747_v31 = vld [vmem:[%s987_s0 + $0x8] ss:$16 sps:$4 sm:$0xff]  }
   0xa   :  { %v745_v23 = vld [vmem:[%s987_s0 + $0x4] ss:$16 sps:$4 sm:$0xff]   ;;  %v742_v26 = vld [vmem:[%s986_s1 + $0x38] sm:$0xff]   ;;  %617 = vmatprep.mubr.msk.bf16.mxu1 %vm257_vm0, %v749_v25  ;;  %v743_v27 = vld [vmem:[%s987_s0] ss:$16 sps:$4 sm:$0xff]  }
   0xb   :  { %307 = vmatpush1.bf16.msra.mxu1 %v726_v8  ;;  %293 = vmatprep.mubr.bf16.mxu0 %v745_v23  ;;  %v751_v32 = vld [vmem:[%s988_s3 + $0x8] sm:$0xff]   ;;  %v752_v33 = vld [vmem:[%s988_s3 + $0x10] sm:$0xff]   ;;  %v753_v34 = vld [vmem:[%s988_s3 + $0x18] sm:$0xff]  }
   0xc   :  { %641 = vmatpush3.bf16.msra.mxu0 %v727_v9  ;;  %308 = vmatprep.subr.bf16.mxu1 %v766_v0  ;;  %v754_v35 = vld [vmem:[%s988_s3 + $0x20] sm:$0xff]   ;;  %v755_v36 = vld [vmem:[%s988_s3 + $0x28] sm:$0xff]   ;;  %v756_v37 = vld [vmem:[%s988_s3 + $0x30] sm:$0xff]  }
   0xd   :  { %642 = vmatprep.subr.bf16.mxu0 %v728_v10  ;;  %v757_v38 = vld [vmem:[%s988_s3 + $0x38] sm:$0xff]   ;;  %v758_v39 = vld [vmem:[%s989_s5] sm:$0xff]   ;;  %v759_v40 = vld [vmem:[%s989_s5 + $0x8] sm:$0xff]  }
   0xe   :  { %v760_v41 = vld [vmem:[%s989_s5 + $0x10] sm:$0xff]   ;;  %v761_v42 = vld [vmem:[%s989_s5 + $0x18] sm:$0xff]   ;;  %v762_v43 = vld [vmem:[%s989_s5 + $0x20] sm:$0xff]  }
   0xf   :  { %309 = vmatpush1.bf16.msra.mxu1 %v729_v11  ;;  %v763_v44 = vld [vmem:[%s989_s5 + $0x28] sm:$0xff]   ;;  %v587_v47 = vld [vmem:[%s990_s2] ss:$0 sm:$0xff]  ;;  %v764_v63 = vld [vmem:[%s989_s5 + $0x30] sm:$0xff]  }
  0x10   :  { %643 = vmatpush3.bf16.msra.mxu0 %v730_v12  ;;  %310 = vmatprep.subr.bf16.mxu1 %v766_v0  ;;  %v618_v1 = vld [vmem:[%s991_s4] ss:$0 sm:$0xff] }
  0x11   :  { %644 = vmatprep.subr.bf16.mxu0 %v731_v13 }
  0x13   :  { %311 = vmatpush1.bf16.msra.mxu1 %v732_v14  ;;  %v627_v14 = vld [vmem:[%s992_s6] ss:$0 sm:$0xff] }
  0x14   :  { %645 = vmatpush3.bf16.msra.mxu0 %v733_v15  ;;  %312 = vmatprep.subr.bf16.mxu1 %v766_v0 }
  0x15   :  { %646 = vmatprep.subr.bf16.mxu0 %v734_v16 }
  0x17   :  { %313 = vmatpush1.bf16.msra.mxu1 %v735_v17 }
  0x18   :  { %647 = vmatpush3.bf16.msra.mxu0 %v736_v18  ;;  %314 = vmatprep.subr.bf16.mxu1 %v766_v0 }
  0x19   :  { %648 = vmatprep.subr.bf16.mxu0 %v737_v19 }
  0x1b   :  { %315 = vmatpush1.bf16.msra.mxu1 %v738_v20 }
  0x1c   :  { %649 = vmatpush3.bf16.msra.mxu0 %v739_v21  ;;  %316 = vmatprep.subr.bf16.mxu1 %v766_v0 }
  0x1d   :  { %650 = vmatprep.subr.bf16.mxu0 %v740_v22 }
  0x1f   :  { %317 = vmatpush1.bf16.msra.mxu1 %v741_v24 }
  0x20   :  { %651 = vmatpush3.bf16.msra.mxu0 %v742_v26  ;;  %318 = vmatprep.subr.bf16.mxu1 %v766_v0  ;;  %v765_v0 = vld [vmem:[%s989_s5 + $0x38] sm:$0xff]  }
  0x21   :  { %676 = vmatprep.subr.bf16.mxu0 %v767_v30 }
  0x23   :  { %294 = vmatmul.mubr.bf16.vlgmr.msra.gmra.mrb[0].mxu0 %v743_v27  ;;  %319 = vmatpush1.bf16.msra.mxu1 %v746_v28 }
  0x24   :  { %677 = vmatpush3.bf16.msra.mxu0 %v750_v29  ;;  %696 = vmatprep.subr.bf16.mxu1 %v767_v30 }
  0x25   :  { %678 = vmatprep.subr.bf16.mxu0 %v767_v30  ;;  %692 = vmatprep.mubr.msk.bf16.mxu0 %vm768_vm1, %v767_v30 }
  0x26   :  { %335 = vmatmul.mubr.bf16.vlgmr.msra.gmra.mrb[0].mxu1 %v747_v31 }
  0x27   :  { %712 = vmatprep.mubr.msk.bf16.mxu1 %vm768_vm1, %v767_v30  ;;  %697 = vmatpush3.bf16.msra.mxu1 %v758_v39 }
  0x28   :  { %679 = vmatpush3.bf16.msra.mxu0 %v751_v32  ;;  %698 = vmatprep.subr.bf16.mxu1 %v767_v30 }
  0x29   :  { %680 = vmatprep.subr.bf16.mxu0 %v767_v30 }
  0x2b   :  { %699 = vmatpush3.bf16.msra.mxu1 %v759_v40 }
  0x2c   :  { %681 = vmatpush3.bf16.msra.mxu0 %v752_v33  ;;  %700 = vmatprep.subr.bf16.mxu1 %v767_v30 }
  0x2d   :  { %682 = vmatprep.subr.bf16.mxu0 %v767_v30 }
  0x2f   :  { %701 = vmatpush3.bf16.msra.mxu1 %v760_v41 }
  0x30   :  { %683 = vmatpush3.bf16.msra.mxu0 %v753_v34  ;;  %702 = vmatprep.subr.bf16.mxu1 %v767_v30 }
  0x31   :  { %684 = vmatprep.subr.bf16.mxu0 %v767_v30 }
  0x33   :  { %703 = vmatpush3.bf16.msra.mxu1 %v761_v42 }
  0x34   :  { %685 = vmatpush3.bf16.msra.mxu0 %v754_v35  ;;  %704 = vmatprep.subr.bf16.mxu1 %v767_v30 }
  0x35   :  { %686 = vmatprep.subr.bf16.mxu0 %v767_v30 }
  0x37   :  { %705 = vmatpush3.bf16.msra.mxu1 %v762_v43 }
  0x38   :  { %687 = vmatpush3.bf16.msra.mxu0 %v755_v36  ;;  %706 = vmatprep.subr.bf16.mxu1 %v767_v30 }
  0x39   :  { %688 = vmatprep.subr.bf16.mxu0 %v767_v30 }
  0x3b   :  { %707 = vmatpush3.bf16.msra.mxu1 %v763_v44 }
  0x3c   :  { %689 = vmatpush3.bf16.msra.mxu0 %v756_v37  ;;  %708 = vmatprep.subr.bf16.mxu1 %v767_v30 }
  0x3d   :  { %690 = vmatprep.subr.bf16.mxu0 %v767_v30 }
  0x3f   :  { %709 = vmatpush3.bf16.msra.mxu1 %v764_v63 }
  0x40   :  { %691 = vmatpush3.bf16.msra.mxu0 %v757_v38  ;;  %710 = vmatprep.subr.bf16.mxu1 %v767_v30 }
  0x43   :  { %711 = vmatpush3.bf16.msra.mxu1 %v765_v0 }
  0xf6   :  { %v652_v45 = vpop.f32.mrb[0].mxu0 }
  0xf7   :  { %v653_v46 = vpop.f32.mrb[1].mxu0 }
  0xf8   :  { %v654_v48 = vadd.f32 %v653_v46, %v652_v45  ;;  %v655_v49 = vpop.f32.mrb[2].mxu0 }
  0xf9   :  { %v656_v50 = vpop.f32.mrb[3].mxu0  ;;  %v336_v51 = vpop.f32.mrb[0].mxu1 }
  0xfa   :  { %v657_v52 = vadd.f32 %v656_v50, %v655_v49  ;;  %v296_v53 = vadd.f32 %v654_v48, %v587_v47  ;;  %v338_v54 = vpop.f32.mrb[1].mxu1 }
  0xfb   :  { %v339_v55 = vpop.f32.mrb[2].mxu1 }
  0xfc   :  { %v337_v56 = vadd.f32 %v336_v51, %v296_v53  ;;  %v299_v57 = vadd.f32 %v657_v52, %v587_v47  ;;  %v341_v58 = vpop.f32.mrb[3].mxu1 }
  0xfe   :  { %v340_v59 = vadd.f32 %v339_v55, %v299_v57  ;;  %v343_v60 = vmax.f32 %v337_v56, 0.0 }
 0x100   :  { %v344_v61 = vmax.f32 %v340_v59, 0.0 }
 0x102   :  { %v345_v62 = vpack.c.bf16 %v344_v61, %v343_v60 }
 0x104   :  { %693 = vmatmul.mubr.bf16.vlgmr.msra.gmra.mrb[4].mxu0 %v345_v62 }
 0x1d7   :  { %v451_v2 = vpop.f32.mrb[4].mxu0 }
 0x1d8   :  { %v452_v3 = vadd.f32 %v618_v1, %v451_v2  ;;  %v694_v4 = vpop.f32.mrb[5].mxu0 }
 0x1d9   :  { %v454_v5 = vpop.f32.mrb[6].mxu0 }
 0x1da   :  { %v458_v6 = vmax.f32 %v452_v3, 0.0  ;;  %v455_v7 = vadd.f32 %v618_v1, %v454_v5  ;;  %v695_v8 = vpop.f32.mrb[7].mxu0 }
 0x1dc   :  { %v459_v9 = vmax.f32 %v455_v7, 0.0  ;;  %v461_v10 = vmul.f32 %v458_v6, %v458_v6 }
 0x1de   :  { %v460_v11 = vpack.c.bf16 %v459_v9, %v458_v6  ;;  %463 = vadd.xlane.f32.xlu0 %v461_v10  ;;  %v462_v12 = vmul.f32 %v459_v9, %v459_v9 }
 0x1e0   :  { %713 = vmatmul.mubr.bf16.vlgmr.msra.gmra.mrb[4].mxu1 %v460_v11 }
 0x1e2   :  { %465 = vadd.xlane.f32.xlu0 %v462_v12 }
 0x26b   :  { %v464_v13 = vpop.xlane.xlu0 %463 }
 0x26f   :  { %v466_v22 = vpop.xlane.xlu0 %465 }
 0x2b3   :  { %v572_v15 = vpop.f32.mrb[4].mxu1 }
 0x2b4   :  { %v573_v16 = vadd.f32 %v627_v14, %v572_v15  ;;  %v714_v17 = vpop.f32.mrb[5].mxu1 }
 0x2b5   :  { %v575_v18 = vpop.f32.mrb[6].mxu1 }
 0x2b6   :  { %v579_v19 = vadd.f32 %v573_v16, %v464_v13  ;;  %v576_v20 = vadd.f32 %v627_v14, %v575_v18  ;;  %v715_v21 = vpop.f32.mrb[7].mxu1 }
 0x2b8   :  { %581 = vst [vmem:[%s993_s7] sm:$0xff] %v579_v19  ;;  %v580_v23 = vadd.f32 %v576_v20, %v466_v22 }
 0x2ba   :  { %582 = vst [vmem:[%s993_s7 + $0x8] sm:$0xff] %v580_v23 }

</bundles_post_ra>
